<compile_context>
chip_gen: v6e
topology: v6e:2x2x1
jax: 0.10.0
libtpu: 0.0.40
codegen_flags: <defaults>
</compile_context>

<pallas_src>
import functools

import jax
import jax.numpy as jnp
from jax import lax
from jax.experimental import pallas as pl
from jax.experimental.pallas import tpu as pltpu

_GROUP = 8  # packed rows per batch in the value/position operand (sublane aligned)


def _round_up(x, m):
    return (x + m - 1) // m * m


def _compact_block(vp, mask_t, tril, cnt, content_ref, position_ref, *,
                   n_out, content_eos, content_pad, pos_eos, pos_pad):
    """Order-preserving compaction of `bt` batch rows: keep mask==1, EOS, pad."""
    n, bt = mask_t.shape

    # Inclusive prefix-sum of the 0/1 mask along N for every batch column, on
    # the MXU.  bf16 {0,1} operands with f32 accumulation are exact.
    csum_t = jnp.dot(tril, mask_t, preferred_element_type=jnp.float32)   # (N, bt)
    # 1-based rank of every selected element; 0 where unselected.
    rank_t = jnp.where(mask_t > 0, csum_t, 0.0).astype(jnp.int32)        # (N, bt)

    jcmp = lax.broadcasted_iota(jnp.int32, (n, n_out), 1) + 1            # hoisted
    jrow = lax.broadcasted_iota(jnp.int32, (1, n_out), 1)                # hoisted

    c_rows, p_rows = [], []
    for b in range(bt):                       # static unroll over the batch tile
        # One-hot scatter matrix: sel[i, j] = 1 iff element i is the (j+1)-th
        # selected element of row b.  Built directly in bf16 (int compare).
        sel = (rank_t[:, b:b + 1] == jcmp).astype(jnp.bfloat16)          # (N, n_out)
        # bf16 x bf16 MXU scatter of this row's [v_hi, v_lo, p_hi, p_lo, 0...]
        # group (sublane-aligned 8-row slab).  Each sel column has at most one
        # nonzero, so the f32 result is exact.
        scat = jnp.dot(vp[_GROUP * b:_GROUP * b + _GROUP, :], sel,
                       preferred_element_type=jnp.float32)               # (8, n_out)
        c_rows.append(scat[0:1] * 256.0 + scat[1:2])                     # hi/lo recombine
        p_rows.append(scat[2:3] * 256.0 + scat[3:4])

    content = jnp.concatenate(c_rows, axis=0).astype(jnp.int32)          # (bt, n_out)
    position = jnp.concatenate(p_rows, axis=0).astype(jnp.int32)

    # EOS/pad selection applied once on the dense (bt, n_out) block; single
    # lane-dense full-block store per output.
    content_ref[...] = jnp.where(jrow < cnt, content,
                                 jnp.where(jrow == cnt, content_eos, content_pad))
    position_ref[...] = jnp.where(jrow < cnt, position,
                                  jnp.where(jrow == cnt, pos_eos, pos_pad))


def _dual_compaction_kernel(vp_c_ref, mt_c_ref, tril_c_ref, cnt_c_ref,
                            vp_f_ref, mt_f_ref, tril_f_ref, cnt_f_ref,
                            cc_ref, cp_ref, fc_ref, fp_ref, *,
                            n_out_c, n_out_f, content_eos, content_pad,
                            cpos_eos, cpos_pad, fpos_eos, fpos_pad):
    # Coarse and fine compaction fused in one launch (halves fixed overhead).
    _compact_block(vp_c_ref[...], mt_c_ref[0], tril_c_ref[...], cnt_c_ref[...],
                   cc_ref, cp_ref, n_out=n_out_c,
                   content_eos=content_eos, content_pad=content_pad,
                   pos_eos=cpos_eos, pos_pad=cpos_pad)
    _compact_block(vp_f_ref[...], mt_f_ref[0], tril_f_ref[...], cnt_f_ref[...],
                   fc_ref, fp_ref, n_out=n_out_f,
                   content_eos=content_eos, content_pad=content_pad,
                   pos_eos=fpos_eos, pos_pad=fpos_pad)


def _pack_compaction_inputs(vals, pos, mask, b_pad, bb):
    """Exact base-256 bf16 split + transposed mask + scan matrix + counts."""
    b, n = vals.shape
    n_out = _round_up(n + 1, 128)           # lane-dense, unmasked output stores
    nb = b_pad // bb
    if b_pad != b:
        padw = ((0, b_pad - b), (0, 0))      # padded rows: mask=0 -> [eos, pad..]
        vals = jnp.pad(vals, padw)
        pos = jnp.pad(pos, padw)
        mask = jnp.pad(mask, padw)

    counts = jnp.sum(mask, axis=-1, dtype=jnp.int32).reshape(b_pad, 1)

    # hi/lo digits are <= 255, exactly representable in bf16 (codes < 2**16),
    # so the bf16 MXU scatter is bit-exact.  Group is padded to 8 rows per
    # batch so every kernel-side LHS slice is sublane-aligned.
    zeros = jnp.zeros_like(vals)
    comps = [vals >> 8, vals & 0xFF, pos >> 8, pos & 0xFF] + [zeros] * (_GROUP - 4)
    vp = jnp.stack(comps, axis=1).astype(jnp.bfloat16).reshape(b_pad * _GROUP, n)

    # Transposed mask: each batch's ranks come out of the MXU as a column,
    # avoiding any in-kernel transpose.
    mask_t = mask.astype(jnp.bfloat16).reshape(nb, bb, n).transpose(0, 2, 1)
    # Lower-triangular matrix for the inclusive scan; a constant index_map
    # keeps it resident in VMEM across grid steps.
    tril = jnp.tril(jnp.ones((n, n), jnp.float32)).astype(jnp.bfloat16)
    return vp, mask_t, tril, counts, n_out


@functools.partial(jax.jit, static_argnames=(
    "coarse_size", "fine_size", "content_pad_code", "content_eos_code",
    "coarse_position_pad_code", "coarse_position_eos_code",
    "fine_position_pad_code", "fine_position_eos_code"))
def _permute_padded(indices, grain_indices, *, coarse_size, fine_size,
                    content_pad_code, content_eos_code,
                    coarse_position_pad_code, coarse_position_eos_code,
                    fine_position_pad_code, fine_position_eos_code):
    """Jitted body: layout glue + fused compaction kernel + batch-max lengths."""
    B = indices.shape[0]
    hw1 = coarse_size
    hw2 = fine_size // coarse_size
    sq = hw2 * hw2
    nc = hw1 * hw1
    nf = nc * sq

    indices = indices.astype(jnp.int32)
    grain = grain_indices.reshape(B, nc).astype(jnp.int32)

    # einops 'B (h1 h2) (w1 w2) -> B h1 w1 (h2 w2)' (pure reshape/transpose glue)
    ind_r = indices.reshape(B, hw1, hw2, hw1, hw2)
    ind_r = ind_r.transpose(0, 1, 3, 2, 4).reshape(B, hw1, hw1, sq)

    coarse_content = ind_r[..., 0].reshape(B, nc)
    fine_content = ind_r.reshape(B, nf)

    mask0 = (grain == 0).astype(jnp.int32)
    mask1 = (grain == 1).astype(jnp.int32)
    mask1_fine = jnp.repeat(mask1, sq, axis=-1)          # region-first expansion

    pos_coarse = jnp.broadcast_to(jnp.arange(nc, dtype=jnp.int32), (B, nc))
    pos_fine = jnp.arange(fine_size * fine_size, dtype=jnp.int32)
    pos_fine = pos_fine.reshape(hw1, hw2, hw1, hw2).transpose(0, 2, 1, 3).reshape(nf)
    pos_fine = jnp.broadcast_to(pos_fine, (B, nf))

    # Batch tile: >=8 (sublane), 16 when the batch allows it, and >=2 grid
    # steps for larger batches so "parallel" can shard across v7x's two cores.
    b_pad = _round_up(B, 8)
    bb = 16 if (b_pad >= 32 and b_pad % 16 == 0) else 8
    nb = b_pad // bb

    vp_c, mt_c, tril_c, cnt_c, n_out_c = _pack_compaction_inputs(
        coarse_content, pos_coarse, mask0, b_pad, bb)
    vp_f, mt_f, tril_f, cnt_f, n_out_f = _pack_compaction_inputs(
        fine_content, pos_fine, mask1_fine, b_pad, bb)

    kernel = functools.partial(
        _dual_compaction_kernel, n_out_c=n_out_c, n_out_f=n_out_f,
        content_eos=content_eos_code, content_pad=content_pad_code,
        cpos_eos=coarse_position_eos_code, cpos_pad=coarse_position_pad_code,
        fpos_eos=fine_position_eos_code, fpos_pad=fine_position_pad_code)

    def row_spec(width):
        return pl.BlockSpec((bb, width), lambda b: (b, 0))

    cc, cp, fc, fp = pl.pallas_call(
        kernel,
        out_shape=(jax.ShapeDtypeStruct((b_pad, n_out_c), jnp.int32),
                   jax.ShapeDtypeStruct((b_pad, n_out_c), jnp.int32),
                   jax.ShapeDtypeStruct((b_pad, n_out_f), jnp.int32),
                   jax.ShapeDtypeStruct((b_pad, n_out_f), jnp.int32)),
        grid_spec=pltpu.PrefetchScalarGridSpec(
            num_scalar_prefetch=0,
            grid=(nb,),
            in_specs=[
                pl.BlockSpec((bb * _GROUP, nc), lambda b: (b, 0)),
                pl.BlockSpec((1, nc, bb), lambda b: (b, 0, 0)),
                pl.BlockSpec((nc, nc), lambda b: (0, 0)),
                pl.BlockSpec((bb, 1), lambda b: (b, 0)),
                pl.BlockSpec((bb * _GROUP, nf), lambda b: (b, 0)),
                pl.BlockSpec((1, nf, bb), lambda b: (b, 0, 0)),
                pl.BlockSpec((nf, nf), lambda b: (0, 0)),
                pl.BlockSpec((bb, 1), lambda b: (b, 0)),
            ],
            out_specs=[row_spec(n_out_c), row_spec(n_out_c),
                       row_spec(n_out_f), row_spec(n_out_f)]),
        compiler_params=pltpu.CompilerParams(
            dimension_semantics=("parallel",)),
    )(vp_c, mt_c, tril_c, cnt_c, vp_f, mt_f, tril_f, cnt_f)

    coarse_len = jnp.max(jnp.sum(mask0, axis=-1)) + 1
    fine_len = jnp.max(jnp.sum(mask1_fine, axis=-1)) + 1
    lens = jnp.stack([coarse_len, fine_len]).astype(jnp.int32)

    return cc[:B], cp[:B], fc[:B], fp[:B], lens


def dual_grain_separate_permute(indices, grain_indices, *,
                                coarse_size=8, fine_size=16,
                                content_pad_code=1024, content_eos_code=1025,
                                coarse_position_pad_code=256,
                                coarse_position_eos_code=257,
                                fine_position_pad_code=1024,
                                fine_position_eos_code=1025):
    """JAX/Pallas equivalent of DualGrainSeparatePermuter.forward (region-first)."""
    coarse_c, coarse_p, fine_c, fine_p, lens = _permute_padded(
        indices, grain_indices,
        coarse_size=coarse_size, fine_size=fine_size,
        content_pad_code=content_pad_code, content_eos_code=content_eos_code,
        coarse_position_pad_code=coarse_position_pad_code,
        coarse_position_eos_code=coarse_position_eos_code,
        fine_position_pad_code=fine_position_pad_code,
        fine_position_eos_code=fine_position_eos_code)

    # TODO(synk): pad_sequence's output width is data-dependent (batch max), so
    # matching the PyTorch semantics requires one host sync.  Everything above
    # is a single jitted dispatch; latency-sensitive consumers should call
    # _permute_padded directly and slice lazily with `lens`.
    coarse_len, fine_len = (int(v) for v in jax.device_get(lens))

    coarse_content = coarse_c[:, :coarse_len]
    coarse_position = coarse_p[:, :coarse_len]
    fine_content = fine_c[:, :fine_len]
    fine_position = fine_p[:, :fine_len]

    return {
        "coarse_content": coarse_content,
        "fine_content": fine_content,
        "coarse_position": coarse_position,
        "fine_position": fine_position,
        "coarse_segment": jnp.zeros_like(coarse_content),
        "fine_segment": jnp.ones_like(fine_content),
    }


def _reference_numpy(indices, grain, coarse_size, fine_size,
                     content_pad, content_eos, cpos_pad, cpos_eos,
                     fpos_pad, fpos_eos):
    """Pure-numpy replica of the PyTorch forward (region-first) for verification."""
    import numpy as np
    B = indices.shape[0]
    hw1 = coarse_size
    hw2 = fine_size // coarse_size
    sq = hw2 * hw2
    ind_r = indices.reshape(B, hw1, hw2, hw1, hw2).transpose(0, 1, 3, 2, 4)
    ind_r = ind_r.reshape(B, hw1, hw1, sq)
    coarse_content = ind_r[..., 0]
    pos_coarse = np.arange(hw1 * hw1)
    pos_fine = np.arange(fine_size ** 2).reshape(fine_size, fine_size)
    pos_fine = pos_fine.reshape(hw1, hw2, hw1, hw2).transpose(0, 2, 1, 3)
    pos_fine = pos_fine.reshape(hw1, hw1, sq)

    cc, cp, fc, fp = [], [], [], []
    for i in range(B):
        m0 = grain[i] == 0
        m1 = grain[i] == 1
        cc.append(np.concatenate([coarse_content[i][m0], [content_eos]]))
        cp.append(np.concatenate([pos_coarse[m0.reshape(-1)], [cpos_eos]]))
        fc.append(np.concatenate([ind_r[i][m1].reshape(-1), [content_eos]]))
        fp.append(np.concatenate([pos_fine[m1].reshape(-1), [fpos_eos]]))

    def pad(lists, code):
        L = max(len(x) for x in lists)
        return np.stack([np.concatenate([x, np.full(L - len(x), code, dtype=x.dtype)])
                         for x in lists])

    cc_t, cp_t = pad(cc, content_pad), pad(cp, cpos_pad)
    fc_t, fp_t = pad(fc, content_pad), pad(fp, fpos_pad)
    return {
        "coarse_content": cc_t, "fine_content": fc_t,
        "coarse_position": cp_t, "fine_position": fp_t,
        "coarse_segment": np.zeros_like(cc_t), "fine_segment": np.ones_like(fc_t),
    }


if __name__ == "__main__":
    import numpy as np

    B, coarse_size, fine_size = 2, 8, 16
    key = jax.random.PRNGKey(0)
    k1, k2 = jax.random.split(key)
    indices = jax.random.randint(k1, (B, fine_size, fine_size), 0, 1024,
                                 dtype=jnp.int32)
    grain_indices = jax.random.randint(k2, (B, coarse_size, coarse_size), 0, 2,
                                       dtype=jnp.int32)

    out = dual_grain_separate_permute(indices, grain_indices,
                                      coarse_size=coarse_size,
                                      fine_size=fine_size)
    jax.block_until_ready(out)

    ref = _reference_numpy(np.asarray(indices), np.asarray(grain_indices),
                           coarse_size, fine_size,
                           content_pad=1024, content_eos=1025,
                           cpos_pad=256, cpos_eos=257,
                           fpos_pad=1024, fpos_eos=1025)

    for k in ref:
        got = np.asarray(out[k])
        want = ref[k].astype(np.int64)
        assert got.shape == want.shape, (k, got.shape, want.shape)
        assert np.array_equal(got.astype(np.int64), want), k

    print("KERNEL_OK")
</pallas_src>

<mosaic_0001>
module attributes {stable_mosaic.version = 11 : i64} {
  func.func @_dual_compaction_kernel(%arg0: i32, %arg1: memref<64x64xbf16, #tpu.memory_space<vmem>>, %arg2: memref<1x64x8xbf16, #tpu.memory_space<vmem>>, %arg3: memref<64x64xbf16, #tpu.memory_space<vmem>>, %arg4: memref<8x1xi32, #tpu.memory_space<vmem>>, %arg5: memref<64x256xbf16, #tpu.memory_space<vmem>>, %arg6: memref<1x256x8xbf16, #tpu.memory_space<vmem>>, %arg7: memref<256x256xbf16, #tpu.memory_space<vmem>>, %arg8: memref<8x1xi32, #tpu.memory_space<vmem>>, %arg9: memref<8x128xi32, #tpu.memory_space<vmem>>, %arg10: memref<8x128xi32, #tpu.memory_space<vmem>>, %arg11: memref<8x384xi32, #tpu.memory_space<vmem>>, %arg12: memref<8x384xi32, #tpu.memory_space<vmem>>) attributes {dimension_semantics = [#tpu.dimension_semantics<parallel>], iteration_bounds = array<i64: 1>, scalar_prefetch = 0 : i64, scratch_operands = 0 : i64, tpu.core_type = #tpu.core_type<tc>, window_params = [{transform_indices = @transform_0, window_bounds = array<i64: 64, 64>}, {transform_indices = @transform_1, window_bounds = array<i64: 1, 64, 8>}, {pipeline_mode = #tpu.pipeline_mode<synchronous>, transform_indices = @transform_2, window_bounds = array<i64: 64, 64>}, {transform_indices = @transform_3, window_bounds = array<i64: 8, 1>}, {transform_indices = @transform_4, window_bounds = array<i64: 64, 256>}, {transform_indices = @transform_5, window_bounds = array<i64: 1, 256, 8>}, {pipeline_mode = #tpu.pipeline_mode<synchronous>, transform_indices = @transform_6, window_bounds = array<i64: 256, 256>}, {transform_indices = @transform_7, window_bounds = array<i64: 8, 1>}, {transform_indices = @transform_8, window_bounds = array<i64: 8, 128>}, {transform_indices = @transform_9, window_bounds = array<i64: 8, 128>}, {transform_indices = @transform_10, window_bounds = array<i64: 8, 384>}, {transform_indices = @transform_11, window_bounds = array<i64: 8, 384>}]} {
    %c0 = arith.constant 0 : index
    %c0_0 = arith.constant 0 : index
    %0 = vector.load %arg1[%c0, %c0_0] : memref<64x64xbf16, #tpu.memory_space<vmem>>, vector<64x64xbf16>
    %c0_1 = arith.constant 0 : index
    %c0_2 = arith.constant 0 : index
    %c0_3 = arith.constant 0 : index
    %1 = vector.load %arg2[%c0_1, %c0_2, %c0_3] : memref<1x64x8xbf16, #tpu.memory_space<vmem>>, vector<1x64x8xbf16>
    %2 = vector.shape_cast %1 : vector<1x64x8xbf16> to vector<64x8xbf16>
    %c0_4 = arith.constant 0 : index
    %c0_5 = arith.constant 0 : index
    %3 = vector.load %arg3[%c0_4, %c0_5] : memref<64x64xbf16, #tpu.memory_space<vmem>>, vector<64x64xbf16>
    %c0_6 = arith.constant 0 : index
    %c0_7 = arith.constant 0 : index
    %4 = vector.load %arg4[%c0_6, %c0_7] : memref<8x1xi32, #tpu.memory_space<vmem>>, vector<8x1xi32>
    %cst = arith.constant dense<0.000000e+00> : vector<64x8xf32>
    %5 = tpu.matmul %3, %2, %cst {dimension_numbers = #tpu.dot_dimension_numbers<[1], [0], [0], [1], [0, 0, 1, 1], [], []>} : vector<64x64xbf16>, vector<64x8xbf16>, vector<64x8xf32> -> vector<64x8xf32>
    %cst_8 = arith.constant 0.000000e+00 : bf16
    %6 = vector.broadcast %cst_8 : bf16 to vector<64x8xbf16>
    %7 = arith.cmpf ogt, %2, %6 : vector<64x8xbf16>
    %cst_9 = arith.constant 0.000000e+00 : f32
    %8 = vector.broadcast %cst_9 : f32 to vector<64x8xf32>
    %9 = arith.select %7, %5, %8 : vector<64x8xi1>, vector<64x8xf32>
    %10 = arith.fptosi %9 : vector<64x8xf32> to vector<64x8xi32>
    %11 = tpu.iota {dimensions = array<i32: 1>} : vector<64x128xi32>
    %c1_i32 = arith.constant 1 : i32
    %12 = vector.broadcast %c1_i32 : i32 to vector<64x128xi32>
    %13 = arith.addi %11, %12 : vector<64x128xi32>
    %14 = tpu.iota {dimensions = array<i32: 1>} : vector<1x128xi32>
    %15 = vector.extract_strided_slice %10 {offsets = [0, 0], sizes = [64, 1], strides = [1, 1]} : vector<64x8xi32> to vector<64x1xi32>
    %16 = vector.broadcast %15 : vector<64x1xi32> to vector<64x128xi32>
    %17 = arith.cmpi eq, %16, %13 : vector<64x128xi32>
    %18 = arith.extui %17 : vector<64x128xi1> to vector<64x128xi32>
    %19 = arith.sitofp %18 : vector<64x128xi32> to vector<64x128xf32>
    %20 = arith.truncf %19 : vector<64x128xf32> to vector<64x128xbf16>
    %21 = vector.extract_strided_slice %0 {offsets = [0, 0], sizes = [8, 64], strides = [1, 1]} : vector<64x64xbf16> to vector<8x64xbf16>
    %cst_10 = arith.constant dense<0.000000e+00> : vector<8x128xf32>
    %22 = tpu.matmul %21, %20, %cst_10 {dimension_numbers = #tpu.dot_dimension_numbers<[1], [0], [0], [1], [0, 0, 1, 1], [], []>} : vector<8x64xbf16>, vector<64x128xbf16>, vector<8x128xf32> -> vector<8x128xf32>
    %23 = vector.extract_strided_slice %22 {offsets = [0, 0], sizes = [1, 128], strides = [1, 1]} : vector<8x128xf32> to vector<1x128xf32>
    %cst_11 = arith.constant 2.560000e+02 : f32
    %24 = vector.broadcast %cst_11 : f32 to vector<1x128xf32>
    %25 = arith.mulf %23, %24 : vector<1x128xf32>
    %26 = vector.extract_strided_slice %22 {offsets = [1, 0], sizes = [1, 128], strides = [1, 1]} : vector<8x128xf32> to vector<1x128xf32>
    %27 = arith.addf %25, %26 : vector<1x128xf32>
    %28 = vector.extract_strided_slice %22 {offsets = [2, 0], sizes = [1, 128], strides = [1, 1]} : vector<8x128xf32> to vector<1x128xf32>
    %cst_12 = arith.constant 2.560000e+02 : f32
    %29 = vector.broadcast %cst_12 : f32 to vector<1x128xf32>
    %30 = arith.mulf %28, %29 : vector<1x128xf32>
    %31 = vector.extract_strided_slice %22 {offsets = [3, 0], sizes = [1, 128], strides = [1, 1]} : vector<8x128xf32> to vector<1x128xf32>
    %32 = arith.addf %30, %31 : vector<1x128xf32>
    %33 = vector.extract_strided_slice %10 {offsets = [0, 1], sizes = [64, 1], strides = [1, 1]} : vector<64x8xi32> to vector<64x1xi32>
    %34 = vector.broadcast %33 : vector<64x1xi32> to vector<64x128xi32>
    %35 = arith.cmpi eq, %34, %13 : vector<64x128xi32>
    %36 = arith.extui %35 : vector<64x128xi1> to vector<64x128xi32>
    %37 = arith.sitofp %36 : vector<64x128xi32> to vector<64x128xf32>
    %38 = arith.truncf %37 : vector<64x128xf32> to vector<64x128xbf16>
    %39 = vector.extract_strided_slice %0 {offsets = [8, 0], sizes = [8, 64], strides = [1, 1]} : vector<64x64xbf16> to vector<8x64xbf16>
    %cst_13 = arith.constant dense<0.000000e+00> : vector<8x128xf32>
    %40 = tpu.matmul %39, %38, %cst_13 {dimension_numbers = #tpu.dot_dimension_numbers<[1], [0], [0], [1], [0, 0, 1, 1], [], []>} : vector<8x64xbf16>, vector<64x128xbf16>, vector<8x128xf32> -> vector<8x128xf32>
    %41 = vector.extract_strided_slice %40 {offsets = [0, 0], sizes = [1, 128], strides = [1, 1]} : vector<8x128xf32> to vector<1x128xf32>
    %cst_14 = arith.constant 2.560000e+02 : f32
    %42 = vector.broadcast %cst_14 : f32 to vector<1x128xf32>
    %43 = arith.mulf %41, %42 : vector<1x128xf32>
    %44 = vector.extract_strided_slice %40 {offsets = [1, 0], sizes = [1, 128], strides = [1, 1]} : vector<8x128xf32> to vector<1x128xf32>
    %45 = arith.addf %43, %44 : vector<1x128xf32>
    %46 = vector.extract_strided_slice %40 {offsets = [2, 0], sizes = [1, 128], strides = [1, 1]} : vector<8x128xf32> to vector<1x128xf32>
    %cst_15 = arith.constant 2.560000e+02 : f32
    %47 = vector.broadcast %cst_15 : f32 to vector<1x128xf32>
    %48 = arith.mulf %46, %47 : vector<1x128xf32>
    %49 = vector.extract_strided_slice %40 {offsets = [3, 0], sizes = [1, 128], strides = [1, 1]} : vector<8x128xf32> to vector<1x128xf32>
    %50 = arith.addf %48, %49 : vector<1x128xf32>
    %51 = vector.extract_strided_slice %10 {offsets = [0, 2], sizes = [64, 1], strides = [1, 1]} : vector<64x8xi32> to vector<64x1xi32>
    %52 = vector.broadcast %51 : vector<64x1xi32> to vector<64x128xi32>
    %53 = arith.cmpi eq, %52, %13 : vector<64x128xi32>
    %54 = arith.extui %53 : vector<64x128xi1> to vector<64x128xi32>
    %55 = arith.sitofp %54 : vector<64x128xi32> to vector<64x128xf32>
    %56 = arith.truncf %55 : vector<64x128xf32> to vector<64x128xbf16>
    %57 = vector.extract_strided_slice %0 {offsets = [16, 0], sizes = [8, 64], strides = [1, 1]} : vector<64x64xbf16> to vector<8x64xbf16>
    %cst_16 = arith.constant dense<0.000000e+00> : vector<8x128xf32>
    %58 = tpu.matmul %57, %56, %cst_16 {dimension_numbers = #tpu.dot_dimension_numbers<[1], [0], [0], [1], [0, 0, 1, 1], [], []>} : vector<8x64xbf16>, vector<64x128xbf16>, vector<8x128xf32> -> vector<8x128xf32>
    %59 = vector.extract_strided_slice %58 {offsets = [0, 0], sizes = [1, 128], strides = [1, 1]} : vector<8x128xf32> to vector<1x128xf32>
    %cst_17 = arith.constant 2.560000e+02 : f32
    %60 = vector.broadcast %cst_17 : f32 to vector<1x128xf32>
    %61 = arith.mulf %59, %60 : vector<1x128xf32>
    %62 = vector.extract_strided_slice %58 {offsets = [1, 0], sizes = [1, 128], strides = [1, 1]} : vector<8x128xf32> to vector<1x128xf32>
    %63 = arith.addf %61, %62 : vector<1x128xf32>
    %64 = vector.extract_strided_slice %58 {offsets = [2, 0], sizes = [1, 128], strides = [1, 1]} : vector<8x128xf32> to vector<1x128xf32>
    %cst_18 = arith.constant 2.560000e+02 : f32
    %65 = vector.broadcast %cst_18 : f32 to vector<1x128xf32>
    %66 = arith.mulf %64, %65 : vector<1x128xf32>
    %67 = vector.extract_strided_slice %58 {offsets = [3, 0], sizes = [1, 128], strides = [1, 1]} : vector<8x128xf32> to vector<1x128xf32>
    %68 = arith.addf %66, %67 : vector<1x128xf32>
    %69 = vector.extract_strided_slice %10 {offsets = [0, 3], sizes = [64, 1], strides = [1, 1]} : vector<64x8xi32> to vector<64x1xi32>
    %70 = vector.broadcast %69 : vector<64x1xi32> to vector<64x128xi32>
    %71 = arith.cmpi eq, %70, %13 : vector<64x128xi32>
    %72 = arith.extui %71 : vector<64x128xi1> to vector<64x128xi32>
    %73 = arith.sitofp %72 : vector<64x128xi32> to vector<64x128xf32>
    %74 = arith.truncf %73 : vector<64x128xf32> to vector<64x128xbf16>
    %75 = vector.extract_strided_slice %0 {offsets = [24, 0], sizes = [8, 64], strides = [1, 1]} : vector<64x64xbf16> to vector<8x64xbf16>
    %cst_19 = arith.constant dense<0.000000e+00> : vector<8x128xf32>
    %76 = tpu.matmul %75, %74, %cst_19 {dimension_numbers = #tpu.dot_dimension_numbers<[1], [0], [0], [1], [0, 0, 1, 1], [], []>} : vector<8x64xbf16>, vector<64x128xbf16>, vector<8x128xf32> -> vector<8x128xf32>
    %77 = vector.extract_strided_slice %76 {offsets = [0, 0], sizes = [1, 128], strides = [1, 1]} : vector<8x128xf32> to vector<1x128xf32>
    %cst_20 = arith.constant 2.560000e+02 : f32
    %78 = vector.broadcast %cst_20 : f32 to vector<1x128xf32>
    %79 = arith.mulf %77, %78 : vector<1x128xf32>
    %80 = vector.extract_strided_slice %76 {offsets = [1, 0], sizes = [1, 128], strides = [1, 1]} : vector<8x128xf32> to vector<1x128xf32>
    %81 = arith.addf %79, %80 : vector<1x128xf32>
    %82 = vector.extract_strided_slice %76 {offsets = [2, 0], sizes = [1, 128], strides = [1, 1]} : vector<8x128xf32> to vector<1x128xf32>
    %cst_21 = arith.constant 2.560000e+02 : f32
    %83 = vector.broadcast %cst_21 : f32 to vector<1x128xf32>
    %84 = arith.mulf %82, %83 : vector<1x128xf32>
    %85 = vector.extract_strided_slice %76 {offsets = [3, 0], sizes = [1, 128], strides = [1, 1]} : vector<8x128xf32> to vector<1x128xf32>
    %86 = arith.addf %84, %85 : vector<1x128xf32>
    %87 = vector.extract_strided_slice %10 {offsets = [0, 4], sizes = [64, 1], strides = [1, 1]} : vector<64x8xi32> to vector<64x1xi32>
    %88 = vector.broadcast %87 : vector<64x1xi32> to vector<64x128xi32>
    %89 = arith.cmpi eq, %88, %13 : vector<64x128xi32>
    %90 = arith.extui %89 : vector<64x128xi1> to vector<64x128xi32>
    %91 = arith.sitofp %90 : vector<64x128xi32> to vector<64x128xf32>
    %92 = arith.truncf %91 : vector<64x128xf32> to vector<64x128xbf16>
    %93 = vector.extract_strided_slice %0 {offsets = [32, 0], sizes = [8, 64], strides = [1, 1]} : vector<64x64xbf16> to vector<8x64xbf16>
    %cst_22 = arith.constant dense<0.000000e+00> : vector<8x128xf32>
    %94 = tpu.matmul %93, %92, %cst_22 {dimension_numbers = #tpu.dot_dimension_numbers<[1], [0], [0], [1], [0, 0, 1, 1], [], []>} : vector<8x64xbf16>, vector<64x128xbf16>, vector<8x128xf32> -> vector<8x128xf32>
    %95 = vector.extract_strided_slice %94 {offsets = [0, 0], sizes = [1, 128], strides = [1, 1]} : vector<8x128xf32> to vector<1x128xf32>
    %cst_23 = arith.constant 2.560000e+02 : f32
    %96 = vector.broadcast %cst_23 : f32 to vector<1x128xf32>
    %97 = arith.mulf %95, %96 : vector<1x128xf32>
    %98 = vector.extract_strided_slice %94 {offsets = [1, 0], sizes = [1, 128], strides = [1, 1]} : vector<8x128xf32> to vector<1x128xf32>
    %99 = arith.addf %97, %98 : vector<1x128xf32>
    %100 = vector.extract_strided_slice %94 {offsets = [2, 0], sizes = [1, 128], strides = [1, 1]} : vector<8x128xf32> to vector<1x128xf32>
    %cst_24 = arith.constant 2.560000e+02 : f32
    %101 = vector.broadcast %cst_24 : f32 to vector<1x128xf32>
    %102 = arith.mulf %100, %101 : vector<1x128xf32>
    %103 = vector.extract_strided_slice %94 {offsets = [3, 0], sizes = [1, 128], strides = [1, 1]} : vector<8x128xf32> to vector<1x128xf32>
    %104 = arith.addf %102, %103 : vector<1x128xf32>
    %105 = vector.extract_strided_slice %10 {offsets = [0, 5], sizes = [64, 1], strides = [1, 1]} : vector<64x8xi32> to vector<64x1xi32>
    %106 = vector.broadcast %105 : vector<64x1xi32> to vector<64x128xi32>
    %107 = arith.cmpi eq, %106, %13 : vector<64x128xi32>
    %108 = arith.extui %107 : vector<64x128xi1> to vector<64x128xi32>
    %109 = arith.sitofp %108 : vector<64x128xi32> to vector<64x128xf32>
    %110 = arith.truncf %109 : vector<64x128xf32> to vector<64x128xbf16>
    %111 = vector.extract_strided_slice %0 {offsets = [40, 0], sizes = [8, 64], strides = [1, 1]} : vector<64x64xbf16> to vector<8x64xbf16>
    %cst_25 = arith.constant dense<0.000000e+00> : vector<8x128xf32>
    %112 = tpu.matmul %111, %110, %cst_25 {dimension_numbers = #tpu.dot_dimension_numbers<[1], [0], [0], [1], [0, 0, 1, 1], [], []>} : vector<8x64xbf16>, vector<64x128xbf16>, vector<8x128xf32> -> vector<8x128xf32>
    %113 = vector.extract_strided_slice %112 {offsets = [0, 0], sizes = [1, 128], strides = [1, 1]} : vector<8x128xf32> to vector<1x128xf32>
    %cst_26 = arith.constant 2.560000e+02 : f32
    %114 = vector.broadcast %cst_26 : f32 to vector<1x128xf32>
    %115 = arith.mulf %113, %114 : vector<1x128xf32>
    %116 = vector.extract_strided_slice %112 {offsets = [1, 0], sizes = [1, 128], strides = [1, 1]} : vector<8x128xf32> to vector<1x128xf32>
    %117 = arith.addf %115, %116 : vector<1x128xf32>
    %118 = vector.extract_strided_slice %112 {offsets = [2, 0], sizes = [1, 128], strides = [1, 1]} : vector<8x128xf32> to vector<1x128xf32>
    %cst_27 = arith.constant 2.560000e+02 : f32
    %119 = vector.broadcast %cst_27 : f32 to vector<1x128xf32>
    %120 = arith.mulf %118, %119 : vector<1x128xf32>
    %121 = vector.extract_strided_slice %112 {offsets = [3, 0], sizes = [1, 128], strides = [1, 1]} : vector<8x128xf32> to vector<1x128xf32>
    %122 = arith.addf %120, %121 : vector<1x128xf32>
    %123 = vector.extract_strided_slice %10 {offsets = [0, 6], sizes = [64, 1], strides = [1, 1]} : vector<64x8xi32> to vector<64x1xi32>
    %124 = vector.broadcast %123 : vector<64x1xi32> to vector<64x128xi32>
    %125 = arith.cmpi eq, %124, %13 : vector<64x128xi32>
    %126 = arith.extui %125 : vector<64x128xi1> to vector<64x128xi32>
    %127 = arith.sitofp %126 : vector<64x128xi32> to vector<64x128xf32>
    %128 = arith.truncf %127 : vector<64x128xf32> to vector<64x128xbf16>
    %129 = vector.extract_strided_slice %0 {offsets = [48, 0], sizes = [8, 64], strides = [1, 1]} : vector<64x64xbf16> to vector<8x64xbf16>
    %cst_28 = arith.constant dense<0.000000e+00> : vector<8x128xf32>
    %130 = tpu.matmul %129, %128, %cst_28 {dimension_numbers = #tpu.dot_dimension_numbers<[1], [0], [0], [1], [0, 0, 1, 1], [], []>} : vector<8x64xbf16>, vector<64x128xbf16>, vector<8x128xf32> -> vector<8x128xf32>
    %131 = vector.extract_strided_slice %130 {offsets = [0, 0], sizes = [1, 128], strides = [1, 1]} : vector<8x128xf32> to vector<1x128xf32>
    %cst_29 = arith.constant 2.560000e+02 : f32
    %132 = vector.broadcast %cst_29 : f32 to vector<1x128xf32>
    %133 = arith.mulf %131, %132 : vector<1x128xf32>
    %134 = vector.extract_strided_slice %130 {offsets = [1, 0], sizes = [1, 128], strides = [1, 1]} : vector<8x128xf32> to vector<1x128xf32>
    %135 = arith.addf %133, %134 : vector<1x128xf32>
    %136 = vector.extract_strided_slice %130 {offsets = [2, 0], sizes = [1, 128], strides = [1, 1]} : vector<8x128xf32> to vector<1x128xf32>
    %cst_30 = arith.constant 2.560000e+02 : f32
    %137 = vector.broadcast %cst_30 : f32 to vector<1x128xf32>
    %138 = arith.mulf %136, %137 : vector<1x128xf32>
    %139 = vector.extract_strided_slice %130 {offsets = [3, 0], sizes = [1, 128], strides = [1, 1]} : vector<8x128xf32> to vector<1x128xf32>
    %140 = arith.addf %138, %139 : vector<1x128xf32>
    %141 = vector.extract_strided_slice %10 {offsets = [0, 7], sizes = [64, 1], strides = [1, 1]} : vector<64x8xi32> to vector<64x1xi32>
    %142 = vector.broadcast %141 : vector<64x1xi32> to vector<64x128xi32>
    %143 = arith.cmpi eq, %142, %13 : vector<64x128xi32>
    %144 = arith.extui %143 : vector<64x128xi1> to vector<64x128xi32>
    %145 = arith.sitofp %144 : vector<64x128xi32> to vector<64x128xf32>
    %146 = arith.truncf %145 : vector<64x128xf32> to vector<64x128xbf16>
    %147 = vector.extract_strided_slice %0 {offsets = [56, 0], sizes = [8, 64], strides = [1, 1]} : vector<64x64xbf16> to vector<8x64xbf16>
    %cst_31 = arith.constant dense<0.000000e+00> : vector<8x128xf32>
    %148 = tpu.matmul %147, %146, %cst_31 {dimension_numbers = #tpu.dot_dimension_numbers<[1], [0], [0], [1], [0, 0, 1, 1], [], []>} : vector<8x64xbf16>, vector<64x128xbf16>, vector<8x128xf32> -> vector<8x128xf32>
    %149 = vector.extract_strided_slice %148 {offsets = [0, 0], sizes = [1, 128], strides = [1, 1]} : vector<8x128xf32> to vector<1x128xf32>
    %cst_32 = arith.constant 2.560000e+02 : f32
    %150 = vector.broadcast %cst_32 : f32 to vector<1x128xf32>
    %151 = arith.mulf %149, %150 : vector<1x128xf32>
    %152 = vector.extract_strided_slice %148 {offsets = [1, 0], sizes = [1, 128], strides = [1, 1]} : vector<8x128xf32> to vector<1x128xf32>
    %153 = arith.addf %151, %152 : vector<1x128xf32>
    %154 = vector.extract_strided_slice %148 {offsets = [2, 0], sizes = [1, 128], strides = [1, 1]} : vector<8x128xf32> to vector<1x128xf32>
    %cst_33 = arith.constant 2.560000e+02 : f32
    %155 = vector.broadcast %cst_33 : f32 to vector<1x128xf32>
    %156 = arith.mulf %154, %155 : vector<1x128xf32>
    %157 = vector.extract_strided_slice %148 {offsets = [3, 0], sizes = [1, 128], strides = [1, 1]} : vector<8x128xf32> to vector<1x128xf32>
    %158 = arith.addf %156, %157 : vector<1x128xf32>
    %159 = tpu.concatenate %27, %45, %63, %81, %99, %117, %135, %153 in 0 : vector<1x128xf32>, vector<1x128xf32>, vector<1x128xf32>, vector<1x128xf32>, vector<1x128xf32>, vector<1x128xf32>, vector<1x128xf32>, vector<1x128xf32> -> vector<8x128xf32>
    %160 = arith.fptosi %159 : vector<8x128xf32> to vector<8x128xi32>
    %161 = tpu.concatenate %32, %50, %68, %86, %104, %122, %140, %158 in 0 : vector<1x128xf32>, vector<1x128xf32>, vector<1x128xf32>, vector<1x128xf32>, vector<1x128xf32>, vector<1x128xf32>, vector<1x128xf32>, vector<1x128xf32> -> vector<8x128xf32>
    %162 = arith.fptosi %161 : vector<8x128xf32> to vector<8x128xi32>
    %163 = vector.broadcast %14 : vector<1x128xi32> to vector<8x128xi32>
    %164 = vector.broadcast %4 : vector<8x1xi32> to vector<8x128xi32>
    %165 = arith.cmpi slt, %163, %164 : vector<8x128xi32>
    %166 = vector.broadcast %14 : vector<1x128xi32> to vector<8x128xi32>
    %167 = vector.broadcast %4 : vector<8x1xi32> to vector<8x128xi32>
    %168 = arith.cmpi eq, %166, %167 : vector<8x128xi32>
    %c1025_i32 = arith.constant 1025 : i32
    %c1024_i32 = arith.constant 1024 : i32
    %169 = vector.broadcast %c1025_i32 : i32 to vector<8x128xi32>
    %170 = vector.broadcast %c1024_i32 : i32 to vector<8x128xi32>
    %171 = arith.select %168, %169, %170 : vector<8x128xi1>, vector<8x128xi32>
    %172 = arith.select %165, %160, %171 : vector<8x128xi1>, vector<8x128xi32>
    %c0_34 = arith.constant 0 : index
    %c0_35 = arith.constant 0 : index
    %173 = vector.load %arg9[%c0_34, %c0_35] : memref<8x128xi32, #tpu.memory_space<vmem>>, vector<8x128xi32>
    tpu.vector_store %arg9[%c0_34, %c0_35], %172 {strides = array<i32>} : memref<8x128xi32, #tpu.memory_space<vmem>>, vector<8x128xi32>,
    %174 = vector.broadcast %14 : vector<1x128xi32> to vector<8x128xi32>
    %175 = vector.broadcast %4 : vector<8x1xi32> to vector<8x128xi32>
    %176 = arith.cmpi slt, %174, %175 : vector<8x128xi32>
    %177 = vector.broadcast %14 : vector<1x128xi32> to vector<8x128xi32>
    %178 = vector.broadcast %4 : vector<8x1xi32> to vector<8x128xi32>
    %179 = arith.cmpi eq, %177, %178 : vector<8x128xi32>
    %c257_i32 = arith.constant 257 : i32
    %c256_i32 = arith.constant 256 : i32
    %180 = vector.broadcast %c257_i32 : i32 to vector<8x128xi32>
    %181 = vector.broadcast %c256_i32 : i32 to vector<8x128xi32>
    %182 = arith.select %179, %180, %181 : vector<8x128xi1>, vector<8x128xi32>
    %183 = arith.select %176, %162, %182 : vector<8x128xi1>, vector<8x128xi32>
    %c0_36 = arith.constant 0 : index
    %c0_37 = arith.constant 0 : index
    %184 = vector.load %arg10[%c0_36, %c0_37] : memref<8x128xi32, #tpu.memory_space<vmem>>, vector<8x128xi32>
    tpu.vector_store %arg10[%c0_36, %c0_37], %183 {strides = array<i32>} : memref<8x128xi32, #tpu.memory_space<vmem>>, vector<8x128xi32>,
    %c0_38 = arith.constant 0 : index
    %c0_39 = arith.constant 0 : index
    %185 = vector.load %arg5[%c0_38, %c0_39] : memref<64x256xbf16, #tpu.memory_space<vmem>>, vector<64x256xbf16>
    %c0_40 = arith.constant 0 : index
    %c0_41 = arith.constant 0 : index
    %c0_42 = arith.constant 0 : index
    %186 = vector.load %arg6[%c0_40, %c0_41, %c0_42] : memref<1x256x8xbf16, #tpu.memory_space<vmem>>, vector<1x256x8xbf16>
    %187 = vector.shape_cast %186 : vector<1x256x8xbf16> to vector<256x8xbf16>
    %c0_43 = arith.constant 0 : index
    %c0_44 = arith.constant 0 : index
    %188 = vector.load %arg7[%c0_43, %c0_44] : memref<256x256xbf16, #tpu.memory_space<vmem>>, vector<256x256xbf16>
    %c0_45 = arith.constant 0 : index
    %c0_46 = arith.constant 0 : index
    %189 = vector.load %arg8[%c0_45, %c0_46] : memref<8x1xi32, #tpu.memory_space<vmem>>, vector<8x1xi32>
    %cst_47 = arith.constant dense<0.000000e+00> : vector<256x8xf32>
    %190 = tpu.matmul %188, %187, %cst_47 {dimension_numbers = #tpu.dot_dimension_numbers<[1], [0], [0], [1], [0, 0, 1, 1], [], []>} : vector<256x256xbf16>, vector<256x8xbf16>, vector<256x8xf32> -> vector<256x8xf32>
    %cst_48 = arith.constant 0.000000e+00 : bf16
    %191 = vector.broadcast %cst_48 : bf16 to vector<256x8xbf16>
    %192 = arith.cmpf ogt, %187, %191 : vector<256x8xbf16>
    %cst_49 = arith.constant 0.000000e+00 : f32
    %193 = vector.broadcast %cst_49 : f32 to vector<256x8xf32>
    %194 = arith.select %192, %190, %193 : vector<256x8xi1>, vector<256x8xf32>
    %195 = arith.fptosi %194 : vector<256x8xf32> to vector<256x8xi32>
    %196 = tpu.iota {dimensions = array<i32: 1>} : vector<256x384xi32>
    %c1_i32_50 = arith.constant 1 : i32
    %197 = vector.broadcast %c1_i32_50 : i32 to vector<256x384xi32>
    %198 = arith.addi %196, %197 : vector<256x384xi32>
    %199 = tpu.iota {dimensions = array<i32: 1>} : vector<1x384xi32>
    %200 = vector.extract_strided_slice %195 {offsets = [0, 0], sizes = [256, 1], strides = [1, 1]} : vector<256x8xi32> to vector<256x1xi32>
    %201 = vector.broadcast %200 : vector<256x1xi32> to vector<256x384xi32>
    %202 = arith.cmpi eq, %201, %198 : vector<256x384xi32>
    %203 = arith.extui %202 : vector<256x384xi1> to vector<256x384xi32>
    %204 = arith.sitofp %203 : vector<256x384xi32> to vector<256x384xf32>
    %205 = arith.truncf %204 : vector<256x384xf32> to vector<256x384xbf16>
    %206 = vector.extract_strided_slice %185 {offsets = [0, 0], sizes = [8, 256], strides = [1, 1]} : vector<64x256xbf16> to vector<8x256xbf16>
    %cst_51 = arith.constant dense<0.000000e+00> : vector<8x384xf32>
    %207 = tpu.matmul %206, %205, %cst_51 {dimension_numbers = #tpu.dot_dimension_numbers<[1], [0], [0], [1], [0, 0, 1, 1], [], []>} : vector<8x256xbf16>, vector<256x384xbf16>, vector<8x384xf32> -> vector<8x384xf32>
    %208 = vector.extract_strided_slice %207 {offsets = [0, 0], sizes = [1, 384], strides = [1, 1]} : vector<8x384xf32> to vector<1x384xf32>
    %cst_52 = arith.constant 2.560000e+02 : f32
    %209 = vector.broadcast %cst_52 : f32 to vector<1x384xf32>
    %210 = arith.mulf %208, %209 : vector<1x384xf32>
    %211 = vector.extract_strided_slice %207 {offsets = [1, 0], sizes = [1, 384], strides = [1, 1]} : vector<8x384xf32> to vector<1x384xf32>
    %212 = arith.addf %210, %211 : vector<1x384xf32>
    %213 = vector.extract_strided_slice %207 {offsets = [2, 0], sizes = [1, 384], strides = [1, 1]} : vector<8x384xf32> to vector<1x384xf32>
    %cst_53 = arith.constant 2.560000e+02 : f32
    %214 = vector.broadcast %cst_53 : f32 to vector<1x384xf32>
    %215 = arith.mulf %213, %214 : vector<1x384xf32>
    %216 = vector.extract_strided_slice %207 {offsets = [3, 0], sizes = [1, 384], strides = [1, 1]} : vector<8x384xf32> to vector<1x384xf32>
    %217 = arith.addf %215, %216 : vector<1x384xf32>
    %218 = vector.extract_strided_slice %195 {offsets = [0, 1], sizes = [256, 1], strides = [1, 1]} : vector<256x8xi32> to vector<256x1xi32>
    %219 = vector.broadcast %218 : vector<256x1xi32> to vector<256x384xi32>
    %220 = arith.cmpi eq, %219, %198 : vector<256x384xi32>
    %221 = arith.extui %220 : vector<256x384xi1> to vector<256x384xi32>
    %222 = arith.sitofp %221 : vector<256x384xi32> to vector<256x384xf32>
    %223 = arith.truncf %222 : vector<256x384xf32> to vector<256x384xbf16>
    %224 = vector.extract_strided_slice %185 {offsets = [8, 0], sizes = [8, 256], strides = [1, 1]} : vector<64x256xbf16> to vector<8x256xbf16>
    %cst_54 = arith.constant dense<0.000000e+00> : vector<8x384xf32>
    %225 = tpu.matmul %224, %223, %cst_54 {dimension_numbers = #tpu.dot_dimension_numbers<[1], [0], [0], [1], [0, 0, 1, 1], [], []>} : vector<8x256xbf16>, vector<256x384xbf16>, vector<8x384xf32> -> vector<8x384xf32>
    %226 = vector.extract_strided_slice %225 {offsets = [0, 0], sizes = [1, 384], strides = [1, 1]} : vector<8x384xf32> to vector<1x384xf32>
    %cst_55 = arith.constant 2.560000e+02 : f32
    %227 = vector.broadcast %cst_55 : f32 to vector<1x384xf32>
    %228 = arith.mulf %226, %227 : vector<1x384xf32>
    %229 = vector.extract_strided_slice %225 {offsets = [1, 0], sizes = [1, 384], strides = [1, 1]} : vector<8x384xf32> to vector<1x384xf32>
    %230 = arith.addf %228, %229 : vector<1x384xf32>
    %231 = vector.extract_strided_slice %225 {offsets = [2, 0], sizes = [1, 384], strides = [1, 1]} : vector<8x384xf32> to vector<1x384xf32>
    %cst_56 = arith.constant 2.560000e+02 : f32
    %232 = vector.broadcast %cst_56 : f32 to vector<1x384xf32>
    %233 = arith.mulf %231, %232 : vector<1x384xf32>
    %234 = vector.extract_strided_slice %225 {offsets = [3, 0], sizes = [1, 384], strides = [1, 1]} : vector<8x384xf32> to vector<1x384xf32>
    %235 = arith.addf %233, %234 : vector<1x384xf32>
    %236 = vector.extract_strided_slice %195 {offsets = [0, 2], sizes = [256, 1], strides = [1, 1]} : vector<256x8xi32> to vector<256x1xi32>
    %237 = vector.broadcast %236 : vector<256x1xi32> to vector<256x384xi32>
    %238 = arith.cmpi eq, %237, %198 : vector<256x384xi32>
    %239 = arith.extui %238 : vector<256x384xi1> to vector<256x384xi32>
    %240 = arith.sitofp %239 : vector<256x384xi32> to vector<256x384xf32>
    %241 = arith.truncf %240 : vector<256x384xf32> to vector<256x384xbf16>
    %242 = vector.extract_strided_slice %185 {offsets = [16, 0], sizes = [8, 256], strides = [1, 1]} : vector<64x256xbf16> to vector<8x256xbf16>
    %cst_57 = arith.constant dense<0.000000e+00> : vector<8x384xf32>
    %243 = tpu.matmul %242, %241, %cst_57 {dimension_numbers = #tpu.dot_dimension_numbers<[1], [0], [0], [1], [0, 0, 1, 1], [], []>} : vector<8x256xbf16>, vector<256x384xbf16>, vector<8x384xf32> -> vector<8x384xf32>
    %244 = vector.extract_strided_slice %243 {offsets = [0, 0], sizes = [1, 384], strides = [1, 1]} : vector<8x384xf32> to vector<1x384xf32>
    %cst_58 = arith.constant 2.560000e+02 : f32
    %245 = vector.broadcast %cst_58 : f32 to vector<1x384xf32>
    %246 = arith.mulf %244, %245 : vector<1x384xf32>
    %247 = vector.extract_strided_slice %243 {offsets = [1, 0], sizes = [1, 384], strides = [1, 1]} : vector<8x384xf32> to vector<1x384xf32>
    %248 = arith.addf %246, %247 : vector<1x384xf32>
    %249 = vector.extract_strided_slice %243 {offsets = [2, 0], sizes = [1, 384], strides = [1, 1]} : vector<8x384xf32> to vector<1x384xf32>
    %cst_59 = arith.constant 2.560000e+02 : f32
    %250 = vector.broadcast %cst_59 : f32 to vector<1x384xf32>
    %251 = arith.mulf %249, %250 : vector<1x384xf32>
    %252 = vector.extract_strided_slice %243 {offsets = [3, 0], sizes = [1, 384], strides = [1, 1]} : vector<8x384xf32> to vector<1x384xf32>
    %253 = arith.addf %251, %252 : vector<1x384xf32>
    %254 = vector.extract_strided_slice %195 {offsets = [0, 3], sizes = [256, 1], strides = [1, 1]} : vector<256x8xi32> to vector<256x1xi32>
    %255 = vector.broadcast %254 : vector<256x1xi32> to vector<256x384xi32>
    %256 = arith.cmpi eq, %255, %198 : vector<256x384xi32>
    %257 = arith.extui %256 : vector<256x384xi1> to vector<256x384xi32>
    %258 = arith.sitofp %257 : vector<256x384xi32> to vector<256x384xf32>
    %259 = arith.truncf %258 : vector<256x384xf32> to vector<256x384xbf16>
    %260 = vector.extract_strided_slice %185 {offsets = [24, 0], sizes = [8, 256], strides = [1, 1]} : vector<64x256xbf16> to vector<8x256xbf16>
    %cst_60 = arith.constant dense<0.000000e+00> : vector<8x384xf32>
    %261 = tpu.matmul %260, %259, %cst_60 {dimension_numbers = #tpu.dot_dimension_numbers<[1], [0], [0], [1], [0, 0, 1, 1], [], []>} : vector<8x256xbf16>, vector<256x384xbf16>, vector<8x384xf32> -> vector<8x384xf32>
    %262 = vector.extract_strided_slice %261 {offsets = [0, 0], sizes = [1, 384], strides = [1, 1]} : vector<8x384xf32> to vector<1x384xf32>
    %cst_61 = arith.constant 2.560000e+02 : f32
    %263 = vector.broadcast %cst_61 : f32 to vector<1x384xf32>
    %264 = arith.mulf %262, %263 : vector<1x384xf32>
    %265 = vector.extract_strided_slice %261 {offsets = [1, 0], sizes = [1, 384], strides = [1, 1]} : vector<8x384xf32> to vector<1x384xf32>
    %266 = arith.addf %264, %265 : vector<1x384xf32>
    %267 = vector.extract_strided_slice %261 {offsets = [2, 0], sizes = [1, 384], strides = [1, 1]} : vector<8x384xf32> to vector<1x384xf32>
    %cst_62 = arith.constant 2.560000e+02 : f32
    %268 = vector.broadcast %cst_62 : f32 to vector<1x384xf32>
    %269 = arith.mulf %267, %268 : vector<1x384xf32>
    %270 = vector.extract_strided_slice %261 {offsets = [3, 0], sizes = [1, 384], strides = [1, 1]} : vector<8x384xf32> to vector<1x384xf32>
    %271 = arith.addf %269, %270 : vector<1x384xf32>
    %272 = vector.extract_strided_slice %195 {offsets = [0, 4], sizes = [256, 1], strides = [1, 1]} : vector<256x8xi32> to vector<256x1xi32>
    %273 = vector.broadcast %272 : vector<256x1xi32> to vector<256x384xi32>
    %274 = arith.cmpi eq, %273, %198 : vector<256x384xi32>
    %275 = arith.extui %274 : vector<256x384xi1> to vector<256x384xi32>
    %276 = arith.sitofp %275 : vector<256x384xi32> to vector<256x384xf32>
    %277 = arith.truncf %276 : vector<256x384xf32> to vector<256x384xbf16>
    %278 = vector.extract_strided_slice %185 {offsets = [32, 0], sizes = [8, 256], strides = [1, 1]} : vector<64x256xbf16> to vector<8x256xbf16>
    %cst_63 = arith.constant dense<0.000000e+00> : vector<8x384xf32>
    %279 = tpu.matmul %278, %277, %cst_63 {dimension_numbers = #tpu.dot_dimension_numbers<[1], [0], [0], [1], [0, 0, 1, 1], [], []>} : vector<8x256xbf16>, vector<256x384xbf16>, vector<8x384xf32> -> vector<8x384xf32>
    %280 = vector.extract_strided_slice %279 {offsets = [0, 0], sizes = [1, 384], strides = [1, 1]} : vector<8x384xf32> to vector<1x384xf32>
    %cst_64 = arith.constant 2.560000e+02 : f32
    %281 = vector.broadcast %cst_64 : f32 to vector<1x384xf32>
    %282 = arith.mulf %280, %281 : vector<1x384xf32>
    %283 = vector.extract_strided_slice %279 {offsets = [1, 0], sizes = [1, 384], strides = [1, 1]} : vector<8x384xf32> to vector<1x384xf32>
    %284 = arith.addf %282, %283 : vector<1x384xf32>
    %285 = vector.extract_strided_slice %279 {offsets = [2, 0], sizes = [1, 384], strides = [1, 1]} : vector<8x384xf32> to vector<1x384xf32>
    %cst_65 = arith.constant 2.560000e+02 : f32
    %286 = vector.broadcast %cst_65 : f32 to vector<1x384xf32>
    %287 = arith.mulf %285, %286 : vector<1x384xf32>
    %288 = vector.extract_strided_slice %279 {offsets = [3, 0], sizes = [1, 384], strides = [1, 1]} : vector<8x384xf32> to vector<1x384xf32>
    %289 = arith.addf %287, %288 : vector<1x384xf32>
    %290 = vector.extract_strided_slice %195 {offsets = [0, 5], sizes = [256, 1], strides = [1, 1]} : vector<256x8xi32> to vector<256x1xi32>
    %291 = vector.broadcast %290 : vector<256x1xi32> to vector<256x384xi32>
    %292 = arith.cmpi eq, %291, %198 : vector<256x384xi32>
    %293 = arith.extui %292 : vector<256x384xi1> to vector<256x384xi32>
    %294 = arith.sitofp %293 : vector<256x384xi32> to vector<256x384xf32>
    %295 = arith.truncf %294 : vector<256x384xf32> to vector<256x384xbf16>
    %296 = vector.extract_strided_slice %185 {offsets = [40, 0], sizes = [8, 256], strides = [1, 1]} : vector<64x256xbf16> to vector<8x256xbf16>
    %cst_66 = arith.constant dense<0.000000e+00> : vector<8x384xf32>
    %297 = tpu.matmul %296, %295, %cst_66 {dimension_numbers = #tpu.dot_dimension_numbers<[1], [0], [0], [1], [0, 0, 1, 1], [], []>} : vector<8x256xbf16>, vector<256x384xbf16>, vector<8x384xf32> -> vector<8x384xf32>
    %298 = vector.extract_strided_slice %297 {offsets = [0, 0], sizes = [1, 384], strides = [1, 1]} : vector<8x384xf32> to vector<1x384xf32>
    %cst_67 = arith.constant 2.560000e+02 : f32
    %299 = vector.broadcast %cst_67 : f32 to vector<1x384xf32>
    %300 = arith.mulf %298, %299 : vector<1x384xf32>
    %301 = vector.extract_strided_slice %297 {offsets = [1, 0], sizes = [1, 384], strides = [1, 1]} : vector<8x384xf32> to vector<1x384xf32>
    %302 = arith.addf %300, %301 : vector<1x384xf32>
    %303 = vector.extract_strided_slice %297 {offsets = [2, 0], sizes = [1, 384], strides = [1, 1]} : vector<8x384xf32> to vector<1x384xf32>
    %cst_68 = arith.constant 2.560000e+02 : f32
    %304 = vector.broadcast %cst_68 : f32 to vector<1x384xf32>
    %305 = arith.mulf %303, %304 : vector<1x384xf32>
    %306 = vector.extract_strided_slice %297 {offsets = [3, 0], sizes = [1, 384], strides = [1, 1]} : vector<8x384xf32> to vector<1x384xf32>
    %307 = arith.addf %305, %306 : vector<1x384xf32>
    %308 = vector.extract_strided_slice %195 {offsets = [0, 6], sizes = [256, 1], strides = [1, 1]} : vector<256x8xi32> to vector<256x1xi32>
    %309 = vector.broadcast %308 : vector<256x1xi32> to vector<256x384xi32>
    %310 = arith.cmpi eq, %309, %198 : vector<256x384xi32>
    %311 = arith.extui %310 : vector<256x384xi1> to vector<256x384xi32>
    %312 = arith.sitofp %311 : vector<256x384xi32> to vector<256x384xf32>
    %313 = arith.truncf %312 : vector<256x384xf32> to vector<256x384xbf16>
    %314 = vector.extract_strided_slice %185 {offsets = [48, 0], sizes = [8, 256], strides = [1, 1]} : vector<64x256xbf16> to vector<8x256xbf16>
    %cst_69 = arith.constant dense<0.000000e+00> : vector<8x384xf32>
    %315 = tpu.matmul %314, %313, %cst_69 {dimension_numbers = #tpu.dot_dimension_numbers<[1], [0], [0], [1], [0, 0, 1, 1], [], []>} : vector<8x256xbf16>, vector<256x384xbf16>, vector<8x384xf32> -> vector<8x384xf32>
    %316 = vector.extract_strided_slice %315 {offsets = [0, 0], sizes = [1, 384], strides = [1, 1]} : vector<8x384xf32> to vector<1x384xf32>
    %cst_70 = arith.constant 2.560000e+02 : f32
    %317 = vector.broadcast %cst_70 : f32 to vector<1x384xf32>
    %318 = arith.mulf %316, %317 : vector<1x384xf32>
    %319 = vector.extract_strided_slice %315 {offsets = [1, 0], sizes = [1, 384], strides = [1, 1]} : vector<8x384xf32> to vector<1x384xf32>
    %320 = arith.addf %318, %319 : vector<1x384xf32>
    %321 = vector.extract_strided_slice %315 {offsets = [2, 0], sizes = [1, 384], strides = [1, 1]} : vector<8x384xf32> to vector<1x384xf32>
    %cst_71 = arith.constant 2.560000e+02 : f32
    %322 = vector.broadcast %cst_71 : f32 to vector<1x384xf32>
    %323 = arith.mulf %321, %322 : vector<1x384xf32>
    %324 = vector.extract_strided_slice %315 {offsets = [3, 0], sizes = [1, 384], strides = [1, 1]} : vector<8x384xf32> to vector<1x384xf32>
    %325 = arith.addf %323, %324 : vector<1x384xf32>
    %326 = vector.extract_strided_slice %195 {offsets = [0, 7], sizes = [256, 1], strides = [1, 1]} : vector<256x8xi32> to vector<256x1xi32>
    %327 = vector.broadcast %326 : vector<256x1xi32> to vector<256x384xi32>
    %328 = arith.cmpi eq, %327, %198 : vector<256x384xi32>
    %329 = arith.extui %328 : vector<256x384xi1> to vector<256x384xi32>
    %330 = arith.sitofp %329 : vector<256x384xi32> to vector<256x384xf32>
    %331 = arith.truncf %330 : vector<256x384xf32> to vector<256x384xbf16>
    %332 = vector.extract_strided_slice %185 {offsets = [56, 0], sizes = [8, 256], strides = [1, 1]} : vector<64x256xbf16> to vector<8x256xbf16>
    %cst_72 = arith.constant dense<0.000000e+00> : vector<8x384xf32>
    %333 = tpu.matmul %332, %331, %cst_72 {dimension_numbers = #tpu.dot_dimension_numbers<[1], [0], [0], [1], [0, 0, 1, 1], [], []>} : vector<8x256xbf16>, vector<256x384xbf16>, vector<8x384xf32> -> vector<8x384xf32>
    %334 = vector.extract_strided_slice %333 {offsets = [0, 0], sizes = [1, 384], strides = [1, 1]} : vector<8x384xf32> to vector<1x384xf32>
    %cst_73 = arith.constant 2.560000e+02 : f32
    %335 = vector.broadcast %cst_73 : f32 to vector<1x384xf32>
    %336 = arith.mulf %334, %335 : vector<1x384xf32>
    %337 = vector.extract_strided_slice %333 {offsets = [1, 0], sizes = [1, 384], strides = [1, 1]} : vector<8x384xf32> to vector<1x384xf32>
    %338 = arith.addf %336, %337 : vector<1x384xf32>
    %339 = vector.extract_strided_slice %333 {offsets = [2, 0], sizes = [1, 384], strides = [1, 1]} : vector<8x384xf32> to vector<1x384xf32>
    %cst_74 = arith.constant 2.560000e+02 : f32
    %340 = vector.broadcast %cst_74 : f32 to vector<1x384xf32>
    %341 = arith.mulf %339, %340 : vector<1x384xf32>
    %342 = vector.extract_strided_slice %333 {offsets = [3, 0], sizes = [1, 384], strides = [1, 1]} : vector<8x384xf32> to vector<1x384xf32>
    %343 = arith.addf %341, %342 : vector<1x384xf32>
    %344 = tpu.concatenate %212, %230, %248, %266, %284, %302, %320, %338 in 0 : vector<1x384xf32>, vector<1x384xf32>, vector<1x384xf32>, vector<1x384xf32>, vector<1x384xf32>, vector<1x384xf32>, vector<1x384xf32>, vector<1x384xf32> -> vector<8x384xf32>
    %345 = arith.fptosi %344 : vector<8x384xf32> to vector<8x384xi32>
    %346 = tpu.concatenate %217, %235, %253, %271, %289, %307, %325, %343 in 0 : vector<1x384xf32>, vector<1x384xf32>, vector<1x384xf32>, vector<1x384xf32>, vector<1x384xf32>, vector<1x384xf32>, vector<1x384xf32>, vector<1x384xf32> -> vector<8x384xf32>
    %347 = arith.fptosi %346 : vector<8x384xf32> to vector<8x384xi32>
    %348 = vector.broadcast %199 : vector<1x384xi32> to vector<8x384xi32>
    %349 = vector.broadcast %189 : vector<8x1xi32> to vector<8x384xi32>
    %350 = arith.cmpi slt, %348, %349 : vector<8x384xi32>
    %351 = vector.broadcast %199 : vector<1x384xi32> to vector<8x384xi32>
    %352 = vector.broadcast %189 : vector<8x1xi32> to vector<8x384xi32>
    %353 = arith.cmpi eq, %351, %352 : vector<8x384xi32>
    %c1025_i32_75 = arith.constant 1025 : i32
    %c1024_i32_76 = arith.constant 1024 : i32
    %354 = vector.broadcast %c1025_i32_75 : i32 to vector<8x384xi32>
    %355 = vector.broadcast %c1024_i32_76 : i32 to vector<8x384xi32>
    %356 = arith.select %353, %354, %355 : vector<8x384xi1>, vector<8x384xi32>
    %357 = arith.select %350, %345, %356 : vector<8x384xi1>, vector<8x384xi32>
    %c0_77 = arith.constant 0 : index
    %c0_78 = arith.constant 0 : index
    %358 = vector.load %arg11[%c0_77, %c0_78] : memref<8x384xi32, #tpu.memory_space<vmem>>, vector<8x384xi32>
    tpu.vector_store %arg11[%c0_77, %c0_78], %357 {strides = array<i32>} : memref<8x384xi32, #tpu.memory_space<vmem>>, vector<8x384xi32>,
    %359 = vector.broadcast %199 : vector<1x384xi32> to vector<8x384xi32>
    %360 = vector.broadcast %189 : vector<8x1xi32> to vector<8x384xi32>
    %361 = arith.cmpi slt, %359, %360 : vector<8x384xi32>
    %362 = vector.broadcast %199 : vector<1x384xi32> to vector<8x384xi32>
    %363 = vector.broadcast %189 : vector<8x1xi32> to vector<8x384xi32>
    %364 = arith.cmpi eq, %362, %363 : vector<8x384xi32>
    %c1025_i32_79 = arith.constant 1025 : i32
    %c1024_i32_80 = arith.constant 1024 : i32
    %365 = vector.broadcast %c1025_i32_79 : i32 to vector<8x384xi32>
    %366 = vector.broadcast %c1024_i32_80 : i32 to vector<8x384xi32>
    %367 = arith.select %364, %365, %366 : vector<8x384xi1>, vector<8x384xi32>
    %368 = arith.select %361, %347, %367 : vector<8x384xi1>, vector<8x384xi32>
    %c0_81 = arith.constant 0 : index
    %c0_82 = arith.constant 0 : index
    %369 = vector.load %arg12[%c0_81, %c0_82] : memref<8x384xi32, #tpu.memory_space<vmem>>, vector<8x384xi32>
    tpu.vector_store %arg12[%c0_81, %c0_82], %368 {strides = array<i32>} : memref<8x384xi32, #tpu.memory_space<vmem>>, vector<8x384xi32>,
    return
  }
  func.func @transform_0(%arg0: i32) -> (i32, i32) {
    %c0_i32 = arith.constant 0 : i32
    %c0_i32_0 = arith.constant 0 : i32
    return %arg0, %c0_i32 : i32, i32
  }
  func.func @transform_1(%arg0: i32) -> (i32, i32, i32) {
    %c0_i32 = arith.constant 0 : i32
    %c0_i32_0 = arith.constant 0 : i32
    %c0_i32_1 = arith.constant 0 : i32
    return %arg0, %c0_i32, %c0_i32_0 : i32, i32, i32
  }
  func.func @transform_2(%arg0: i32) -> (i32, i32) {
    %c0_i32 = arith.constant 0 : i32
    %c0_i32_0 = arith.constant 0 : i32
    %c0_i32_1 = arith.constant 0 : i32
    return %c0_i32, %c0_i32_0 : i32, i32
  }
  func.func @transform_3(%arg0: i32) -> (i32, i32) {
    %c0_i32 = arith.constant 0 : i32
    %c0_i32_0 = arith.constant 0 : i32
    return %arg0, %c0_i32 : i32, i32
  }
  func.func @transform_4(%arg0: i32) -> (i32, i32) {
    %c0_i32 = arith.constant 0 : i32
    %c0_i32_0 = arith.constant 0 : i32
    return %arg0, %c0_i32 : i32, i32
  }
  func.func @transform_5(%arg0: i32) -> (i32, i32, i32) {
    %c0_i32 = arith.constant 0 : i32
    %c0_i32_0 = arith.constant 0 : i32
    %c0_i32_1 = arith.constant 0 : i32
    return %arg0, %c0_i32, %c0_i32_0 : i32, i32, i32
  }
  func.func @transform_6(%arg0: i32) -> (i32, i32) {
    %c0_i32 = arith.constant 0 : i32
    %c0_i32_0 = arith.constant 0 : i32
    %c0_i32_1 = arith.constant 0 : i32
    return %c0_i32, %c0_i32_0 : i32, i32
  }
  func.func @transform_7(%arg0: i32) -> (i32, i32) {
    %c0_i32 = arith.constant 0 : i32
    %c0_i32_0 = arith.constant 0 : i32
    return %arg0, %c0_i32 : i32, i32
  }
  func.func @transform_8(%arg0: i32) -> (i32, i32) {
    %c0_i32 = arith.constant 0 : i32
    %c0_i32_0 = arith.constant 0 : i32
    return %arg0, %c0_i32 : i32, i32
  }
  func.func @transform_9(%arg0: i32) -> (i32, i32) {
    %c0_i32 = arith.constant 0 : i32
    %c0_i32_0 = arith.constant 0 : i32
    return %arg0, %c0_i32 : i32, i32
  }
  func.func @transform_10(%arg0: i32) -> (i32, i32) {
    %c0_i32 = arith.constant 0 : i32
    %c0_i32_0 = arith.constant 0 : i32
    return %arg0, %c0_i32 : i32, i32
  }
  func.func @transform_11(%arg0: i32) -> (i32, i32) {
    %c0_i32 = arith.constant 0 : i32
    %c0_i32_0 = arith.constant 0 : i32
    return %arg0, %c0_i32 : i32, i32
  }
}

</mosaic_0001>

<bundles_post_ra>
// kernel: squeeze.1
= control target key start
LH: loop header
LB: loop body
LE: loop exit
PB: predicated region body
PF: predicated region fallthrough
CT: control target
= control target key end

     0   :  { %s7_s6 = smov 3  ;;  %s21_s9 = smov 3  ;;  %vm4_vm0 = vcmask 64512   ;;  %vm11_vm1 = vcmask 523712   ;;  %vm18_vm2 = vcmask 458112   ;;  %vm25_vm3 = vcmask 392512   ;;  %s121_s0 = inlined_call_operand.vmem [shape: s32[2,8,8,1], index: 0, kind: input, shape index: {}]   ;;  %s122_s1 = inlined_call_operand.vmem [shape: s32[2,64], index: 1, kind: output, shape index: {}]  }
   0x1   :  { %v63_v0 = vld [vmem:[%s121_s0 + $0x7] ss:$8 sm:%s7_s6]   ;;  %s77_s10 = smov 56   ;;  %v65_v1 = vld [vmem:[%s121_s0 + $0x5] ss:$8 sm:%s21_s9]   ;;  %s14_s13 = smov 3 }
   0x2   :  { %9 = vrot.lane.b32.xlu0 %v63_v0, %s77_s10  ;;  %s78_s14 = smov 40   ;;  %v64_v2 = vld [vmem:[%s121_s0 + $0x6] ss:$8 sm:%s14_s13]   ;;  %s28_s17 = smov 3  ;;  %vm32_vm4 = vcmask 326912   ;;  %vm39_vm5 = vcmask 261312  }
   0x3   :  { %23 = vrot.lane.b32.xlu1 %v65_v1, %s78_s14  ;;  %v66_v3 = vld [vmem:[%s121_s0 + $0x4] ss:$8 sm:%s28_s17]   ;;  %s35_s20 = smov 3  ;;  %s42_s21 = smov 3  ;;  %vm46_vm6 = vcmask 195712   ;;  %vm53_vm7 = vcmask 130112  }
   0x4   :  { %s79_s22 = smov 48   ;;  %s80_s23 = smov 32   ;;  %v67_v4 = vld [vmem:[%s121_s0 + $0x3] ss:$8 sm:%s35_s20]   ;;  %v68_v5 = vld [vmem:[%s121_s0 + $0x2] ss:$8 sm:%s42_s21]  }
   0x5   :  { %s2_s26 = smov 3  ;;  %s49_s29 = smov 3 }
   0x6   :  { %16 = vrot.lane.b32.xlu0 %v64_v2, %s79_s22  ;;  %v3_v6 = vld [vmem:[%s121_s0] ss:$8 sm:%s2_s26]   ;;  %s81_s3 = smov 24   ;;  %s82_s4 = smov 16  }
   0x7   :  { %30 = vrot.lane.b32.xlu1 %v66_v3, %s80_s23  ;;  %5 = vst.msk [vmem:[#allocation0] sm:$0x3] %vm4_vm0, %v3_v6   ;;  %v69_v7 = vld [vmem:[%s121_s0 + $0x1] ss:$8 sm:%s49_s29]   ;;  %s83_s0 = smov 8  }
   0xa   :  { %37 = vrot.lane.b32.xlu0 %v67_v4, %s81_s3 }
   0xb   :  { %44 = vrot.lane.b32.xlu1 %v68_v5, %s82_s4 }
   0xe   :  { %51 = vrot.lane.b32.xlu0 %v69_v7, %s83_s0 }
  0x74   :  { %v10_v8 = vpop.permute.xlu0 %9  }
  0x75   :  { %12 = vst.msk [vmem:[#allocation0] sm:$0x3] %vm11_vm1, %v10_v8   ;;  %v24_v9 = vpop.permute.xlu1 %23  }
  0x78   :  { %v17_v10 = vpop.permute.xlu0 %16  }
  0x79   :  { %19 = vst.msk [vmem:[#allocation0] sm:$0x3] %vm18_vm2, %v17_v10   ;;  %v31_v11 = vpop.permute.xlu1 %30  }
  0x7a   :  { %26 = vst.msk [vmem:[#allocation0] sm:$0x3] %vm25_vm3, %v24_v9  }
  0x7b   :  { %33 = vst.msk [vmem:[#allocation0] sm:$0x3] %vm32_vm4, %v31_v11  }
  0x7c   :  { %v38_v12 = vpop.permute.xlu0 %37  }
  0x7d   :  { %40 = vst.msk [vmem:[#allocation0] sm:$0x3] %vm39_vm5, %v38_v12   ;;  %v45_v13 = vpop.permute.xlu1 %44  }
  0x7e   :  { %47 = vst.msk [vmem:[#allocation0] sm:$0x3] %vm46_vm6, %v45_v13  }
  0x80   :  { %v52_v14 = vpop.permute.xlu0 %51  }
  0x81   :  { %54 = vst.msk [vmem:[#allocation0] sm:$0x3] %vm53_vm7, %v52_v14  }
  0x88   :  { %v59_v15 = vld [vmem:[#allocation0] sm:$0x3] }
  0x89   :  { %62 = vst [vmem:[%s122_s1] sm:$0x3] %v59_v15 }

// kernel: _permute_padded.1
= control target key start
LH: loop header
LB: loop body
LE: loop exit
PB: predicated region body
PF: predicated region fallthrough
CT: control target
= control target key end

     0   :  { %vm105_vm0 = vcmask 523264   ;;  %v13704_v16 = vmov 0   ;;  %v13709_v36 = vmov 1   ;;  %v13714_v38 = vmov 3   ;;  %s13686_s1 = inlined_call_operand.vmem [shape: bf16[1,64,8], index: 1, kind: input, shape index: {}]   ;;  %s13687_s2 = inlined_call_operand.vmem [shape: bf16[64,64], index: 2, kind: input, shape index: {}]   ;;  %s13688_s6 = inlined_call_operand.vmem [shape: bf16[256,256], index: 6, kind: input, shape index: {}]   ;;  %s13689_s0 = inlined_call_operand.vmem [shape: bf16[64,64], index: 0, kind: input, shape index: {}]   ;;  %s13690_s3 = inlined_call_operand.vmem [shape: s32[8,1], index: 3, kind: input, shape index: {}]   ;;  %s13691_s5 = inlined_call_operand.vmem [shape: bf16[1,256,8], index: 5, kind: input, shape index: {}]   ;;  %s13692_s8 = inlined_call_operand.vmem [shape: s32[8,128], index: 8, kind: output, shape index: {0}]   ;;  %s13693_s9 = inlined_call_operand.vmem [shape: s32[8,128], index: 9, kind: output, shape index: {1}]   ;;  %s13694_s4 = inlined_call_operand.vmem [shape: bf16[64,256], index: 4, kind: input, shape index: {}]   ;;  %s13695_s7 = inlined_call_operand.vmem [shape: s32[8,1], index: 7, kind: input, shape index: {}]   ;;  %s13696_s10 = inlined_call_operand.vmem [shape: s32[8,384], index: 10, kind: output, shape index: {2}]   ;;  %s13697_s11 = inlined_call_operand.vmem [shape: s32[8,384], index: 11, kind: output, shape index: {3}]  }
   0x1   :  { %v8849_v0 = vld [vmem:[%s13686_s1 + $0x18] sm:$0xf]  ;;  %v8854_v1 = vld [vmem:[%s13686_s1 + $0x1c] sm:$0xf]  ;;  %v8859_v2 = vld [vmem:[%s13686_s1 + $0x10] sm:$0xf]  ;;  %8571 = vset.pattern.permute.xlu1 %v13704_v16  ;;  %8575 = vset.pattern.permute.xlu0 %v13704_v16 }
   0x2   :  { %v6273_v3 = vcombine.low %v8849_v0, %v8854_v1  ;;  %v8866_v4 = vld [vmem:[%s13686_s1 + $0x14] sm:$0xf]  ;;  %v46_v6 = vld [vmem:[%s13686_s1 + $0x8] sm:$0xf]  ;;  %v47_v7 = vld [vmem:[%s13686_s1 + $0xc] sm:$0xf] }
   0x3   :  { %v6272_v5 = vcombine.low %v8859_v2, %v8866_v4  ;;  %v8681_v8 = vld [vmem:[%s13687_s2] sm:$0xff]   ;;  %v6271_v9 = vcombine.low %v46_v6, %v47_v7  ;;  %v8682_v13 = vld [vmem:[%s13687_s2 + $0x8] sm:$0xff]   ;;  %v8683_v14 = vld [vmem:[%s13687_s2 + $0x10] sm:$0xff]   ;;  %vm185_vm1 = vcmp.gt.bf16.partialorder %v46_v6, 0  ;;  %vm186_vm3 = vcmp.gt.bf16.partialorder %v47_v7, 0 }
   0x4   :  { %8350 = vmatprep.subr.bf16.mxu0 %v6273_v3  ;;  %8358 = vmatprep.mubr.msk.bf16.mxu0 %vm105_vm0, %v8681_v8  ;;  %v44_v10 = vld [vmem:[%s13686_s1] sm:$0xf]  ;;  %v45_v11 = vld [vmem:[%s13686_s1 + $0x4] sm:$0xf]  ;;  %v8684_v15 = vld [vmem:[%s13687_s2 + $0x18] sm:$0xff]   ;;  %v193_v17 = vsel %vm185_vm1, 65537, %v13704_v16 }
   0x5   :  { %8351 = vmatpush3.bf16.msra.mxu0 %v6273_v3  ;;  %v6270_v12 = vcombine.low %v44_v10, %v45_v11  ;;  %vm183_vm2 = vcmp.gt.bf16.partialorder %v44_v10, 0  ;;  %v201_v19 = vunpack.c.l.b16 %v193_v17  ;;  %v194_v21 = vsel %vm186_vm3, 65537, %v13704_v16 }
   0x6   :  { %8352 = vmatprep.subr.bf16.mxu0 %v6272_v5  ;;  %v191_v18 = vsel %vm183_vm2, 65537, %v13704_v16  ;;  %vm184_vm6 = vcmp.gt.bf16.partialorder %v45_v11, 0  ;;  %v202_v24 = vunpack.c.l.b16 %v194_v21  ;;  %vm189_vm9 = vcmp.gt.bf16.partialorder %v8849_v0, 0 }
   0x7   :  { %v199_v20 = vunpack.c.l.b16 %v191_v18  ;;  %vm209_vm4 = vcmp.ne.s32.totalorder %v201_v19, 0  ;;  %v192_v28 = vsel %vm184_vm6, 65537, %v13704_v16  ;;  %v13710_v41 = vmov 2  }
   0x8   :  { %vm210_vm7 = vcmp.ne.s32.totalorder %v202_v24, 0  ;;  %v200_v33 = vunpack.c.l.b16 %v192_v28  ;;  %v197_v43 = vsel %vm189_vm9, 65537, %v13704_v16  ;;  %vm187_vm11 = vcmp.gt.bf16.partialorder %v8859_v2, 0 }
   0x9   :  { %8353 = vmatpush3.bf16.msra.mxu0 %v6272_v5  ;;  %vm207_vm5 = vcmp.ne.s32.totalorder %v199_v20, 0  ;;  %v205_v44 = vunpack.c.l.b16 %v197_v43  ;;  %v195_v48 = vsel %vm187_vm11, 65537, %v13704_v16  ;;  %v13707_v51 = vmov 4  }
   0xa   :  { %8354 = vmatprep.subr.bf16.mxu0 %v6271_v9  ;;  %vm208_vm8 = vcmp.ne.s32.totalorder %v200_v33, 0  ;;  %v203_v50 = vunpack.c.l.b16 %v195_v48  ;;  %vm190_vm13 = vcmp.gt.bf16.partialorder %v8854_v1, 0  ;;  %vm188_vm15 = vcmp.gt.bf16.partialorder %v8866_v4, 0 }
   0xb   :  { %vm213_vm10 = vcmp.ne.s32.totalorder %v205_v44, 0  ;;  %v198_v55 = vsel %vm190_vm13, 65537, %v13704_v16  ;;  %v196_v63 = vsel %vm188_vm15, 65537, %v13704_v16  ;;  %v8778_v2 = vmov 0.0  }
   0xc   :  { %vm211_vm12 = vcmp.ne.s32.totalorder %v203_v50, 0  ;;  %v206_v57 = vunpack.c.l.b16 %v198_v55  ;;  %v204_v0 = vunpack.c.l.b16 %v196_v63  ;;  %8366 = vmatprep.subr.bf16.mxu1 %v8778_v2  ;;  %v13702_v6 = vmov 6  }
   0xd   :  { %8355 = vmatpush3.bf16.msra.mxu0 %v6271_v9  ;;  %vm8780_vm2 = vmmov 0   ;;  %v13705_v7 = vmov 5   ;;  %v13700_v8 = vmov 7  }
   0xe   :  { %8356 = vmatprep.subr.bf16.mxu0 %v6270_v12  ;;  %vm214_vm14 = vcmp.ne.s32.totalorder %v206_v57, 0  ;;  %vm212_vm1 = vcmp.ne.s32.totalorder %v204_v0, 0  ;;  %8374 = vmatprep.mubr.msk.bf16.mxu1 %vm8780_vm2, %v8778_v2 }
  0x11   :  { %8357 = vmatpush3.bf16.msra.mxu0 %v6270_v12 }
  0x12   :  { %8378 = vmatprep.subr.bf16.mxu0 %v8778_v2 }
  0x14   :  { %8359 = vmatmul.mubr.msk.bf16.vlgmr.msra.gmra.mxu0 %vm105_vm0, %v8682_v13 }
  0x15   :  { %8362 = vmatprep.mubr.msk.bf16.mxu0 %vm105_vm0, %v8683_v14 }
  0x1c   :  { %8363 = vmatmul.mubr.msk.bf16.gmra.mxu0 %vm105_vm0, %v8684_v15 }
  0x1d   :  { %8386 = vmatprep.mubr.msk.bf16.mxu0 %vm8780_vm2, %v8778_v2 }
  0xd4   :  { %v8360_v22 = vpop.f32.mrf.mxu0 }
  0xd5   :  { %v217_v23 = vsel %vm209_vm4, %v8360_v22, 0.0 }
  0xd6   :  { %v8466_v25 = vtrunc.f32 %v217_v23  ;;  %v152_v26 = vpop.f32.mrf.mxu0 }
  0xd7   :  { %v215_v27 = vsel %vm207_vm5, %v152_v26, 0.0 }
  0xd8   :  { %v8904_v29 = vcvt.f32.s32 %v8466_v25  ;;  %v8462_v30 = vtrunc.f32 %v215_v27  ;;  %v8361_v31 = vpop.f32.mrf.mxu0 }
  0xd9   :  { %v218_v34 = vsel %vm210_vm7, %v8361_v31, 0.0 }
  0xda   :  { %v8906_v32 = vcvt.f32.s32 %v8462_v30  ;;  %241 = vperm.xlu1 %8571, %v8904_v29   ;;  %v155_v35 = vpop.f32.mrf.mxu0  ;;  %v8468_v37 = vtrunc.f32 %v218_v34 }
  0xdb   :  { %v216_v39 = vsel %vm208_vm8, %v155_v35, 0.0 }
  0xdc   :  { %235 = vperm.xlu0 %8575, %v8906_v32   ;;  %v8915_v40 = vcvt.f32.s32 %v8468_v37  ;;  %v8464_v42 = vtrunc.f32 %v216_v39  ;;  %v8364_v46 = vpop.f32.mrf.mxu0  ;;  %v231_v37 = vlaneseq }
  0xdd   :  { %v221_v47 = vsel %vm213_vm10, %v8364_v46, 0.0 }
  0xde   :  { %8572 = vset.pattern.permute.xlu1 %v13709_v36  ;;  %v8921_v45 = vcvt.f32.s32 %v8464_v42  ;;  %v8474_v49 = vtrunc.f32 %v221_v47  ;;  %v168_v53 = vpop.f32.mrf.mxu0  ;;  %v9065_v39 = vand.u32 127, %v231_v37  ;;  %v13712_v47 = vmov 1.0|1.0  }
  0xdf   :  { %341 = vperm.xlu1 %8572, %v8904_v29   ;;  %v219_v54 = vsel %vm211_vm12, %v168_v53, 0.0 }
  0xe0   :  { %8577 = vset.pattern.permute.xlu0 %v13714_v38  ;;  %v8937_v52 = vcvt.f32.s32 %v8474_v49  ;;  %v8470_v56 = vtrunc.f32 %v219_v54  ;;  %v8365_v59 = vpop.f32.mrf.mxu0  ;;  %13851 = vst [vmem:[#allocation2_spill] sm:$0xff] %v9065_v39  ;;  %v9070_v43 = vadd.s32 1, %v9065_v39  ;;  %v37_v54 = vld [vmem:[%s13689_s0 + $0x4] sm:$0xf] }
  0xe1   :  { %535 = vperm.xlu0 %8577, %v8906_v32   ;;  %v222_v60 = vsel %vm214_vm14, %v8365_v59, 0.0 }
  0xe2   :  { %v8949_v58 = vcvt.f32.s32 %v8470_v56  ;;  %v8476_v61 = vtrunc.f32 %v222_v60  ;;  %v171_v1 = vpop.f32.mrf.mxu0  ;;  %v36_v56 = vld [vmem:[%s13689_s0] sm:$0xf] }
  0xe3   :  { %8573 = vset.pattern.permute.xlu1 %v13710_v41  ;;  %v220_v3 = vsel %vm212_vm1, %v171_v1, 0.0  ;;  %v38_v1 = vld [vmem:[%s13689_s0 + $0x8] sm:$0xf] }
  0xe4   :  { %441 = vperm.xlu1 %8573, %v8904_v29   ;;  %v8959_v62 = vcvt.f32.s32 %v8476_v61  ;;  %v8472_v4 = vtrunc.f32 %v220_v3 }
  0xe5   :  { %544 = vperm.xlu0 %8577, %v8915_v40  }
  0xe6   :  { %v8473_v5 = vcvt.f32.s32 %v8472_v4 }
  0xe8   :  { %8574 = vset.pattern.permute.xlu1 %v13714_v38 }
  0xe9   :  { %541 = vperm.xlu1 %8574, %v8904_v29   ;;  %8581 = vset.pattern.permute.xlu0 %v13704_v16 }
  0xea   :  { %238 = vperm.xlu0 %8581, %v8921_v45  }
  0xed   :  { %8576 = vset.pattern.permute.xlu1 %v13710_v41 }
  0xee   :  { %435 = vperm.xlu1 %8576, %v8906_v32   ;;  %8583 = vset.pattern.permute.xlu0 %v13710_v41 }
  0xef   :  { %438 = vperm.xlu0 %8583, %v8921_v45  }
  0xf2   :  { %8578 = vset.pattern.permute.xlu1 %v13707_v51 }
  0xf3   :  { %635 = vperm.xlu1 %8578, %v8906_v32   ;;  %8585 = vset.pattern.permute.xlu0 %v13707_v51 }
  0xf4   :  { %638 = vperm.xlu0 %8585, %v8921_v45  }
  0xf7   :  { %8579 = vset.pattern.permute.xlu1 %v13704_v16 }
  0xf8   :  { %244 = vperm.xlu1 %8579, %v8915_v40   ;;  %8586 = vset.pattern.permute.xlu0 %v13704_v16 }
  0xf9   :  { %253 = vperm.xlu0 %8586, %v8937_v52  }
  0xfc   :  { %8580 = vset.pattern.permute.xlu1 %v13710_v41 }
  0xfd   :  { %444 = vperm.xlu1 %8580, %v8915_v40   ;;  %8588 = vset.pattern.permute.xlu0 %v13710_v41 }
  0xfe   :  { %453 = vperm.xlu0 %8588, %v8937_v52  }
 0x101   :  { %8582 = vset.pattern.permute.xlu1 %v13709_v36 }
 0x102   :  { %338 = vperm.xlu1 %8582, %v8921_v45   ;;  %8590 = vset.pattern.permute.xlu0 %v13704_v16 }
 0x103   :  { %247 = vperm.xlu0 %8590, %v8949_v58  }
 0x106   :  { %8584 = vset.pattern.permute.xlu1 %v13714_v38 }
 0x107   :  { %538 = vperm.xlu1 %8584, %v8921_v45   ;;  %8592 = vset.pattern.permute.xlu0 %v13710_v41 }
 0x108   :  { %447 = vperm.xlu0 %8592, %v8949_v58  }
 0x10b   :  { %8587 = vset.pattern.permute.xlu1 %v13709_v36 }
 0x10c   :  { %353 = vperm.xlu1 %8587, %v8937_v52   ;;  %8596 = vset.pattern.permute.xlu0 %v13714_v38 }
 0x10d   :  { %556 = vperm.xlu0 %8596, %v8959_v62  }
 0x110   :  { %8589 = vset.pattern.permute.xlu1 %v13714_v38 }
 0x111   :  { %553 = vperm.xlu1 %8589, %v8937_v52   ;;  %8599 = vset.pattern.permute.xlu0 %v13707_v51 }
 0x112   :  { %647 = vperm.xlu0 %8599, %v8949_v58  }
 0x115   :  { %8591 = vset.pattern.permute.xlu1 %v13709_v36 }
 0x116   :  { %347 = vperm.xlu1 %8591, %v8949_v58   ;;  %653 = vperm.xlu0 %8599, %v8937_v52  }
 0x11a   :  { %8593 = vset.pattern.permute.xlu1 %v13714_v38  ;;  %8600 = vset.pattern.permute.xlu0 %v13709_v36 }
 0x11b   :  { %547 = vperm.xlu1 %8593, %v8949_v58   ;;  %335 = vperm.xlu0 %8600, %v8906_v32  }
 0x11f   :  { %8594 = vset.pattern.permute.xlu1 %v13704_v16  ;;  %344 = vperm.xlu0 %8600, %v8915_v40  }
 0x120   :  { %256 = vperm.xlu1 %8594, %v8959_v62  }
 0x123   :  { %356 = vperm.xlu0 %8600, %v8959_v62  }
 0x124   :  { %8595 = vset.pattern.permute.xlu1 %v13710_v41 }
 0x125   :  { %456 = vperm.xlu1 %8595, %v8959_v62  }
 0x127   :  { %350 = vperm.xlu0 %8600, %v8473_v5  }
 0x129   :  { %8597 = vset.pattern.permute.xlu1 %v13704_v16 }
 0x12a   :  { %250 = vperm.xlu1 %8597, %v8473_v5  }
 0x12b   :  { %8603 = vset.pattern.permute.xlu0 %v13714_v38 }
 0x12c   :  { %550 = vperm.xlu0 %8603, %v8473_v5  }
 0x12e   :  { %8598 = vset.pattern.permute.xlu1 %v13707_v51 }
 0x12f   :  { %641 = vperm.xlu1 %8598, %v8904_v29  }
 0x130   :  { %8607 = vset.pattern.permute.xlu0 %v13702_v6 }
 0x131   :  { %856 = vperm.xlu0 %8607, %v8959_v62  }
 0x133   :  { %644 = vperm.xlu1 %8598, %v8915_v40  }
 0x135   :  { %841 = vperm.xlu0 %8607, %v8904_v29  }
 0x137   :  { %656 = vperm.xlu1 %8598, %v8959_v62  }
 0x139   :  { %8608 = vset.pattern.permute.xlu0 %v13705_v7 }
 0x13a   :  { %735 = vperm.xlu0 %8608, %v8906_v32  }
 0x13b   :  { %8601 = vset.pattern.permute.xlu1 %v13710_v41 }
 0x13c   :  { %450 = vperm.xlu1 %8601, %v8473_v5  }
 0x13e   :  { %744 = vperm.xlu0 %8608, %v8915_v40  }
 0x140   :  { %8602 = vset.pattern.permute.xlu1 %v13705_v7 }
 0x141   :  { %738 = vperm.xlu1 %8602, %v8921_v45  }
 0x142   :  { %756 = vperm.xlu0 %8608, %v8959_v62  }
 0x145   :  { %741 = vperm.xlu1 %8602, %v8904_v29  }
 0x146   :  { %750 = vperm.xlu0 %8608, %v8473_v5  }
 0x149   :  { %747 = vperm.xlu1 %8602, %v8949_v58  }
 0x14a   :  { %8609 = vset.pattern.permute.xlu0 %v13702_v6 }
 0x14b   :  { %835 = vperm.xlu0 %8609, %v8906_v32  }
 0x14d   :  { %8604 = vset.pattern.permute.xlu1 %v13707_v51 }
 0x14e   :  { %650 = vperm.xlu1 %8604, %v8473_v5  }
 0x14f   :  { %8610 = vset.pattern.permute.xlu0 %v13700_v8 }
 0x150   :  { %935 = vperm.xlu0 %8610, %v8906_v32  }
 0x152   :  { %8605 = vset.pattern.permute.xlu1 %v13705_v7 }
 0x153   :  { %753 = vperm.xlu1 %8605, %v8937_v52  }
 0x154   :  { %944 = vperm.xlu0 %8610, %v8915_v40  }
 0x155   :  { %v9016_v9 = vpop.permute.xlu1 %241 }
 0x157   :  { %v9018_v10 = vpop.permute.xlu0 %235  ;;  %8606 = vset.pattern.permute.xlu1 %v13702_v6 }
 0x158   :  { %956 = vperm.xlu0 %8610, %v8959_v62   ;;  %853 = vperm.xlu1 %8606, %v8937_v52   ;;  %v39_v62 = vld [vmem:[%s13689_s0 + $0xc] sm:$0xf] }
 0x15a   :  { %v9023_v11 = vpop.permute.xlu1 %341 }
 0x15b   :  { %vm360_vm15 = vcmp.eq.s32.totalorder %v9023_v11, %v9070_v43 }
 0x15c   :  { %v9025_v12 = vpop.permute.xlu0 %535  ;;  %950 = vperm.xlu0 %8610, %v8473_v5   ;;  %847 = vperm.xlu1 %8606, %v8949_v58  }
 0x15f   :  { %v9028_v13 = vpop.permute.xlu1 %441 }
 0x160   :  { %v9030_v14 = vpop.permute.xlu0 %544  ;;  %850 = vperm.xlu1 %8606, %v8473_v5   ;;  %8613 = vset.pattern.permute.xlu0 %v13704_v16 }
 0x164   :  { %v9033_v15 = vpop.permute.xlu1 %541  ;;  %844 = vperm.xlu1 %8606, %v8915_v40  }
 0x165   :  { %v9036_v17 = vpop.permute.xlu0 %238 }
 0x168   :  { %838 = vperm.xlu1 %8606, %v8921_v45  }
 0x169   :  { %v9039_v18 = vpop.permute.xlu1 %435 }
 0x16a   :  { %v9041_v19 = vpop.permute.xlu0 %438 }
 0x16c   :  { %8611 = vset.pattern.permute.xlu1 %v13700_v8 }
 0x16d   :  { %938 = vperm.xlu1 %8611, %v8921_v45  }
 0x16e   :  { %v9045_v20 = vpop.permute.xlu1 %635 }
 0x16f   :  { %v9047_v21 = vpop.permute.xlu0 %638 }
 0x171   :  { %941 = vperm.xlu1 %8611, %v8904_v29  }
 0x173   :  { %v245_v22 = vpop.permute.xlu1 %244 }
 0x174   :  { %v254_v23 = vpop.permute.xlu0 %253 }
 0x175   :  { %947 = vperm.xlu1 %8611, %v8949_v58   ;;  %vm264_vm3 = vcmp.eq.s32.totalorder %v254_v23, %v9070_v43 }
 0x178   :  { %v9051_v24 = vpop.permute.xlu1 %444 }
 0x179   :  { %953 = vperm.xlu1 %8611, %v8937_v52   ;;  %v9054_v25 = vpop.permute.xlu0 %453 }
 0x17d   :  { %v339_v26 = vpop.permute.xlu1 %338  ;;  %8612 = vset.pattern.permute.xlu1 %v13704_v16 }
 0x17e   :  { %v248_v27 = vpop.permute.xlu0 %247 }
 0x17f   :  { %vm262_vm13 = vcmp.eq.s32.totalorder %v248_v27, %v9070_v43 }
 0x182   :  { %v9057_v28 = vpop.permute.xlu1 %538 }
 0x183   :  { %v9059_v30 = vpop.permute.xlu0 %447 }
 0x187   :  { %v354_v31 = vpop.permute.xlu1 %353 }
 0x188   :  { %v557_v29 = vpop.permute.xlu0 %556  ;;  %vm364_vm6 = vcmp.eq.s32.totalorder %v354_v31, %v9070_v43  ;;  %v42_v31 = vld [vmem:[%s13689_s0 + $0x18] sm:$0xf] }
 0x18c   :  { %v554_v32 = vpop.permute.xlu1 %553 }
 0x18d   :  { %v9061_v33 = vpop.permute.xlu0 %647 }
 0x191   :  { %v348_v34 = vpop.permute.xlu1 %347  ;;  %v9063_v35 = vpop.permute.xlu0 %653 }
 0x192   :  { %vm362_vm9 = vcmp.eq.s32.totalorder %v348_v34, %v9070_v43  ;;  %v9295_v34 = vld [vmem:[%s13691_s5 + $0x30] sm:$0xf] }
 0x196   :  { %v9067_v40 = vpop.permute.xlu1 %547  ;;  %v336_v42 = vpop.permute.xlu0 %335 }
 0x19a   :  { %v345_v44 = vpop.permute.xlu0 %344 }
 0x19b   :  { %v257_v45 = vpop.permute.xlu1 %256  ;;  %vm361_vm12 = vcmp.eq.s32.totalorder %v345_v44, %v9070_v43 }
 0x19c   :  { %vm265_vm4 = vcmp.eq.s32.totalorder %v257_v45, %v9070_v43 }
 0x19d   :  { %vm6286_vm5 = vmpackc.low %vm265_vm4, %vm264_vm3  ;;  %vm261_vm3 = vcmp.eq.s32.totalorder %v245_v22, %v9070_v43  ;;  %v1143_v22 = vld [vmem:[%s13691_s5 + $0x7c] sm:$0xf] }
 0x19e   :  { %v357_v46 = vpop.permute.xlu0 %356  ;;  %8367 = vmatpush3.bf16.msk.msra.mxu1 %vm6286_vm5, %v13712_v47  ;;  %vm6307_vm4 = vmpackc.low %vm361_vm12, %vm360_vm15  ;;  %vm358_vm5 = vcmp.eq.s32.totalorder %v336_v42, %v9070_v43  ;;  %vm258_vm12 = vcmp.eq.s32.totalorder %v9018_v10, %v9070_v43  ;;  %v9310_v42 = vld [vmem:[%s13691_s5 + $0x6c] sm:$0xf] }
 0x19f   :  { %vm365_vm7 = vcmp.eq.s32.totalorder %v357_v46, %v9070_v43  ;;  %8368 = vmatprep.subr.bf16.mxu1 %v8778_v2 }
 0x1a0   :  { %vm6303_vm8 = vmpackc.low %vm365_vm7, %vm364_vm6  ;;  %v457_v48 = vpop.permute.xlu1 %456  ;;  %vm260_vm6 = vcmp.eq.s32.totalorder %v9016_v9, %v9070_v43 }
 0x1a1   :  { %8379 = vmatpush3.bf16.msk.msra.mxu0 %vm6303_vm8, %v13712_v47  ;;  %vm6290_vm7 = vmpackc.low %vm261_vm3, %vm260_vm6  ;;  %vm359_vm8 = vcmp.eq.s32.totalorder %v339_v26, %v9070_v43  ;;  %v9271_v26 = vld [vmem:[%s13691_s5 + $0x3c] sm:$0xf] }
 0x1a2   :  { %v351_v49 = vpop.permute.xlu0 %350  ;;  %8380 = vmatprep.subr.bf16.mxu0 %v8778_v2 }
 0x1a3   :  { %vm363_vm10 = vcmp.eq.s32.totalorder %v351_v49, %v9070_v43  ;;  %v9324_v49 = vld [vmem:[%s13691_s5 + $0x2c] sm:$0xf] }
 0x1a4   :  { %vm6305_vm11 = vmpackc.low %vm363_vm10, %vm362_vm9  ;;  %vm259_vm9 = vcmp.eq.s32.totalorder %v9036_v17, %v9070_v43 }
 0x1a5   :  { %8381 = vmatpush3.bf16.msk.msra.mxu0 %vm6305_vm11, %v13712_v47  ;;  %v251_v50 = vpop.permute.xlu1 %250  ;;  %vm6309_vm10 = vmpackc.low %vm359_vm8, %vm358_vm5  ;;  %vm564_vm11 = vcmp.eq.s32.totalorder %v554_v32, %v9070_v43  ;;  %vm562_vm5 = vcmp.eq.s32.totalorder %v9067_v40, %v9070_v43  ;;  %vm560_vm8 = vcmp.eq.s32.totalorder %v9033_v15, %v9070_v43  ;;  %v8703_v32 = vld [vmem:[%s13688_s6 + $0x4] ss:$8 sps:$4 sm:$0xff]   ;;  %v1138_v40 = vld [vmem:[%s13691_s5 + $0x68] sm:$0xf] }
 0x1a6   :  { %vm263_vm14 = vcmp.eq.s32.totalorder %v251_v50, %v9070_v43  ;;  %8382 = vmatprep.subr.bf16.mxu0 %v8778_v2  ;;  %v6459_v46 = vcombine.low %v1138_v40, %v9310_v42  ;;  %v8710_v40 = vld [vmem:[%s13688_s6 + $0x34] ss:$8 sps:$4 sm:$0xff]  }
 0x1a7   :  { %vm6288_vm1 = vmpackc.low %vm263_vm14, %vm262_vm13  ;;  %v551_v53 = vpop.permute.xlu0 %550  ;;  %vm565_vm14 = vcmp.eq.s32.totalorder %v557_v29, %v9070_v43 }
 0x1a8   :  { %8369 = vmatpush3.bf16.msk.msra.mxu1 %vm6288_vm1, %v13712_v47  ;;  %vm6292_vm13 = vmpackc.low %vm259_vm9, %vm258_vm12  ;;  %vm465_vm1 = vcmp.eq.s32.totalorder %v457_v48, %v9070_v43  ;;  %vm563_vm3 = vcmp.eq.s32.totalorder %v551_v53, %v9070_v43  ;;  %vm561_vm9 = vcmp.eq.s32.totalorder %v9030_v14, %v9070_v43  ;;  %v40_v14 = vld [vmem:[%s13689_s0 + $0x10] sm:$0xf]  ;;  %v9319_v48 = vld [vmem:[%s13691_s5 + $0x28] sm:$0xf] }
 0x1a9   :  { %8383 = vmatpush3.bf16.msk.msra.mxu0 %vm6307_vm4, %v13712_v47  ;;  %8370 = vmatprep.subr.bf16.mxu1 %v8778_v2  ;;  %vm6337_vm15 = vmpackc.low %vm565_vm14, %vm564_vm11  ;;  %vm464_vm4 = vcmp.eq.s32.totalorder %v9054_v25, %v9070_v43  ;;  %vm462_vm11 = vcmp.eq.s32.totalorder %v9059_v30, %v9070_v43  ;;  %v9266_v25 = vld [vmem:[%s13691_s5 + $0x38] sm:$0xf]  ;;  %v1141_v30 = vld [vmem:[%s13691_s5 + $0x74] sm:$0xf] }
 0x1aa   :  { %v9096_v52 = vpop.permute.xlu1 %641  ;;  %8384 = vmatprep.subr.bf16.mxu0 %v8778_v2  ;;  %vm6320_vm6 = vmpackc.low %vm465_vm1, %vm464_vm4  ;;  %vm558_vm1 = vcmp.eq.s32.totalorder %v9025_v12, %v9070_v43  ;;  %v60_v12 = vld [vmem:[%s13690_s3] sm:$0xff]  ;;  %v6453_v29 = vcombine.low %v9266_v25, %v9271_v26 }
 0x1ab   :  { %1094 = vperm.xlu1 %8612, %v60_v12   ;;  %v9332_v53 = vld [vmem:[%s13691_s5 + $0x64] sm:$0xf]  ;;  %v9386_v12 = vld [vmem:[%s13691_s5 + $0x10] sm:$0xf] }
 0x1ac   :  { %8371 = vmatpush3.bf16.msk.msra.mxu1 %vm6290_vm7, %v13712_v47  ;;  %v9126_v57 = vpop.permute.xlu0 %856  ;;  %vm6339_vm7 = vmpackc.low %vm563_vm3, %vm562_vm5  ;;  %vm460_vm3 = vcmp.eq.s32.totalorder %v9028_v13, %v9070_v43 }
 0x1ad   :  { %8385 = vmatpush3.bf16.msk.msra.mxu0 %vm6309_vm10, %v13712_v47  ;;  %8372 = vmatprep.subr.bf16.mxu1 %v8778_v2  ;;  %vm6341_vm10 = vmpackc.low %vm561_vm9, %vm560_vm8 }
 0x1ae   :  { %v9111_v55 = vpop.permute.xlu1 %644  ;;  %8402 = vmatprep.subr.bf16.mxu0 %v8778_v2 }
 0x1af   :  { %8614 = vset.pattern.permute.xlu1 %v13709_v36 }
 0x1b0   :  { %8373 = vmatpush3.bf16.msk.msra.mxu1 %vm6292_vm13, %v13712_v47  ;;  %8387 = vmatmul.mubr.msk.bf16.vlgmr.msra.gmra.mxu0 %vm105_vm0, %v37_v54  ;;  %v9146_v60 = vpop.permute.xlu0 %841  ;;  %vm559_vm13 = vcmp.eq.s32.totalorder %v9057_v28, %v9070_v43  ;;  %v1140_v28 = vld [vmem:[%s13691_s5 + $0x70] sm:$0xf]  ;;  %v6451_v54 = vcombine.low %v9319_v48, %v9324_v49 }
 0x1b1   :  { %8403 = vmatpush3.bf16.msk.msra.mxu0 %vm6337_vm15, %v13712_v47  ;;  %8390 = vmatprep.subr.bf16.mxu1 %v8778_v2  ;;  %vm461_vm15 = vcmp.eq.s32.totalorder %v9051_v24, %v9070_v43  ;;  %vm6343_vm4 = vmpackc.low %vm559_vm13, %vm558_vm1  ;;  %vm660_vm1 = vcmp.eq.s32.totalorder %v9096_v52, %v9070_v43  ;;  %v1136_v52 = vld [vmem:[%s13691_s5 + $0x60] sm:$0xf] }
 0x1b2   :  { %v657_v58 = vpop.permute.xlu1 %656  ;;  %8404 = vmatprep.subr.bf16.mxu0 %v8778_v2  ;;  %8410 = vmatprep.mubr.msk.bf16.mxu0 %vm8780_vm2, %v8778_v2  ;;  %vm6324_vm5 = vmpackc.low %vm461_vm15, %vm460_vm3  ;;  %vm661_vm15 = vcmp.eq.s32.totalorder %v9111_v55, %v9070_v43  ;;  %v6458_v55 = vcombine.low %v1136_v52, %v9332_v53  ;;  %v8718_v52 = vld [vmem:[%s13688_s6 + $0x50] ss:$8 sps:$4 sm:$0xff]  }
 0x1b3   :  { %8375 = vmatmul.mubr.msk.bf16.vlgmr.msra.gmra.mxu1 %vm105_vm0, %v36_v56  ;;  %vm665_vm9 = vcmp.eq.s32.totalorder %v657_v58, %v9070_v43  ;;  %vm6358_vm3 = vmpackc.low %vm661_vm15, %vm660_vm1  ;;  %vm865_vm15 = vcmp.eq.s32.totalorder %v9126_v57, %v9070_v43  ;;  %v9340_v56 = vld [vmem:[%s13691_s5 + $0x20] sm:$0xf]  ;;  %v9345_v57 = vld [vmem:[%s13691_s5 + $0x24] sm:$0xf] }
 0x1b4   :  { %8391 = vmatpush3.bf16.msk.msra.mxu1 %vm6320_vm6, %v13712_v47  ;;  %8398 = vmatprep.mubr.msk.bf16.mxu1 %vm8780_vm2, %v8778_v2  ;;  %vm458_vm6 = vcmp.eq.s32.totalorder %v9039_v18, %v9070_v43  ;;  %v41_v18 = vld [vmem:[%s13689_s0 + $0x14] sm:$0xf] }
 0x1b5   :  { %8405 = vmatpush3.bf16.msk.msra.mxu0 %vm6339_vm7, %v13712_v47  ;;  %8392 = vmatprep.subr.bf16.mxu1 %v8778_v2  ;;  %vm459_vm7 = vcmp.eq.s32.totalorder %v9041_v19, %v9070_v43  ;;  %v9171_v63 = vpop.permute.xlu0 %735 }
 0x1b6   :  { %8406 = vmatprep.subr.bf16.mxu0 %v8778_v2  ;;  %vm6326_vm8 = vmpackc.low %vm459_vm7, %vm458_vm6  ;;  %vm658_vm6 = vcmp.eq.s32.totalorder %v9045_v20, %v9070_v43  ;;  %vm659_vm7 = vcmp.eq.s32.totalorder %v9047_v21, %v9070_v43  ;;  %v1142_v21 = vld [vmem:[%s13691_s5 + $0x78] sm:$0xf] }
 0x1b7   :  { %v451_v59 = vpop.permute.xlu1 %450  ;;  %v6461_v24 = vcombine.low %v1142_v21, %v1143_v22  ;;  %v9425_v21 = vld [vmem:[%s13691_s5 + $0x40] sm:$0xf]  ;;  %v9430_v22 = vld [vmem:[%s13691_s5 + $0x44] sm:$0xf] }
 0x1b8   :  { %vm463_vm12 = vcmp.eq.s32.totalorder %v451_v59, %v9070_v43 }
 0x1b9   :  { %vm6322_vm14 = vmpackc.low %vm463_vm12, %vm462_vm11  ;;  %8407 = vmatpush3.bf16.msk.msra.mxu0 %vm6341_vm10, %v13712_v47  ;;  %vm664_vm10 = vcmp.eq.s32.totalorder %v9063_v35, %v9070_v43  ;;  %v745_v3 = vpop.permute.xlu0 %744  ;;  %vm662_vm12 = vcmp.eq.s32.totalorder %v9061_v33, %v9070_v43  ;;  %v6460_v33 = vcombine.low %v1140_v28, %v1141_v30  ;;  %v9300_v35 = vld [vmem:[%s13691_s5 + $0x34] sm:$0xf]  ;;  %v9443_v28 = vld [vmem:[%s13691_s5] sm:$0xf] }
 0x1ba   :  { %8393 = vmatpush3.bf16.msk.msra.mxu1 %vm6322_vm14, %v13712_v47  ;;  %8408 = vmatprep.subr.bf16.mxu0 %v8778_v2  ;;  %vm6354_vm11 = vmpackc.low %vm665_vm9, %vm664_vm10  ;;  %vm761_vm1 = vcmp.eq.s32.totalorder %v745_v3, %v9070_v43  ;;  %v6452_v45 = vcombine.low %v9295_v34, %v9300_v35  ;;  %v9448_v30 = vld [vmem:[%s13691_s5 + $0x4] sm:$0xf] }
 0x1bb   :  { %8394 = vmatprep.subr.bf16.mxu1 %v8778_v2  ;;  %vm6360_vm10 = vmpackc.low %vm659_vm7, %vm658_vm6  ;;  %vm758_vm6 = vcmp.eq.s32.totalorder %v9171_v63, %v9070_v43 }
 0x1bc   :  { %v9161_v61 = vpop.permute.xlu1 %738 }
 0x1bd   :  { %8409 = vmatpush3.bf16.msk.msra.mxu0 %vm6343_vm4, %v13712_v47  ;;  %v757_v9 = vpop.permute.xlu0 %756 }
 0x1be   :  { %8395 = vmatpush3.bf16.msk.msra.mxu1 %vm6324_vm5, %v13712_v47  ;;  %8426 = vmatprep.subr.bf16.mxu0 %v8778_v2  ;;  %vm765_vm4 = vcmp.eq.s32.totalorder %v757_v9, %v9070_v43 }
 0x1bf   :  { %8396 = vmatprep.subr.bf16.mxu1 %v8778_v2 }
 0x1c0   :  { %v742_v0 = vpop.permute.xlu1 %741  ;;  %8411 = vmatmul.mubr.msk.bf16.vlgmr.msra.gmra.mxu0 %vm105_vm0, %v39_v62  ;;  %v6450_v62 = vcombine.low %v9340_v56, %v9345_v57 }
 0x1c1   :  { %8434 = vmatprep.mubr.msk.bf16.mxu0 %vm8780_vm2, %v8778_v2  ;;  %v751_v11 = vpop.permute.xlu0 %750 }
 0x1c2   :  { %8397 = vmatpush3.bf16.msk.msra.mxu1 %vm6326_vm8, %v13712_v47 }
 0x1c3   :  { %8414 = vmatprep.subr.bf16.mxu1 %v8778_v2 }
 0x1c4   :  { %v748_v4 = vpop.permute.xlu1 %747 }
 0x1c5   :  { %8399 = vmatmul.mubr.msk.bf16.vlgmr.msra.gmra.mxu1 %vm105_vm0, %v38_v1  ;;  %vm762_vm9 = vcmp.eq.s32.totalorder %v748_v4, %v9070_v43  ;;  %v9366_v1 = vld [vmem:[%s13691_s5 + $0x1c] sm:$0xf]  ;;  %v1132_v4 = vld [vmem:[%s13691_s5 + $0x50] sm:$0xf] }
 0x1c6   :  { %8415 = vmatpush3.bf16.msk.msra.mxu1 %vm6354_vm11, %v13712_v47  ;;  %8422 = vmatprep.mubr.msk.bf16.mxu1 %vm8780_vm2, %v8778_v2  ;;  %vm763_vm11 = vcmp.eq.s32.totalorder %v751_v11, %v9070_v43  ;;  %v836_v19 = vpop.permute.xlu0 %835 }
 0x1c7   :  { %8416 = vmatprep.subr.bf16.mxu1 %v8778_v2 }
 0x1c9   :  { %v651_v5 = vpop.permute.xlu1 %650 }
 0x1ca   :  { %vm663_vm13 = vcmp.eq.s32.totalorder %v651_v5, %v9070_v43  ;;  %v9374_v5 = vld [vmem:[%s13691_s5 + $0x54] sm:$0xf] }
 0x1cb   :  { %vm6356_vm14 = vmpackc.low %vm663_vm13, %vm662_vm12  ;;  %v9274_v27 = vpop.permute.xlu0 %935  ;;  %v6456_v11 = vcombine.low %v1132_v4, %v9374_v5  ;;  %v8731_v4 = vld [vmem:[%s13688_s6 + $0xa4] ss:$8 sps:$4 sm:$0xff]  }
 0x1cc   :  { %8417 = vmatpush3.bf16.msk.msra.mxu1 %vm6356_vm14, %v13712_v47  ;;  %vm6373_vm12 = vmpackc.low %vm763_vm11, %vm762_vm9  ;;  %vm760_vm14 = vcmp.eq.s32.totalorder %v742_v0, %v9070_v43  ;;  %vm860_vm11 = vcmp.eq.s32.totalorder %v9146_v60, %v9070_v43  ;;  %v1134_v60 = vld [vmem:[%s13691_s5 + $0x58] sm:$0xf] }
 0x1cd   :  { %8418 = vmatprep.subr.bf16.mxu1 %v8778_v2  ;;  %v9361_v0 = vld [vmem:[%s13691_s5 + $0x18] sm:$0xf] }
 0x1ce   :  { %v754_v10 = vpop.permute.xlu1 %753 }
 0x1cf   :  { %vm764_vm5 = vcmp.eq.s32.totalorder %v754_v10, %v9070_v43  ;;  %v945_v44 = vpop.permute.xlu0 %944  ;;  %v6449_v10 = vcombine.low %v9361_v0, %v9366_v1 }
 0x1d0   :  { %vm6371_vm8 = vmpackc.low %vm765_vm4, %vm764_vm5  ;;  %8419 = vmatpush3.bf16.msk.msra.mxu1 %vm6358_vm3, %v13712_v47  ;;  %vm759_vm5 = vcmp.eq.s32.totalorder %v9161_v61, %v9070_v43  ;;  %v9353_v61 = vld [vmem:[%s13691_s5 + $0x5c] sm:$0xf] }
 0x1d1   :  { %8427 = vmatpush3.bf16.msk.msra.mxu0 %vm6371_vm8, %v13712_v47  ;;  %8420 = vmatprep.subr.bf16.mxu1 %v8778_v2  ;;  %vm6375_vm4 = vmpackc.low %vm761_vm1, %vm760_vm14  ;;  %vm858_vm14 = vcmp.eq.s32.totalorder %v836_v19, %v9070_v43  ;;  %v6457_v63 = vcombine.low %v1134_v60, %v9353_v61  ;;  %v9414_v19 = vld [vmem:[%s13691_s5 + $0x8] sm:$0xf]  ;;  %v8725_v60 = vld [vmem:[%s13688_s6 + $0x84] ss:$8 sps:$4 sm:$0xff]  }
 0x1d2   :  { %8428 = vmatprep.subr.bf16.mxu0 %v8778_v2  ;;  %vm6377_vm7 = vmpackc.low %vm759_vm5, %vm758_vm6 }
 0x1d3   :  { %v854_v13 = vpop.permute.xlu1 %853  ;;  %v957_v58 = vpop.permute.xlu0 %956 }
 0x1d4   :  { %vm864_vm13 = vcmp.eq.s32.totalorder %v854_v13, %v9070_v43  ;;  %8421 = vmatpush3.bf16.msk.msra.mxu1 %vm6360_vm10, %v13712_v47  ;;  %vm965_vm1 = vcmp.eq.s32.totalorder %v957_v58, %v9070_v43  ;;  %v9391_v13 = vld [vmem:[%s13691_s5 + $0x14] sm:$0xf] }
 0x1d5   :  { %8429 = vmatpush3.bf16.msk.msra.mxu0 %vm6373_vm12, %v13712_v47  ;;  %8438 = vmatprep.subr.bf16.mxu1 %v8778_v2  ;;  %vm6388_vm3 = vmpackc.low %vm865_vm15, %vm864_vm13  ;;  %v8722_v58 = vld [vmem:[%s13688_s6 + $0x74] ss:$8 sps:$4 sm:$0xff]  }
 0x1d6   :  { %8430 = vmatprep.subr.bf16.mxu0 %v8778_v2 }
 0x1d7   :  { %v848_v15 = vpop.permute.xlu1 %847  ;;  %8423 = vmatmul.mubr.msk.bf16.vlgmr.msra.gmra.mxu1 %vm105_vm0, %v40_v14  ;;  %v951_v9 = vpop.permute.xlu0 %950  ;;  %v9397_v14 = vld [vmem:[%s13691_s5 + $0x48] sm:$0xf] }
 0x1d8   :  { %8439 = vmatpush3.bf16.msk.msra.mxu1 %vm6388_vm3, %v13712_v47  ;;  %8446 = vmatprep.mubr.msk.bf16.mxu1 %vm8780_vm2, %v8778_v2  ;;  %vm862_vm8 = vcmp.eq.s32.totalorder %v848_v15, %v9070_v43  ;;  %v9402_v15 = vld [vmem:[%s13691_s5 + $0x4c] sm:$0xf]  ;;  %vm963_vm6 = vcmp.eq.s32.totalorder %v951_v9, %v9070_v43  ;;  %v8733_v9 = vld [vmem:[%s13688_s6 + $0xa0] ss:$8 sps:$4 sm:$0xff]  }
 0x1d9   :  { %8431 = vmatpush3.bf16.msk.msra.mxu0 %vm6375_vm4, %v13712_v47  ;;  %8440 = vmatprep.subr.bf16.mxu1 %v8778_v2 }
 0x1da   :  { %8432 = vmatprep.subr.bf16.mxu0 %v8778_v2 }
 0x1db   :  { %v851_v17 = vpop.permute.xlu1 %850 }
 0x1dc   :  { %vm863_vm9 = vcmp.eq.s32.totalorder %v851_v17, %v9070_v43  ;;  %v6448_v17 = vcombine.low %v9386_v12, %v9391_v13 }
 0x1dd   :  { %vm6390_vm10 = vmpackc.low %vm863_vm9, %vm862_vm8  ;;  %8433 = vmatpush3.bf16.msk.msra.mxu0 %vm6377_vm7, %v13712_v47  ;;  %vm961_vm9 = vcmp.eq.s32.totalorder %v945_v44, %v9070_v43  ;;  %v8712_v44 = vld [vmem:[%s13688_s6 + $0x30] ss:$8 sps:$4 sm:$0xff]  }
 0x1de   :  { %8441 = vmatpush3.bf16.msk.msra.mxu1 %vm6390_vm10, %v13712_v47  ;;  %8450 = vmatprep.subr.bf16.mxu0 %v8778_v2 }
 0x1df   :  { %v845_v20 = vpop.permute.xlu1 %844  ;;  %8442 = vmatprep.subr.bf16.mxu1 %v8778_v2 }
 0x1e0   :  { %vm861_vm12 = vcmp.eq.s32.totalorder %v845_v20, %v9070_v43  ;;  %8435 = vmatmul.mubr.msk.bf16.vlgmr.msra.gmra.mxu0 %vm105_vm0, %v41_v18  ;;  %v6455_v18 = vcombine.low %v9397_v14, %v9402_v15  ;;  %v9419_v20 = vld [vmem:[%s13691_s5 + $0xc] sm:$0xf] }
 0x1e1   :  { %vm6392_vm13 = vmpackc.low %vm861_vm12, %vm860_vm11  ;;  %8458 = vmatprep.mubr.msk.bf16.mxu0 %vm8780_vm2, %v8778_v2  ;;  %vm958_vm12 = vcmp.eq.s32.totalorder %v9274_v27, %v9070_v43  ;;  %v8706_v27 = vld [vmem:[%s13688_s6 + $0x10] ss:$8 sps:$4 sm:$0xff]  }
 0x1e2   :  { %8443 = vmatpush3.bf16.msk.msra.mxu1 %vm6392_vm13, %v13712_v47 }
 0x1e3   :  { %v839_v23 = vpop.permute.xlu1 %838  ;;  %8444 = vmatprep.subr.bf16.mxu1 %v8778_v2 }
 0x1e4   :  { %vm859_vm2 = vcmp.eq.s32.totalorder %v839_v23, %v9070_v43  ;;  %v6447_v23 = vcombine.low %v9414_v19, %v9419_v20 }
 0x1e5   :  { %vm6394_vm15 = vmpackc.low %vm859_vm2, %vm858_vm14  ;;  %vm13848_vm14 = vcmask 1041408   ;;  %vm13811_vm2 = vcmask 1042432  }
 0x1e6   :  { %8445 = vmatpush3.bf16.msk.msra.mxu1 %vm6394_vm15, %v13712_v47  ;;  %vm1594_vm15 = vcmp.gt.bf16.partialorder %v9443_v28, 0 }
 0x1e7   :  { %8062 = vmatprep.subr.bf16.mxu1 %v6461_v24  ;;  %v6454_v24 = vcombine.low %v9425_v21, %v9430_v22 }
 0x1e8   :  { %v9302_v37 = vpop.permute.xlu1 %938 }
 0x1e9   :  { %8447 = vmatmul.mubr.msk.bf16.vlgmr.msra.gmra.mxu1 %vm105_vm0, %v42_v31  ;;  %vm959_vm11 = vcmp.eq.s32.totalorder %v9302_v37, %v9070_v43  ;;  %v6446_v31 = vcombine.low %v9443_v28, %v9448_v30  ;;  %v8709_v37 = vld [vmem:[%s13688_s6 + $0x20] ss:$8 sps:$4 sm:$0xff]  }
 0x1ea   :  { %8063 = vmatpush3.bf16.msra.mxu1 %v6453_v29  ;;  %1465 = vmatprep.mubr.bf16.mxu1 %v8703_v32  ;;  %vm6411_vm13 = vmpackc.low %vm959_vm11, %vm958_vm12  ;;  %v43_v29 = vld [vmem:[%s13689_s0 + $0x1c] sm:$0xf]  ;;  %v8701_v32 = vld [vmem:[%s13688_s6] ss:$8 sps:$4 sm:$0xff]   ;;  %vm1597_vm11 = vcmp.gt.bf16.partialorder %v9419_v20, 0 }
 0x1eb   :  { %8064 = vmatprep.subr.bf16.mxu1 %v6460_v33  ;;  %v8707_v33 = vld [vmem:[%s13688_s6 + $0x24] ss:$8 sps:$4 sm:$0xff]  }
 0x1ec   :  { %v942_v50 = vpop.permute.xlu1 %941 }
 0x1ed   :  { %vm960_vm8 = vcmp.eq.s32.totalorder %v942_v50, %v9070_v43  ;;  %v8716_v50 = vld [vmem:[%s13688_s6 + $0x54] ss:$8 sps:$4 sm:$0xff]  }
 0x1ee   :  { %8065 = vmatpush3.bf16.msra.mxu1 %v6452_v45  ;;  %vm6409_vm10 = vmpackc.low %vm961_vm9, %vm960_vm8  ;;  %v8713_v45 = vld [vmem:[%s13688_s6 + $0x44] ss:$8 sps:$4 sm:$0xff]   ;;  %vm1596_vm9 = vcmp.gt.bf16.partialorder %v9414_v19, 0 }
 0x1ef   :  { %8066 = vmatprep.subr.bf16.mxu1 %v6459_v46  ;;  %v8715_v46 = vld [vmem:[%s13688_s6 + $0x40] ss:$8 sps:$4 sm:$0xff]  }
 0x1f0   :  { %v948_v59 = vpop.permute.xlu1 %947 }
 0x1f1   :  { %vm962_vm5 = vcmp.eq.s32.totalorder %v948_v59, %v9070_v43  ;;  %v8724_v59 = vld [vmem:[%s13688_s6 + $0x70] ss:$8 sps:$4 sm:$0xff]  }
 0x1f2   :  { %8067 = vmatpush3.bf16.msra.mxu1 %v6451_v54  ;;  %vm6407_vm7 = vmpackc.low %vm963_vm6, %vm962_vm5  ;;  %v8719_v54 = vld [vmem:[%s13688_s6 + $0x64] ss:$8 sps:$4 sm:$0xff]   ;;  %vm13808_vm5 = vcmask 1045504   ;;  %vm13784_vm6 = vcmask 1046528  }
 0x1f3   :  { %8068 = vmatprep.subr.bf16.mxu1 %v6458_v55  ;;  %v8721_v55 = vld [vmem:[%s13688_s6 + $0x60] ss:$8 sps:$4 sm:$0xff]  }
 0x1f4   :  { %v954_v3 = vpop.permute.xlu1 %953 }
 0x1f5   :  { %vm964_vm3 = vcmp.eq.s32.totalorder %v954_v3, %v9070_v43  ;;  %v8730_v3 = vld [vmem:[%s13688_s6 + $0x90] ss:$8 sps:$4 sm:$0xff]  }
 0x1f6   :  { %vm6405_vm4 = vmpackc.low %vm965_vm1, %vm964_vm3  ;;  %8069 = vmatpush3.bf16.msra.mxu1 %v6450_v62  ;;  %v8727_v62 = vld [vmem:[%s13688_s6 + $0x80] ss:$8 sps:$4 sm:$0xff]   ;;  %vm1595_vm1 = vcmp.gt.bf16.partialorder %v9448_v30, 0  ;;  %vm13810_vm3 = vcmask 1043456  }
 0x1f7   :  { %8451 = vmatpush3.bf16.msk.msra.mxu0 %vm6405_vm4, %v13712_v47  ;;  %8070 = vmatprep.subr.bf16.mxu1 %v6457_v63  ;;  %v8728_v63 = vld [vmem:[%s13688_s6 + $0x94] ss:$8 sps:$4 sm:$0xff]   ;;  %vm13809_vm4 = vcmask 1044480  }
 0x1f8   :  { %8452 = vmatprep.subr.bf16.mxu0 %v8778_v2 }
 0x1fa   :  { %8071 = vmatpush3.bf16.msra.mxu1 %v6449_v10  ;;  %v8734_v10 = vld [vmem:[%s13688_s6 + $0xb4] ss:$8 sps:$4 sm:$0xff]  }
 0x1fb   :  { %8453 = vmatpush3.bf16.msk.msra.mxu0 %vm6407_vm7, %v13712_v47  ;;  %8072 = vmatprep.subr.bf16.mxu1 %v6456_v11  ;;  %v8736_v11 = vld [vmem:[%s13688_s6 + $0xb0] ss:$8 sps:$4 sm:$0xff]  }
 0x1fc   :  { %8454 = vmatprep.subr.bf16.mxu0 %v8778_v2 }
 0x1fe   :  { %8073 = vmatpush3.bf16.msra.mxu1 %v6448_v17  ;;  %v8737_v17 = vld [vmem:[%s13688_s6 + $0xc4] ss:$8 sps:$4 sm:$0xff]  }
 0x1ff   :  { %8455 = vmatpush3.bf16.msk.msra.mxu0 %vm6409_vm10, %v13712_v47  ;;  %8074 = vmatprep.subr.bf16.mxu1 %v6455_v18  ;;  %v8739_v18 = vld [vmem:[%s13688_s6 + $0xc0] ss:$8 sps:$4 sm:$0xff]  }
 0x200   :  { %8456 = vmatprep.subr.bf16.mxu0 %v8778_v2  ;;  %v8704_v2 = vld [vmem:[%s13688_s6 + $0x14] ss:$8 sps:$4 sm:$0xff]  }
 0x202   :  { %8075 = vmatpush3.bf16.msra.mxu1 %v6447_v23  ;;  %v8740_v23 = vld [vmem:[%s13688_s6 + $0xd4] ss:$8 sps:$4 sm:$0xff]  }
 0x203   :  { %8457 = vmatpush3.bf16.msk.msra.mxu0 %vm6411_vm13, %v13712_v47  ;;  %8076 = vmatprep.subr.bf16.mxu1 %v6454_v24  ;;  %v8742_v24 = vld [vmem:[%s13688_s6 + $0xd0] ss:$8 sps:$4 sm:$0xff]   ;;  %vm1599_vm13 = vcmp.gt.bf16.partialorder %v9391_v13, 0 }
 0x206   :  { %8459 = vmatmul.mubr.msk.bf16.vlgmr.msra.gmra.mxu0 %vm105_vm0, %v43_v29  ;;  %8077 = vmatpush3.bf16.msra.mxu1 %v6446_v31  ;;  %v8743_v31 = vld [vmem:[%s13688_s6 + $0xe4] ss:$8 sps:$4 sm:$0xff]   ;;  %vm13849_vm0 = vcmask 1040384  }
 0x209   :  { %1466 = vmatmul.mubr.bf16.vlgmr.msra.gmra.mxu1 %v8701_v32 }
 0x20a   :  { %1473 = vmatprep.mubr.bf16.mxu1 %v8704_v2 }
 0x211   :  { %1474 = vmatmul.mubr.bf16.gmra.mxu1 %v8706_v27 }
 0x212   :  { %1481 = vmatprep.mubr.bf16.mxu1 %v8707_v33 }
 0x219   :  { %1482 = vmatmul.mubr.bf16.gmra.mxu1 %v8709_v37 }
 0x21a   :  { %1489 = vmatprep.mubr.bf16.mxu1 %v8710_v40 }
 0x221   :  { %1490 = vmatmul.mubr.bf16.gmra.mxu1 %v8712_v44 }
 0x222   :  { %1497 = vmatprep.mubr.bf16.mxu1 %v8713_v45 }
 0x229   :  { %1498 = vmatmul.mubr.bf16.gmra.mxu1 %v8715_v46 }
 0x22a   :  { %1505 = vmatprep.mubr.bf16.mxu1 %v8716_v50 }
 0x231   :  { %1506 = vmatmul.mubr.bf16.gmra.mxu1 %v8718_v52  ;;  %v8745_v52 = vld [vmem:[%s13688_s6 + $0xe0] ss:$8 sps:$4 sm:$0xff]  }
 0x232   :  { %1513 = vmatprep.mubr.bf16.mxu1 %v8719_v54 }
 0x239   :  { %1514 = vmatmul.mubr.bf16.gmra.mxu1 %v8721_v55 }
 0x23a   :  { %1521 = vmatprep.mubr.bf16.mxu1 %v8722_v58 }
 0x241   :  { %1522 = vmatmul.mubr.bf16.gmra.mxu1 %v8724_v59  ;;  %v8746_v59 = vld [vmem:[%s13688_s6 + $0xf4] ss:$8 sps:$4 sm:$0xff]  }
 0x242   :  { %1529 = vmatprep.mubr.bf16.mxu1 %v8725_v60 }
 0x249   :  { %1530 = vmatmul.mubr.bf16.gmra.mxu1 %v8727_v62 }
 0x24a   :  { %1537 = vmatprep.mubr.bf16.mxu1 %v8728_v63 }
 0x251   :  { %1538 = vmatmul.mubr.bf16.gmra.mxu1 %v8730_v3 }
 0x252   :  { %1545 = vmatprep.mubr.bf16.mxu1 %v8731_v4 }
 0x259   :  { %1546 = vmatmul.mubr.bf16.gmra.mxu1 %v8733_v9  ;;  %v8748_v9 = vld [vmem:[%s13688_s6 + $0xf0] ss:$8 sps:$4 sm:$0xff]  }
 0x25a   :  { %1553 = vmatprep.mubr.bf16.mxu1 %v8734_v10 }
 0x261   :  { %1554 = vmatmul.mubr.bf16.gmra.mxu1 %v8736_v11 }
 0x262   :  { %1561 = vmatprep.mubr.bf16.mxu1 %v8737_v17 }
 0x269   :  { %1562 = vmatmul.mubr.bf16.gmra.mxu1 %v8739_v18 }
 0x26a   :  { %1569 = vmatprep.mubr.bf16.mxu1 %v8740_v23 }
 0x270   :  { %v423_v29 = vpop.f32.mrf.mxu0 }
 0x271   :  { %1570 = vmatmul.mubr.bf16.gmra.mxu1 %v8742_v24  ;;  %v429_v32 = vmul.f32 256.0, %v423_v29  ;;  %v431_v2 = vrot.slane %v423_v29, 1 }
 0x272   :  { %1577 = vmatprep.mubr.bf16.mxu1 %v8743_v31  ;;  %v8388_v27 = vpop.f32.mrf.mxu0 }
 0x273   :  { %v323_v33 = vpop.f32.mrf.mxu1  ;;  %v433_v37 = vadd.f32 %v431_v2, %v429_v32 }
 0x274   :  { %v329_v40 = vmul.f32 256.0, %v323_v33  ;;  %v331_v44 = vrot.slane %v323_v33, 1  ;;  %v426_v45 = vpop.f32.mrf.mxu0 }
 0x275   :  { %v8376_v46 = vpop.f32.mrf.mxu1  ;;  %v1035_v50 = vrot.slane %v433_v37, 7  ;;  %v1073_v55 = vrot.slane %v433_v37, 1 }
 0x276   :  { %v333_v54 = vadd.f32 %v331_v44, %v329_v40  ;;  %v8389_v58 = vpop.f32.mrf.mxu0 }
 0x277   :  { %v326_v60 = vpop.f32.mrf.mxu1 }
 0x278   :  { %v1071_v62 = vrot.slane %v333_v54, 2  ;;  %v1056_v63 = vsel %vm13849_vm0, %v333_v54, %v1035_v50 }
 0x279   :  { %1578 = vmatmul.mubr.bf16.gmra.mxu1 %v8745_v52  ;;  %v8377_v3 = vpop.f32.mrf.mxu1 }
 0x27a   :  { %v1085_v4 = vsel %vm13849_vm0, %v1071_v62, %v1073_v55  ;;  %1585 = vmatprep.mubr.bf16.mxu1 %v8746_v59 }
 0x280   :  { %v623_v10 = vpop.f32.mrf.mxu0 }
 0x281   :  { %v629_v11 = vmul.f32 256.0, %v623_v10  ;;  %v631_v17 = vrot.slane %v623_v10, 1  ;;  %1586 = vmatmul.mubr.bf16.gmra.mxu1 %v8748_v9 }
 0x282   :  { %v8412_v18 = vpop.f32.mrf.mxu0 }
 0x283   :  { %v633_v23 = vadd.f32 %v631_v17, %v629_v11 }
 0x284   :  { %v626_v24 = vpop.f32.mrf.mxu0 }
 0x285   :  { %v523_v31 = vpop.f32.mrf.mxu1  ;;  %v1075_v27 = vrot.slane %v633_v23, 7  ;;  %v1041_v40 = vrot.slane %v633_v23, 5 }
 0x286   :  { %v529_v29 = vmul.f32 256.0, %v523_v31  ;;  %v531_v32 = vrot.slane %v523_v31, 1  ;;  %v8413_v2 = vpop.f32.mrf.mxu0 }
 0x287   :  { %v8400_v33 = vpop.f32.mrf.mxu1 }
 0x288   :  { %v533_v37 = vadd.f32 %v531_v32, %v529_v29  ;;  %v1626_v33 = vsel %vm1594_vm15, 65537, %v13704_v16 }
 0x289   :  { %v526_v44 = vpop.f32.mrf.mxu1 }
 0x28a   :  { %v1038_v45 = vrot.slane %v533_v37, 6  ;;  %v1086_v46 = vsel %vm13848_vm14, %v1085_v4, %v533_v37  ;;  %v1658_v44 = vunpack.c.l.b16 %v1626_v33 }
 0x28b   :  { %v1087_v50 = vsel %vm13811_vm2, %v1086_v46, %v1075_v27  ;;  %v8401_v52 = vpop.f32.mrf.mxu1 }
 0x28c   :  { %v1058_v54 = vsel %vm13848_vm14, %v1056_v63, %v1038_v45  ;;  %vm9563_vm7 = vcmp.ne.s32.totalorder %v1658_v44, 0 }
 0x28d   :  { %v1060_v55 = vsel %vm13811_vm2, %v1058_v54, %v1041_v40  ;;  %v1627_v54 = vsel %vm1595_vm1, 65537, %v13704_v16 }
 0x297   :  { %v723_v58 = vpop.f32.mrf.mxu1 }
 0x298   :  { %v729_v4 = vmul.f32 256.0, %v723_v58  ;;  %v731_v31 = vrot.slane %v723_v58, 1 }
 0x299   :  { %v8424_v59 = vpop.f32.mrf.mxu1 }
 0x29a   :  { %v733_v27 = vadd.f32 %v731_v31, %v729_v4 }
 0x29b   :  { %v726_v60 = vpop.f32.mrf.mxu1 }
 0x29c   :  { %v1044_v45 = vrot.slane %v733_v27, 4  ;;  %v1077_v46 = vrot.slane %v733_v27, 6 }
 0x29d   :  { %v8425_v62 = vpop.f32.mrf.mxu1 }
 0x29e   :  { %v1095_v62 = vpop.permute.xlu1 %1094 }
 0x29f   :  { %vm1097_vm8 = vcmp.eq.s32.totalorder %v9065_v39, %v1095_v62  ;;  %vm1096_vm10 = vcmp.lt.s32.totalorder %v9065_v39, %v1095_v62 }
 0x2a0   :  { %v823_v3 = vpop.f32.mrf.mxu0 }
 0x2a1   :  { %v829_v29 = vmul.f32 256.0, %v823_v3  ;;  %v831_v32 = vrot.slane %v823_v3, 1 }
 0x2a2   :  { %v8436_v9 = vpop.f32.mrf.mxu0 }
 0x2a3   :  { %v833_v37 = vadd.f32 %v831_v32, %v829_v29 }
 0x2a4   :  { %v826_v10 = vpop.f32.mrf.mxu0 }
 0x2a5   :  { %v1047_v58 = vrot.slane %v833_v37, 3  ;;  %v1079_v59 = vrot.slane %v833_v37, 5 }
 0x2a6   :  { %v8437_v11 = vpop.f32.mrf.mxu0 }
 0x2a9   :  { %v923_v17 = vpop.f32.mrf.mxu1 }
 0x2aa   :  { %v929_v63 = vmul.f32 256.0, %v923_v17  ;;  %v931_v2 = vrot.slane %v923_v17, 1 }
 0x2ab   :  { %v8448_v18 = vpop.f32.mrf.mxu1 }
 0x2ac   :  { %v933_v40 = vadd.f32 %v931_v2, %v929_v63  ;;  %v1659_v18 = vunpack.c.l.b16 %v1627_v54  ;;  %v13698_v54 = vmov 1024  }
 0x2ad   :  { %v926_v23 = vpop.f32.mrf.mxu1 }
 0x2ae   :  { %v1050_v3 = vrot.slane %v933_v40, 2  ;;  %v1081_v9 = vrot.slane %v933_v40, 4  ;;  %v1062_v23 = vsel %vm13810_vm3, %v1060_v55, %v1044_v45  ;;  %vm9586_vm12 = vcmp.ne.s32.totalorder %v1659_v18, 0 }
 0x2af   :  { %v8449_v24 = vpop.f32.mrf.mxu1  ;;  %v1064_v31 = vsel %vm13809_vm4, %v1062_v23, %v1047_v58  ;;  %v1098_v58 = vsel %vm1097_vm8, 1025, %v13698_v54  ;;  %v1629_v23 = vsel %vm1597_vm11, 65537, %v13704_v16 }
 0x2b0   :  { %v1088_v24 = vsel %vm13810_vm3, %v1087_v50, %v1077_v46  ;;  %v1066_v27 = vsel %vm13808_vm5, %v1064_v31, %v1050_v3  ;;  %v1661_v62 = vunpack.c.l.b16 %v1629_v23 }
 0x2b1   :  { %v1089_v29 = vsel %vm13809_vm4, %v1088_v24, %v1079_v59 }
 0x2b2   :  { %v1090_v33 = vsel %vm13808_vm5, %v1089_v29, %v1081_v9  ;;  %vm1693_vm1 = vcmp.ne.s32.totalorder %v1661_v62, 0 }
 0x2c6   :  { %v1023_v52 = vpop.f32.mrf.mxu0 }
 0x2c7   :  { %v1029_v28 = vmul.f32 256.0, %v1023_v52  ;;  %v1031_v60 = vrot.slane %v1023_v52, 1 }
 0x2c8   :  { %v8460_v10 = vpop.f32.mrf.mxu0 }
 0x2c9   :  { %v1033_v30 = vadd.f32 %v1031_v60, %v1029_v28  ;;  %v8078_v11 = vpop.f32.mrf.mxu1  ;;  %v8785_v28 = vmov 256   ;;  %v1628_v10 = vsel %vm1596_vm9, 65537, %v13704_v16  ;;  %vm1598_vm9 = vcmp.gt.bf16.partialorder %v9386_v12, 0 }
 0x2ca   :  { %v1026_v4 = vpop.f32.mrf.mxu0  ;;  %v1101_v60 = vsel %vm1097_vm8, 257, %v8785_v28  ;;  %v1660_v29 = vunpack.c.l.b16 %v1628_v10 }
 0x2cb   :  { %v1053_v32 = vrot.slane %v1033_v30, 1  ;;  %v1083_v63 = vrot.slane %v1033_v30, 3  ;;  %v8079_v2 = vpop.f32.mrf.mxu1 }
 0x2cc   :  { %v8080_v37 = vadd.f32 %v8079_v2, %v8078_v11  ;;  %v8461_v55 = vpop.f32.mrf.mxu0  ;;  %vm1692_vm15 = vcmp.ne.s32.totalorder %v1660_v29, 0 }
 0x2cd   :  { %v1068_v50 = vsel %vm13784_vm6, %v1066_v27, %v1053_v32  ;;  %v1091_v40 = vsel %vm13784_vm6, %v1090_v33, %v1083_v63  ;;  %v8081_v44 = vpop.f32.mrf.mxu1  ;;  %v1631_v55 = vsel %vm1599_vm13, 65537, %v13704_v16  ;;  %vm1605_vm13 = vcmp.gt.bf16.partialorder %v9324_v49, 0 }
 0x2ce   :  { %v8478_v45 = vtrunc.f32 %v1068_v50  ;;  %v8480_v46 = vtrunc.f32 %v1091_v40  ;;  %v1722_v52 = vsel %vm9563_vm7, %v8080_v37, 0.0  ;;  %vm1601_vm7 = vcmp.gt.bf16.partialorder %v9366_v1, 0 }
 0x2cf   :  { %v8482_v59 = vtrunc.f32 %v1722_v52  ;;  %v8082_v3 = vpop.f32.mrf.mxu1  ;;  %v1663_v52 = vunpack.c.l.b16 %v1631_v55  ;;  %v1633_v9 = vsel %vm1601_vm7, 65537, %v13704_v16  ;;  %vm1607_vm7 = vcmp.gt.bf16.partialorder %v9300_v35, 0 }
 0x2d0   :  { %v8479_v30 = vcvt.f32.s32 %v8478_v45  ;;  %v8481_v11 = vcvt.f32.s32 %v8480_v46  ;;  %v8083_v17 = vadd.f32 %v8082_v3, %v8081_v44  ;;  %v1665_v23 = vunpack.c.l.b16 %v1633_v9 }
 0x2d1   :  { %v9596_v24 = vcvt.f32.s32 %v8482_v59  ;;  %v8084_v4 = vpop.f32.mrf.mxu1  ;;  %vm1695_vm8 = vcmp.ne.s32.totalorder %v1663_v52, 0 }
 0x2d2   :  { %v1099_v18 = vsel %vm1096_vm10, %v8479_v30, %v1098_v58  ;;  %v1102_v31 = vsel %vm1096_vm10, %v8481_v11, %v1101_v60  ;;  %v1723_v19 = vsel %vm9586_vm12, %v8083_v17, 0.0  ;;  %v1630_v11 = vsel %vm1598_vm9, 65537, %v13704_v16 }
 0x2d3   :  { %13856 = vst [vmem:[#allocation3_spill] sm:$0xff] %v9596_v24  ;;  %1100 = vst [vmem:[%s13692_s8] sm:$0xff] %v1099_v18  ;;  %v8484_v20 = vtrunc.f32 %v1723_v19  ;;  %v8085_v32 = vpop.f32.mrf.mxu1  ;;  %2326 = vperm.xlu1 %8614, %v9596_v24   ;;  %1791 = vperm.xlu0 %8613, %v9596_v24   ;;  %vm1603_vm10 = vcmp.gt.bf16.partialorder %v9345_v57, 0  ;;  %v1662_v12 = vunpack.c.l.b16 %v1630_v11  ;;  %vm1697_vm11 = vcmp.ne.s32.totalorder %v1665_v23, 0 }
 0x2d4   :  { %1103 = vst [vmem:[%s13693_s9] sm:$0xff] %v1102_v31  ;;  %v8086_v2 = vadd.f32 %v8085_v32, %v8084_v4  ;;  %v1635_v29 = vsel %vm1603_vm10, 65537, %v13704_v16  ;;  %vm1609_vm10 = vcmp.gt.bf16.partialorder %v9271_v26, 0 }
 0x2d5   :  { %v9612_v63 = vcvt.f32.s32 %v8484_v20  ;;  %v8087_v27 = vpop.f32.mrf.mxu1  ;;  %vm1694_vm12 = vcmp.ne.s32.totalorder %v1662_v12, 0  ;;  %v1667_v57 = vunpack.c.l.b16 %v1635_v29 }
 0x2d6   :  { %v1724_v50 = vsel %vm1692_vm15, %v8086_v2, 0.0  ;;  %vm1600_vm15 = vcmp.gt.bf16.partialorder %v9361_v0, 0 }
 0x2d7   :  { %13857 = vst [vmem:[#allocation4_spill] sm:$0xff] %v9612_v63  ;;  %v8088_v33 = vpop.f32.mrf.mxu1  ;;  %8615 = vset.pattern.permute.xlu1 %v13704_v16  ;;  %v8486_v58 = vtrunc.f32 %v1724_v50  ;;  %v1632_v52 = vsel %vm1600_vm15, 65537, %v13704_v16 }
 0x2d8   :  { %v8089_v37 = vadd.f32 %v8088_v33, %v8087_v27  ;;  %1794 = vperm.xlu1 %8615, %v9612_v63  }
 0x2d9   :  { %v8090_v40 = vpop.f32.mrf.mxu1  ;;  %v9624_v60 = vcvt.f32.s32 %v8486_v58 }
 0x2da   :  { %v1725_v44 = vsel %vm1693_vm1, %v8089_v37, 0.0  ;;  %vm1699_vm1 = vcmp.ne.s32.totalorder %v1667_v57, 0 }
 0x2db   :  { %v8488_v45 = vtrunc.f32 %v1725_v44  ;;  %v8091_v46 = vpop.f32.mrf.mxu1  ;;  %13859 = vst [vmem:[#allocation6_spill] sm:$0xff] %v9624_v60 }
 0x2dc   :  { %8616 = vset.pattern.permute.xlu1 %v13710_v41  ;;  %v8092_v20 = vadd.f32 %v8091_v46, %v8090_v40 }
 0x2dd   :  { %v9619_v13 = vcvt.f32.s32 %v8488_v45  ;;  %v8093_v59 = vpop.f32.mrf.mxu1  ;;  %2864 = vperm.xlu1 %8616, %v9612_v63   ;;  %v1637_v45 = vsel %vm1605_vm13, 65537, %v13704_v16  ;;  %vm1611_vm13 = vcmp.gt.bf16.partialorder %v9430_v22, 0 }
 0x2de   :  { %v1726_v33 = vsel %vm1694_vm12, %v8092_v20, 0.0  ;;  %v1669_v0 = vunpack.c.l.b16 %v1637_v45 }
 0x2df   :  { %13858 = vst [vmem:[#allocation5_spill] sm:$0xff] %v9619_v13  ;;  %v8094_v28 = vpop.f32.mrf.mxu1  ;;  %1800 = vperm.xlu0 %8613, %v9619_v13   ;;  %v8490_v40 = vtrunc.f32 %v1726_v33  ;;  %v1641_v33 = vsel %vm1609_vm10, 65537, %v13704_v16  ;;  %vm1615_vm10 = vcmp.gt.bf16.partialorder %v9374_v5, 0 }
 0x2e0   :  { %v8095_v3 = vadd.f32 %v8094_v28, %v8093_v59  ;;  %v1673_v45 = vunpack.c.l.b16 %v1641_v33 }
 0x2e1   :  { %v8096_v10 = vpop.f32.mrf.mxu1  ;;  %8617 = vset.pattern.permute.xlu1 %v13704_v16  ;;  %v9657_v28 = vcvt.f32.s32 %v8490_v40 }
 0x2e2   :  { %v1727_v30 = vsel %vm1695_vm8, %v8095_v3, 0.0  ;;  %1797 = vperm.xlu1 %8617, %v9624_v60   ;;  %v1664_v3 = vunpack.c.l.b16 %v1632_v52  ;;  %vm1701_vm8 = vcmp.ne.s32.totalorder %v1669_v0, 0  ;;  %vm1705_vm15 = vcmp.ne.s32.totalorder %v1673_v45, 0 }
 0x2e3   :  { %v8492_v1 = vtrunc.f32 %v1727_v30  ;;  %v8097_v17 = vpop.f32.mrf.mxu1 }
 0x2e4   :  { %vm1696_vm9 = vcmp.ne.s32.totalorder %v1664_v3, 0 }
 0x2e5   :  { %v9631_v4 = vcvt.f32.s32 %v8492_v1  ;;  %v8099_v18 = vpop.f32.mrf.mxu1  ;;  %v8098_v1 = vadd.f32 %v8097_v17, %v8096_v10 }
 0x2e6   :  { %8618 = vset.pattern.permute.xlu1 %v13709_v36 }
 0x2e7   :  { %v8100_v31 = vpop.f32.mrf.mxu1  ;;  %2332 = vperm.xlu1 %8618, %v9624_v60   ;;  %1806 = vperm.xlu0 %8613, %v9631_v4   ;;  %v1728_v20 = vsel %vm1696_vm9, %v8098_v1, 0.0 }
 0x2e8   :  { %v8101_v19 = vadd.f32 %v8100_v31, %v8099_v18  ;;  %v1639_v18 = vsel %vm1607_vm7, 65537, %v13704_v16  ;;  %v8494_v10 = vtrunc.f32 %v1728_v20  ;;  %vm1604_vm7 = vcmp.gt.bf16.partialorder %v9319_v48, 0 }
 0x2e9   :  { %v9638_v32 = vpop.f32.mrf.mxu1  ;;  %v1671_v35 = vunpack.c.l.b16 %v1639_v18 }
 0x2ea   :  { %v1729_v62 = vsel %vm1697_vm11, %v8101_v19, 0.0  ;;  %vm1602_vm11 = vcmp.gt.bf16.partialorder %v9340_v56, 0  ;;  %v9683_v26 = vcvt.f32.s32 %v8494_v10 }
 0x2eb   :  { %v8496_v2 = vtrunc.f32 %v1729_v62  ;;  %v9640_v27 = vpop.f32.mrf.mxu1  ;;  %8619 = vset.pattern.permute.xlu1 %v13710_v41  ;;  %vm1703_vm12 = vcmp.ne.s32.totalorder %v1671_v35, 0 }
 0x2ec   :  { %2867 = vperm.xlu1 %8619, %v9624_v60   ;;  %13860 = vst [vmem:[#allocation7_spill] sm:$0xff] %v9683_v26  ;;  %v8104_v0 = vadd.f32 %v9640_v27, %v9638_v32 }
 0x2ed   :  { %v9644_v37 = vcvt.f32.s32 %v8496_v2  ;;  %v8105_v55 = vpop.f32.mrf.mxu1 }
 0x2ef   :  { %v8106_v50 = vpop.f32.mrf.mxu1  ;;  %1812 = vperm.xlu0 %8613, %v9644_v37  }
 0x2f0   :  { %v8107_v44 = vadd.f32 %v8106_v50, %v8105_v55  ;;  %8620 = vset.pattern.permute.xlu1 %v13709_v36  ;;  %v1634_v55 = vsel %vm1602_vm11, 65537, %v13704_v16 }
 0x2f1   :  { %v9651_v46 = vpop.f32.mrf.mxu1  ;;  %2335 = vperm.xlu1 %8620, %v9619_v13   ;;  %v1666_v52 = vunpack.c.l.b16 %v1634_v55 }
 0x2f2   :  { %v1731_v58 = vsel %vm1699_vm1, %v8107_v44, 0.0 }
 0x2f3   :  { %v8500_v49 = vtrunc.f32 %v1731_v58  ;;  %v9655_v59 = vpop.f32.mrf.mxu1  ;;  %vm1698_vm1 = vcmp.ne.s32.totalorder %v1666_v52, 0 }
 0x2f4   :  { %v1730_v18 = vsel %vm1698_vm1, %v8104_v0, 0.0 }
 0x2f5   :  { %v9659_v9 = vcvt.f32.s32 %v8500_v49  ;;  %v8111_v30 = vpop.f32.mrf.mxu1  ;;  %8621 = vset.pattern.permute.xlu1 %v13704_v16  ;;  %v8498_v35 = vtrunc.f32 %v1730_v18 }
 0x2f6   :  { %1803 = vperm.xlu1 %8621, %v9657_v28  }
 0x2f7   :  { %v8112_v11 = vpop.f32.mrf.mxu1  ;;  %1818 = vperm.xlu0 %8613, %v9659_v9  }
 0x2f8   :  { %v8113_v23 = vadd.f32 %v8112_v11, %v8111_v30  ;;  %v1643_v11 = vsel %vm1611_vm13, 65537, %v13704_v16 }
 0x2f9   :  { %v9666_v12 = vpop.f32.mrf.mxu1  ;;  %v1675_v32 = vunpack.c.l.b16 %v1643_v11  ;;  %v1647_v11 = vsel %vm1615_vm10, 65537, %v13704_v16 }
 0x2fa   :  { %v1733_v31 = vsel %vm1701_vm8, %v8113_v23, 0.0  ;;  %8622 = vset.pattern.permute.xlu1 %v13710_v41  ;;  %vm1613_vm8 = vcmp.gt.bf16.partialorder %v9402_v15, 0 }
 0x2fb   :  { %v8504_v19 = vtrunc.f32 %v1733_v31  ;;  %v9669_v29 = vpop.f32.mrf.mxu1  ;;  %2873 = vperm.xlu1 %8622, %v9657_v28   ;;  %vm1707_vm9 = vcmp.ne.s32.totalorder %v1675_v32, 0 }
 0x2fd   :  { %v9672_v62 = vcvt.f32.s32 %v8504_v19  ;;  %v8117_v2 = vpop.f32.mrf.mxu1 }
 0x2ff   :  { %v8118_v17 = vpop.f32.mrf.mxu1  ;;  %8623 = vset.pattern.permute.xlu1 %v13709_v36  ;;  %1824 = vperm.xlu0 %8613, %v9672_v62  }
 0x300   :  { %v8119_v57 = vadd.f32 %v8118_v17, %v8117_v2  ;;  %2341 = vperm.xlu1 %8623, %v9631_v4   ;;  %v1636_v2 = vsel %vm1604_vm7, 65537, %v13704_v16  ;;  %v1645_v17 = vsel %vm1613_vm8, 65537, %v13704_v16  ;;  %vm1608_vm8 = vcmp.gt.bf16.partialorder %v9266_v25, 0 }
 0x301   :  { %v9681_v50 = vpop.f32.mrf.mxu1  ;;  %v1668_v15 = vunpack.c.l.b16 %v1636_v2 }
 0x302   :  { %v1735_v40 = vsel %vm1703_vm12, %v8119_v57, 0.0  ;;  %v9713_v57 = vcvt.f32.s32 %v8498_v35  ;;  %vm1606_vm12 = vcmp.gt.bf16.partialorder %v9295_v34, 0 }
 0x303   :  { %v8508_v56 = vtrunc.f32 %v1735_v40  ;;  %v9685_v44 = vpop.f32.mrf.mxu1  ;;  %vm9724_vm11 = vcmp.ne.s32.totalorder %v1668_v15, 0 }
 0x304   :  { %8624 = vset.pattern.permute.xlu1 %v13704_v16  ;;  %13861 = vst [vmem:[#allocation8_spill] sm:$0xff] %v9713_v57 }
 0x305   :  { %v9688_v58 = vcvt.f32.s32 %v8508_v56  ;;  %v8123_v49 = vpop.f32.mrf.mxu1  ;;  %1809 = vperm.xlu1 %8624, %v9683_v26   ;;  %v1677_v56 = vunpack.c.l.b16 %v1645_v17 }
 0x307   :  { %v8124_v3 = vpop.f32.mrf.mxu1  ;;  %1830 = vperm.xlu0 %8613, %v9688_v58   ;;  %vm1709_vm13 = vcmp.ne.s32.totalorder %v1677_v56, 0 }
 0x308   :  { %v8125_v30 = vadd.f32 %v8124_v3, %v8123_v49  ;;  %v8110_v49 = vadd.f32 %v9655_v59, %v9651_v46  ;;  %v1638_v46 = vsel %vm1606_vm12, 65537, %v13704_v16 }
 0x309   :  { %v9696_v1 = vpop.f32.mrf.mxu1  ;;  %8625 = vset.pattern.permute.xlu1 %v13710_v41 }
 0x30a   :  { %v1737_v23 = vsel %vm1705_vm15, %v8125_v30, 0.0  ;;  %2879 = vperm.xlu1 %8625, %v9683_v26   ;;  %v1732_v5 = vsel %vm9724_vm11, %v8110_v49, 0.0  ;;  %vm1617_vm15 = vcmp.gt.bf16.partialorder %v9353_v61, 0  ;;  %vm1610_vm11 = vcmp.gt.bf16.partialorder %v9425_v21, 0 }
 0x30b   :  { %v8512_v22 = vtrunc.f32 %v1737_v23  ;;  %v9700_v31 = vpop.f32.mrf.mxu1  ;;  %v8502_v32 = vtrunc.f32 %v1732_v5 }
 0x30d   :  { %v9703_v27 = vcvt.f32.s32 %v8512_v22  ;;  %v8129_v19 = vpop.f32.mrf.mxu1  ;;  %v1679_v22 = vunpack.c.l.b16 %v1647_v11  ;;  %v9749_v15 = vcvt.f32.s32 %v8502_v32 }
 0x30e   :  { %8626 = vset.pattern.permute.xlu1 %v13709_v36 }
 0x30f   :  { %v8130_v20 = vpop.f32.mrf.mxu1  ;;  %2347 = vperm.xlu1 %8626, %v9644_v37   ;;  %1836 = vperm.xlu0 %8613, %v9703_v27   ;;  %vm1711_vm1 = vcmp.ne.s32.totalorder %v1679_v22, 0 }
 0x310   :  { %v8131_v10 = vadd.f32 %v8130_v20, %v8129_v19  ;;  %v1670_v19 = vunpack.c.l.b16 %v1638_v46 }
 0x311   :  { %v9711_v48 = vpop.f32.mrf.mxu1 }
 0x312   :  { %v1739_v33 = vsel %vm1707_vm9, %v8131_v10, 0.0  ;;  %v8116_v10 = vadd.f32 %v9669_v29, %v9666_v12  ;;  %vm1702_vm7 = vcmp.ne.s32.totalorder %v1670_v19, 0  ;;  %v1640_v29 = vsel %vm1608_vm8, 65537, %v13704_v16 }
 0x313   :  { %v8516_v55 = vtrunc.f32 %v1739_v33  ;;  %v9715_v40 = vpop.f32.mrf.mxu1  ;;  %8627 = vset.pattern.permute.xlu1 %v13704_v16  ;;  %v1649_v33 = vsel %vm1617_vm15, 65537, %v13704_v16  ;;  %vm1619_vm9 = vcmp.gt.bf16.partialorder %v9332_v53, 0 }
 0x314   :  { %1815 = vperm.xlu1 %8627, %v9713_v57   ;;  %v1681_v49 = vunpack.c.l.b16 %v1649_v33  ;;  %v1734_v12 = vsel %vm1702_vm7, %v8116_v10, 0.0  ;;  %v1651_v46 = vsel %vm1619_vm9, 65537, %v13704_v16  ;;  %v1642_v10 = vsel %vm1610_vm11, 65537, %v13704_v16 }
 0x315   :  { %v9719_v45 = vcvt.f32.s32 %v8516_v55  ;;  %v8135_v52 = vpop.f32.mrf.mxu1  ;;  %v8506_v25 = vtrunc.f32 %v1734_v12  ;;  %v1674_v33 = vunpack.c.l.b16 %v1642_v10  ;;  %vm1612_vm7 = vcmp.gt.bf16.partialorder %v9397_v14, 0 }
 0x316   :  { %vm1713_vm10 = vcmp.ne.s32.totalorder %v1681_v49, 0  ;;  %v1644_v14 = vsel %vm1612_vm7, 65537, %v13704_v16 }
 0x317   :  { %13862 = vst [vmem:[#allocation9_spill] sm:$0xff] %v9719_v45  ;;  %v8136_v3 = vpop.f32.mrf.mxu1  ;;  %1842 = vperm.xlu0 %8613, %v9719_v45   ;;  %v9771_v22 = vcvt.f32.s32 %v8506_v25 }
 0x318   :  { %v8137_v30 = vadd.f32 %v8136_v3, %v8135_v52  ;;  %8628 = vset.pattern.permute.xlu1 %v13710_v41 }
 0x319   :  { %v9732_v23 = vpop.f32.mrf.mxu1  ;;  %2885 = vperm.xlu1 %8628, %v9713_v57  }
 0x31a   :  { %v1741_v59 = vsel %vm1709_vm13, %v8137_v30, 0.0  ;;  %v1672_v30 = vunpack.c.l.b16 %v1640_v29  ;;  %vm1621_vm13 = vcmp.gt.bf16.partialorder %v9310_v42, 0 }
 0x31b   :  { %v8520_v34 = vtrunc.f32 %v1741_v59  ;;  %v9738_v18 = vpop.f32.mrf.mxu1 }
 0x31c   :  { %vm9773_vm12 = vcmp.ne.s32.totalorder %v1672_v30, 0  ;;  %v8128_v30 = vadd.f32 %v9700_v31, %v9696_v1 }
 0x31d   :  { %v9740_v35 = vcvt.f32.s32 %v8520_v34  ;;  %v8141_v20 = vpop.f32.mrf.mxu1  ;;  %8629 = vset.pattern.permute.xlu1 %v13709_v36  ;;  %v8122_v34 = vadd.f32 %v9685_v44, %v9681_v50 }
 0x31e   :  { %2353 = vperm.xlu1 %8629, %v9659_v9  }
 0x31f   :  { %13865 = vst [vmem:[#allocation10_spill] sm:$0xff] %v9740_v35  ;;  %v8142_v2 = vpop.f32.mrf.mxu1  ;;  %1848 = vperm.xlu0 %8613, %v9740_v35   ;;  %v1736_v21 = vsel %vm9773_vm12, %v8122_v34, 0.0 }
 0x320   :  { %v8143_v17 = vadd.f32 %v8142_v2, %v8141_v20  ;;  %v1683_v2 = vunpack.c.l.b16 %v1651_v46  ;;  %v8510_v49 = vtrunc.f32 %v1736_v21  ;;  %v1676_v21 = vunpack.c.l.b16 %v1644_v14 }
 0x321   :  { %v9752_v55 = vpop.f32.mrf.mxu1 }
 0x322   :  { %v1743_v61 = vsel %vm1711_vm1, %v8143_v17, 0.0  ;;  %8630 = vset.pattern.permute.xlu1 %v13704_v16  ;;  %vm1715_vm15 = vcmp.ne.s32.totalorder %v1683_v2, 0  ;;  %vm9797_vm1 = vcmp.ne.s32.totalorder %v1674_v33, 0 }
 0x323   :  { %v8524_v56 = vtrunc.f32 %v1743_v61  ;;  %v9755_v52 = vpop.f32.mrf.mxu1  ;;  %1821 = vperm.xlu1 %8630, %v9749_v15   ;;  %v1738_v1 = vsel %vm9797_vm1, %v8128_v30, 0.0 }
 0x325   :  { %v9759_v0 = vcvt.f32.s32 %v8524_v56  ;;  %v8147_v3 = vpop.f32.mrf.mxu1  ;;  %v1653_v56 = vsel %vm1621_vm13, 65537, %v13704_v16 }
 0x326   :  { %v1685_v25 = vunpack.c.l.b16 %v1653_v56 }
 0x327   :  { %v8148_v11 = vpop.f32.mrf.mxu1  ;;  %8631 = vset.pattern.permute.xlu1 %v13709_v36  ;;  %1854 = vperm.xlu0 %8613, %v9759_v0  }
 0x328   :  { %v8149_v5 = vadd.f32 %v8148_v11, %v8147_v3  ;;  %2359 = vperm.xlu1 %8631, %v9672_v62   ;;  %vm1717_vm9 = vcmp.ne.s32.totalorder %v1685_v25, 0  ;;  %v8766_v25 = vld [vmem:[%s13691_s5 + $0x50] sm:$0xf] }
 0x329   :  { %v9766_v59 = vpop.f32.mrf.mxu1  ;;  %vm1614_vm11 = vcmp.gt.bf16.partialorder %v8766_v25, 0 }
 0x32a   :  { %v1745_v53 = vsel %vm1713_vm10, %v8149_v5, 0.0  ;;  %v9801_v5 = vcvt.f32.s32 %v8510_v49  ;;  %vm1708_vm10 = vcmp.ne.s32.totalorder %v1676_v21, 0 }
 0x32b   :  { %v8528_v19 = vtrunc.f32 %v1745_v53  ;;  %v9777_v20 = vpop.f32.mrf.mxu1  ;;  %v8765_v53 = vld [vmem:[%s13691_s5 + $0x74] sm:$0xf] }
 0x32c   :  { %8632 = vset.pattern.permute.xlu1 %v13704_v16  ;;  %vm1623_vm8 = vcmp.gt.bf16.partialorder %v8765_v53, 0 }
 0x32d   :  { %v9781_v17 = vcvt.f32.s32 %v8528_v19  ;;  %v8153_v50 = vpop.f32.mrf.mxu1  ;;  %1827 = vperm.xlu1 %8632, %v9771_v22   ;;  %v1655_v19 = vsel %vm1623_vm8, 65537, %v13704_v16 }
 0x32f   :  { %13868 = vst [vmem:[#allocation11_spill] sm:$0xff] %v9781_v17  ;;  %v8154_v44 = vpop.f32.mrf.mxu1  ;;  %1860 = vperm.xlu0 %8613, %v9781_v17  }
 0x330   :  { %v8155_v61 = vadd.f32 %v8154_v44, %v8153_v50  ;;  %v8514_v50 = vtrunc.f32 %v1738_v1 }
 0x331   :  { %v9789_v12 = vpop.f32.mrf.mxu1  ;;  %8633 = vset.pattern.permute.xlu1 %v13709_v36 }
 0x332   :  { %v1747_v29 = vsel %vm1715_vm15, %v8155_v61, 0.0  ;;  %2365 = vperm.xlu1 %8633, %v9688_v58   ;;  %v1687_v61 = vunpack.c.l.b16 %v1655_v19 }
 0x333   :  { %v8532_v42 = vtrunc.f32 %v1747_v29  ;;  %v9793_v3 = vpop.f32.mrf.mxu1  ;;  %v8134_v29 = vadd.f32 %v9715_v40, %v9711_v48  ;;  %v1646_v48 = vsel %vm1614_vm11, 65537, %v13704_v16 }
 0x334   :  { %vm1719_vm12 = vcmp.ne.s32.totalorder %v1687_v61, 0  ;;  %v1678_v1 = vunpack.c.l.b16 %v1646_v48  ;;  %v8146_v61 = vadd.f32 %v9755_v52, %v9752_v55  ;;  %v8152_v48 = vadd.f32 %v9777_v20, %v9766_v59 }
 0x335   :  { %v9804_v46 = vcvt.f32.s32 %v8532_v42  ;;  %v8159_v34 = vpop.f32.mrf.mxu1  ;;  %v9826_v42 = vcvt.f32.s32 %v8514_v50 }
 0x336   :  { %8634 = vset.pattern.permute.xlu1 %v13704_v16  ;;  %vm1710_vm13 = vcmp.ne.s32.totalorder %v1678_v1, 0 }
 0x337   :  { %13871 = vst [vmem:[#allocation12_spill] sm:$0xff] %v9804_v46  ;;  %v8160_v32 = vpop.f32.mrf.mxu1  ;;  %1833 = vperm.xlu1 %8634, %v9801_v5   ;;  %1866 = vperm.xlu0 %8613, %v9804_v46   ;;  %13873 = vst [vmem:[#allocation14_spill] sm:$0xff] %v9826_v42 }
 0x338   :  { %v8161_v31 = vadd.f32 %v8160_v32, %v8159_v34  ;;  %v1740_v34 = vsel %vm1708_vm10, %v8134_v29, 0.0  ;;  %v8768_v29 = vld [vmem:[%s13691_s5 + $0x60] sm:$0xf] }
 0x339   :  { %v9816_v2 = vpop.f32.mrf.mxu1  ;;  %v8518_v32 = vtrunc.f32 %v1740_v34  ;;  %vm1618_vm7 = vcmp.gt.bf16.partialorder %v8768_v29, 0 }
 0x33a   :  { %v1749_v10 = vsel %vm1717_vm9, %v8161_v31, 0.0  ;;  %v8140_v31 = vadd.f32 %v9738_v18, %v9732_v23 }
 0x33b   :  { %v8536_v44 = vtrunc.f32 %v1749_v10  ;;  %v9818_v33 = vpop.f32.mrf.mxu1  ;;  %8635 = vset.pattern.permute.xlu1 %v13709_v36  ;;  %v9842_v19 = vcvt.f32.s32 %v8518_v32  ;;  %v8767_v10 = vld [vmem:[%s13691_s5 + $0x58] sm:$0xf] }
 0x33c   :  { %2371 = vperm.xlu1 %8635, %v9703_v27   ;;  %vm1616_vm15 = vcmp.gt.bf16.partialorder %v8767_v10, 0  ;;  %v1742_v50 = vsel %vm1710_vm13, %v8140_v31, 0.0 }
 0x33d   :  { %v9822_v56 = vcvt.f32.s32 %v8536_v44  ;;  %v8165_v49 = vpop.f32.mrf.mxu1  ;;  %13875 = vst [vmem:[#allocation16_spill] sm:$0xff] %v9842_v19  ;;  %v1648_v21 = vsel %vm1616_vm15, 65537, %v13704_v16  ;;  %v8522_v18 = vtrunc.f32 %v1742_v50  ;;  %v8158_v50 = vadd.f32 %v9793_v3, %v9789_v12 }
 0x33e   :  { %v1680_v44 = vunpack.c.l.b16 %v1648_v21 }
 0x33f   :  { %13872 = vst [vmem:[#allocation13_spill] sm:$0xff] %v9822_v56  ;;  %v8166_v30 = vpop.f32.mrf.mxu1  ;;  %1872 = vperm.xlu0 %8613, %v9822_v56  }
 0x340   :  { %v8167_v11 = vadd.f32 %v8166_v30, %v8165_v49  ;;  %8636 = vset.pattern.permute.xlu1 %v13704_v16  ;;  %v9859_v49 = vcvt.f32.s32 %v8522_v18  ;;  %vm1712_vm1 = vcmp.ne.s32.totalorder %v1680_v44, 0  ;;  %v8770_v18 = vld [vmem:[%s13691_s5 + $0x70] sm:$0xf] }
 0x341   :  { %1839 = vperm.xlu1 %8636, %v9826_v42   ;;  %v1744_v30 = vsel %vm1712_vm1, %v8146_v61, 0.0  ;;  %vm1622_vm11 = vcmp.gt.bf16.partialorder %v8770_v18, 0 }
 0x342   :  { %v1751_v40 = vsel %vm1719_vm12, %v8167_v11, 0.0  ;;  %13876 = vst [vmem:[#allocation17_spill] sm:$0xff] %v9859_v49  ;;  %v1650_v11 = vsel %vm1618_vm7, 65537, %v13704_v16  ;;  %v8526_v52 = vtrunc.f32 %v1744_v30  ;;  %v1654_v29 = vsel %vm1622_vm11, 65537, %v13704_v16 }
 0x343   :  { %v8540_v53 = vtrunc.f32 %v1751_v40  ;;  %v1682_v34 = vunpack.c.l.b16 %v1650_v11  ;;  %v1686_v30 = vunpack.c.l.b16 %v1654_v29  ;;  %v8771_v11 = vld [vmem:[%s13691_s5 + $0x78] sm:$0xf] }
 0x344   :  { %v9878_v40 = vcvt.f32.s32 %v8526_v52  ;;  %vm1624_vm12 = vcmp.gt.bf16.partialorder %v8771_v11, 0  ;;  %v8164_v52 = vadd.f32 %v9818_v33, %v9816_v2 }
 0x345   :  { %v9835_v14 = vcvt.f32.s32 %v8540_v53  ;;  %8637 = vset.pattern.permute.xlu1 %v13709_v36  ;;  %vm1714_vm8 = vcmp.ne.s32.totalorder %v1682_v34, 0  ;;  %v8769_v53 = vld [vmem:[%s13691_s5 + $0x68] sm:$0xf]  ;;  %vm1718_vm13 = vcmp.ne.s32.totalorder %v1686_v30, 0  ;;  %v8772_v30 = vld [vmem:[%s13691_s5 + $0x7c] sm:$0xf] }
 0x346   :  { %2377 = vperm.xlu1 %8637, %v9719_v45   ;;  %13879 = vst [vmem:[#allocation20_spill] sm:$0xff] %v9878_v40  ;;  %vm1620_vm9 = vcmp.gt.bf16.partialorder %v8769_v53, 0  ;;  %v1746_v1 = vsel %vm1714_vm8, %v8152_v48, 0.0  ;;  %v1656_v53 = vsel %vm1624_vm12, 65537, %v13704_v16  ;;  %vm1625_vm1 = vcmp.gt.bf16.partialorder %v8772_v30, 0 }
 0x347   :  { %13874 = vst [vmem:[#allocation15_spill] sm:$0xff] %v9835_v14  ;;  %1878 = vperm.xlu0 %8613, %v9835_v14   ;;  %v1652_v31 = vsel %vm1620_vm9, 65537, %v13704_v16  ;;  %v8530_v20 = vtrunc.f32 %v1746_v1  ;;  %v8168_v1 = vpop.f32.mrf.mxu1 }
 0x348   :  { %v1684_v10 = vunpack.c.l.b16 %v1652_v31  ;;  %v1750_v31 = vsel %vm1718_vm13, %v8164_v52, 0.0 }
 0x349   :  { %v9897_v21 = vcvt.f32.s32 %v8530_v20  ;;  %v1688_v20 = vunpack.c.l.b16 %v1656_v53  ;;  %v8538_v2 = vtrunc.f32 %v1750_v31  ;;  %v8169_v33 = vpop.f32.mrf.mxu1 }
 0x34a   :  { %8638 = vset.pattern.permute.xlu1 %v13704_v16  ;;  %vm1716_vm10 = vcmp.ne.s32.totalorder %v1684_v10, 0 }
 0x34b   :  { %1845 = vperm.xlu1 %8638, %v9842_v19   ;;  %8653 = vset.pattern.permute.xlu0 %v13714_v38  ;;  %13882 = vst [vmem:[#allocation23_spill] sm:$0xff] %v9897_v21  ;;  %v1748_v61 = vsel %vm1716_vm10, %v8158_v50, 0.0  ;;  %v8170_v50 = vadd.f32 %v8169_v33, %v8168_v1  ;;  %vm1720_vm15 = vcmp.ne.s32.totalorder %v1688_v20, 0  ;;  %v9932_v18 = vcvt.f32.s32 %v8538_v2  ;;  %v8171_v52 = vpop.f32.mrf.mxu1 }
 0x34c   :  { %3399 = vperm.xlu0 %8653, %v9612_v63   ;;  %v8534_v3 = vtrunc.f32 %v1748_v61  ;;  %v1657_v1 = vsel %vm1625_vm1, 65537, %v13704_v16 }
 0x34d   :  { %13888 = vst [vmem:[#allocation29_spill] sm:$0xff] %v9932_v18  ;;  %v1752_v29 = vsel %vm1720_vm15, %v8170_v50, 0.0  ;;  %v8172_v20 = vpop.f32.mrf.mxu1  ;;  %v1689_v2 = vunpack.c.l.b16 %v1657_v1 }
 0x34e   :  { %v9852_v23 = vpop.permute.xlu1 %2326  ;;  %v9918_v34 = vcvt.f32.s32 %v8534_v3  ;;  %v8542_v3 = vtrunc.f32 %v1752_v29  ;;  %v8173_v33 = vadd.f32 %v8172_v20, %v8171_v52  ;;  %v9956_v50 = vpop.permute.xlu0 %1791 }
 0x34f   :  { %8639 = vset.pattern.permute.xlu1 %v13709_v36  ;;  %13893 = vst [vmem:[#allocation34_spill] sm:$0xff] %v9956_v50  ;;  %vm1721_vm7 = vcmp.ne.s32.totalorder %v1689_v2, 0 }
 0x350   :  { %2383 = vperm.xlu1 %8639, %v9740_v35   ;;  %3408 = vperm.xlu0 %8653, %v9657_v28   ;;  %13885 = vst [vmem:[#allocation26_spill] sm:$0xff] %v9918_v34  ;;  %v9947_v53 = vcvt.f32.s32 %v8542_v3  ;;  %v1753_v3 = vsel %vm1721_vm7, %v8173_v33, 0.0 }
 0x351   :  { %v8544_v54 = vtrunc.f32 %v1753_v3 }
 0x352   :  { %13891 = vst [vmem:[#allocation32_spill] sm:$0xff] %v9947_v53 }
 0x353   :  { %v9864_v25 = vpop.permute.xlu1 %1794  ;;  %v9971_v20 = vcvt.f32.s32 %v8544_v54 }
 0x354   :  { %13877 = vst [vmem:[#allocation18_spill] sm:$0xff] %v9864_v25  ;;  %8640 = vset.pattern.permute.xlu1 %v13704_v16  ;;  %3414 = vperm.xlu0 %8653, %v9683_v26  }
 0x355   :  { %1851 = vperm.xlu1 %8640, %v9859_v49   ;;  %13898 = vst [vmem:[#allocation39_spill] sm:$0xff] %v9971_v20 }
 0x358   :  { %v9870_v55 = vpop.permute.xlu1 %2864  ;;  %8654 = vset.pattern.permute.xlu0 %v13709_v36 }
 0x359   :  { %13878 = vst [vmem:[#allocation19_spill] sm:$0xff] %v9870_v55  ;;  %8641 = vset.pattern.permute.xlu1 %v13709_v36  ;;  %2329 = vperm.xlu0 %8654, %v9612_v63  }
 0x35a   :  { %2389 = vperm.xlu1 %8641, %v9759_v0   ;;  %v9963_v30 = vpop.permute.xlu0 %1800 }
 0x35b   :  { %13895 = vst [vmem:[#allocation36_spill] sm:$0xff] %v9963_v30 }
 0x35d   :  { %v9883_v32 = vpop.permute.xlu1 %1797  ;;  %2338 = vperm.xlu0 %8654, %v9657_v28  }
 0x35e   :  { %13880 = vst [vmem:[#allocation21_spill] sm:$0xff] %v9883_v32  ;;  %8642 = vset.pattern.permute.xlu1 %v13704_v16 }
 0x35f   :  { %1857 = vperm.xlu1 %8642, %v9878_v40  }
 0x361   :  { %2344 = vperm.xlu0 %8654, %v9683_v26  }
 0x362   :  { %v9890_v59 = vpop.permute.xlu1 %2332  ;;  %v9969_v52 = vpop.permute.xlu0 %1806 }
 0x363   :  { %13881 = vst [vmem:[#allocation22_spill] sm:$0xff] %v9890_v59  ;;  %8643 = vset.pattern.permute.xlu1 %v13709_v36  ;;  %13897 = vst [vmem:[#allocation38_spill] sm:$0xff] %v9969_v52 }
 0x364   :  { %2395 = vperm.xlu1 %8643, %v9781_v17  }
 0x365   :  { %2350 = vperm.xlu0 %8654, %v9713_v57  }
 0x367   :  { %v9902_v44 = vpop.permute.xlu1 %2867 }
 0x368   :  { %13883 = vst [vmem:[#allocation24_spill] sm:$0xff] %v9902_v44  ;;  %8644 = vset.pattern.permute.xlu1 %v13704_v16 }
 0x369   :  { %1863 = vperm.xlu1 %8644, %v9897_v21   ;;  %2356 = vperm.xlu0 %8654, %v9749_v15  }
 0x36a   :  { %v9977_v33 = vpop.permute.xlu0 %1812 }
 0x36b   :  { %13900 = vst [vmem:[#allocation41_spill] sm:$0xff] %v9977_v33 }
 0x36c   :  { %v9908_v12 = vpop.permute.xlu1 %2335 }
 0x36d   :  { %13884 = vst [vmem:[#allocation25_spill] sm:$0xff] %v9908_v12  ;;  %8645 = vset.pattern.permute.xlu1 %v13709_v36  ;;  %2362 = vperm.xlu0 %8654, %v9771_v22  }
 0x36e   :  { %2401 = vperm.xlu1 %8645, %v9804_v46  }
 0x371   :  { %v9920_v48 = vpop.permute.xlu1 %1803  ;;  %2368 = vperm.xlu0 %8654, %v9801_v5  }
 0x372   :  { %13886 = vst [vmem:[#allocation27_spill] sm:$0xff] %v9920_v48  ;;  %8646 = vset.pattern.permute.xlu1 %v13704_v16  ;;  %v9983_v8 = vpop.permute.xlu0 %1818 }
 0x373   :  { %1869 = vperm.xlu1 %8646, %v9918_v34   ;;  %13902 = vst [vmem:[#allocation43_spill] sm:$0xff] %v9983_v8 }
 0x375   :  { %2374 = vperm.xlu0 %8654, %v9826_v42  }
 0x376   :  { %v9927_v10 = vpop.permute.xlu1 %2873 }
 0x377   :  { %13887 = vst [vmem:[#allocation28_spill] sm:$0xff] %v9927_v10  ;;  %8647 = vset.pattern.permute.xlu1 %v13709_v36 }
 0x378   :  { %2407 = vperm.xlu1 %8647, %v9822_v56  }
 0x379   :  { %2380 = vperm.xlu0 %8654, %v9842_v19  }
 0x37a   :  { %v9988_v54 = vpop.permute.xlu0 %1824 }
 0x37b   :  { %v9934_v61 = vpop.permute.xlu1 %2341  ;;  %13903 = vst [vmem:[#allocation44_spill] sm:$0xff] %v9988_v54 }
 0x37c   :  { %13889 = vst [vmem:[#allocation30_spill] sm:$0xff] %v9934_v61  ;;  %8648 = vset.pattern.permute.xlu1 %v13704_v16 }
 0x37d   :  { %1875 = vperm.xlu1 %8648, %v9932_v18   ;;  %2386 = vperm.xlu0 %8654, %v9859_v49  }
 0x380   :  { %v9942_v11 = vpop.permute.xlu1 %1809 }
 0x381   :  { %13890 = vst [vmem:[#allocation31_spill] sm:$0xff] %v9942_v11  ;;  %8649 = vset.pattern.permute.xlu1 %v13709_v36  ;;  %2392 = vperm.xlu0 %8654, %v9878_v40  }
 0x382   :  { %2413 = vperm.xlu1 %8649, %v9835_v14  }
 0x385   :  { %v9950_v31 = vpop.permute.xlu1 %2879  ;;  %2398 = vperm.xlu0 %8654, %v9897_v21  }
 0x386   :  { %13892 = vst [vmem:[#allocation33_spill] sm:$0xff] %v9950_v31  ;;  %8650 = vset.pattern.permute.xlu1 %v13704_v16 }
 0x387   :  { %1881 = vperm.xlu1 %8650, %v9947_v53  }
 0x389   :  { %2404 = vperm.xlu0 %8654, %v9918_v34  }
 0x38a   :  { %v9958_v29 = vpop.permute.xlu1 %2347 }
 0x38b   :  { %13894 = vst [vmem:[#allocation35_spill] sm:$0xff] %v9958_v29  ;;  %8651 = vset.pattern.permute.xlu1 %v13710_v41 }
 0x38c   :  { %2891 = vperm.xlu1 %8651, %v9749_v15  }
 0x38d   :  { %2410 = vperm.xlu0 %8654, %v9932_v18  }
 0x38f   :  { %v9965_v1 = vpop.permute.xlu1 %1815 }
 0x390   :  { %13896 = vst [vmem:[#allocation37_spill] sm:$0xff] %v9965_v1  ;;  %2897 = vperm.xlu1 %8651, %v9771_v22  }
 0x391   :  { %2416 = vperm.xlu0 %8654, %v9947_v53  }
 0x394   :  { %2903 = vperm.xlu1 %8651, %v9801_v5   ;;  %v9974_v2 = vpop.permute.xlu1 %2885 }
 0x395   :  { %13899 = vst [vmem:[#allocation40_spill] sm:$0xff] %v9974_v2  ;;  %8656 = vset.pattern.permute.xlu0 %v13704_v16  ;;  %v9994_v16 = vpop.permute.xlu0 %1830  ;;  %v13910_v2 = vmov 3  }
 0x396   :  { %1884 = vperm.xlu0 %8656, %v9971_v20   ;;  %13905 = vst [vmem:[#allocation46_spill] sm:$0xff] %v9994_v16 }
 0x398   :  { %2909 = vperm.xlu1 %8651, %v9826_v42  }
 0x399   :  { %v9981_v3 = vpop.permute.xlu1 %2353  ;;  %v10000_v51 = vpop.permute.xlu0 %1836 }
 0x39a   :  { %13901 = vst [vmem:[#allocation42_spill] sm:$0xff] %v9981_v3  ;;  %8659 = vset.pattern.permute.xlu0 %v13714_v38  ;;  %13907 = vst [vmem:[#allocation48_spill] sm:$0xff] %v10000_v51  ;;  %v10013_v38 = vadd.s32 128, %v9065_v39  ;;  %vm1931_vm12 = vcmp.eq.s32.totalorder %v10000_v51, %v9070_v43 }
 0x39b   :  { %3420 = vperm.xlu0 %8659, %v9713_v57  }
 0x39c   :  { %2915 = vperm.xlu1 %8651, %v9842_v19   ;;  %13909 = vst [vmem:[#allocation50_spill] sm:$0xff] %v10013_v38  ;;  %v10020_v44 = vadd.s32 1, %v10013_v38  ;;  %v10038_v38 = vld [vmem:[%s13694_s4] sm:$0xff] }
 0x39d   :  { %v10006_v41 = vpop.permute.xlu0 %1842 }
 0x39e   :  { %v9990_v6 = vpop.permute.xlu1 %1821  ;;  %vm1932_vm10 = vcmp.eq.s32.totalorder %v10000_v51, %v10020_v44  ;;  %vm1926_vm1 = vcmp.eq.s32.totalorder %v9994_v16, %v10020_v44 }
 0x39f   :  { %13904 = vst [vmem:[#allocation45_spill] sm:$0xff] %v9990_v6  ;;  %3426 = vperm.xlu0 %8659, %v9749_v15  }
 0x3a0   :  { %2921 = vperm.xlu1 %8651, %v9859_v49  }
 0x3a1   :  { %v10015_v55 = vpop.permute.xlu0 %1848 }
 0x3a3   :  { %v9996_v7 = vpop.permute.xlu1 %2359  ;;  %3432 = vperm.xlu0 %8659, %v9771_v22  }
 0x3a4   :  { %13906 = vst [vmem:[#allocation47_spill] sm:$0xff] %v9996_v7  ;;  %2927 = vperm.xlu1 %8651, %v9878_v40  }
 0x3a5   :  { %v10022_v10 = vpop.permute.xlu0 %1854 }
 0x3a7   :  { %3438 = vperm.xlu0 %8659, %v9801_v5  }
 0x3a8   :  { %2933 = vperm.xlu1 %8651, %v9897_v21   ;;  %v10004_v36 = vpop.permute.xlu1 %1827 }
 0x3a9   :  { %13908 = vst [vmem:[#allocation49_spill] sm:$0xff] %v10004_v36  ;;  %vm1923_vm11 = vcmp.eq.s32.totalorder %v10004_v36, %v10020_v44  ;;  %vm1922_vm7 = vcmp.eq.s32.totalorder %v10004_v36, %v9070_v43  ;;  %v13914_v36 = vmov 2  }
 0x3ab   :  { %3444 = vperm.xlu0 %8659, %v9826_v42   ;;  %v10045_v42 = vcombine.high %v10038_v38, %v10038_v38 }
 0x3ac   :  { %2939 = vperm.xlu1 %8651, %v9918_v34  }
 0x3ad   :  { %v10010_v47 = vpop.permute.xlu1 %2365  ;;  %13911 = vst [vmem:[#allocation51_spill] sm:$0xff] %v10045_v42  ;;  %2261 = vmatprep.mubr.bf16.mxu0 %v10045_v42 }
 0x3af   :  { %3450 = vperm.xlu0 %8659, %v9842_v19   ;;  %v13912_v19 = vmov 1.0|1.0  }
 0x3b0   :  { %2945 = vperm.xlu1 %8651, %v9932_v18  }
 0x3b2   :  { %v10024_v31 = vpop.permute.xlu1 %1833 }
 0x3b3   :  { %vm1928_vm8 = vcmp.eq.s32.totalorder %v10024_v31, %v9070_v43  ;;  %3456 = vperm.xlu0 %8659, %v9859_v49   ;;  %vm1929_vm9 = vcmp.eq.s32.totalorder %v10024_v31, %v10020_v44  ;;  %v10053_v49 = vpop.permute.xlu0 %1860 }
 0x3b4   :  { %8652 = vset.pattern.permute.xlu1 %v13910_v2  ;;  %vm6560_vm13 = vmpackc.low %vm1932_vm10, %vm1929_vm9  ;;  %vm1925_vm10 = vcmp.eq.s32.totalorder %v9994_v16, %v9070_v43 }
 0x3b5   :  { %3396 = vperm.xlu1 %8652, %v9596_v24   ;;  %6561 = vmatprep.subr.msk.bf16.mxu0 %vm6560_vm13, %v13912_v19  ;;  %vm6562_vm15 = vmpackc.low %vm1931_vm12, %vm1928_vm8  ;;  %vm1917_vm8 = vcmp.eq.s32.totalorder %v9990_v6, %v10020_v44  ;;  %vm1916_vm13 = vcmp.eq.s32.totalorder %v9990_v6, %v9070_v43 }
 0x3b6   :  { %6563 = vmatpush1.bf16.msk.msra.mxu0 %vm6562_vm15, %v13912_v19  ;;  %vm6564_vm9 = vmpackc.low %vm1926_vm1, %vm1923_vm11  ;;  %vm1920_vm11 = vcmp.eq.s32.totalorder %v9988_v54, %v10020_v44  ;;  %vm1911_vm1 = vcmp.eq.s32.totalorder %v9965_v1, %v10020_v44 }
 0x3b7   :  { %v10057_v51 = vpop.permute.xlu1 %2371  ;;  %3462 = vperm.xlu0 %8659, %v9878_v40   ;;  %6565 = vmatprep.subr.msk.bf16.mxu0 %vm6564_vm9, %v13912_v19  ;;  %vm6566_vm12 = vmpackc.low %vm1925_vm10, %vm1922_vm7  ;;  %v10070_v42 = vpop.permute.xlu0 %1866  ;;  %vm1919_vm7 = vcmp.eq.s32.totalorder %v9988_v54, %v9070_v43  ;;  %vm1914_vm10 = vcmp.eq.s32.totalorder %v9983_v8, %v10020_v44  ;;  %v10199_v40 = vld [vmem:[%s13694_s4 + $0x8] sm:$0xff] }
 0x3b8   :  { %13913 = vst [vmem:[#allocation52_spill] sm:$0xff] %v10057_v51  ;;  %vm6568_vm15 = vmpackc.low %vm1920_vm11, %vm1917_vm8  ;;  %vm1910_vm8 = vcmp.eq.s32.totalorder %v9965_v1, %v9070_v43  ;;  %vm1905_vm11 = vcmp.eq.s32.totalorder %v9942_v11, %v10020_v44 }
 0x3b9   :  { %3402 = vperm.xlu1 %8652, %v9624_v60   ;;  %vm6570_vm9 = vmpackc.low %vm1919_vm7, %vm1916_vm13  ;;  %vm1913_vm13 = vcmp.eq.s32.totalorder %v9983_v8, %v9070_v43  ;;  %vm1904_vm7 = vcmp.eq.s32.totalorder %v9942_v11, %v9070_v43  ;;  %13927 = vst [vmem:[#allocation64_spill] sm:$0xff] %v10199_v40 }
 0x3ba   :  { %6567 = vmatpush1.bf16.msk.msra.mxu0 %vm6566_vm12, %v13912_v19  ;;  %vm6572_vm12 = vmpackc.low %vm1914_vm10, %vm1911_vm1  ;;  %vm1908_vm1 = vcmp.eq.s32.totalorder %v9977_v33, %v10020_v44  ;;  %vm1899_vm10 = vcmp.eq.s32.totalorder %v9920_v48, %v10020_v44 }
 0x3bb   :  { %3468 = vperm.xlu0 %8659, %v9897_v21   ;;  %6569 = vmatprep.subr.msk.bf16.mxu0 %vm6568_vm15, %v13912_v19  ;;  %v10086_v6 = vpop.permute.xlu0 %1872  ;;  %vm6574_vm15 = vmpackc.low %vm1913_vm13, %vm1910_vm8  ;;  %vm1902_vm13 = vcmp.eq.s32.totalorder %v9969_v52, %v10020_v44 }
 0x3bc   :  { %v10079_v16 = vpop.permute.xlu1 %1839 }
 0x3bd   :  { %3405 = vperm.xlu1 %8652, %v9619_v13  }
 0x3be   :  { %6571 = vmatpush1.bf16.msk.msra.mxu0 %vm6570_vm9, %v13912_v19  ;;  %vm6576_vm9 = vmpackc.low %vm1908_vm1, %vm1905_vm11  ;;  %vm1893_vm1 = vcmp.eq.s32.totalorder %v9883_v32, %v10020_v44 }
 0x3bf   :  { %8660 = vset.pattern.permute.xlu0 %v13914_v36  ;;  %6573 = vmatprep.subr.msk.bf16.mxu0 %vm6572_vm12, %v13912_v19  ;;  %vm1907_vm12 = vcmp.eq.s32.totalorder %v9977_v33, %v9070_v43  ;;  %vm6580_vm11 = vmpackc.low %vm1902_vm13, %vm1899_vm10  ;;  %vm1890_vm13 = vcmp.eq.s32.totalorder %v9864_v25, %v10020_v44 }
 0x3c0   :  { %2861 = vperm.xlu0 %8660, %v9596_v24   ;;  %vm6578_vm8 = vmpackc.low %vm1907_vm12, %vm1904_vm7  ;;  %vm1901_vm7 = vcmp.eq.s32.totalorder %v9969_v52, %v9070_v43  ;;  %vm1896_vm12 = vcmp.eq.s32.totalorder %v9963_v30, %v10020_v44 }
 0x3c1   :  { %3411 = vperm.xlu1 %8652, %v9631_v4   ;;  %v10097_v1 = vpop.permute.xlu1 %2377  ;;  %vm6584_vm10 = vmpackc.low %vm1896_vm12, %vm1893_vm1  ;;  %vm1887_vm1 = vcmp.eq.s32.totalorder %v9956_v50, %v10020_v44  ;;  %vm1886_vm12 = vcmp.eq.s32.totalorder %v9956_v50, %v9070_v43 }
 0x3c2   :  { %13915 = vst [vmem:[#allocation53_spill] sm:$0xff] %v10097_v1  ;;  %6575 = vmatpush1.bf16.msk.msra.mxu0 %vm6574_vm15, %v13912_v19  ;;  %v10104_v54 = vpop.permute.xlu0 %1878  ;;  %vm1898_vm15 = vcmp.eq.s32.totalorder %v9920_v48, %v9070_v43 }
 0x3c3   :  { %6577 = vmatprep.subr.msk.bf16.mxu0 %vm6576_vm9, %v13912_v19  ;;  %vm6582_vm9 = vmpackc.low %vm1901_vm7, %vm1898_vm15  ;;  %vm1895_vm15 = vcmp.eq.s32.totalorder %v9963_v30, %v9070_v43  ;;  %vm1889_vm7 = vcmp.eq.s32.totalorder %v9864_v25, %v9070_v43 }
 0x3c4   :  { %2870 = vperm.xlu0 %8660, %v9619_v13  }
 0x3c5   :  { %8655 = vset.pattern.permute.xlu1 %v13914_v36  ;;  %v13917_v36 = vmov 1  }
 0x3c6   :  { %2951 = vperm.xlu1 %8655, %v9947_v53   ;;  %v10118_v1 = vpop.permute.xlu1 %1845  ;;  %6579 = vmatpush1.bf16.msk.msra.mxu0 %vm6578_vm8, %v13912_v19  ;;  %vm1892_vm8 = vcmp.eq.s32.totalorder %v9883_v32, %v9070_v43 }
 0x3c7   :  { %6581 = vmatprep.subr.msk.bf16.mxu0 %vm6580_vm11, %v13912_v19  ;;  %v10122_v33 = vpop.permute.xlu0 %3399  ;;  %vm6586_vm11 = vmpackc.low %vm1895_vm15, %vm1892_vm8  ;;  %vm2467_vm15 = vcmp.eq.s32.totalorder %v10057_v51, %v10020_v44 }
 0x3c8   :  { %13916 = vst [vmem:[#allocation54_spill] sm:$0xff] %v10122_v33  ;;  %2876 = vperm.xlu0 %8660, %v9631_v4   ;;  %vm6590_vm8 = vmpackc.low %vm1889_vm7, %vm1886_vm12  ;;  %vm2461_vm12 = vcmp.eq.s32.totalorder %v10010_v47, %v10020_v44 }
 0x3ca   :  { %8657 = vset.pattern.permute.xlu1 %v13917_v36  ;;  %6583 = vmatpush1.bf16.msk.msra.mxu0 %vm6582_vm9, %v13912_v19  ;;  %vm6588_vm9 = vmpackc.low %vm1890_vm13, %vm1887_vm1 }
 0x3cb   :  { %2419 = vperm.xlu1 %8657, %v9971_v20   ;;  %v10136_v33 = vpop.permute.xlu1 %2383  ;;  %6585 = vmatprep.subr.msk.bf16.mxu0 %vm6584_vm10, %v13912_v19  ;;  %v10139_v52 = vpop.permute.xlu0 %3408 }
 0x3cc   :  { %13918 = vst [vmem:[#allocation55_spill] sm:$0xff] %v10136_v33  ;;  %13919 = vst [vmem:[#allocation56_spill] sm:$0xff] %v10139_v52  ;;  %2882 = vperm.xlu0 %8660, %v9644_v37  }
 0x3ce   :  { %6587 = vmatpush1.bf16.msk.msra.mxu0 %vm6586_vm11, %v13912_v19  ;;  %vm2466_vm11 = vcmp.eq.s32.totalorder %v10057_v51, %v9070_v43 }
 0x3cf   :  { %8658 = vset.pattern.permute.xlu1 %v13910_v2  ;;  %6589 = vmatprep.subr.msk.bf16.mxu0 %vm6588_vm9, %v13912_v19  ;;  %v10153_v36 = vpop.permute.xlu0 %3414 }
 0x3d0   :  { %13920 = vst [vmem:[#allocation57_spill] sm:$0xff] %v10153_v36  ;;  %3417 = vperm.xlu1 %8658, %v9644_v37   ;;  %v10158_v52 = vpop.permute.xlu1 %1851  ;;  %2888 = vperm.xlu0 %8660, %v9659_v9  }
 0x3d2   :  { %6591 = vmatpush1.bf16.msk.msra.mxu0 %vm6590_vm8, %v13912_v19 }
 0x3d4   :  { %3423 = vperm.xlu1 %8658, %v9659_v9   ;;  %2894 = vperm.xlu0 %8660, %v9672_v62   ;;  %v10164_v33 = vpop.permute.xlu0 %2329 }
 0x3d5   :  { %13921 = vst [vmem:[#allocation58_spill] sm:$0xff] %v10164_v33  ;;  %v10166_v25 = vpop.permute.xlu1 %2389 }
 0x3d6   :  { %13922 = vst [vmem:[#allocation59_spill] sm:$0xff] %v10166_v25 }
 0x3d8   :  { %3429 = vperm.xlu1 %8658, %v9672_v62   ;;  %2900 = vperm.xlu0 %8660, %v9688_v58   ;;  %v10170_v36 = vpop.permute.xlu0 %2338 }
 0x3da   :  { %v10172_v50 = vpop.permute.xlu1 %1857 }
 0x3dc   :  { %3435 = vperm.xlu1 %8658, %v9688_v58   ;;  %2906 = vperm.xlu0 %8660, %v9703_v27   ;;  %v10176_v30 = vpop.permute.xlu0 %2344 }
 0x3dd   :  { %13923 = vst [vmem:[#allocation60_spill] sm:$0xff] %v10176_v30 }
 0x3df   :  { %v10178_v32 = vpop.permute.xlu1 %2395 }
 0x3e0   :  { %13924 = vst [vmem:[#allocation61_spill] sm:$0xff] %v10178_v32  ;;  %3441 = vperm.xlu1 %8658, %v9703_v27   ;;  %2912 = vperm.xlu0 %8660, %v9719_v45   ;;  %v10182_v25 = vpop.permute.xlu0 %2350 }
 0x3e1   :  { %13925 = vst [vmem:[#allocation62_spill] sm:$0xff] %v10182_v25 }
 0x3e4   :  { %3447 = vperm.xlu1 %8658, %v9719_v45   ;;  %v10185_v48 = vpop.permute.xlu1 %1863  ;;  %2918 = vperm.xlu0 %8660, %v9740_v35   ;;  %v10188_v11 = vpop.permute.xlu0 %2356  ;;  %v10203_v45 = vcombine.high %v10199_v40, %v10199_v40 }
 0x3e5   :  { %13926 = vst [vmem:[#allocation63_spill] sm:$0xff] %v10188_v11 }
 0x3e6   :  { %13928 = vst [vmem:[#allocation65_spill] sm:$0xff] %v10203_v45  ;;  %2796 = vmatprep.mubr.bf16.mxu1 %v10203_v45 }
 0x3e8   :  { %3453 = vperm.xlu1 %8658, %v9740_v35   ;;  %2924 = vperm.xlu0 %8660, %v9759_v0   ;;  %v10192_v8 = vpop.permute.xlu0 %2362 }
 0x3e9   :  { %v10194_v32 = vpop.permute.xlu1 %2401  ;;  %vm2458_vm7 = vcmp.eq.s32.totalorder %v10192_v8, %v10020_v44  ;;  %vm2457_vm8 = vcmp.eq.s32.totalorder %v10192_v8, %v9070_v43 }
 0x3ec   :  { %3459 = vperm.xlu1 %8658, %v9759_v0   ;;  %2930 = vperm.xlu0 %8660, %v9781_v17   ;;  %v10207_v35 = vpop.permute.xlu0 %2368 }
 0x3ed   :  { %13929 = vst [vmem:[#allocation66_spill] sm:$0xff] %v10207_v35  ;;  %vm2463_vm10 = vcmp.eq.s32.totalorder %v10207_v35, %v9070_v43  ;;  %vm2464_vm13 = vcmp.eq.s32.totalorder %v10207_v35, %v10020_v44 }
 0x3ee   :  { %v10218_v40 = vpop.permute.xlu1 %1869  ;;  %vm6754_vm1 = vmpackc.low %vm2467_vm15, %vm2464_vm13  ;;  %vm2460_vm15 = vcmp.eq.s32.totalorder %v10010_v47, %v9070_v43 }
 0x3ef   :  { %6755 = vmatprep.subr.msk.bf16.mxu1 %vm6754_vm1, %v13912_v19  ;;  %vm6756_vm9 = vmpackc.low %vm2466_vm11, %vm2463_vm10  ;;  %vm2452_vm10 = vcmp.eq.s32.totalorder %v10188_v11, %v10020_v44  ;;  %vm2455_vm1 = vcmp.eq.s32.totalorder %v9996_v7, %v10020_v44 }
 0x3f0   :  { %3465 = vperm.xlu1 %8658, %v9781_v17   ;;  %2936 = vperm.xlu0 %8660, %v9804_v46   ;;  %v10225_v35 = vpop.permute.xlu0 %2374  ;;  %vm6758_vm13 = vmpackc.low %vm2461_vm12, %vm2458_vm7  ;;  %vm2451_vm7 = vcmp.eq.s32.totalorder %v10188_v11, %v9070_v43  ;;  %vm2446_vm12 = vcmp.eq.s32.totalorder %v10182_v25, %v10020_v44 }
 0x3f1   :  { %13930 = vst [vmem:[#allocation67_spill] sm:$0xff] %v10225_v35  ;;  %6757 = vmatpush1.bf16.msk.msra.mxu1 %vm6756_vm9, %v13912_v19  ;;  %vm6760_vm11 = vmpackc.low %vm2460_vm15, %vm2457_vm8  ;;  %vm2445_vm15 = vcmp.eq.s32.totalorder %v10182_v25, %v9070_v43 }
 0x3f2   :  { %6759 = vmatprep.subr.msk.bf16.mxu1 %vm6758_vm13, %v13912_v19  ;;  %vm6762_vm9 = vmpackc.low %vm2455_vm1, %vm2452_vm10  ;;  %vm2454_vm13 = vcmp.eq.s32.totalorder %v9996_v7, %v9070_v43  ;;  %vm2449_vm10 = vcmp.eq.s32.totalorder %v9981_v3, %v10020_v44  ;;  %vm2440_vm1 = vcmp.eq.s32.totalorder %v10176_v30, %v10020_v44 }
 0x3f3   :  { %v10237_v45 = vpop.permute.xlu1 %2407  ;;  %vm6764_vm8 = vmpackc.low %vm2454_vm13, %vm2451_vm7  ;;  %vm2443_vm13 = vcmp.eq.s32.totalorder %v9958_v29, %v10020_v44 }
 0x3f4   :  { %3471 = vperm.xlu1 %8658, %v9804_v46   ;;  %2942 = vperm.xlu0 %8660, %v9822_v56   ;;  %v10241_v35 = vpop.permute.xlu0 %2380 }
 0x3f5   :  { %13931 = vst [vmem:[#allocation68_spill] sm:$0xff] %v10241_v35  ;;  %6761 = vmatpush1.bf16.msk.msra.mxu1 %vm6760_vm11, %v13912_v19  ;;  %vm6766_vm11 = vmpackc.low %vm2449_vm10, %vm2446_vm12  ;;  %vm2439_vm12 = vcmp.eq.s32.totalorder %v10176_v30, %v9070_v43  ;;  %vm2434_vm10 = vcmp.eq.s32.totalorder %v10170_v36, %v10020_v44 }
 0x3f6   :  { %6763 = vmatprep.subr.msk.bf16.mxu1 %vm6762_vm9, %v13912_v19  ;;  %vm2448_vm9 = vcmp.eq.s32.totalorder %v9981_v3, %v9070_v43  ;;  %v13932_v3 = vmov 4  }
 0x3f7   :  { %vm6768_vm7 = vmpackc.low %vm2448_vm9, %vm2445_vm15  ;;  %vm2442_vm15 = vcmp.eq.s32.totalorder %v9958_v29, %v9070_v43  ;;  %vm2433_vm9 = vcmp.eq.s32.totalorder %v10170_v36, %v9070_v43 }
 0x3f8   :  { %3477 = vperm.xlu1 %8658, %v9822_v56   ;;  %v10254_v35 = vpop.permute.xlu1 %1875  ;;  %2948 = vperm.xlu0 %8660, %v9835_v14   ;;  %v10257_v51 = vpop.permute.xlu0 %2386 }
 0x3f9   :  { %6765 = vmatpush1.bf16.msk.msra.mxu1 %vm6764_vm8, %v13912_v19  ;;  %vm6770_vm8 = vmpackc.low %vm2443_vm13, %vm2440_vm1  ;;  %vm2437_vm1 = vcmp.eq.s32.totalorder %v9934_v61, %v10020_v44  ;;  %vm2431_vm13 = vcmp.eq.s32.totalorder %v9908_v12, %v10020_v44 }
 0x3fa   :  { %6767 = vmatprep.subr.msk.bf16.mxu1 %vm6766_vm11, %v13912_v19  ;;  %vm6772_vm11 = vmpackc.low %vm2442_vm15, %vm2439_vm12  ;;  %vm2436_vm12 = vcmp.eq.s32.totalorder %v9934_v61, %v9070_v43  ;;  %vm2428_vm15 = vcmp.eq.s32.totalorder %v9890_v59, %v10020_v44 }
 0x3fc   :  { %3483 = vperm.xlu1 %8658, %v9835_v14   ;;  %2954 = vperm.xlu0 %8660, %v9971_v20   ;;  %v10271_v7 = vpop.permute.xlu0 %2392 }
 0x3fd   :  { %6769 = vmatpush1.bf16.msk.msra.mxu1 %vm6768_vm7, %v13912_v19  ;;  %v10278_v25 = vpop.permute.xlu1 %2413  ;;  %vm6774_vm7 = vmpackc.low %vm2437_vm1, %vm2434_vm10  ;;  %vm2430_vm10 = vcmp.eq.s32.totalorder %v9908_v12, %v9070_v43  ;;  %vm2425_vm1 = vcmp.eq.s32.totalorder %v10164_v33, %v10020_v44 }
 0x3fe   :  { %6771 = vmatprep.subr.msk.bf16.mxu1 %vm6770_vm8, %v13912_v19  ;;  %vm6776_vm8 = vmpackc.low %vm2436_vm12, %vm2433_vm9  ;;  %vm2427_vm9 = vcmp.eq.s32.totalorder %v9890_v59, %v9070_v43  ;;  %vm2422_vm12 = vcmp.eq.s32.totalorder %v9852_v23, %v10020_v44 }
 0x400   :  { %8663 = vset.pattern.permute.xlu1 %v13932_v3  ;;  %8661 = vset.pattern.permute.xlu0 %v13910_v2  ;;  %v10287_v11 = vpop.permute.xlu0 %2398 }
 0x401   :  { %6773 = vmatpush1.bf16.msk.msra.mxu1 %vm6772_vm11, %v13912_v19  ;;  %3934 = vperm.xlu1 %8663, %v9612_v63   ;;  %vm6778_vm11 = vmpackc.low %vm2431_vm13, %vm2428_vm15  ;;  %vm2424_vm13 = vcmp.eq.s32.totalorder %v10164_v33, %v9070_v43  ;;  %vm2421_vm15 = vcmp.eq.s32.totalorder %v9852_v23, %v9070_v43 }
 0x402   :  { %3474 = vperm.xlu0 %8661, %v9918_v34   ;;  %6775 = vmatprep.subr.msk.bf16.mxu1 %vm6774_vm7, %v13912_v19  ;;  %v10297_v29 = vpop.permute.xlu1 %1881  ;;  %vm6780_vm7 = vmpackc.low %vm2430_vm10, %vm2427_vm9 }
 0x403   :  { %vm6784_vm10 = vmpackc.low %vm2424_vm13, %vm2421_vm15  ;;  %vm1974_vm15 = vcmp.eq.s32.totalorder %v10104_v54, %v10020_v44 }
 0x404   :  { %v10303_v30 = vpop.permute.xlu0 %2404 }
 0x405   :  { %6777 = vmatpush1.bf16.msk.msra.mxu1 %vm6776_vm8, %v13912_v19  ;;  %3937 = vperm.xlu1 %8663, %v9624_v60   ;;  %vm6782_vm8 = vmpackc.low %vm2425_vm1, %vm2422_vm12  ;;  %vm1977_vm1 = vcmp.eq.s32.totalorder %v10297_v29, %v10020_v44  ;;  %vm1976_vm12 = vcmp.eq.s32.totalorder %v10297_v29, %v9070_v43 }
 0x406   :  { %3480 = vperm.xlu0 %8661, %v9932_v18   ;;  %6779 = vmatprep.subr.msk.bf16.mxu1 %vm6778_vm11, %v13912_v19 }
 0x407   :  { %v10317_v63 = vpop.permute.xlu1 %2891 }
 0x408   :  { %13933 = vst [vmem:[#allocation69_spill] sm:$0xff] %v10317_v63  ;;  %v10319_v61 = vpop.permute.xlu0 %2410 }
 0x409   :  { %6781 = vmatpush1.bf16.msk.msra.mxu1 %vm6780_vm7, %v13912_v19  ;;  %3943 = vperm.xlu1 %8663, %v9657_v28   ;;  %vm1971_vm7 = vcmp.eq.s32.totalorder %v10254_v35, %v10020_v44  ;;  %vm2505_vm2 = vcmp.eq.s32.totalorder %v10319_v61, %v9070_v43 }
 0x40a   :  { %3486 = vperm.xlu0 %8661, %v9947_v53   ;;  %6783 = vmatprep.subr.msk.bf16.mxu1 %vm6782_vm8, %v13912_v19  ;;  %vm6596_vm6 = vmpackc.low %vm1974_vm15, %vm1971_vm7  ;;  %vm1964_vm7 = vcmp.eq.s32.totalorder %v10218_v40, %v9070_v43 }
 0x40b   :  { %v10331_v63 = vpop.permute.xlu1 %2897 }
 0x40c   :  { %13934 = vst [vmem:[#allocation70_spill] sm:$0xff] %v10331_v63  ;;  %v10333_v59 = vpop.permute.xlu0 %2416 }
 0x40d   :  { %6785 = vmatpush1.bf16.msk.msra.mxu1 %vm6784_vm10, %v13912_v19  ;;  %3949 = vperm.xlu1 %8663, %v9683_v26   ;;  %vm1970_vm10 = vcmp.eq.s32.totalorder %v10254_v35, %v9070_v43  ;;  %vm2512_vm5 = vcmp.eq.s32.totalorder %v10333_v59, %v10020_v44 }
 0x40e   :  { %8662 = vset.pattern.permute.xlu0 %v13932_v3 }
 0x40f   :  { %3931 = vperm.xlu0 %8662, %v9596_v24   ;;  %v10339_v33 = vpop.permute.xlu1 %2903 }
 0x410   :  { %13935 = vst [vmem:[#allocation71_spill] sm:$0xff] %v10339_v33 }
 0x411   :  { %3955 = vperm.xlu1 %8663, %v9713_v57   ;;  %v10342_v12 = vpop.permute.xlu0 %1884 }
 0x412   :  { %vm1979_vm11 = vcmp.eq.s32.totalorder %v10342_v12, %v9070_v43  ;;  %vm1980_vm9 = vcmp.eq.s32.totalorder %v10342_v12, %v10020_v44 }
 0x413   :  { %3940 = vperm.xlu0 %8662, %v9619_v13   ;;  %v10355_v63 = vpop.permute.xlu1 %2909  ;;  %vm6592_vm13 = vmpackc.low %vm1980_vm9, %vm1977_vm1  ;;  %vm1965_vm1 = vcmp.eq.s32.totalorder %v10218_v40, %v10020_v44 }
 0x414   :  { %13936 = vst [vmem:[#allocation72_spill] sm:$0xff] %v10355_v63  ;;  %6593 = vmatprep.subr.msk.bf16.mxu0 %vm6592_vm13, %v13912_v19  ;;  %vm6594_vm8 = vmpackc.low %vm1979_vm11, %vm1976_vm12  ;;  %vm1973_vm11 = vcmp.eq.s32.totalorder %v10104_v54, %v9070_v43  ;;  %vm1968_vm12 = vcmp.eq.s32.totalorder %v10086_v6, %v10020_v44  ;;  %vm1959_vm13 = vcmp.eq.s32.totalorder %v10185_v48, %v10020_v44 }
 0x415   :  { %3961 = vperm.xlu1 %8663, %v9749_v15   ;;  %6595 = vmatpush2.bf16.msk.msra.mxu0 %vm6594_vm8, %v13912_v19  ;;  %vm6598_vm9 = vmpackc.low %vm1973_vm11, %vm1970_vm10  ;;  %vm1967_vm8 = vcmp.eq.s32.totalorder %v10086_v6, %v9070_v43  ;;  %vm1962_vm10 = vcmp.eq.s32.totalorder %v10070_v42, %v10020_v44 }
 0x416   :  { %6597 = vmatprep.subr.msk.bf16.mxu0 %vm6596_vm6, %v13912_v19  ;;  %v10365_v33 = vpop.permute.xlu0 %3420  ;;  %vm6600_vm6 = vmpackc.low %vm1968_vm12, %vm1965_vm1  ;;  %vm1958_vm1 = vcmp.eq.s32.totalorder %v10185_v48, %v9070_v43  ;;  %vm1961_vm12 = vcmp.eq.s32.totalorder %v10070_v42, %v9070_v43 }
 0x417   :  { %13937 = vst [vmem:[#allocation73_spill] sm:$0xff] %v10365_v33  ;;  %3946 = vperm.xlu0 %8662, %v9631_v4   ;;  %v10372_v63 = vpop.permute.xlu1 %2915  ;;  %vm6602_vm15 = vmpackc.low %vm1967_vm8, %vm1964_vm7 }
 0x418   :  { %13938 = vst [vmem:[#allocation74_spill] sm:$0xff] %v10372_v63  ;;  %vm6604_vm11 = vmpackc.low %vm1962_vm10, %vm1959_vm13  ;;  %vm1952_vm13 = vcmp.eq.s32.totalorder %v10172_v50, %v9070_v43  ;;  %vm1955_vm10 = vcmp.eq.s32.totalorder %v10053_v49, %v9070_v43 }
 0x419   :  { %3967 = vperm.xlu1 %8663, %v9771_v22   ;;  %6599 = vmatpush2.bf16.msk.msra.mxu0 %vm6598_vm9, %v13912_v19  ;;  %vm1953_vm9 = vcmp.eq.s32.totalorder %v10172_v50, %v10020_v44  ;;  %vm6606_vm7 = vmpackc.low %vm1961_vm12, %vm1958_vm1 }
 0x41a   :  { %6601 = vmatprep.subr.msk.bf16.mxu0 %vm6600_vm6, %v13912_v19  ;;  %v10381_v33 = vpop.permute.xlu0 %3426  ;;  %vm1956_vm6 = vcmp.eq.s32.totalorder %v10053_v49, %v10020_v44  ;;  %vm6610_vm1 = vmpackc.low %vm1955_vm10, %vm1952_vm13 }
 0x41b   :  { %13939 = vst [vmem:[#allocation75_spill] sm:$0xff] %v10381_v33  ;;  %3952 = vperm.xlu0 %8662, %v9644_v37   ;;  %v10388_v63 = vpop.permute.xlu1 %2921  ;;  %vm6608_vm8 = vmpackc.low %vm1956_vm6, %vm1953_vm9  ;;  %vm1946_vm9 = vcmp.eq.s32.totalorder %v10158_v52, %v9070_v43  ;;  %vm1949_vm6 = vcmp.eq.s32.totalorder %v10022_v10, %v9070_v43 }
 0x41c   :  { %13940 = vst [vmem:[#allocation76_spill] sm:$0xff] %v10388_v63  ;;  %vm6614_vm13 = vmpackc.low %vm1949_vm6, %vm1946_vm9 }
 0x41d   :  { %3976 = vperm.xlu1 %8663, %v9703_v27   ;;  %6603 = vmatpush2.bf16.msk.msra.mxu0 %vm6602_vm15, %v13912_v19  ;;  %vm1947_vm15 = vcmp.eq.s32.totalorder %v10158_v52, %v10020_v44 }
 0x41e   :  { %6605 = vmatprep.subr.msk.bf16.mxu0 %vm6604_vm11, %v13912_v19  ;;  %v10397_v33 = vpop.permute.xlu0 %3432  ;;  %vm1950_vm11 = vcmp.eq.s32.totalorder %v10022_v10, %v10020_v44 }
 0x41f   :  { %13941 = vst [vmem:[#allocation77_spill] sm:$0xff] %v10397_v33  ;;  %3958 = vperm.xlu0 %8662, %v9659_v9   ;;  %v10404_v63 = vpop.permute.xlu1 %2927  ;;  %vm6612_vm12 = vmpackc.low %vm1950_vm11, %vm1947_vm15  ;;  %vm1940_vm15 = vcmp.eq.s32.totalorder %v10118_v1, %v9070_v43  ;;  %vm1943_vm11 = vcmp.eq.s32.totalorder %v10015_v55, %v9070_v43 }
 0x420   :  { %13942 = vst [vmem:[#allocation78_spill] sm:$0xff] %v10404_v63  ;;  %vm6618_vm9 = vmpackc.low %vm1943_vm11, %vm1940_vm15 }
 0x421   :  { %4015 = vperm.xlu1 %8663, %v9932_v18   ;;  %6607 = vmatpush2.bf16.msk.msra.mxu0 %vm6606_vm7, %v13912_v19  ;;  %vm1941_vm7 = vcmp.eq.s32.totalorder %v10118_v1, %v10020_v44  ;;  %v10439_v18 = vadd.s32 256, %v9065_v39 }
 0x422   :  { %6609 = vmatprep.subr.msk.bf16.mxu0 %vm6608_vm8, %v13912_v19  ;;  %v10413_v33 = vpop.permute.xlu0 %3438  ;;  %vm1944_vm8 = vcmp.eq.s32.totalorder %v10015_v55, %v10020_v44 }
 0x423   :  { %13943 = vst [vmem:[#allocation79_spill] sm:$0xff] %v10413_v33  ;;  %3964 = vperm.xlu0 %8662, %v9672_v62   ;;  %v10420_v63 = vpop.permute.xlu1 %2933  ;;  %13947 = vst [vmem:[#allocation83_spill] sm:$0xff] %v10439_v18 }
 0x424   :  { %13944 = vst [vmem:[#allocation80_spill] sm:$0xff] %v10420_v63  ;;  %vm6616_vm10 = vmpackc.low %vm1944_vm8, %vm1941_vm7  ;;  %vm1934_vm7 = vcmp.eq.s32.totalorder %v10079_v16, %v9070_v43  ;;  %vm1937_vm8 = vcmp.eq.s32.totalorder %v10006_v41, %v9070_v43 }
 0x425   :  { %4009 = vperm.xlu1 %8663, %v9918_v34   ;;  %6611 = vmatpush2.bf16.msk.msra.mxu0 %vm6610_vm1, %v13912_v19  ;;  %vm1935_vm1 = vcmp.eq.s32.totalorder %v10079_v16, %v10020_v44  ;;  %vm6622_vm15 = vmpackc.low %vm1937_vm8, %vm1934_vm7 }
 0x426   :  { %6613 = vmatprep.subr.msk.bf16.mxu0 %vm6612_vm12, %v13912_v19  ;;  %v10429_v33 = vpop.permute.xlu0 %3444  ;;  %vm1938_vm12 = vcmp.eq.s32.totalorder %v10006_v41, %v10020_v44 }
 0x427   :  { %13945 = vst [vmem:[#allocation81_spill] sm:$0xff] %v10429_v33  ;;  %3973 = vperm.xlu0 %8662, %v9801_v5   ;;  %v10436_v63 = vpop.permute.xlu1 %2939  ;;  %vm6620_vm6 = vmpackc.low %vm1938_vm12, %vm1935_vm1 }
 0x428   :  { %13946 = vst [vmem:[#allocation82_spill] sm:$0xff] %v10436_v63  ;;  %v10458_v63 = vadd.s32 1, %v10439_v18 }
 0x429   :  { %4003 = vperm.xlu1 %8663, %v9897_v21   ;;  %6615 = vmatpush2.bf16.msk.msra.mxu0 %vm6614_vm13, %v13912_v19 }
 0x42a   :  { %6617 = vmatprep.subr.msk.bf16.mxu0 %vm6616_vm10, %v13912_v19  ;;  %v10448_v33 = vpop.permute.xlu0 %3450  ;;  %vm1981_vm13 = vcmp.eq.s32.totalorder %v10342_v12, %v10458_v63  ;;  %vm1978_vm10 = vcmp.eq.s32.totalorder %v10297_v29, %v10458_v63  ;;  %vm1930_vm1 = vcmp.eq.s32.totalorder %v10024_v31, %v10458_v63  ;;  %v13952_v29 = vld [vmem:[#allocation48_spill] sm:$0xff] }
 0x42b   :  { %13948 = vst [vmem:[#allocation84_spill] sm:$0xff] %v10448_v33  ;;  %4021 = vperm.xlu0 %8662, %v9947_v53   ;;  %v10455_v39 = vpop.permute.xlu1 %2945  ;;  %vm6640_vm11 = vmpackc.low %vm1981_vm13, %vm1978_vm10  ;;  %vm1933_vm12 = vcmp.eq.s32.totalorder %v13952_v29, %v10458_v63 }
 0x42c   :  { %vm6624_vm7 = vmpackc.low %vm1933_vm12, %vm1930_vm1 }
 0x42d   :  { %8664 = vset.pattern.permute.xlu1 %v13910_v2  ;;  %6619 = vmatpush2.bf16.msk.msra.mxu0 %vm6618_vm9, %v13912_v19  ;;  %v10481_v2 = vcombine.low %v10038_v38, %v10038_v38  ;;  %vm1972_vm9 = vcmp.eq.s32.totalorder %v10254_v35, %v10458_v63  ;;  %v13953_v38 = vld [vmem:[#allocation20_spill] sm:$0xff]  ;;  %v13956_v35 = vld [vmem:[#allocation51_spill] sm:$0xff] }
 0x42e   :  { %3489 = vperm.xlu1 %8664, %v9971_v20   ;;  %6621 = vmatprep.subr.msk.bf16.mxu0 %vm6620_vm6, %v13912_v19  ;;  %v10468_v33 = vpop.permute.xlu0 %3456  ;;  %vm1975_vm6 = vcmp.eq.s32.totalorder %v10104_v54, %v10458_v63  ;;  %v13959_v54 = vld [vmem:[#allocation17_spill] sm:$0xff] }
 0x42f   :  { %13949 = vst [vmem:[#allocation85_spill] sm:$0xff] %v10468_v33  ;;  %3970 = vperm.xlu0 %8662, %v9688_v58   ;;  %v13955_v33 = vld [vmem:[#allocation49_spill] sm:$0xff]  ;;  %vm6642_vm8 = vmpackc.low %vm1975_vm6, %vm1972_vm9 }
 0x430   :  { %v10475_v18 = vpop.permute.xlu1 %3396  ;;  %vm1924_vm13 = vcmp.eq.s32.totalorder %v13955_v33, %v10458_v63 }
 0x431   :  { %13950 = vst [vmem:[#allocation86_spill] sm:$0xff] %v10475_v18  ;;  %6623 = vmatpush2.bf16.msk.msra.mxu0 %vm6622_vm15, %v13912_v19  ;;  %vm1966_vm15 = vcmp.eq.s32.totalorder %v10218_v40, %v10458_v63  ;;  %v13962_v40 = vld [vmem:[#allocation44_spill] sm:$0xff] }
 0x432   :  { %8665 = vset.pattern.permute.xlu1 %v13932_v3  ;;  %8174 = vmatprep.subr.msk.bf16.mxu0 %vm6640_vm11, %v13912_v19  ;;  %v10488_v12 = vpop.permute.xlu0 %3462  ;;  %vm1969_vm11 = vcmp.eq.s32.totalorder %v10086_v6, %v10458_v63  ;;  %vm1921_vm6 = vcmp.eq.s32.totalorder %v13962_v40, %v10458_v63  ;;  %v13966_v40 = vld [vmem:[#allocation14_spill] sm:$0xff] }
 0x433   :  { %13951 = vst [vmem:[#allocation87_spill] sm:$0xff] %v10488_v12  ;;  %4018 = vperm.xlu0 %8662, %v9835_v14   ;;  %3997 = vperm.xlu1 %8665, %v13953_v38   ;;  %v13958_v12 = vld [vmem:[#allocation46_spill] sm:$0xff]  ;;  %vm6644_vm12 = vmpackc.low %vm1969_vm11, %vm1966_vm15 }
 0x434   :  { %v10496_v31 = vpop.permute.xlu1 %3402  ;;  %2262 = vmatmul.mubr.bf16.vlgmr.msra.gmra.mxu0 %v10481_v2  ;;  %vm1927_vm10 = vcmp.eq.s32.totalorder %v13958_v12, %v10458_v63  ;;  %v13963_v12 = vld [vmem:[#allocation16_spill] sm:$0xff] }
 0x435   :  { %13954 = vst [vmem:[#allocation48_spill] sm:$0xff] %v10496_v31  ;;  %8175 = vmatpush3.bf16.msk.msra.mxu0 %vm6624_vm7, %v13912_v19  ;;  %2302 = vmatprep.mubr.bf16.mxu0 %v13956_v35  ;;  %vm6626_vm1 = vmpackc.low %vm1927_vm10, %vm1924_vm13  ;;  %v13961_v35 = vld [vmem:[#allocation45_spill] sm:$0xff]  ;;  %vm1960_vm7 = vcmp.eq.s32.totalorder %v10185_v48, %v10458_v63  ;;  %v13965_v48 = vld [vmem:[#allocation43_spill] sm:$0xff] }
 0x436   :  { %8176 = vmatprep.subr.msk.bf16.mxu0 %vm6642_vm8, %v13912_v19  ;;  %v10506_v29 = vpop.permute.xlu0 %3468  ;;  %vm1918_vm9 = vcmp.eq.s32.totalorder %v13961_v35, %v10458_v63  ;;  %vm1963_vm8 = vcmp.eq.s32.totalorder %v10070_v42, %v10458_v63  ;;  %v13964_v35 = vld [vmem:[#allocation37_spill] sm:$0xff]  ;;  %vm1915_vm11 = vcmp.eq.s32.totalorder %v13965_v48, %v10458_v63  ;;  %v13967_v42 = vld [vmem:[#allocation31_spill] sm:$0xff] }
 0x437   :  { %13957 = vst [vmem:[#allocation20_spill] sm:$0xff] %v10506_v29  ;;  %4012 = vperm.xlu0 %8662, %v9822_v56   ;;  %3991 = vperm.xlu1 %8665, %v13959_v54   ;;  %vm6628_vm13 = vmpackc.low %vm1921_vm6, %vm1918_vm9  ;;  %vm1912_vm15 = vcmp.eq.s32.totalorder %v13964_v35, %v10458_v63  ;;  %v13969_v48 = vld [vmem:[#allocation41_spill] sm:$0xff] }
 0x438   :  { %v10514_v33 = vpop.permute.xlu1 %3405  ;;  %vm6646_vm10 = vmpackc.low %vm1963_vm8, %vm1960_vm7  ;;  %vm1906_vm7 = vcmp.eq.s32.totalorder %v13967_v42, %v10458_v63 }
 0x439   :  { %13960 = vst [vmem:[#allocation49_spill] sm:$0xff] %v10514_v33  ;;  %8177 = vmatpush3.bf16.msk.msra.mxu0 %vm6626_vm1, %v13912_v19  ;;  %vm1954_vm1 = vcmp.eq.s32.totalorder %v10172_v50, %v10458_v63  ;;  %vm6630_vm9 = vmpackc.low %vm1915_vm11, %vm1912_vm15  ;;  %v13968_v50 = vld [vmem:[#allocation27_spill] sm:$0xff]  ;;  %vm1909_vm15 = vcmp.eq.s32.totalorder %v13969_v48, %v10458_v63  ;;  %vm1942_vm11 = vcmp.eq.s32.totalorder %v10118_v1, %v10458_v63  ;;  %v13973_v48 = vld [vmem:[#allocation21_spill] sm:$0xff] }
 0x43a   :  { %8178 = vmatprep.subr.msk.bf16.mxu0 %vm6644_vm12, %v13912_v19  ;;  %vm1957_vm12 = vcmp.eq.s32.totalorder %v10053_v49, %v10458_v63  ;;  %vm1900_vm8 = vcmp.eq.s32.totalorder %v13968_v50, %v10458_v63  ;;  %v13970_v49 = vmov 5  }
 0x43b   :  { %4006 = vperm.xlu0 %8662, %v9804_v46   ;;  %3985 = vperm.xlu1 %8665, %v13963_v12   ;;  %v10528_v29 = vpop.permute.xlu0 %2861  ;;  %vm6648_vm6 = vmpackc.low %vm1957_vm12, %vm1954_vm1  ;;  %vm1951_vm1 = vcmp.eq.s32.totalorder %v10022_v10, %v10458_v63  ;;  %v13972_v10 = vld [vmem:[#allocation10_spill] sm:$0xff] }
 0x43c   :  { %v10530_v6 = vpop.permute.xlu1 %3411 }
 0x43d   :  { %8179 = vmatpush3.bf16.msk.msra.mxu0 %vm6628_vm13, %v13912_v19  ;;  %vm1948_vm13 = vcmp.eq.s32.totalorder %v10158_v52, %v10458_v63  ;;  %v13971_v52 = vld [vmem:[#allocation38_spill] sm:$0xff] }
 0x43e   :  { %8180 = vmatprep.subr.msk.bf16.mxu0 %vm6646_vm10, %v13912_v19  ;;  %vm6632_vm10 = vmpackc.low %vm1909_vm15, %vm1906_vm7  ;;  %vm1945_vm7 = vcmp.eq.s32.totalorder %v10015_v55, %v10458_v63  ;;  %v13974_v55 = vld [vmem:[#allocation36_spill] sm:$0xff] }
 0x43f   :  { %4000 = vperm.xlu0 %8662, %v9781_v17   ;;  %3979 = vperm.xlu1 %8665, %v13966_v40   ;;  %v10544_v18 = vpop.permute.xlu0 %2870  ;;  %vm6650_vm12 = vmpackc.low %vm1951_vm1, %vm1948_vm13  ;;  %vm1894_vm1 = vcmp.eq.s32.totalorder %v13973_v48, %v10458_v63  ;;  %vm1897_vm3 = vcmp.eq.s32.totalorder %v13974_v55, %v10458_v63  ;;  %v13976_v55 = vld [vmem:[#allocation18_spill] sm:$0xff] }
 0x441   :  { %v10550_v35 = vpop.permute.xlu1 %2951  ;;  %8181 = vmatpush3.bf16.msk.msra.mxu0 %vm6630_vm9, %v13912_v19  ;;  %vm1903_vm9 = vcmp.eq.s32.totalorder %v13971_v52, %v10458_v63  ;;  %v13975_v52 = vld [vmem:[#allocation9_spill] sm:$0xff] }
 0x442   :  { %8182 = vmatprep.subr.msk.bf16.mxu0 %vm6648_vm6, %v13912_v19  ;;  %vm6634_vm6 = vmpackc.low %vm1903_vm9, %vm1900_vm8  ;;  %vm2506_vm8 = vcmp.eq.s32.totalorder %v10319_v61, %v10020_v44  ;;  %vm2511_vm9 = vcmp.eq.s32.totalorder %v10333_v59, %v9070_v43 }
 0x443   :  { %3994 = vperm.xlu0 %8662, %v9759_v0   ;;  %8666 = vset.pattern.permute.xlu1 %v13970_v49  ;;  %v10562_v42 = vpop.permute.xlu0 %2876 }
 0x444   :  { %4508 = vperm.xlu1 %8666, %v9801_v5  }
 0x445   :  { %8183 = vmatpush3.bf16.msk.msra.mxu0 %vm6632_vm10, %v13912_v19  ;;  %vm6652_vm10 = vmpackc.low %vm1945_vm7, %vm1942_vm11  ;;  %vm2509_vm11 = vcmp.eq.s32.totalorder %v10278_v25, %v10020_v44  ;;  %vm1936_vm7 = vcmp.eq.s32.totalorder %v10079_v16, %v10458_v63 }
 0x446   :  { %v10572_v50 = vpop.permute.xlu1 %2419  ;;  %8184 = vmatprep.subr.msk.bf16.mxu0 %vm6650_vm12, %v13912_v19 }
 0x447   :  { %vm2514_vm15 = vcmp.eq.s32.totalorder %v10572_v50, %v9070_v43  ;;  %3988 = vperm.xlu0 %8662, %v13972_v10   ;;  %v10580_v1 = vpop.permute.xlu0 %2882  ;;  %vm2515_vm13 = vcmp.eq.s32.totalorder %v10572_v50, %v10020_v44 }
 0x448   :  { %4502 = vperm.xlu1 %8666, %v9771_v22   ;;  %vm6786_vm12 = vmpackc.low %vm2515_vm13, %vm2512_vm5  ;;  %vm2500_vm13 = vcmp.eq.s32.totalorder %v10303_v30, %v10020_v44 }
 0x449   :  { %8185 = vmatpush3.bf16.msk.msra.mxu0 %vm6634_vm6, %v13912_v19  ;;  %6787 = vmatprep.subr.msk.bf16.mxu1 %vm6786_vm12, %v13912_v19  ;;  %vm6788_vm4 = vmpackc.low %vm2514_vm15, %vm2511_vm9  ;;  %vm1939_vm15 = vcmp.eq.s32.totalorder %v10006_v41, %v10458_v63  ;;  %vm2494_vm9 = vcmp.eq.s32.totalorder %v10287_v11, %v10020_v44  ;;  %v13977_v41 = vld [vmem:[#allocation34_spill] sm:$0xff] }
 0x44a   :  { %8186 = vmatprep.subr.msk.bf16.mxu0 %vm6652_vm10, %v13912_v19  ;;  %6789 = vmatpush2.bf16.msk.msra.mxu1 %vm6788_vm4, %v13912_v19  ;;  %vm6790_vm5 = vmpackc.low %vm2509_vm11, %vm2506_vm8  ;;  %vm1891_vm4 = vcmp.eq.s32.totalorder %v13976_v55, %v10458_v63  ;;  %vm2508_vm10 = vcmp.eq.s32.totalorder %v10278_v25, %v9070_v43  ;;  %vm1888_vm12 = vcmp.eq.s32.totalorder %v13977_v41, %v10458_v63  ;;  %v13979_v55 = vld [vmem:[#allocation52_spill] sm:$0xff]  ;;  %v13984_v41 = vld [vmem:[#allocation63_spill] sm:$0xff] }
 0x44b   :  { %3982 = vperm.xlu0 %8662, %v13975_v52   ;;  %v10606_v31 = vpop.permute.xlu1 %3417  ;;  %6791 = vmatprep.subr.msk.bf16.mxu1 %vm6790_vm5, %v13912_v19  ;;  %v10609_v33 = vpop.permute.xlu0 %2888  ;;  %vm6636_vm6 = vmpackc.low %vm1897_vm3, %vm1894_vm1  ;;  %vm2503_vm1 = vcmp.eq.s32.totalorder %v10237_v45, %v10020_v44  ;;  %vm2499_vm11 = vcmp.eq.s32.totalorder %v10303_v30, %v9070_v43  ;;  %vm2516_vm5 = vcmp.eq.s32.totalorder %v10572_v50, %v10458_v63  ;;  %v13978_v50 = vld [vmem:[#allocation66_spill] sm:$0xff] }
 0x44c   :  { %4505 = vperm.xlu1 %8666, %v9688_v58   ;;  %vm6654_vm8 = vmpackc.low %vm1939_vm15, %vm1936_vm7  ;;  %vm2502_vm15 = vcmp.eq.s32.totalorder %v10237_v45, %v9070_v43 }
 0x44d   :  { %8187 = vmatpush3.bf16.msk.msra.mxu0 %vm6636_vm6, %v13912_v19  ;;  %vm6792_vm3 = vmpackc.low %vm2508_vm10, %vm2505_vm2  ;;  %vm2497_vm6 = vcmp.eq.s32.totalorder %v10194_v32, %v10020_v44  ;;  %vm2459_vm10 = vcmp.eq.s32.totalorder %v10192_v8, %v10458_v63 }
 0x44e   :  { %8188 = vmatprep.subr.msk.bf16.mxu0 %vm6654_vm8, %v13912_v19  ;;  %6793 = vmatpush2.bf16.msk.msra.mxu1 %vm6792_vm3, %v13912_v19  ;;  %vm6794_vm7 = vmpackc.low %vm2503_vm1, %vm2500_vm13  ;;  %vm2513_vm8 = vcmp.eq.s32.totalorder %v10333_v59, %v10458_v63  ;;  %vm2465_vm3 = vcmp.eq.s32.totalorder %v13978_v50, %v10458_v63  ;;  %v13985_v50 = vld [vmem:[#allocation65_spill] sm:$0xff] }
 0x44f   :  { %8667 = vset.pattern.permute.xlu0 %v13970_v49  ;;  %v10641_v16 = vpop.permute.xlu1 %3423  ;;  %6795 = vmatprep.subr.msk.bf16.mxu1 %vm6794_vm7, %v13912_v19  ;;  %v10644_v48 = vpop.permute.xlu0 %2894  ;;  %vm6638_vm2 = vmpackc.low %vm1891_vm4, %vm1888_vm12  ;;  %vm2493_vm12 = vcmp.eq.s32.totalorder %v10287_v11, %v9070_v43  ;;  %vm2507_vm7 = vcmp.eq.s32.totalorder %v10319_v61, %v10458_v63  ;;  %v13982_v61 = vld [vmem:[#allocation61_spill] sm:$0xff] }
 0x450   :  { %4511 = vperm.xlu0 %8667, %v9703_v27   ;;  %vm6798_vm13 = vmpackc.low %vm2497_vm6, %vm2494_vm9  ;;  %8668 = vset.pattern.permute.xlu1 %v13932_v3  ;;  %vm2462_vm9 = vcmp.eq.s32.totalorder %v10010_v47, %v10458_v63 }
 0x451   :  { %8189 = vmatpush3.bf16.msk.msra.mxu0 %vm6638_vm2, %v13912_v19  ;;  %vm6796_vm4 = vmpackc.low %vm2502_vm15, %vm2499_vm11  ;;  %4024 = vperm.xlu1 %8668, %v9971_v20   ;;  %vm2468_vm11 = vcmp.eq.s32.totalorder %v13979_v55, %v10458_v63  ;;  %vm2488_vm15 = vcmp.eq.s32.totalorder %v10271_v7, %v10020_v44  ;;  %v13986_v55 = vld [vmem:[#allocation68_spill] sm:$0xff] }
 0x452   :  { %6797 = vmatpush2.bf16.msk.msra.mxu1 %vm6796_vm4, %v13912_v19  ;;  %vm6834_vm1 = vmpackc.low %vm2516_vm5, %vm2513_vm8  ;;  %vm2496_vm5 = vcmp.eq.s32.totalorder %v10194_v32, %v9070_v43  ;;  %vm2482_vm4 = vcmp.eq.s32.totalorder %v10257_v51, %v10020_v44  ;;  %vm2487_vm8 = vcmp.eq.s32.totalorder %v10271_v7, %v9070_v43 }
 0x453   :  { %8196 = vmatprep.subr.msk.bf16.mxu0 %vm6834_vm1, %v13912_v19  ;;  %v10677_v3 = vpop.permute.xlu1 %3429  ;;  %6799 = vmatprep.subr.msk.bf16.mxu1 %vm6798_vm13, %v13912_v19  ;;  %v10680_v59 = vpop.permute.xlu0 %2900  ;;  %vm10690_vm2 = vmpackc.low %vm2462_vm9, %vm2459_vm10  ;;  %vm2510_vm10 = vcmp.eq.s32.totalorder %v10278_v25, %v10458_v63  ;;  %vm2491_vm1 = vcmp.eq.s32.totalorder %v13982_v61, %v10020_v44  ;;  %v13983_v25 = vld [vmem:[#allocation59_spill] sm:$0xff] }
 0x454   :  { %4496 = vperm.xlu0 %8667, %v9749_v15   ;;  %2303 = vmatmul.mubr.bf16.vlgmr.msra.gmra.mxu0 %v10481_v2  ;;  %vm6818_vm6 = vmpackc.low %vm2468_vm11, %vm2465_vm3  ;;  %vm2485_vm11 = vcmp.eq.s32.totalorder %v13983_v25, %v10020_v44 }
 0x455   :  { %8669 = vset.pattern.permute.xlu1 %v13970_v49  ;;  %8197 = vmatpush3.bf16.msk.msra.mxu0 %vm6818_vm6, %v13912_v19  ;;  %vm6800_vm13 = vmpackc.low %vm2496_vm5, %vm2493_vm12  ;;  %vm2501_vm12 = vcmp.eq.s32.totalorder %v10303_v30, %v10458_v63  ;;  %vm2453_vm5 = vcmp.eq.s32.totalorder %v13984_v41, %v10458_v63  ;;  %v13989_v30 = vld [vmem:[#allocation62_spill] sm:$0xff] }
 0x456   :  { %4499 = vperm.xlu1 %8669, %v9672_v62   ;;  %6801 = vmatpush2.bf16.msk.msra.mxu1 %vm6800_vm13, %v13912_v19  ;;  %vm6836_vm3 = vmpackc.low %vm2510_vm10, %vm2507_vm7  ;;  %vm2490_vm7 = vcmp.eq.s32.totalorder %v13982_v61, %v9070_v43  ;;  %vm2504_vm13 = vcmp.eq.s32.totalorder %v10237_v45, %v10458_v63  ;;  %vm2476_vm10 = vcmp.eq.s32.totalorder %v13986_v55, %v10020_v44  ;;  %v13991_v41 = vld [vmem:[#allocation42_spill] sm:$0xff] }
 0x457   :  { %v10715_v8 = vpop.permute.xlu1 %3435  ;;  %v10719_v2 = vpop.permute.xlu0 %2906  ;;  %8198 = vmatprep.subr.msk.bf16.mxu0 %vm6836_vm3, %v13912_v19  ;;  %vm6802_vm9 = vmpackc.low %vm2491_vm1, %vm2488_vm15  ;;  %2837 = vmatprep.mubr.bf16.mxu0 %v13985_v50  ;;  %vm2495_vm1 = vcmp.eq.s32.totalorder %v10287_v11, %v10458_v63  ;;  %v13990_v11 = vld [vmem:[#allocation67_spill] sm:$0xff] }
 0x458   :  { %4490 = vperm.xlu0 %8667, %v9713_v57   ;;  %6803 = vmatprep.subr.msk.bf16.mxu1 %vm6802_vm9, %v13912_v19  ;;  %vm6806_vm6 = vmpackc.low %vm2485_vm11, %vm2482_vm4  ;;  %v13987_v57 = vld [vmem:[#allocation47_spill] sm:$0xff]  ;;  %vm2481_vm4 = vcmp.eq.s32.totalorder %v10257_v51, %v9070_v43  ;;  %vm2447_vm11 = vcmp.eq.s32.totalorder %v13989_v30, %v10458_v63 }
 0x459   :  { %8199 = vmatpush3.bf16.msk.msra.mxu0 %vm10690_vm2, %v13912_v19  ;;  %vm6804_vm15 = vmpackc.low %vm2490_vm7, %vm2487_vm8  ;;  %vm2456_vm3 = vcmp.eq.s32.totalorder %v13987_v57, %v10458_v63  ;;  %v13988_v57 = vld [vmem:[#allocation55_spill] sm:$0xff] }
 0x45a   :  { %4493 = vperm.xlu1 %8669, %v9659_v9   ;;  %6805 = vmatpush2.bf16.msk.msra.mxu1 %vm6804_vm15, %v13912_v19  ;;  %vm6838_vm2 = vmpackc.low %vm2504_vm13, %vm2501_vm12  ;;  %vm2479_vm9 = vcmp.eq.s32.totalorder %v13988_v57, %v10020_v44  ;;  %vm2484_vm12 = vcmp.eq.s32.totalorder %v13983_v25, %v9070_v43  ;;  %vm2470_vm15 = vcmp.eq.s32.totalorder %v13990_v11, %v10020_v44 }
 0x45b   :  { %v10758_v47 = vpop.permute.xlu1 %3441  ;;  %v10760_v45 = vpop.permute.xlu0 %2912  ;;  %8200 = vmatprep.subr.msk.bf16.mxu0 %vm6838_vm2, %v13912_v19  ;;  %6807 = vmatprep.subr.msk.bf16.mxu1 %vm6806_vm6, %v13912_v19  ;;  %vm6822_vm8 = vmpackc.low %vm2456_vm3, %vm2453_vm5  ;;  %vm2498_vm6 = vcmp.eq.s32.totalorder %v10194_v32, %v10458_v63  ;;  %vm2450_vm13 = vcmp.eq.s32.totalorder %v13991_v41, %v10458_v63  ;;  %vm2475_vm3 = vcmp.eq.s32.totalorder %v13986_v55, %v9070_v43  ;;  %v13993_v32 = vld [vmem:[#allocation53_spill] sm:$0xff]  ;;  %v13994_v41 = vld [vmem:[#allocation60_spill] sm:$0xff] }
 0x45c   :  { %4484 = vperm.xlu0 %8667, %v9683_v26   ;;  %vm6810_vm7 = vmpackc.low %vm2479_vm9, %vm2476_vm10  ;;  %vm2489_vm2 = vcmp.eq.s32.totalorder %v10271_v7, %v10458_v63 }
 0x45d   :  { %8201 = vmatpush3.bf16.msk.msra.mxu0 %vm6822_vm8, %v13912_v19  ;;  %vm6808_vm5 = vmpackc.low %vm2484_vm12, %vm2481_vm4  ;;  %vm2473_vm8 = vcmp.eq.s32.totalorder %v13993_v32, %v10020_v44  ;;  %vm2441_vm12 = vcmp.eq.s32.totalorder %v13994_v41, %v10458_v63 }
 0x45e   :  { %4487 = vperm.xlu1 %8669, %v9644_v37   ;;  %6809 = vmatpush2.bf16.msk.msra.mxu1 %vm6808_vm5, %v13912_v19  ;;  %vm6840_vm10 = vmpackc.low %vm2498_vm6, %vm2495_vm1  ;;  %vm2478_vm1 = vcmp.eq.s32.totalorder %v13988_v57, %v9070_v43  ;;  %vm2469_vm5 = vcmp.eq.s32.totalorder %v13990_v11, %v9070_v43 }
 0x45f   :  { %v10793_v50 = vpop.permute.xlu1 %3447  ;;  %v10795_v26 = vpop.permute.xlu0 %2918  ;;  %8202 = vmatprep.subr.msk.bf16.mxu0 %vm6840_vm10, %v13912_v19  ;;  %6811 = vmatprep.subr.msk.bf16.mxu1 %vm6810_vm7, %v13912_v19  ;;  %vm6824_vm4 = vmpackc.low %vm2450_vm13, %vm2447_vm11  ;;  %vm2492_vm7 = vcmp.eq.s32.totalorder %v13982_v61, %v10458_v63  ;;  %vm2483_vm13 = vcmp.eq.s32.totalorder %v10257_v51, %v10458_v63  ;;  %v10843_v61 = vld [vmem:[%s13694_s4 + $0x10] sm:$0xff] }
 0x460   :  { %13992 = vst [vmem:[#allocation51_spill] sm:$0xff] %v10793_v50  ;;  %4478 = vperm.xlu0 %8667, %v9657_v28   ;;  %vm6814_vm9 = vmpackc.low %vm2473_vm8, %vm2470_vm15  ;;  %v13996_v50 = vld [vmem:[#allocation35_spill] sm:$0xff]  ;;  %vm2486_vm8 = vcmp.eq.s32.totalorder %v13983_v25, %v10458_v63  ;;  %v13997_v51 = vld [vmem:[#allocation64_spill] sm:$0xff]  ;;  %v6947_v25 = vcombine.high %v10843_v61, %v10843_v61 }
 0x461   :  { %8203 = vmatpush3.bf16.msk.msra.mxu0 %vm6824_vm4, %v13912_v19  ;;  %vm6812_vm11 = vmpackc.low %vm2478_vm1, %vm2475_vm3  ;;  %vm2444_vm15 = vcmp.eq.s32.totalorder %v13996_v50, %v10458_v63  ;;  %vm2472_vm3 = vcmp.eq.s32.totalorder %v13993_v32, %v9070_v43  ;;  %vm2435_vm4 = vcmp.eq.s32.totalorder %v10170_v36, %v10458_v63  ;;  %v6752_v50 = vcombine.low %v13997_v51, %v13997_v51  ;;  %v14000_v51 = vld [vmem:[#allocation25_spill] sm:$0xff]  ;;  %v14003_v36 = vld [vmem:[#allocation22_spill] sm:$0xff] }
 0x462   :  { %4481 = vperm.xlu1 %8669, %v9631_v4   ;;  %6813 = vmatpush2.bf16.msk.msra.mxu1 %vm6812_vm11, %v13912_v19  ;;  %vm6842_vm6 = vmpackc.low %vm2492_vm7, %vm2489_vm2  ;;  %vm2480_vm7 = vcmp.eq.s32.totalorder %v13988_v57, %v10458_v63  ;;  %v14004_v57 = vld [vmem:[#allocation58_spill] sm:$0xff] }
 0x463   :  { %v10824_v7 = vpop.permute.xlu1 %3453  ;;  %v10826_v30 = vpop.permute.xlu0 %2924  ;;  %8204 = vmatprep.subr.msk.bf16.mxu0 %vm6842_vm6, %v13912_v19  ;;  %6815 = vmatprep.subr.msk.bf16.mxu1 %vm6814_vm9, %v13912_v19  ;;  %vm6826_vm10 = vmpackc.low %vm2444_vm15, %vm2441_vm12  ;;  %vm2477_vm9 = vcmp.eq.s32.totalorder %v13986_v55, %v10458_v63  ;;  %vm2471_vm15 = vcmp.eq.s32.totalorder %v13990_v11, %v10458_v63 }
 0x464   :  { %13995 = vst [vmem:[#allocation46_spill] sm:$0xff] %v10824_v7  ;;  %4472 = vperm.xlu0 %8667, %v9624_v60   ;;  %vm6816_vm2 = vmpackc.low %vm2472_vm3, %vm2469_vm5  ;;  %v13999_v60 = vld [vmem:[#allocation30_spill] sm:$0xff]  ;;  %vm2432_vm5 = vcmp.eq.s32.totalorder %v14000_v51, %v10458_v63 }
 0x465   :  { %8205 = vmatpush3.bf16.msk.msra.mxu0 %vm6826_vm10, %v13912_v19  ;;  %vm6844_vm1 = vmpackc.low %vm2486_vm8, %vm2483_vm13  ;;  %vm2438_vm12 = vcmp.eq.s32.totalorder %v13999_v60, %v10458_v63  ;;  %v14001_v60 = vld [vmem:[#allocation4_spill] sm:$0xff]  ;;  %vm2429_vm13 = vcmp.eq.s32.totalorder %v14003_v36, %v10458_v63  ;;  %vm2474_vm10 = vcmp.eq.s32.totalorder %v13993_v32, %v10458_v63  ;;  %vm3002_vm8 = vcmp.eq.s32.totalorder %v10719_v2, %v10020_v44  ;;  %v14005_v32 = vld [vmem:[#allocation29_spill] sm:$0xff] }
 0x466   :  { %4475 = vperm.xlu1 %8669, %v9619_v13   ;;  %6817 = vmatpush2.bf16.msk.msra.mxu1 %vm6816_vm2, %v13912_v19  ;;  %vm6828_vm11 = vmpackc.low %vm2438_vm12, %vm2435_vm4  ;;  %vm2426_vm4 = vcmp.eq.s32.totalorder %v14004_v57, %v10458_v63  ;;  %v14006_v36 = vld [vmem:[#allocation71_spill] sm:$0xff]  ;;  %v14013_v13 = vld [vmem:[#allocation33_spill] sm:$0xff] }
 0x467   :  { %v10857_v41 = vpop.permute.xlu1 %3459  ;;  %v10859_v7 = vpop.permute.xlu0 %2930  ;;  %8206 = vmatprep.subr.msk.bf16.mxu0 %vm6844_vm1, %v13912_v19  ;;  %vm6846_vm6 = vmpackc.low %vm2480_vm7, %vm2477_vm9  ;;  %vm2423_vm1 = vcmp.eq.s32.totalorder %v9852_v23, %v10458_v63  ;;  %vm2999_vm12 = vcmp.eq.s32.totalorder %v14006_v36, %v10020_v44  ;;  %v14007_v23 = vld [vmem:[#allocation70_spill] sm:$0xff] }
 0x468   :  { %13998 = vst [vmem:[#allocation17_spill] sm:$0xff] %v10857_v41  ;;  %4466 = vperm.xlu0 %8667, %v9596_v24   ;;  %vm6830_vm3 = vmpackc.low %vm2432_vm5, %vm2429_vm13  ;;  %vm2996_vm5 = vcmp.eq.s32.totalorder %v10680_v59, %v10020_v44 }
 0x469   :  { %2797 = vmatmul.mubr.bf16.vlgmr.msra.gmra.mxu1 %v6752_v50  ;;  %8207 = vmatpush3.bf16.msk.msra.mxu0 %vm6828_vm11, %v13912_v19  ;;  %vm6848_vm2 = vmpackc.low %vm2474_vm10, %vm2471_vm15  ;;  %vm3001_vm11 = vcmp.eq.s32.totalorder %v10719_v2, %v9070_v43  ;;  %vm2995_vm15 = vcmp.eq.s32.totalorder %v10680_v59, %v9070_v43 }
 0x46a   :  { %4469 = vperm.xlu1 %8669, %v14001_v60   ;;  %8208 = vmatprep.subr.msk.bf16.mxu0 %vm6846_vm6, %v13912_v19  ;;  %vm6832_vm9 = vmpackc.low %vm2426_vm4, %vm2423_vm1  ;;  %vm2998_vm6 = vcmp.eq.s32.totalorder %v14006_v36, %v9070_v43  ;;  %vm2992_vm4 = vcmp.eq.s32.totalorder %v14007_v23, %v9070_v43 }
 0x46b   :  { %v10879_v55 = vpop.permute.xlu1 %3465  ;;  %v10881_v24 = vpop.permute.xlu0 %2936  ;;  %3372 = vmatprep.mubr.bf16.mxu1 %v6947_v25  ;;  %vm6948_vm7 = vmpackc.low %vm3002_vm8, %vm2999_vm12  ;;  %vm3003_vm8 = vcmp.eq.s32.totalorder %v10719_v2, %v10458_v63 }
 0x46c   :  { %14002 = vst [vmem:[#allocation45_spill] sm:$0xff] %v10879_v55  ;;  %4556 = vperm.xlu0 %8667, %v9947_v53   ;;  %vm6950_vm13 = vmpackc.low %vm3001_vm11, %vm2998_vm6  ;;  %vm3000_vm6 = vcmp.eq.s32.totalorder %v14006_v36, %v10458_v63  ;;  %v14010_v36 = vld [vmem:[#allocation40_spill] sm:$0xff] }
 0x46d   :  { %8209 = vmatpush3.bf16.msk.msra.mxu0 %vm6830_vm3, %v13912_v19  ;;  %vm2993_vm3 = vcmp.eq.s32.totalorder %v14007_v23, %v10020_v44  ;;  %vm6954_vm1 = vmpackc.low %vm2995_vm15, %vm2992_vm4  ;;  %vm2989_vm15 = vcmp.eq.s32.totalorder %v10644_v48, %v9070_v43  ;;  %vm2984_vm4 = vcmp.eq.s32.totalorder %v10609_v33, %v10020_v44 }
 0x46e   :  { %4553 = vperm.xlu1 %8669, %v9835_v14   ;;  %8210 = vmatprep.subr.msk.bf16.mxu0 %vm6848_vm2, %v13912_v19  ;;  %vm6952_vm10 = vmpackc.low %vm2996_vm5, %vm2993_vm3  ;;  %vm2990_vm2 = vcmp.eq.s32.totalorder %v10644_v48, %v10020_v44 }
 0x46f   :  { %v10895_v11 = vpop.permute.xlu1 %3471  ;;  %v10897_v51 = vpop.permute.xlu0 %2942  ;;  %vm7012_vm3 = vmpackc.low %vm3003_vm8, %vm3000_vm6 }
 0x470   :  { %4550 = vperm.xlu0 %8667, %v14005_v32  }
 0x471   :  { %8211 = vmatpush3.bf16.msk.msra.mxu0 %vm6832_vm9, %v13912_v19  ;;  %vm3048_vm9 = vcmp.eq.s32.totalorder %v10550_v35, %v10458_v63 }
 0x472   :  { %4547 = vperm.xlu1 %8669, %v9822_v56   ;;  %6949 = vmatprep.subr.msk.bf16.mxu0 %vm6948_vm7, %v13912_v19 }
 0x473   :  { %v10911_v57 = vpop.permute.xlu1 %3477  ;;  %v10913_v60 = vpop.permute.xlu0 %2948 }
 0x474   :  { %4544 = vperm.xlu0 %8667, %v9918_v34   ;;  %2838 = vmatmul.mubr.bf16.vlgmr.msra.gmra.mxu0 %v6752_v50  ;;  %v14008_v50 = vld [vmem:[#allocation69_spill] sm:$0xff]  ;;  %vm3045_vm5 = vcmp.eq.s32.totalorder %v10913_v60, %v10458_v63 }
 0x475   :  { %6951 = vmatpush1.bf16.msk.msra.mxu0 %vm6950_vm13, %v13912_v19  ;;  %3331 = vmatprep.mubr.bf16.mxu0 %v6947_v25  ;;  %vm2987_vm11 = vcmp.eq.s32.totalorder %v14008_v50, %v10020_v44 }
 0x476   :  { %4541 = vperm.xlu1 %8669, %v9804_v46   ;;  %6953 = vmatprep.subr.msk.bf16.mxu0 %vm6952_vm10, %v13912_v19  ;;  %vm6956_vm13 = vmpackc.low %vm2990_vm2, %vm2987_vm11  ;;  %vm3042_vm10 = vcmp.eq.s32.totalorder %v10455_v39, %v10458_v63  ;;  %vm2997_vm2 = vcmp.eq.s32.totalorder %v10680_v59, %v10458_v63  ;;  %vm3039_vm11 = vcmp.eq.s32.totalorder %v10897_v51, %v10458_v63 }
 0x477   :  { %v10929_v41 = vpop.permute.xlu1 %3483  ;;  %v10931_v55 = vpop.permute.xlu0 %2954  ;;  %vm7030_vm8 = vmpackc.low %vm3045_vm5, %vm3042_vm10  ;;  %vm2983_vm5 = vcmp.eq.s32.totalorder %v10609_v33, %v9070_v43  ;;  %vm2980_vm10 = vcmp.eq.s32.totalorder %v14010_v36, %v9070_v43 }
 0x478   :  { %vm3051_vm12 = vcmp.eq.s32.totalorder %v10931_v55, %v10458_v63  ;;  %4538 = vperm.xlu0 %8667, %v9897_v21  }
 0x479   :  { %vm7028_vm7 = vmpackc.low %vm3051_vm12, %vm3048_vm9  ;;  %6955 = vmatpush1.bf16.msk.msra.mxu0 %vm6954_vm1, %v13912_v19  ;;  %vm2986_vm1 = vcmp.eq.s32.totalorder %v14008_v50, %v9070_v43  ;;  %vm2981_vm12 = vcmp.eq.s32.totalorder %v14010_v36, %v10020_v44 }
 0x47a   :  { %8218 = vmatprep.subr.msk.bf16.mxu1 %vm7028_vm7, %v13912_v19  ;;  %4535 = vperm.xlu1 %8669, %v9781_v17   ;;  %vm6958_vm9 = vmpackc.low %vm2989_vm15, %vm2986_vm1  ;;  %vm2994_vm7 = vcmp.eq.s32.totalorder %v14007_v23, %v10458_v63 }
 0x47b   :  { %6957 = vmatprep.subr.msk.bf16.mxu0 %vm6956_vm13, %v13912_v19  ;;  %8219 = vmatpush3.bf16.msk.msra.mxu1 %vm7012_vm3, %v13912_v19  ;;  %vm6960_vm6 = vmpackc.low %vm2984_vm4, %vm2981_vm12  ;;  %vm2978_vm3 = vcmp.eq.s32.totalorder %v10580_v1, %v10020_v44  ;;  %vm2991_vm4 = vcmp.eq.s32.totalorder %v10644_v48, %v10458_v63  ;;  %vm2988_vm12 = vcmp.eq.s32.totalorder %v14008_v50, %v10458_v63 }
 0x47c   :  { %v10969_v25 = vpop.permute.xlu1 %3934  ;;  %4532 = vperm.xlu0 %8667, %v13953_v38   ;;  %8220 = vmatprep.subr.msk.bf16.mxu1 %vm7030_vm8, %v13912_v19  ;;  %vm7014_vm15 = vmpackc.low %vm2997_vm2, %vm2994_vm7  ;;  %vm2975_vm8 = vcmp.eq.s32.totalorder %v14013_v13, %v10020_v44 }
 0x47d   :  { %14009 = vst [vmem:[#allocation44_spill] sm:$0xff] %v10969_v25  ;;  %v10976_v2 = vpop.permute.xlu0 %3474  ;;  %6959 = vmatpush1.bf16.msk.msra.mxu0 %vm6958_vm9, %v13912_v19  ;;  %v14011_v25 = vld [vmem:[#allocation82_spill] sm:$0xff]  ;;  %vm6962_vm2 = vmpackc.low %vm2983_vm5, %vm2980_vm10  ;;  %vm3033_vm9 = vcmp.eq.s32.totalorder %v10881_v24, %v10458_v63 }
 0x47e   :  { %4529 = vperm.xlu1 %8669, %v9759_v0   ;;  %6961 = vmatprep.subr.msk.bf16.mxu0 %vm6960_vm6, %v13912_v19  ;;  %vm3036_vm13 = vcmp.eq.s32.totalorder %v14011_v25, %v10458_v63  ;;  %vm6964_vm7 = vmpackc.low %vm2978_vm3, %vm2975_vm8  ;;  %vm2985_vm3 = vcmp.eq.s32.totalorder %v10609_v33, %v10458_v63  ;;  %vm2982_vm8 = vcmp.eq.s32.totalorder %v14010_v36, %v10458_v63  ;;  %v14019_v33 = vld [vmem:[#allocation24_spill] sm:$0xff] }
 0x47f   :  { %8221 = vmatpush3.bf16.msk.msra.mxu1 %vm7014_vm15, %v13912_v19  ;;  %vm7032_vm1 = vmpackc.low %vm3039_vm11, %vm3036_vm13  ;;  %vm2977_vm11 = vcmp.eq.s32.totalorder %v10580_v1, %v9070_v43  ;;  %vm2972_vm15 = vcmp.eq.s32.totalorder %v10562_v42, %v10020_v44  ;;  %vm2974_vm13 = vcmp.eq.s32.totalorder %v14013_v13, %v9070_v43 }
 0x480   :  { %v11007_v23 = vpop.permute.xlu1 %3937  ;;  %4526 = vperm.xlu0 %8667, %v13959_v54   ;;  %8222 = vmatprep.subr.msk.bf16.mxu1 %vm7032_vm1, %v13912_v19  ;;  %vm7016_vm5 = vmpackc.low %vm2991_vm4, %vm2988_vm12 }
 0x481   :  { %14012 = vst [vmem:[#allocation16_spill] sm:$0xff] %v11007_v23  ;;  %v11011_v59 = vpop.permute.xlu0 %3480  ;;  %6963 = vmatpush1.bf16.msk.msra.mxu0 %vm6962_vm2, %v13912_v19  ;;  %v14014_v23 = vld [vmem:[#allocation80_spill] sm:$0xff]  ;;  %vm6966_vm4 = vmpackc.low %vm2977_vm11, %vm2974_vm13  ;;  %vm3027_vm2 = vcmp.eq.s32.totalorder %v10859_v7, %v10458_v63 }
 0x482   :  { %4523 = vperm.xlu1 %8669, %v13972_v10   ;;  %6965 = vmatprep.subr.msk.bf16.mxu0 %vm6964_vm7, %v13912_v19  ;;  %vm3030_vm6 = vcmp.eq.s32.totalorder %v14014_v23, %v10458_v63  ;;  %v14016_v10 = vld [vmem:[#allocation28_spill] sm:$0xff]  ;;  %vm7018_vm11 = vmpackc.low %vm2985_vm3, %vm2982_vm8 }
 0x483   :  { %8223 = vmatpush3.bf16.msk.msra.mxu1 %vm7016_vm5, %v13912_v19  ;;  %vm7034_vm10 = vmpackc.low %vm3033_vm9, %vm3030_vm6  ;;  %vm2969_vm1 = vcmp.eq.s32.totalorder %v14016_v10, %v10020_v44  ;;  %vm2971_vm9 = vcmp.eq.s32.totalorder %v10562_v42, %v9070_v43  ;;  %vm2966_vm5 = vcmp.eq.s32.totalorder %v10544_v18, %v10020_v44  ;;  %vm2968_vm6 = vcmp.eq.s32.totalorder %v14016_v10, %v9070_v43 }
 0x484   :  { %v11042_v50 = vpop.permute.xlu1 %3943  ;;  %4520 = vperm.xlu0 %8667, %v13963_v12   ;;  %8224 = vmatprep.subr.msk.bf16.mxu1 %vm7034_vm10, %v13912_v19  ;;  %vm6968_vm12 = vmpackc.low %vm2972_vm15, %vm2969_vm1  ;;  %vm2979_vm15 = vcmp.eq.s32.totalorder %v10580_v1, %v10458_v63  ;;  %vm2963_vm10 = vcmp.eq.s32.totalorder %v14019_v33, %v10020_v44  ;;  %vm2976_vm1 = vcmp.eq.s32.totalorder %v14013_v13, %v10458_v63  ;;  %v14022_v13 = vld [vmem:[#allocation76_spill] sm:$0xff]  ;;  %v14024_v1 = vld [vmem:[#allocation19_spill] sm:$0xff] }
 0x485   :  { %14015 = vst [vmem:[#allocation37_spill] sm:$0xff] %v11042_v50  ;;  %v11046_v48 = vpop.permute.xlu0 %3486  ;;  %6967 = vmatpush1.bf16.msk.msra.mxu0 %vm6966_vm4, %v13912_v19  ;;  %v14017_v50 = vld [vmem:[#allocation78_spill] sm:$0xff]  ;;  %vm6970_vm3 = vmpackc.low %vm2971_vm9, %vm2968_vm6  ;;  %vm3021_vm4 = vcmp.eq.s32.totalorder %v10826_v30, %v10458_v63 }
 0x486   :  { %4517 = vperm.xlu1 %8669, %v13975_v52   ;;  %6969 = vmatprep.subr.msk.bf16.mxu0 %vm6968_vm12, %v13912_v19  ;;  %vm3024_vm7 = vcmp.eq.s32.totalorder %v14017_v50, %v10458_v63  ;;  %vm6972_vm8 = vmpackc.low %vm2966_vm5, %vm2963_vm10  ;;  %vm3018_vm12 = vcmp.eq.s32.totalorder %v14022_v13, %v10458_v63  ;;  %vm2973_vm5 = vcmp.eq.s32.totalorder %v10562_v42, %v10458_v63 }
 0x487   :  { %8225 = vmatpush3.bf16.msk.msra.mxu1 %vm7018_vm11, %v13912_v19  ;;  %vm7036_vm13 = vmpackc.low %vm3027_vm2, %vm3024_vm7  ;;  %vm2965_vm2 = vcmp.eq.s32.totalorder %v10544_v18, %v9070_v43  ;;  %vm2957_vm11 = vcmp.eq.s32.totalorder %v10528_v29, %v10020_v44  ;;  %vm2962_vm7 = vcmp.eq.s32.totalorder %v14019_v33, %v9070_v43  ;;  %vm2970_vm10 = vcmp.eq.s32.totalorder %v14016_v10, %v10458_v63  ;;  %v14026_v10 = vld [vmem:[#allocation74_spill] sm:$0xff] }
 0x488   :  { %v11077_v36 = vpop.permute.xlu1 %3949  ;;  %4514 = vperm.xlu0 %8667, %v13966_v40   ;;  %8226 = vmatprep.subr.msk.bf16.mxu1 %vm7036_vm13, %v13912_v19  ;;  %v14021_v40 = vmov 6   ;;  %vm7020_vm9 = vmpackc.low %vm2979_vm15, %vm2976_vm1  ;;  %vm2960_vm13 = vcmp.eq.s32.totalorder %v14024_v1, %v10020_v44 }
 0x489   :  { %14018 = vst [vmem:[#allocation43_spill] sm:$0xff] %v11077_v36  ;;  %6971 = vmatpush1.bf16.msk.msra.mxu0 %vm6970_vm3, %v13912_v19  ;;  %vm7038_vm6 = vmpackc.low %vm3021_vm4, %vm3018_vm12  ;;  %vm3015_vm3 = vcmp.eq.s32.totalorder %v10795_v26, %v10458_v63  ;;  %vm2956_vm4 = vcmp.eq.s32.totalorder %v10528_v29, %v9070_v43  ;;  %vm2959_vm12 = vcmp.eq.s32.totalorder %v14024_v1, %v9070_v43 }
 0x48a   :  { %v11093_v36 = vpop.permute.xlu0 %3931  ;;  %8671 = vset.pattern.permute.xlu1 %v14021_v40  ;;  %6973 = vmatprep.subr.msk.bf16.mxu0 %vm6972_vm8, %v13912_v19  ;;  %vm6974_vm15 = vmpackc.low %vm2965_vm2, %vm2962_vm7  ;;  %vm3012_vm8 = vcmp.eq.s32.totalorder %v14026_v10, %v10458_v63  ;;  %vm2967_vm7 = vcmp.eq.s32.totalorder %v10544_v18, %v10458_v63 }
 0x48b   :  { %14020 = vst [vmem:[#allocation31_spill] sm:$0xff] %v11093_v36  ;;  %5046 = vperm.xlu1 %8671, %v9703_v27   ;;  %8227 = vmatpush3.bf16.msk.msra.mxu1 %vm7020_vm9, %v13912_v19  ;;  %vm6976_vm1 = vmpackc.low %vm2960_vm13, %vm2957_vm11  ;;  %vm3050_vm9 = vcmp.eq.s32.totalorder %v10931_v55, %v10020_v44  ;;  %vm2964_vm13 = vcmp.eq.s32.totalorder %v14019_v33, %v10458_v63  ;;  %v14027_v33 = vld [vmem:[#allocation72_spill] sm:$0xff] }
 0x48c   :  { %v11113_v36 = vpop.permute.xlu1 %3955  ;;  %8670 = vset.pattern.permute.xlu0 %v14021_v40  ;;  %8228 = vmatprep.subr.msk.bf16.mxu1 %vm7038_vm6, %v13912_v19  ;;  %vm7022_vm2 = vmpackc.low %vm2973_vm5, %vm2970_vm10  ;;  %vm3047_vm6 = vcmp.eq.s32.totalorder %v10550_v35, %v10020_v44  ;;  %vm3049_vm10 = vcmp.eq.s32.totalorder %v10931_v55, %v9070_v43 }
 0x48d   :  { %14023 = vst [vmem:[#allocation27_spill] sm:$0xff] %v11113_v36  ;;  %5043 = vperm.xlu0 %8670, %v9801_v5   ;;  %6975 = vmatpush1.bf16.msk.msra.mxu0 %vm6974_vm15, %v13912_v19  ;;  %vm7040_vm11 = vmpackc.low %vm3015_vm3, %vm3012_vm8  ;;  %vm3009_vm15 = vcmp.eq.s32.totalorder %v10760_v45, %v10458_v63  ;;  %vm2958_vm8 = vcmp.eq.s32.totalorder %v10528_v29, %v10458_v63  ;;  %v11240_v29 = vld [vmem:[%s13694_s4 + $0x18] sm:$0xff] }
 0x48e   :  { %v11133_v36 = vpop.permute.xlu0 %3940  ;;  %6977 = vmatprep.subr.msk.bf16.mxu0 %vm6976_vm1, %v13912_v19  ;;  %vm6978_vm5 = vmpackc.low %vm2959_vm12, %vm2956_vm4  ;;  %vm3006_vm1 = vcmp.eq.s32.totalorder %v14027_v33, %v10458_v63  ;;  %vm3046_vm12 = vcmp.eq.s32.totalorder %v10550_v35, %v9070_v43  ;;  %v14028_v35 = vld [vmem:[#allocation79_spill] sm:$0xff] }
 0x48f   :  { %14025 = vst [vmem:[#allocation41_spill] sm:$0xff] %v11133_v36  ;;  %5091 = vperm.xlu1 %8671, %v9947_v53   ;;  %8229 = vmatpush3.bf16.msk.msra.mxu1 %vm7022_vm2, %v13912_v19  ;;  %vm6980_vm3 = vmpackc.low %vm3050_vm9, %vm3047_vm6  ;;  %vm3044_vm2 = vcmp.eq.s32.totalorder %v10913_v60, %v10020_v44  ;;  %vm2961_vm6 = vcmp.eq.s32.totalorder %v14024_v1, %v10458_v63 }
 0x490   :  { %v11152_v36 = vpop.permute.xlu1 %3961  ;;  %8230 = vmatprep.subr.msk.bf16.mxu1 %vm7040_vm11, %v13912_v19  ;;  %vm7024_vm4 = vmpackc.low %vm2967_vm7, %vm2964_vm13  ;;  %vm3041_vm11 = vcmp.eq.s32.totalorder %v10455_v39, %v10020_v44 }
 0x491   :  { %5040 = vperm.xlu0 %8670, %v9688_v58   ;;  %6979 = vmatpush1.bf16.msk.msra.mxu0 %vm6978_vm5, %v13912_v19  ;;  %vm7042_vm9 = vmpackc.low %vm3009_vm15, %vm3006_vm1  ;;  %vm3537_vm5 = vcmp.eq.s32.totalorder %v10758_v47, %v10020_v44  ;;  %vm3536_vm15 = vcmp.eq.s32.totalorder %v10758_v47, %v9070_v43  ;;  %vm3533_vm1 = vcmp.eq.s32.totalorder %v14028_v35, %v9070_v43 }
 0x492   :  { %v11171_v42 = vpop.permute.xlu0 %3946  ;;  %6981 = vmatprep.subr.msk.bf16.mxu0 %vm6980_vm3, %v13912_v19  ;;  %vm6982_vm7 = vmpackc.low %vm3049_vm10, %vm3046_vm12  ;;  %vm3043_vm10 = vcmp.eq.s32.totalorder %v10913_v60, %v9070_v43  ;;  %vm3040_vm12 = vcmp.eq.s32.totalorder %v10455_v39, %v9070_v43  ;;  %v11277_v60 = vcombine.high %v11240_v29, %v11240_v29 }
 0x493   :  { %8672 = vset.pattern.permute.xlu1 %v13970_v49  ;;  %8231 = vmatpush3.bf16.msk.msra.mxu1 %vm7024_vm4, %v13912_v19  ;;  %vm6984_vm13 = vmpackc.low %vm3044_vm2, %vm3041_vm11  ;;  %vm3534_vm4 = vcmp.eq.s32.totalorder %v14028_v35, %v10020_v44  ;;  %v11225_v49 = vcombine.low %v10843_v61, %v10843_v61  ;;  %vm3530_vm11 = vcmp.eq.s32.totalorder %v10715_v8, %v9070_v43  ;;  %v14032_v61 = vld [vmem:[#allocation75_spill] sm:$0xff] }
 0x494   :  { %v11190_v53 = vpop.permute.xlu1 %3967  ;;  %4559 = vperm.xlu1 %8672, %v9971_v20   ;;  %8232 = vmatprep.subr.msk.bf16.mxu1 %vm7042_vm9, %v13912_v19  ;;  %vm7026_vm3 = vmpackc.low %vm2961_vm6, %vm2958_vm8  ;;  %vm3038_vm8 = vcmp.eq.s32.totalorder %v10897_v51, %v10020_v44  ;;  %vm3035_vm6 = vcmp.eq.s32.totalorder %v14011_v25, %v10020_v44 }
 0x495   :  { %5088 = vperm.xlu0 %8670, %v9835_v14   ;;  %6983 = vmatpush2.bf16.msk.msra.mxu0 %vm6982_vm7, %v13912_v19  ;;  %vm7142_vm2 = vmpackc.low %vm3537_vm5, %vm3534_vm4  ;;  %vm3531_vm7 = vcmp.eq.s32.totalorder %v10715_v8, %v10020_v44  ;;  %v14034_v14 = vld [vmem:[#allocation57_spill] sm:$0xff] }
 0x496   :  { %v11210_v18 = vpop.permute.xlu0 %3952  ;;  %6985 = vmatprep.subr.msk.bf16.mxu0 %vm6984_vm13, %v13912_v19  ;;  %vm11249_vm9 = vmpackc.low %vm3536_vm15, %vm3533_vm1  ;;  %vm3037_vm15 = vcmp.eq.s32.totalorder %v10897_v51, %v9070_v43  ;;  %vm3032_vm1 = vcmp.eq.s32.totalorder %v10881_v24, %v10020_v44 }
 0x497   :  { %8233 = vmatpush3.bf16.msk.msra.mxu1 %vm7026_vm3, %v13912_v19  ;;  %vm6986_vm5 = vmpackc.low %vm3043_vm10, %vm3040_vm12  ;;  %vm3525_vm12 = vcmp.eq.s32.totalorder %v10677_v3, %v10020_v44 }
 0x498   :  { %v11230_v55 = vpop.permute.xlu1 %3976  ;;  %8673 = vset.pattern.permute.xlu1 %v14021_v40  ;;  %7143 = vmatprep.subr.msk.bf16.mxu1 %vm7142_vm2, %v13912_v19  ;;  %vm6988_vm13 = vmpackc.low %vm3038_vm8, %vm3035_vm6  ;;  %v14031_v40 = vld [vmem:[#allocation77_spill] sm:$0xff]  ;;  %vm3034_vm2 = vcmp.eq.s32.totalorder %v14011_v25, %v9070_v43 }
 0x499   :  { %5034 = vperm.xlu0 %8670, %v9672_v62   ;;  %5037 = vperm.xlu1 %8673, %v9771_v22   ;;  %vm3528_vm3 = vcmp.eq.s32.totalorder %v14031_v40, %v10020_v44  ;;  %vm3527_vm10 = vcmp.eq.s32.totalorder %v14031_v40, %v9070_v43 }
 0x49a   :  { %v11262_v39 = vpop.permute.xlu0 %3958  ;;  %6987 = vmatpush2.bf16.msk.msra.mxu0 %vm6986_vm5, %v13912_v19  ;;  %3373 = vmatmul.mubr.bf16.vlgmr.msra.gmra.mxu1 %v11225_v49  ;;  %vm7146_vm4 = vmpackc.low %vm3531_vm7, %vm3528_vm3  ;;  %vm3031_vm5 = vcmp.eq.s32.totalorder %v10881_v24, %v9070_v43  ;;  %vm3521_vm3 = vcmp.eq.s32.totalorder %v14032_v61, %v9070_v43 }
 0x49b   :  { %6989 = vmatprep.subr.msk.bf16.mxu0 %vm6988_vm13, %v13912_v19  ;;  %7145 = vmatpush1.bf16.msk.msra.mxu1 %vm11249_vm9, %v13912_v19  ;;  %vm7148_vm8 = vmpackc.low %vm3530_vm11, %vm3527_vm10  ;;  %vm3524_vm9 = vcmp.eq.s32.totalorder %v10677_v3, %v9070_v43  ;;  %vm3029_vm11 = vcmp.eq.s32.totalorder %v14014_v23, %v10020_v44  ;;  %vm3522_vm13 = vcmp.eq.s32.totalorder %v14032_v61, %v10020_v44 }
 0x49c   :  { %v11285_v1 = vpop.permute.xlu1 %4015  ;;  %7147 = vmatprep.subr.msk.bf16.mxu1 %vm7146_vm4, %v13912_v19  ;;  %3866 = vmatprep.mubr.bf16.mxu1 %v11277_v60  ;;  %vm6990_vm7 = vmpackc.low %vm3037_vm15, %vm3034_vm2  ;;  %vm3026_vm10 = vcmp.eq.s32.totalorder %v10859_v7, %v10020_v44  ;;  %vm3028_vm4 = vcmp.eq.s32.totalorder %v14014_v23, %v9070_v43  ;;  %vm3519_vm2 = vcmp.eq.s32.totalorder %v10641_v16, %v10020_v44 }
 0x49d   :  { %5082 = vperm.xlu0 %8670, %v9822_v56   ;;  %5085 = vperm.xlu1 %8673, %v14005_v32   ;;  %vm6992_vm6 = vmpackc.low %vm3032_vm1, %vm3029_vm11  ;;  %v14033_v56 = vld [vmem:[#allocation73_spill] sm:$0xff] }
 0x49e   :  { %v11308_v25 = vpop.permute.xlu0 %3964  ;;  %6991 = vmatpush2.bf16.msk.msra.mxu0 %vm6990_vm7, %v13912_v19  ;;  %vm7150_vm15 = vmpackc.low %vm3525_vm12, %vm3522_vm13  ;;  %vm3023_vm7 = vcmp.eq.s32.totalorder %v14017_v50, %v10020_v44  ;;  %vm3515_vm13 = vcmp.eq.s32.totalorder %v14033_v56, %v9070_v43 }
 0x49f   :  { %6993 = vmatprep.subr.msk.bf16.mxu0 %vm6992_vm6, %v13912_v19  ;;  %7149 = vmatpush1.bf16.msk.msra.mxu1 %vm7148_vm8, %v13912_v19  ;;  %vm7152_vm1 = vmpackc.low %vm3524_vm9, %vm3521_vm3  ;;  %vm3518_vm8 = vcmp.eq.s32.totalorder %v10641_v16, %v9070_v43  ;;  %vm3025_vm9 = vcmp.eq.s32.totalorder %v10859_v7, %v9070_v43  ;;  %vm3516_vm6 = vcmp.eq.s32.totalorder %v14033_v56, %v10020_v44 }
 0x4a0   :  { %v11321_v51 = vpop.permute.xlu1 %4009  ;;  %7151 = vmatprep.subr.msk.bf16.mxu1 %vm7150_vm15, %v13912_v19  ;;  %vm6994_vm12 = vmpackc.low %vm3031_vm5, %vm3028_vm4  ;;  %vm3020_vm3 = vcmp.eq.s32.totalorder %v10826_v30, %v10020_v44  ;;  %vm3022_vm15 = vcmp.eq.s32.totalorder %v14017_v50, %v9070_v43  ;;  %vm3513_vm4 = vcmp.eq.s32.totalorder %v10606_v31, %v10020_v44 }
 0x4a1   :  { %5028 = vperm.xlu0 %8670, %v9659_v9   ;;  %5031 = vperm.xlu1 %8673, %v9749_v15   ;;  %vm6996_vm11 = vmpackc.low %vm3026_vm10, %vm3023_vm7  ;;  %vm3510_vm7 = vcmp.eq.s32.totalorder %v14034_v14, %v10020_v44 }
 0x4a2   :  { %v11343_v23 = vpop.permute.xlu0 %3973  ;;  %6995 = vmatpush2.bf16.msk.msra.mxu0 %vm6994_vm12, %v13912_v19  ;;  %vm7154_vm5 = vmpackc.low %vm3519_vm2, %vm3516_vm6  ;;  %vm3017_vm12 = vcmp.eq.s32.totalorder %v14022_v13, %v10020_v44  ;;  %vm3016_vm6 = vcmp.eq.s32.totalorder %v14022_v13, %v9070_v43  ;;  %v14035_v13 = vld [vmem:[#allocation8_spill] sm:$0xff] }
 0x4a3   :  { %6997 = vmatprep.subr.msk.bf16.mxu0 %vm6996_vm11, %v13912_v19  ;;  %7153 = vmatpush1.bf16.msk.msra.mxu1 %vm7152_vm1, %v13912_v19  ;;  %vm7156_vm10 = vmpackc.low %vm3518_vm8, %vm3515_vm13  ;;  %vm3019_vm1 = vcmp.eq.s32.totalorder %v10826_v30, %v9070_v43  ;;  %vm3014_vm11 = vcmp.eq.s32.totalorder %v10795_v26, %v10020_v44  ;;  %v14036_v30 = vld [vmem:[#allocation56_spill] sm:$0xff] }
 0x4a4   :  { %v11356_v24 = vpop.permute.xlu1 %4003  ;;  %7155 = vmatprep.subr.msk.bf16.mxu1 %vm7154_vm5, %v13912_v19  ;;  %vm6998_vm2 = vmpackc.low %vm3025_vm9, %vm3022_vm15  ;;  %vm3512_vm9 = vcmp.eq.s32.totalorder %v10606_v31, %v9070_v43  ;;  %vm3507_vm15 = vcmp.eq.s32.totalorder %v10530_v6, %v10020_v44 }
 0x4a5   :  { %5076 = vperm.xlu0 %8670, %v9804_v46   ;;  %5079 = vperm.xlu1 %8673, %v9918_v34   ;;  %vm7000_vm8 = vmpackc.low %vm3020_vm3, %vm3017_vm12  ;;  %vm3011_vm3 = vcmp.eq.s32.totalorder %v14026_v10, %v10020_v44  ;;  %v14037_v34 = vld [vmem:[#allocation49_spill] sm:$0xff] }
 0x4a6   :  { %v11378_v50 = vpop.permute.xlu0 %4021  ;;  %6999 = vmatpush2.bf16.msk.msra.mxu0 %vm6998_vm2, %v13912_v19  ;;  %vm7158_vm13 = vmpackc.low %vm3513_vm4, %vm3510_vm7  ;;  %vm3506_vm4 = vcmp.eq.s32.totalorder %v10530_v6, %v9070_v43  ;;  %vm3013_vm2 = vcmp.eq.s32.totalorder %v10795_v26, %v9070_v43  ;;  %vm3503_vm7 = vcmp.eq.s32.totalorder %v14036_v30, %v9070_v43  ;;  %v14040_v26 = vld [vmem:[#allocation86_spill] sm:$0xff] }
 0x4a7   :  { %7001 = vmatprep.subr.msk.bf16.mxu0 %vm7000_vm8, %v13912_v19  ;;  %7157 = vmatpush1.bf16.msk.msra.mxu1 %vm7156_vm10, %v13912_v19  ;;  %vm7002_vm5 = vmpackc.low %vm3019_vm1, %vm3016_vm6  ;;  %vm3509_vm10 = vcmp.eq.s32.totalorder %v14034_v14, %v9070_v43  ;;  %vm3504_vm8 = vcmp.eq.s32.totalorder %v14036_v30, %v10020_v44  ;;  %vm3008_vm6 = vcmp.eq.s32.totalorder %v10760_v45, %v10020_v44 }
 0x4a8   :  { %7159 = vmatprep.subr.msk.bf16.mxu1 %vm7158_vm13, %v13912_v19  ;;  %vm7004_vm1 = vmpackc.low %vm3014_vm11, %vm3011_vm3  ;;  %vm3010_vm13 = vcmp.eq.s32.totalorder %v14026_v10, %v9070_v43  ;;  %vm3500_vm3 = vcmp.eq.s32.totalorder %v14037_v34, %v9070_v43 }
 0x4a9   :  { %v11397_v7 = vpop.permute.xlu1 %3489  ;;  %5022 = vperm.xlu0 %8670, %v9644_v37   ;;  %5025 = vperm.xlu1 %8673, %v14035_v13   ;;  %vm7160_vm12 = vmpackc.low %vm3512_vm9, %vm3509_vm10  ;;  %vm3005_vm10 = vcmp.eq.s32.totalorder %v14027_v33, %v10020_v44 }
 0x4aa   :  { %v11412_v46 = vpop.permute.xlu0 %3970  ;;  %7003 = vmatpush2.bf16.msk.msra.mxu0 %vm7002_vm5, %v13912_v19  ;;  %vm7162_vm11 = vmpackc.low %vm3507_vm15, %vm3504_vm8  ;;  %vm3501_vm5 = vcmp.eq.s32.totalorder %v14037_v34, %v10020_v44 }
 0x4ab   :  { %7005 = vmatprep.subr.msk.bf16.mxu0 %vm7004_vm1, %v13912_v19  ;;  %7161 = vmatpush1.bf16.msk.msra.mxu1 %vm7160_vm12, %v13912_v19  ;;  %vm7164_vm9 = vmpackc.low %vm3506_vm4, %vm3503_vm7  ;;  %vm3007_vm4 = vcmp.eq.s32.totalorder %v10760_v45, %v9070_v43  ;;  %vm3586_vm7 = vcmp.eq.s32.totalorder %v11397_v7, %v10458_v63  ;;  %v14055_v45 = vld [vmem:[#allocation46_spill] sm:$0xff] }
 0x4ac   :  { %7163 = vmatprep.subr.msk.bf16.mxu1 %vm7162_vm11, %v13912_v19  ;;  %vm7006_vm15 = vmpackc.low %vm3013_vm2, %vm3010_vm13  ;;  %vm3004_vm11 = vcmp.eq.s32.totalorder %v14027_v33, %v9070_v43  ;;  %vm3492_vm13 = vcmp.eq.s32.totalorder %v14040_v26, %v10020_v44 }
 0x4ad   :  { %5070 = vperm.xlu0 %8670, %v9781_v17   ;;  %5073 = vperm.xlu1 %8673, %v9897_v21   ;;  %vm7008_vm1 = vmpackc.low %vm3008_vm6, %vm3005_vm10  ;;  %v14039_v17 = vld [vmem:[#allocation48_spill] sm:$0xff]  ;;  %v14041_v21 = vld [vmem:[#allocation7_spill] sm:$0xff] }
 0x4ae   :  { %v11446_v10 = vpop.permute.xlu0 %4018  ;;  %v11448_v32 = vpop.permute.xlu1 %3997  ;;  %7007 = vmatpush2.bf16.msk.msra.mxu0 %vm7006_vm15, %v13912_v19  ;;  %vm3498_vm12 = vcmp.eq.s32.totalorder %v14039_v17, %v10020_v44  ;;  %vm3497_vm8 = vcmp.eq.s32.totalorder %v14039_v17, %v9070_v43  ;;  %vm3538_vm15 = vcmp.eq.s32.totalorder %v10758_v47, %v10458_v63 }
 0x4af   :  { %14038 = vst [vmem:[#allocation38_spill] sm:$0xff] %v11448_v32  ;;  %7009 = vmatprep.subr.msk.bf16.mxu0 %vm7008_vm1, %v13912_v19  ;;  %7165 = vmatpush1.bf16.msk.msra.mxu1 %vm7164_vm9, %v13912_v19  ;;  %vm7166_vm2 = vmpackc.low %vm3501_vm5, %vm3498_vm12  ;;  %vm3491_vm9 = vcmp.eq.s32.totalorder %v14040_v26, %v9070_v43 }
 0x4b0   :  { %7167 = vmatprep.subr.msk.bf16.mxu1 %vm7166_vm2, %v13912_v19  ;;  %vm7168_vm6 = vmpackc.low %vm3500_vm3, %vm3497_vm8  ;;  %vm3583_vm3 = vcmp.eq.s32.totalorder %v11046_v48, %v10458_v63  ;;  %vm3577_vm8 = vcmp.eq.s32.totalorder %v11011_v59, %v10458_v63  ;;  %vm3535_vm2 = vcmp.eq.s32.totalorder %v14028_v35, %v10458_v63 }
 0x4b1   :  { %5094 = vperm.xlu0 %8670, %v9971_v20   ;;  %5019 = vperm.xlu1 %8673, %v14041_v21   ;;  %vm7010_vm5 = vmpackc.low %vm3007_vm4, %vm3004_vm11  ;;  %v14043_v20 = vld [vmem:[#allocation54_spill] sm:$0xff]  ;;  %vm3585_vm11 = vcmp.eq.s32.totalorder %v11397_v7, %v10020_v44 }
 0x4b2   :  { %v11481_v33 = vpop.permute.xlu0 %4012  ;;  %v11483_v32 = vpop.permute.xlu1 %3991  ;;  %7011 = vmatpush2.bf16.msk.msra.mxu0 %vm7010_vm5, %v13912_v19  ;;  %vm7222_vm10 = vmpackc.low %vm3586_vm7, %vm3583_vm3  ;;  %vm3495_vm1 = vcmp.eq.s32.totalorder %v14043_v20, %v10020_v44  ;;  %vm3494_vm12 = vcmp.eq.s32.totalorder %v14043_v20, %v9070_v43  ;;  %vm3582_vm3 = vcmp.eq.s32.totalorder %v11046_v48, %v10020_v44 }
 0x4b3   :  { %14042 = vst [vmem:[#allocation21_spill] sm:$0xff] %v11483_v32  ;;  %8240 = vmatprep.subr.msk.bf16.mxu0 %vm7222_vm10, %v13912_v19  ;;  %7169 = vmatpush1.bf16.msk.msra.mxu1 %vm7168_vm6, %v13912_v19  ;;  %vm7170_vm4 = vmpackc.low %vm3495_vm1, %vm3492_vm13  ;;  %vm3532_vm6 = vcmp.eq.s32.totalorder %v10715_v8, %v10458_v63  ;;  %vm3571_vm10 = vcmp.eq.s32.totalorder %v10976_v2, %v10458_v63 }
 0x4b4   :  { %7171 = vmatprep.subr.msk.bf16.mxu1 %vm7170_vm4, %v13912_v19  ;;  %vm11507_vm7 = vmpackc.low %vm3494_vm12, %vm3491_vm9  ;;  %vm3580_vm9 = vcmp.eq.s32.totalorder %v10929_v41, %v10458_v63  ;;  %vm3584_vm1 = vcmp.eq.s32.totalorder %v11397_v7, %v9070_v43 }
 0x4b5   :  { %5016 = vperm.xlu0 %8670, %v9631_v4   ;;  %3332 = vmatmul.mubr.bf16.vlgmr.msra.gmra.mxu0 %v11225_v49  ;;  %vm7206_vm13 = vmpackc.low %vm3538_vm15, %vm3535_vm2  ;;  %vm3529_vm15 = vcmp.eq.s32.totalorder %v14031_v40, %v10458_v63  ;;  %vm3576_vm2 = vcmp.eq.s32.totalorder %v11011_v59, %v10020_v44  ;;  %v14047_v49 = vld [vmem:[#allocation5_spill] sm:$0xff] }
 0x4b6   :  { %v11520_v35 = vpop.permute.xlu0 %4006  ;;  %v11522_v32 = vpop.permute.xlu1 %3985  ;;  %5067 = vperm.xlu1 %8673, %v13953_v38   ;;  %8241 = vmatpush3.bf16.msk.msra.mxu0 %vm7206_vm13, %v13912_v19  ;;  %vm7224_vm5 = vmpackc.low %vm3580_vm9, %vm3577_vm8  ;;  %vm3574_vm8 = vcmp.eq.s32.totalorder %v10911_v57, %v10458_v63  ;;  %vm3579_vm9 = vcmp.eq.s32.totalorder %v10929_v41, %v10020_v44 }
 0x4b7   :  { %8242 = vmatprep.subr.msk.bf16.mxu0 %vm7224_vm5, %v13912_v19  ;;  %7173 = vmatpush1.bf16.msk.msra.mxu1 %vm11507_vm7, %v13912_v19  ;;  %vm7174_vm12 = vmpackc.low %vm3585_vm11, %vm3582_vm3  ;;  %vm3526_vm7 = vcmp.eq.s32.totalorder %v10677_v3, %v10458_v63  ;;  %vm3581_vm11 = vcmp.eq.s32.totalorder %v11046_v48, %v9070_v43  ;;  %vm3568_vm5 = vcmp.eq.s32.totalorder %v10895_v11, %v10458_v63  ;;  %v14046_v48 = vld [vmem:[#allocation20_spill] sm:$0xff] }
 0x4b8   :  { %7175 = vmatprep.subr.msk.bf16.mxu1 %vm7174_vm12, %v13912_v19  ;;  %vm7208_vm4 = vmpackc.low %vm3532_vm6, %vm3529_vm15  ;;  %3907 = vmatprep.mubr.bf16.mxu0 %v11277_v60  ;;  %vm3523_vm3 = vcmp.eq.s32.totalorder %v14032_v61, %v10458_v63  ;;  %vm3565_vm12 = vcmp.eq.s32.totalorder %v14046_v48, %v10458_v63  ;;  %v14051_v61 = vld [vmem:[#allocation6_spill] sm:$0xff] }
 0x4b9   :  { %5064 = vperm.xlu0 %8670, %v9759_v0   ;;  %vm7226_vm6 = vmpackc.low %vm3574_vm8, %vm3571_vm10  ;;  %vm3575_vm10 = vcmp.eq.s32.totalorder %v11011_v59, %v9070_v43  ;;  %vm3520_vm8 = vcmp.eq.s32.totalorder %v10641_v16, %v10458_v63  ;;  %v14049_v59 = vld [vmem:[#allocation87_spill] sm:$0xff] }
 0x4ba   :  { %v11557_v47 = vpop.permute.xlu0 %4000  ;;  %v11559_v8 = vpop.permute.xlu1 %3979  ;;  %5013 = vperm.xlu1 %8673, %v9657_v28   ;;  %8243 = vmatpush3.bf16.msk.msra.mxu0 %vm7208_vm4, %v13912_v19  ;;  %vm7176_vm13 = vmpackc.low %vm3584_vm1, %vm3581_vm11  ;;  %vm3570_vm4 = vcmp.eq.s32.totalorder %v10976_v2, %v10020_v44  ;;  %vm3578_vm11 = vcmp.eq.s32.totalorder %v10929_v41, %v9070_v43  ;;  %v14048_v41 = vld [vmem:[#allocation45_spill] sm:$0xff] }
 0x4bb   :  { %8244 = vmatprep.subr.msk.bf16.mxu0 %vm7226_vm6, %v13912_v19  ;;  %7177 = vmatpush2.bf16.msk.msra.mxu1 %vm7176_vm13, %v13912_v19  ;;  %vm7178_vm15 = vmpackc.low %vm3579_vm9, %vm3576_vm2  ;;  %vm3573_vm6 = vcmp.eq.s32.totalorder %v10911_v57, %v10020_v44  ;;  %vm3562_vm13 = vcmp.eq.s32.totalorder %v14048_v41, %v10458_v63  ;;  %vm3517_vm9 = vcmp.eq.s32.totalorder %v14033_v56, %v10458_v63  ;;  %v14050_v56 = vld [vmem:[#allocation10_spill] sm:$0xff] }
 0x4bc   :  { %7179 = vmatprep.subr.msk.bf16.mxu1 %vm7178_vm15, %v13912_v19  ;;  %vm7210_vm1 = vmpackc.low %vm3526_vm7, %vm3523_vm3  ;;  %vm3559_vm15 = vcmp.eq.s32.totalorder %v14049_v59, %v10458_v63 }
 0x4bd   :  { %5010 = vperm.xlu0 %8670, %v14047_v49   ;;  %vm7228_vm2 = vmpackc.low %vm3568_vm5, %vm3565_vm12  ;;  %vm3569_vm5 = vcmp.eq.s32.totalorder %v10976_v2, %v9070_v43  ;;  %vm3514_vm12 = vcmp.eq.s32.totalorder %v10606_v31, %v10458_v63  ;;  %v14053_v2 = vld [vmem:[#allocation85_spill] sm:$0xff] }
 0x4be   :  { %v11595_v40 = vpop.permute.xlu0 %3994  ;;  %5061 = vperm.xlu1 %8673, %v13959_v54   ;;  %8245 = vmatpush3.bf16.msk.msra.mxu0 %vm7210_vm1, %v13912_v19  ;;  %vm7180_vm7 = vmpackc.low %vm3578_vm11, %vm3575_vm10  ;;  %vm3567_vm1 = vcmp.eq.s32.totalorder %v10895_v11, %v10020_v44  ;;  %vm3572_vm11 = vcmp.eq.s32.totalorder %v10911_v57, %v9070_v43  ;;  %v14052_v57 = vld [vmem:[#allocation17_spill] sm:$0xff] }
 0x4bf   :  { %v11599_v3 = vpop.permute.xlu1 %4508  ;;  %8246 = vmatprep.subr.msk.bf16.mxu0 %vm7228_vm2, %v13912_v19  ;;  %7181 = vmatpush2.bf16.msk.msra.mxu1 %vm7180_vm7, %v13912_v19  ;;  %vm7182_vm3 = vmpackc.low %vm3573_vm6, %vm3570_vm4  ;;  %vm3564_vm2 = vcmp.eq.s32.totalorder %v14046_v48, %v10020_v44  ;;  %vm3556_vm7 = vcmp.eq.s32.totalorder %v14052_v57, %v10458_v63  ;;  %vm3511_vm6 = vcmp.eq.s32.totalorder %v14034_v14, %v10458_v63  ;;  %v14054_v14 = vld [vmem:[#allocation4_spill] sm:$0xff] }
 0x4c0   :  { %7183 = vmatprep.subr.msk.bf16.mxu1 %vm7182_vm3, %v13912_v19  ;;  %vm7212_vm10 = vmpackc.low %vm3520_vm8, %vm3517_vm9  ;;  %vm3553_vm3 = vcmp.eq.s32.totalorder %v14053_v2, %v10458_v63 }
 0x4c1   :  { %5058 = vperm.xlu0 %8670, %v14050_v56   ;;  %vm7230_vm4 = vmpackc.low %vm3562_vm13, %vm3559_vm15  ;;  %vm3566_vm13 = vcmp.eq.s32.totalorder %v10895_v11, %v9070_v43  ;;  %vm3563_vm15 = vcmp.eq.s32.totalorder %v14046_v48, %v9070_v43  ;;  %v14056_v11 = vld [vmem:[#allocation84_spill] sm:$0xff]  ;;  %v14072_v48 = vld [vmem:[#allocation27_spill] sm:$0xff] }
 0x4c2   :  { %v11630_v60 = vpop.permute.xlu0 %3988  ;;  %5007 = vperm.xlu1 %8673, %v14051_v61   ;;  %8247 = vmatpush3.bf16.msk.msra.mxu0 %vm7212_vm10, %v13912_v19  ;;  %vm7184_vm8 = vmpackc.low %vm3572_vm11, %vm3569_vm5  ;;  %vm3561_vm10 = vcmp.eq.s32.totalorder %v14048_v41, %v10020_v44  ;;  %vm3508_vm11 = vcmp.eq.s32.totalorder %v10530_v6, %v10458_v63  ;;  %v14057_v6 = vld [vmem:[#allocation3_spill] sm:$0xff] }
 0x4c3   :  { %v11634_v16 = vpop.permute.xlu1 %4502  ;;  %8248 = vmatprep.subr.msk.bf16.mxu0 %vm7230_vm4, %v13912_v19  ;;  %7185 = vmatpush2.bf16.msk.msra.mxu1 %vm7184_vm8, %v13912_v19  ;;  %vm7186_vm9 = vmpackc.low %vm3567_vm1, %vm3564_vm2  ;;  %vm3558_vm4 = vcmp.eq.s32.totalorder %v14049_v59, %v10020_v44  ;;  %vm3550_vm8 = vcmp.eq.s32.totalorder %v14055_v45, %v10458_v63  ;;  %vm3505_vm2 = vcmp.eq.s32.totalorder %v14036_v30, %v10458_v63 }
 0x4c4   :  { %7187 = vmatprep.subr.msk.bf16.mxu1 %vm7186_vm9, %v13912_v19  ;;  %vm7214_vm5 = vmpackc.low %vm3514_vm12, %vm3511_vm6  ;;  %vm3560_vm6 = vcmp.eq.s32.totalorder %v14048_v41, %v9070_v43 }
 0x4c5   :  { %5004 = vperm.xlu0 %8670, %v14054_v14   ;;  %vm7232_vm1 = vmpackc.low %vm3556_vm7, %vm3553_vm3  ;;  %vm3493_vm7 = vcmp.eq.s32.totalorder %v14040_v26, %v10458_v63  ;;  %vm3555_vm3 = vcmp.eq.s32.totalorder %v14052_v57, %v10020_v44  ;;  %v14062_v26 = vmov 7  }
 0x4c6   :  { %v11665_v7 = vpop.permute.xlu0 %3982  ;;  %5055 = vperm.xlu1 %8673, %v13963_v12   ;;  %8249 = vmatpush3.bf16.msk.msra.mxu0 %vm7214_vm5, %v13912_v19  ;;  %vm7188_vm12 = vmpackc.low %vm3566_vm13, %vm3563_vm15  ;;  %vm3547_vm5 = vcmp.eq.s32.totalorder %v14056_v11, %v10458_v63  ;;  %vm3496_vm15 = vcmp.eq.s32.totalorder %v14043_v20, %v10458_v63  ;;  %v14058_v20 = vld [vmem:[#allocation51_spill] sm:$0xff] }
 0x4c7   :  { %v11669_v31 = vpop.permute.xlu1 %4505  ;;  %8250 = vmatprep.subr.msk.bf16.mxu0 %vm7232_vm1, %v13912_v19  ;;  %7189 = vmatpush2.bf16.msk.msra.mxu1 %vm7188_vm12, %v13912_v19  ;;  %vm7190_vm13 = vmpackc.low %vm3561_vm10, %vm3558_vm4  ;;  %vm3557_vm1 = vcmp.eq.s32.totalorder %v14049_v59, %v9070_v43  ;;  %vm3502_vm10 = vcmp.eq.s32.totalorder %v14037_v34, %v10458_v63  ;;  %vm3552_vm4 = vcmp.eq.s32.totalorder %v14053_v2, %v10020_v44  ;;  %v14063_v34 = vld [vmem:[#allocation14_spill] sm:$0xff] }
 0x4c8   :  { %7191 = vmatprep.subr.msk.bf16.mxu1 %vm7190_vm13, %v13912_v19  ;;  %vm7216_vm9 = vmpackc.low %vm3508_vm11, %vm3505_vm2  ;;  %vm3544_vm2 = vcmp.eq.s32.totalorder %v14058_v20, %v10458_v63  ;;  %vm3499_vm13 = vcmp.eq.s32.totalorder %v14039_v17, %v10458_v63  ;;  %v14061_v17 = vld [vmem:[#allocation81_spill] sm:$0xff] }
 0x4c9   :  { %5052 = vperm.xlu0 %8670, %v13975_v52   ;;  %vm7234_vm11 = vmpackc.low %vm3550_vm8, %vm3547_vm5  ;;  %vm3541_vm5 = vcmp.eq.s32.totalorder %v14061_v17, %v10458_v63 }
 0x4ca   :  { %5001 = vperm.xlu1 %8673, %v14057_v6   ;;  %8251 = vmatpush3.bf16.msk.msra.mxu0 %vm7216_vm9, %v13912_v19  ;;  %vm7192_vm12 = vmpackc.low %vm3560_vm6, %vm3557_vm1  ;;  %vm3554_vm9 = vcmp.eq.s32.totalorder %v14052_v57, %v9070_v43  ;;  %vm3551_vm1 = vcmp.eq.s32.totalorder %v14053_v2, %v9070_v43  ;;  %v11791_v2 = vcombine.low %v11240_v29, %v11240_v29  ;;  %v14080_v29 = vld [vmem:[#allocation43_spill] sm:$0xff] }
 0x4cb   :  { %v11709_v30 = vpop.permute.xlu0 %4511  ;;  %vm11721_vm8 = vmpackc.low %vm3496_vm15, %vm3493_vm7  ;;  %8252 = vmatprep.subr.msk.bf16.mxu0 %vm7234_vm11, %v13912_v19  ;;  %7193 = vmatpush2.bf16.msk.msra.mxu1 %vm7192_vm12, %v13912_v19  ;;  %vm3549_vm15 = vcmp.eq.s32.totalorder %v14055_v45, %v10020_v44  ;;  %vm3546_vm12 = vcmp.eq.s32.totalorder %v14056_v11, %v10020_v44 }
 0x4cc   :  { %vm7194_vm6 = vmpackc.low %vm3555_vm3, %vm3552_vm4  ;;  %v11734_v41 = vpop.permute.xlu1 %4024  ;;  %vm3548_vm3 = vcmp.eq.s32.totalorder %v14055_v45, %v9070_v43  ;;  %vm3543_vm4 = vcmp.eq.s32.totalorder %v14058_v20, %v10020_v44 }
 0x4cd   :  { %7195 = vmatprep.subr.msk.bf16.mxu1 %vm7194_vm6, %v13912_v19  ;;  %vm7218_vm7 = vmpackc.low %vm3502_vm10, %vm3499_vm13  ;;  %8675 = vset.pattern.permute.xlu0 %v14062_v26  ;;  %vm3545_vm13 = vcmp.eq.s32.totalorder %v14056_v11, %v9070_v43  ;;  %vm4069_vm6 = vcmp.eq.s32.totalorder %v11343_v23, %v10020_v44  ;;  %v14110_v11 = vld [vmem:[#allocation32_spill] sm:$0xff] }
 0x4ce   :  { %vm7236_vm11 = vmpackc.low %vm3544_vm2, %vm3541_vm5  ;;  %5049 = vperm.xlu1 %8673, %v14063_v34   ;;  %5581 = vperm.xlu0 %8675, %v9703_v27   ;;  %vm3542_vm2 = vcmp.eq.s32.totalorder %v14058_v20, %v9070_v43 }
 0x4cf   :  { %v11754_v59 = vpop.permute.xlu0 %4496  ;;  %vm7196_vm10 = vmpackc.low %vm3554_vm9, %vm3551_vm1  ;;  %8253 = vmatpush3.bf16.msk.msra.mxu0 %vm7218_vm7, %v13912_v19  ;;  %vm3540_vm7 = vcmp.eq.s32.totalorder %v14061_v17, %v10020_v44 }
 0x4d0   :  { %7197 = vmatpush2.bf16.msk.msra.mxu1 %vm7196_vm10, %v13912_v19  ;;  %vm7198_vm9 = vmpackc.low %vm3549_vm15, %vm3546_vm12  ;;  %8254 = vmatprep.subr.msk.bf16.mxu0 %vm7236_vm11, %v13912_v19  ;;  %vm3539_vm15 = vcmp.eq.s32.totalorder %v14061_v17, %v9070_v43  ;;  %vm4072_vm10 = vcmp.eq.s32.totalorder %v11230_v55, %v10020_v44  ;;  %v14106_v17 = vmov 0 }
 0x4d1   :  { %7199 = vmatprep.subr.msk.bf16.mxu1 %vm7198_vm9, %v13912_v19  ;;  %vm11779_vm5 = vmpackc.low %vm3548_vm3, %vm3545_vm13  ;;  %v11787_v57 = vpop.permute.xlu1 %4499  ;;  %vm4068_vm3 = vcmp.eq.s32.totalorder %v11343_v23, %v9070_v43  ;;  %vm4066_vm9 = vcmp.eq.s32.totalorder %v11412_v46, %v10020_v44 }
 0x4d2   :  { %vm11793_vm1 = vmpackc.low %vm3543_vm4, %vm3540_vm7  ;;  %8674 = vset.pattern.permute.xlu1 %v14062_v26  ;;  %vm4596_vm11 = vcmp.eq.s32.totalorder %v11787_v57, %v10458_v63  ;;  %5566 = vperm.xlu0 %8675, %v9749_v15   ;;  %vm4593_vm4 = vcmp.eq.s32.totalorder %v11754_v59, %v10458_v63  ;;  %vm4121_vm7 = vcmp.eq.s32.totalorder %v11734_v41, %v10458_v63 }
 0x4d3   :  { %v11805_v45 = vpop.permute.xlu0 %4490  ;;  %vm11810_vm12 = vmpackc.low %vm3542_vm2, %vm3539_vm15  ;;  %8255 = vmatpush3.bf16.msk.msra.mxu0 %vm11721_vm8, %v13912_v19  ;;  %5578 = vperm.xlu1 %8674, %v9801_v5   ;;  %vm4071_vm2 = vcmp.eq.s32.totalorder %v11230_v55, %v9070_v43  ;;  %vm4054_vm8 = vcmp.eq.s32.totalorder %v11262_v39, %v10020_v44  ;;  %v11842_v5 = vld [vmem:[%s13694_s4 + $0x20] sm:$0xff] }
 0x4d4   :  { %vm7336_vm13 = vmpackc.low %vm4072_vm10, %vm4069_vm6  ;;  %7201 = vmatpush2.bf16.msk.msra.mxu1 %vm11779_vm5, %v13912_v19  ;;  %vm4063_vm5 = vcmp.eq.s32.totalorder %v11190_v53, %v10020_v44  ;;  %v7335_v26 = vcombine.high %v11842_v5, %v11842_v5 }
 0x4d5   :  { %vm11829_vm15 = vmpackc.low %vm4596_vm11, %vm4593_vm4  ;;  %7337 = vmatprep.subr.msk.bf16.mxu0 %vm7336_vm13, %v13912_v19  ;;  %7203 = vmatprep.subr.msk.bf16.mxu1 %vm11793_vm1, %v13912_v19  ;;  %v11847_v20 = vpop.permute.xlu1 %4493  ;;  %vm4051_vm11 = vcmp.eq.s32.totalorder %v14072_v48, %v10020_v44  ;;  %vm4060_vm4 = vcmp.eq.s32.totalorder %v11308_v25, %v10020_v44  ;;  %vm4065_vm13 = vcmp.eq.s32.totalorder %v11412_v46, %v9070_v43 }
 0x4d6   :  { %vm7338_vm6 = vmpackc.low %vm4071_vm2, %vm4068_vm3  ;;  %3908 = vmatmul.mubr.bf16.vlgmr.msra.gmra.mxu0 %v11791_v2  ;;  %vm4590_vm10 = vcmp.eq.s32.totalorder %v11847_v20, %v10458_v63  ;;  %5560 = vperm.xlu0 %8675, %v14035_v13   ;;  %vm4118_vm3 = vcmp.eq.s32.totalorder %v11378_v50, %v10458_v63  ;;  %vm4587_vm2 = vcmp.eq.s32.totalorder %v11805_v45, %v10458_v63 }
 0x4d7   :  { %vm7340_vm1 = vmpackc.low %vm4066_vm9, %vm4063_vm5  ;;  %7339 = vmatpush1.bf16.msk.msra.mxu0 %vm7338_vm6, %v13912_v19  ;;  %5572 = vperm.xlu1 %8674, %v9771_v22   ;;  %v11873_v13 = vpop.permute.xlu0 %4484  ;;  %vm4070_vm6 = vcmp.eq.s32.totalorder %v11343_v23, %v10458_v63  ;;  %v14075_v22 = vmov 0  ;;  %v14085_v23 = vld [vmem:[#allocation37_spill] sm:$0xff] }
 0x4d8   :  { %vm7416_vm9 = vmpackc.low %vm4121_vm7, %vm4118_vm3  ;;  %7341 = vmatprep.subr.msk.bf16.mxu0 %vm7340_vm1, %v13912_v19  ;;  %7205 = vmatpush2.bf16.msk.msra.mxu1 %vm11810_vm12, %v13912_v19  ;;  %vm4057_vm7 = vcmp.eq.s32.totalorder %v11152_v36, %v10020_v44  ;;  %vm4073_vm12 = vcmp.eq.s32.totalorder %v11230_v55, %v10458_v63  ;;  %vm4581_vm0 = vcmp.eq.s32.totalorder %v11873_v13, %v10458_v63 }
 0x4d9   :  { %vm11881_vm5 = vmpackc.low %vm4054_vm8, %vm4051_vm11  ;;  %vm4048_vm8 = vcmp.eq.s32.totalorder %v11210_v18, %v10020_v44  ;;  %vm4062_vm11 = vcmp.eq.s32.totalorder %v11190_v53, %v9070_v43  ;;  %8262 = vmatprep.subr.msk.bf16.mxu1 %vm7416_vm9, %v13912_v19  ;;  %v11904_v27 = vpop.permute.xlu1 %4487  ;;  %4401 = vmatprep.mubr.bf16.mxu0 %v7335_v26 }
 0x4da   :  { %vm11889_vm14 = vmpackc.low %vm4590_vm10, %vm4587_vm2  ;;  %vm4584_vm1 = vcmp.eq.s32.totalorder %v11904_v27, %v10458_v63  ;;  %5554 = vperm.xlu0 %8675, %v14041_v21   ;;  %vm4115_vm2 = vcmp.eq.s32.totalorder %v11446_v10, %v10458_v63 }
 0x4db   :  { %v14076_v22 = vsel %vm11889_vm14, 4294967295, %v14075_v22  ;;  %vm11909_vm10 = vmpackc.low %vm4060_vm4, %vm4057_vm7  ;;  %vm4045_vm4 = vcmp.eq.s32.totalorder %v14080_v29, %v10020_v44  ;;  %5575 = vperm.xlu1 %8674, %v9688_v58   ;;  %v11933_v21 = vpop.permute.xlu0 %4478  ;;  %3867 = vmatmul.mubr.bf16.vlgmr.msra.gmra.mxu1 %v11791_v2  ;;  %v14113_v2 = vld [vmem:[#allocation21_spill] sm:$0xff] }
 0x4dc   :  { %14077 = vst [vmem:[#allocation36_spill] sm:$0xff] %v14076_v22  ;;  %vm7342_vm3 = vmpackc.low %vm4065_vm13, %vm4062_vm11  ;;  %4442 = vmatprep.mubr.bf16.mxu1 %v7335_v26  ;;  %vm4575_vm9 = vcmp.eq.s32.totalorder %v11933_v21, %v10458_v63  ;;  %v14109_v26 = vld [vmem:[#allocation16_spill] sm:$0xff] }
 0x4dd   :  { %7343 = vmatpush1.bf16.msk.msra.mxu0 %vm7342_vm3, %v13912_v19  ;;  %vm7400_vm13 = vmpackc.low %vm4073_vm12, %vm4070_vm6  ;;  %vm4112_vm6 = vcmp.eq.s32.totalorder %v11285_v1, %v10458_v63  ;;  %vm4044_vm12 = vcmp.eq.s32.totalorder %v14080_v29, %v9070_v43  ;;  %v11967_v58 = vpop.permute.xlu1 %4481  ;;  %vm4064_vm3 = vcmp.eq.s32.totalorder %v11190_v53, %v10458_v63  ;;  %v14115_v53 = vld [vmem:[#allocation29_spill] sm:$0xff] }
 0x4de   :  { %vm11941_vm11 = vmpackc.low %vm4048_vm8, %vm4045_vm4  ;;  %7345 = vmatprep.subr.msk.bf16.mxu0 %vm11909_vm10, %v13912_v19  ;;  %8263 = vmatpush3.bf16.msk.msra.mxu1 %vm7400_vm13, %v13912_v19  ;;  %vm4578_vm4 = vcmp.eq.s32.totalorder %v11967_v58, %v10458_v63  ;;  %vm14086_vm13 = vcmp.eq.s32.totalorder %v11308_v25, %v9070_v43  ;;  %vm14087_vm8 = vcmp.eq.s32.totalorder %v11210_v18, %v9070_v43 }
 0x4df   :  { %vm11947_vm7 = vmpackc.low %vm4584_vm1, %vm4581_vm0  ;;  %vm4056_vm0 = vcmp.eq.s32.totalorder %v11152_v36, %v9070_v43  ;;  %5548 = vperm.xlu0 %8675, %v9657_v28   ;;  %5569 = vperm.xlu1 %8674, %v9672_v62   ;;  %v11995_v28 = vpop.permute.xlu0 %4472  ;;  %v14095_v62 = vmov 0 }
 0x4e0   :  { %vm7418_vm1 = vmpackc.low %vm4115_vm2, %vm4112_vm6 }
 0x4e1   :  { %8264 = vmatprep.subr.msk.bf16.mxu1 %vm7418_vm1, %v13912_v19  ;;  %vm7346_vm2 = vmpackc.low %vm14086_vm13, %vm4056_vm0  ;;  %vm14090_vm0 = vcmp.eq.s32.totalorder %v11412_v46, %v10458_v63  ;;  %v12027_v46 = vpop.permute.xlu1 %4475 }
 0x4e2   :  { %vm11985_vm10 = vmpackc.low %vm14087_vm8, %vm4044_vm12  ;;  %7347 = vmatpush1.bf16.msk.msra.mxu0 %vm7346_vm2, %v13912_v19  ;;  %vm14091_vm8 = vcmp.eq.s32.totalorder %v14085_v23, %v10020_v44  ;;  %vm14092_vm12 = vcmp.eq.s32.totalorder %v11171_v42, %v10020_v44  ;;  %vm4103_vm2 = vcmp.eq.s32.totalorder %v11520_v35, %v10458_v63 }
 0x4e3   :  { %vm7402_vm13 = vmpackc.low %vm14090_vm0, %vm4064_vm3  ;;  %7349 = vmatprep.subr.msk.bf16.mxu0 %vm11881_vm5, %v13912_v19  ;;  %vm4106_vm3 = vcmp.eq.s32.totalorder %v11321_v51, %v10458_v63  ;;  %vm4050_vm0 = vcmp.eq.s32.totalorder %v14072_v48, %v9070_v43  ;;  %vm4572_vm5 = vcmp.eq.s32.totalorder %v12027_v46, %v10458_v63  ;;  %5542 = vperm.xlu0 %8675, %v14051_v61  }
 0x4e4   :  { %vm12006_vm1 = vmpackc.low %vm14092_vm12, %vm14091_vm8  ;;  %8265 = vmatpush3.bf16.msk.msra.mxu1 %vm7402_vm13, %v13912_v19  ;;  %vm14097_vm8 = vcmp.eq.s32.totalorder %v11481_v33, %v10458_v63  ;;  %5563 = vperm.xlu1 %8674, %v9659_v9  }
 0x4e5   :  { %vm12012_vm6 = vmpackc.low %vm4578_vm4, %vm4575_vm9  ;;  %vm4058_vm9 = vcmp.eq.s32.totalorder %v11152_v36, %v10458_v63  ;;  %vm14098_vm4 = vcmp.eq.s32.totalorder %v11262_v39, %v9070_v43  ;;  %v12046_v36 = vpop.permute.xlu0 %4466  ;;  %v12065_v9 = vpop.permute.xlu1 %4469 }
 0x4e6   :  { %v14096_v62 = vsel %vm12012_vm6, 4294967295, %v14095_v62  ;;  %vm7420_vm12 = vmpackc.low %vm14097_vm8, %vm4106_vm3  ;;  %vm4569_vm8 = vcmp.eq.s32.totalorder %v11995_v28, %v10458_v63  ;;  %vm4038_vm3 = vcmp.eq.s32.totalorder %v14085_v23, %v9070_v43 }
 0x4e7   :  { %8266 = vmatprep.subr.msk.bf16.mxu1 %vm7420_vm12, %v13912_v19  ;;  %vm7350_vm13 = vmpackc.low %vm14098_vm4, %vm4050_vm0  ;;  %vm14099_vm12 = vcmp.eq.s32.totalorder %v11308_v25, %v10458_v63  ;;  %vm4055_vm0 = vcmp.eq.s32.totalorder %v11262_v39, %v10458_v63  ;;  %5536 = vperm.xlu0 %8675, %v14057_v6  }
 0x4e8   :  { %7351 = vmatpush1.bf16.msk.msra.mxu0 %vm7350_vm13, %v13912_v19  ;;  %vm7404_vm6 = vmpackc.low %vm14099_vm12, %vm4058_vm9  ;;  %vm4100_vm13 = vcmp.eq.s32.totalorder %v11356_v24, %v10458_v63  ;;  %vm14102_vm12 = vcmp.eq.s32.totalorder %v11171_v42, %v9070_v43  ;;  %5557 = vperm.xlu1 %8674, %v9644_v37   ;;  %v14108_v37 = vld [vmem:[#allocation38_spill] sm:$0xff] }
 0x4e9   :  { %vm12053_vm4 = vmpackc.low %vm4572_vm5, %vm4569_vm8  ;;  %7353 = vmatprep.subr.msk.bf16.mxu0 %vm11941_vm11, %v13912_v19  ;;  %8267 = vmatpush3.bf16.msk.msra.mxu1 %vm7404_vm6, %v13912_v19  ;;  %vm4052_vm5 = vcmp.eq.s32.totalorder %v14072_v48, %v10458_v63  ;;  %vm4566_vm8 = vcmp.eq.s32.totalorder %v12065_v9, %v10458_v63  ;;  %vm4097_vm11 = vcmp.eq.s32.totalorder %v11557_v47, %v10458_v63  ;;  %v12088_v6 = vpop.permute.xlu0 %4556  ;;  %v14105_v48 = vld [vmem:[#allocation41_spill] sm:$0xff]  ;;  %v12109_v39 = vpop.permute.xlu1 %4553 }
 0x4ea   :  { %vm7422_vm9 = vmpackc.low %vm4103_vm2, %vm4100_vm13  ;;  %vm4563_vm2 = vcmp.eq.s32.totalorder %v12046_v36, %v10458_v63 }
 0x4eb   :  { %8268 = vmatprep.subr.msk.bf16.mxu1 %vm7422_vm9, %v13912_v19  ;;  %vm12078_vm6 = vmpackc.low %vm14102_vm12, %vm4038_vm3  ;;  %vm4036_vm3 = vcmp.eq.s32.totalorder %v14105_v48, %v10020_v44  ;;  %5626 = vperm.xlu0 %8675, %v14110_v11   ;;  %vm4091_vm9 = vcmp.eq.s32.totalorder %v11595_v40, %v10458_v63 }
 0x4ec   :  { %7355 = vmatpush1.bf16.msk.msra.mxu0 %vm11985_vm10, %v13912_v19  ;;  %vm7406_vm13 = vmpackc.low %vm4055_vm0, %vm4052_vm5  ;;  %vm4094_vm10 = vcmp.eq.s32.totalorder %v14108_v37, %v10458_v63  ;;  %vm4035_vm0 = vcmp.eq.s32.totalorder %v14105_v48, %v9070_v43  ;;  %5551 = vperm.xlu1 %8674, %v9631_v4  }
 0x4ed   :  { %vm12097_vm12 = vmpackc.low %vm4566_vm8, %vm4563_vm2  ;;  %7357 = vmatprep.subr.msk.bf16.mxu0 %vm12006_vm1, %v13912_v19  ;;  %8269 = vmatpush3.bf16.msk.msra.mxu1 %vm7406_vm13, %v13912_v19  ;;  %vm4033_vm8 = vcmp.eq.s32.totalorder %v14109_v26, %v10020_v44  ;;  %vm4046_vm2 = vcmp.eq.s32.totalorder %v14080_v29, %v10458_v63  ;;  %vm4032_vm13 = vcmp.eq.s32.totalorder %v14109_v26, %v9070_v43  ;;  %v12125_v55 = vpop.permute.xlu0 %4550  ;;  %v14112_v29 = vld [vmem:[#allocation31_spill] sm:$0xff]  ;;  %v12143_v4 = vpop.permute.xlu1 %4547 }
 0x4ee   :  { %v14107_v17 = vsel %vm12097_vm12, 4294967295, %v14106_v17  ;;  %vm7424_vm5 = vmpackc.low %vm4097_vm11, %vm4094_vm10  ;;  %vm14111_vm11 = vcmp.eq.s32.totalorder %v11210_v18, %v10458_v63  ;;  %vm4026_vm12 = vcmp.eq.s32.totalorder %v14112_v29, %v9070_v43  ;;  %v14114_v18 = vld [vmem:[#allocation44_spill] sm:$0xff] }
 0x4ef   :  { %8270 = vmatprep.subr.msk.bf16.mxu1 %vm7424_vm5, %v13912_v19  ;;  %vm7360_vm1 = vmpackc.low %vm4036_vm3, %vm4033_vm8  ;;  %vm4027_vm3 = vcmp.eq.s32.totalorder %v14112_v29, %v10020_v44  ;;  %vm4088_vm8 = vcmp.eq.s32.totalorder %v14113_v2, %v10458_v63  ;;  %vm4085_vm5 = vcmp.eq.s32.totalorder %v11630_v60, %v10458_v63  ;;  %5620 = vperm.xlu0 %8675, %v14115_v53   ;;  %v14121_v53 = vld [vmem:[#allocation39_spill] sm:$0xff] }
 0x4f0   :  { %7359 = vmatpush1.bf16.msk.msra.mxu0 %vm12078_vm6, %v13912_v19  ;;  %vm7408_vm10 = vmpackc.low %vm14111_vm11, %vm4046_vm2  ;;  %vm4030_vm11 = vcmp.eq.s32.totalorder %v14114_v18, %v10020_v44  ;;  %5545 = vperm.xlu1 %8674, %v14047_v49   ;;  %v14117_v49 = vld [vmem:[#allocation26_spill] sm:$0xff] }
 0x4f1   :  { %7361 = vmatprep.subr.msk.bf16.mxu0 %vm7360_vm1, %v13912_v19  ;;  %vm7362_vm6 = vmpackc.low %vm4035_vm0, %vm4032_vm13  ;;  %8271 = vmatpush3.bf16.msk.msra.mxu1 %vm7408_vm10, %v13912_v19  ;;  %vm4040_vm1 = vcmp.eq.s32.totalorder %v14085_v23, %v10458_v63  ;;  %vm4029_vm13 = vcmp.eq.s32.totalorder %v14114_v18, %v9070_v43  ;;  %v12159_v25 = vpop.permute.xlu0 %4544  ;;  %vm14116_vm10 = vcmp.eq.s32.totalorder %v11171_v42, %v10458_v63  ;;  %v12178_v42 = vpop.permute.xlu1 %4541 }
 0x4f2   :  { %vm7426_vm2 = vmpackc.low %vm4091_vm9, %vm4088_vm8  ;;  %vm4037_vm9 = vcmp.eq.s32.totalorder %v14105_v48, %v10458_v63 }
 0x4f3   :  { %8272 = vmatprep.subr.msk.bf16.mxu1 %vm7426_vm2, %v13912_v19  ;;  %vm7364_vm0 = vmpackc.low %vm4030_vm11, %vm4027_vm3  ;;  %vm4120_vm2 = vcmp.eq.s32.totalorder %v11734_v41, %v10020_v44  ;;  %vm4082_vm3 = vcmp.eq.s32.totalorder %v11522_v32, %v10458_v63  ;;  %vm4034_vm11 = vcmp.eq.s32.totalorder %v14109_v26, %v10458_v63  ;;  %5614 = vperm.xlu0 %8675, %v14117_v49  }
 0x4f4   :  { %7363 = vmatpush1.bf16.msk.msra.mxu0 %vm7362_vm6, %v13912_v19  ;;  %vm7410_vm8 = vmpackc.low %vm14116_vm10, %vm4040_vm1  ;;  %vm4079_vm10 = vcmp.eq.s32.totalorder %v11665_v7, %v10458_v63  ;;  %5539 = vperm.xlu1 %8674, %v14054_v14   ;;  %v12202_v26 = vpop.f32.mrf.mxu0 }
 0x4f5   :  { %7365 = vmatprep.subr.msk.bf16.mxu0 %vm7364_vm0, %v13912_v19  ;;  %vm7366_vm6 = vmpackc.low %vm4029_vm13, %vm4026_vm12  ;;  %8273 = vmatpush3.bf16.msk.msra.mxu1 %vm7410_vm8, %v13912_v19  ;;  %vm4114_vm0 = vcmp.eq.s32.totalorder %v11446_v10, %v10020_v44  ;;  %vm4117_vm12 = vcmp.eq.s32.totalorder %v11378_v50, %v10020_v44  ;;  %v12198_v23 = vpop.permute.xlu0 %4538  ;;  %v12224_v48 = vpop.permute.xlu1 %4535 }
 0x4f6   :  { %vm7428_vm1 = vmpackc.low %vm4085_vm5, %vm4082_vm3  ;;  %vm4119_vm5 = vcmp.eq.s32.totalorder %v11734_v41, %v9070_v43  ;;  %vm4111_vm3 = vcmp.eq.s32.totalorder %v11285_v1, %v10020_v44  ;;  %v12226_v11 = vpop.f32.mrf.mxu0 }
 0x4f7   :  { %8274 = vmatprep.subr.msk.bf16.mxu1 %vm7428_vm1, %v13912_v19  ;;  %vm7412_vm13 = vmpackc.low %vm4037_vm9, %vm4034_vm11  ;;  %vm4028_vm9 = vcmp.eq.s32.totalorder %v14112_v29, %v10458_v63  ;;  %vm4116_vm1 = vcmp.eq.s32.totalorder %v11378_v50, %v9070_v43  ;;  %v14120_v50 = vld [vmem:[#allocation23_spill] sm:$0xff] }
 0x4f8   :  { %7367 = vmatpush1.bf16.msk.msra.mxu0 %vm7366_vm6, %v13912_v19  ;;  %vm7368_vm8 = vmpackc.low %vm4120_vm2, %vm4117_vm12  ;;  %vm4076_vm6 = vcmp.eq.s32.totalorder %v11559_v8, %v10458_v63  ;;  %vm4113_vm2 = vcmp.eq.s32.totalorder %v11446_v10, %v9070_v43  ;;  %5608 = vperm.xlu0 %8675, %v14120_v50   ;;  %v2267_v41 = vpop.f32.mrf.mxu0  ;;  %v12265_v29 = vld [vmem:[%s13694_s4 + $0x28] sm:$0xff]  ;;  %v14125_v50 = vld [vmem:[#allocation13_spill] sm:$0xff] }
 0x4f9   :  { %7369 = vmatprep.subr.msk.bf16.mxu0 %vm7368_vm8, %v13912_v19  ;;  %vm12212_vm11 = vmpackc.low %vm4114_vm0, %vm4111_vm3  ;;  %8275 = vmatpush3.bf16.msk.msra.mxu1 %vm7412_vm13, %v13912_v19  ;;  %vm4031_vm0 = vcmp.eq.s32.totalorder %v14114_v18, %v10458_v63  ;;  %vm4607_vm8 = vcmp.eq.s32.totalorder %v11709_v30, %v10020_v44  ;;  %v12241_v49 = vpop.permute.xlu0 %4532  ;;  %v12273_v10 = vpop.permute.xlu1 %4529  ;;  %v14122_v18 = vld [vmem:[#allocation15_spill] sm:$0xff] }
 0x4fa   :  { %vm7430_vm12 = vmpackc.low %vm4079_vm10, %vm4076_vm6  ;;  %vm4110_vm10 = vcmp.eq.s32.totalorder %v11285_v1, %v9070_v43  ;;  %5629 = vperm.xlu1 %8674, %v14121_v53   ;;  %vm4107_vm6 = vcmp.eq.s32.totalorder %v11481_v33, %v9070_v43  ;;  %v12260_v1 = vcombine.low %v11842_v5, %v11842_v5  ;;  %v2268_v5 = vpop.f32.mrf.mxu0  ;;  %v14128_v53 = vld [vmem:[#allocation12_spill] sm:$0xff] }
 0x4fb   :  { %vm7370_vm3 = vmpackc.low %vm4119_vm5, %vm4116_vm1  ;;  %8276 = vmatprep.subr.msk.bf16.mxu1 %vm7430_vm12, %v13912_v19  ;;  %vm4108_vm5 = vcmp.eq.s32.totalorder %v11481_v33, %v10020_v44  ;;  %vm4604_vm1 = vcmp.eq.s32.totalorder %v11599_v3, %v10020_v44 }
 0x4fc   :  { %7371 = vmatpush2.bf16.msk.msra.mxu0 %vm7370_vm3, %v13912_v19  ;;  %vm7414_vm13 = vmpackc.low %vm4031_vm0, %vm4028_vm9  ;;  %vm4606_vm9 = vcmp.eq.s32.totalorder %v11709_v30, %v9070_v43  ;;  %vm4104_vm0 = vcmp.eq.s32.totalorder %v11321_v51, %v9070_v43  ;;  %vm4601_vm3 = vcmp.eq.s32.totalorder %v11669_v31, %v10020_v44  ;;  %5602 = vperm.xlu0 %8675, %v13953_v38  }
 0x4fd   :  { %7373 = vmatprep.subr.msk.bf16.mxu0 %vm12212_vm11, %v13912_v19  ;;  %vm7374_vm12 = vmpackc.low %vm4113_vm2, %vm4110_vm10  ;;  %8277 = vmatpush3.bf16.msk.msra.mxu1 %vm7414_vm13, %v13912_v19  ;;  %vm4105_vm2 = vcmp.eq.s32.totalorder %v11321_v51, %v10020_v44  ;;  %vm4603_vm10 = vcmp.eq.s32.totalorder %v11599_v3, %v9070_v43  ;;  %v12290_v14 = vpop.permute.xlu0 %4526  ;;  %v12303_v38 = vcombine.high %v12265_v29, %v12265_v29  ;;  %v12320_v33 = vpop.permute.xlu1 %4523 }
 0x4fe   :  { %vm7530_vm11 = vmpackc.low %vm4607_vm8, %vm4604_vm1  ;;  %5623 = vperm.xlu1 %8674, %v14122_v18   ;;  %vm4102_vm1 = vcmp.eq.s32.totalorder %v11520_v35, %v10020_v44 }
 0x4ff   :  { %7531 = vmatprep.subr.msk.bf16.mxu1 %vm7530_vm11, %v13912_v19  ;;  %vm7376_vm8 = vmpackc.low %vm4108_vm5, %vm4105_vm2  ;;  %vm4101_vm5 = vcmp.eq.s32.totalorder %v11520_v35, %v9070_v43  ;;  %vm4600_vm11 = vcmp.eq.s32.totalorder %v11669_v31, %v9070_v43 }
 0x500   :  { %7375 = vmatpush2.bf16.msk.msra.mxu0 %vm7374_vm12, %v13912_v19  ;;  %vm12295_vm13 = vmpackc.low %vm4107_vm6, %vm4104_vm0  ;;  %4443 = vmatmul.mubr.bf16.vlgmr.msra.gmra.mxu1 %v12260_v1  ;;  %vm4598_vm6 = vcmp.eq.s32.totalorder %v11634_v16, %v10020_v44  ;;  %vm4098_vm0 = vcmp.eq.s32.totalorder %v11356_v24, %v9070_v43 }
 0x501   :  { %vm7532_vm12 = vmpackc.low %vm4606_vm9, %vm4603_vm10  ;;  %7377 = vmatprep.subr.msk.bf16.mxu0 %vm7376_vm8, %v13912_v19  ;;  %vm4099_vm9 = vcmp.eq.s32.totalorder %v11356_v24, %v10020_v44  ;;  %4936 = vmatprep.mubr.bf16.mxu1 %v12303_v38  ;;  %vm4595_vm8 = vcmp.eq.s32.totalorder %v11787_v57, %v10020_v44  ;;  %vm4597_vm10 = vcmp.eq.s32.totalorder %v11634_v16, %v9070_v43  ;;  %v12340_v24 = vpop.permute.xlu0 %4520  ;;  %v12365_v35 = vpop.permute.xlu1 %4517 }
 0x502   :  { %7533 = vmatpush1.bf16.msk.msra.mxu1 %vm7532_vm12, %v13912_v19  ;;  %vm7534_vm2 = vmpackc.low %vm4601_vm3, %vm4598_vm6  ;;  %5596 = vperm.xlu0 %8675, %v13959_v54   ;;  %vm4095_vm6 = vcmp.eq.s32.totalorder %v11557_v47, %v9070_v43 }
 0x503   :  { %7535 = vmatprep.subr.msk.bf16.mxu1 %vm7534_vm2, %v13912_v19  ;;  %vm7380_vm3 = vmpackc.low %vm4102_vm1, %vm4099_vm9  ;;  %5617 = vperm.xlu1 %8674, %v14125_v50   ;;  %vm4096_vm1 = vcmp.eq.s32.totalorder %v11557_v47, %v10020_v44  ;;  %vm4592_vm2 = vcmp.eq.s32.totalorder %v11754_v59, %v10020_v44  ;;  %v14131_v47 = vld [vmem:[#allocation11_spill] sm:$0xff] }
 0x504   :  { %7379 = vmatpush2.bf16.msk.msra.mxu0 %vm12295_vm13, %v13912_v19  ;;  %vm12345_vm12 = vmpackc.low %vm4101_vm5, %vm4098_vm0  ;;  %vm4594_vm5 = vcmp.eq.s32.totalorder %v11787_v57, %v9070_v43  ;;  %vm4093_vm0 = vcmp.eq.s32.totalorder %v14108_v37, %v10020_v44 }
 0x505   :  { %vm7536_vm13 = vmpackc.low %vm4600_vm11, %vm4597_vm10  ;;  %7381 = vmatprep.subr.msk.bf16.mxu0 %vm7380_vm3, %v13912_v19  ;;  %vm4092_vm11 = vcmp.eq.s32.totalorder %v14108_v37, %v9070_v43  ;;  %vm4589_vm3 = vcmp.eq.s32.totalorder %v11847_v20, %v10020_v44  ;;  %v12381_v41 = vpop.permute.xlu0 %4514 }
 0x506   :  { %7537 = vmatpush1.bf16.msk.msra.mxu1 %vm7536_vm13, %v13912_v19  ;;  %vm7538_vm9 = vmpackc.low %vm4595_vm8, %vm4592_vm2  ;;  %5590 = vperm.xlu0 %8675, %v13963_v12   ;;  %vm4591_vm13 = vcmp.eq.s32.totalorder %v11754_v59, %v9070_v43  ;;  %vm4089_vm2 = vcmp.eq.s32.totalorder %v11595_v40, %v9070_v43  ;;  %v12414_v12 = vpop.permute.xlu1 %5046 }
 0x507   :  { %7539 = vmatprep.subr.msk.bf16.mxu1 %vm7538_vm9, %v13912_v19  ;;  %vm7384_vm10 = vmpackc.low %vm4096_vm1, %vm4093_vm0  ;;  %5611 = vperm.xlu1 %8674, %v14128_v53   ;;  %vm4090_vm1 = vcmp.eq.s32.totalorder %v11595_v40, %v10020_v44  ;;  %vm4586_vm9 = vcmp.eq.s32.totalorder %v11805_v45, %v10020_v44 }
 0x508   :  { %7383 = vmatpush2.bf16.msk.msra.mxu0 %vm12345_vm12, %v13912_v19  ;;  %vm12386_vm8 = vmpackc.low %vm4095_vm6, %vm4092_vm11  ;;  %vm4588_vm6 = vcmp.eq.s32.totalorder %v11847_v20, %v9070_v43  ;;  %vm4087_vm11 = vcmp.eq.s32.totalorder %v14113_v2, %v10020_v44 }
 0x509   :  { %vm7540_vm12 = vmpackc.low %vm4594_vm5, %vm4591_vm13  ;;  %7385 = vmatprep.subr.msk.bf16.mxu0 %vm7384_vm10, %v13912_v19  ;;  %vm4086_vm5 = vcmp.eq.s32.totalorder %v14113_v2, %v9070_v43  ;;  %vm4583_vm13 = vcmp.eq.s32.totalorder %v11904_v27, %v10020_v44  ;;  %v12439_v59 = vpop.permute.xlu0 %5043 }
 0x50a   :  { %7541 = vmatpush1.bf16.msk.msra.mxu1 %vm7540_vm12, %v13912_v19  ;;  %vm7542_vm0 = vmpackc.low %vm4589_vm3, %vm4586_vm9  ;;  %5584 = vperm.xlu0 %8675, %v14063_v34   ;;  %vm4083_vm12 = vcmp.eq.s32.totalorder %v11630_v60, %v9070_v43  ;;  %vm4585_vm3 = vcmp.eq.s32.totalorder %v11805_v45, %v9070_v43  ;;  %v12456_v57 = vpop.permute.xlu1 %5091  ;;  %v14136_v45 = vmov 0  }
 0x50b   :  { %7543 = vmatprep.subr.msk.bf16.mxu1 %vm7542_vm0, %v13912_v19  ;;  %vm7388_vm10 = vmpackc.low %vm4090_vm1, %vm4087_vm11  ;;  %5605 = vperm.xlu1 %8674, %v14131_v47   ;;  %vm4084_vm1 = vcmp.eq.s32.totalorder %v11630_v60, %v10020_v44  ;;  %vm4580_vm11 = vcmp.eq.s32.totalorder %v11873_v13, %v10020_v44 }
 0x50c   :  { %7387 = vmatpush2.bf16.msk.msra.mxu0 %vm12386_vm8, %v13912_v19  ;;  %vm12427_vm9 = vmpackc.low %vm4089_vm2, %vm4086_vm5  ;;  %vm4080_vm8 = vcmp.eq.s32.totalorder %v11522_v32, %v9070_v43  ;;  %vm4582_vm2 = vcmp.eq.s32.totalorder %v11904_v27, %v9070_v43 }
 0x50d   :  { %vm7544_vm0 = vmpackc.low %vm4588_vm6, %vm4585_vm3  ;;  %7389 = vmatprep.subr.msk.bf16.mxu0 %vm7388_vm10, %v13912_v19  ;;  %vm4577_vm10 = vcmp.eq.s32.totalorder %v11967_v58, %v10020_v44  ;;  %vm4081_vm3 = vcmp.eq.s32.totalorder %v11522_v32, %v10020_v44  ;;  %v12480_v32 = vpop.permute.xlu0 %5040 }
 0x50e   :  { %7545 = vmatpush1.bf16.msk.msra.mxu1 %vm7544_vm0, %v13912_v19  ;;  %vm7546_vm5 = vmpackc.low %vm4583_vm13, %vm4580_vm11  ;;  %8676 = vset.pattern.permute.xlu0 %v14136_v45  ;;  %vm4077_vm0 = vcmp.eq.s32.totalorder %v11665_v7, %v9070_v43  ;;  %vm4579_vm13 = vcmp.eq.s32.totalorder %v11873_v13, %v9070_v43  ;;  %vm4573_vm11 = vcmp.eq.s32.totalorder %v11933_v21, %v9070_v43 }
 0x50f   :  { %vm12449_vm6 = vmpackc.low %vm4083_vm12, %vm4080_vm8  ;;  %7547 = vmatprep.subr.msk.bf16.mxu1 %vm7546_vm5, %v13912_v19  ;;  %5599 = vperm.xlu1 %8674, %v9759_v0   ;;  %vm4574_vm5 = vcmp.eq.s32.totalorder %v11933_v21, %v10020_v44  ;;  %v4560_v60 = vpop.permute.xlu1 %4559  ;;  %v12807_v0 = vld [vmem:[%s13694_s4 + $0x30] sm:$0xff] }
 0x510   :  { %7391 = vmatpush2.bf16.msk.msra.mxu0 %vm12427_vm9, %v13912_v19  ;;  %vm7392_vm12 = vmpackc.low %vm4084_vm1, %vm4081_vm3  ;;  %vm4074_vm9 = vcmp.eq.s32.totalorder %v11559_v8, %v9070_v43  ;;  %vm4576_vm1 = vcmp.eq.s32.totalorder %v11967_v58, %v9070_v43 }
 0x511   :  { %vm7548_vm8 = vmpackc.low %vm4582_vm2, %vm4579_vm13  ;;  %7393 = vmatprep.subr.msk.bf16.mxu0 %vm7392_vm12, %v13912_v19  ;;  %vm4571_vm13 = vcmp.eq.s32.totalorder %v12027_v46, %v10020_v44  ;;  %vm4075_vm12 = vcmp.eq.s32.totalorder %v11559_v8, %v10020_v44  ;;  %v12512_v8 = vpop.permute.xlu0 %5088 }
 0x512   :  { %7549 = vmatpush1.bf16.msk.msra.mxu1 %vm7548_vm8, %v13912_v19  ;;  %vm7550_vm3 = vmpackc.low %vm4577_vm10, %vm4574_vm5  ;;  %vm14139_vm10 = vcmp.eq.s32.totalorder %v11665_v7, %v10020_v44  ;;  %vm4568_vm5 = vcmp.eq.s32.totalorder %v11995_v28, %v10020_v44 }
 0x513   :  { %vm12490_vm2 = vmpackc.low %vm4077_vm0, %vm4074_vm9  ;;  %7551 = vmatprep.subr.msk.bf16.mxu1 %vm7550_vm3, %v13912_v19  ;;  %5593 = vperm.xlu1 %8674, %v14050_v56   ;;  %vm4656_vm9 = vcmp.eq.s32.totalorder %v4560_v60, %v10458_v63  ;;  %vm4653_vm3 = vcmp.eq.s32.totalorder %v12088_v6, %v10458_v63 }
 0x514   :  { %7395 = vmatpush2.bf16.msk.msra.mxu0 %vm12449_vm6, %v13912_v19  ;;  %vm7396_vm0 = vmpackc.low %vm14139_vm10, %vm4075_vm12  ;;  %vm4570_vm6 = vcmp.eq.s32.totalorder %v12027_v46, %v9070_v43  ;;  %vm4608_vm10 = vcmp.eq.s32.totalorder %v11709_v30, %v10458_v63  ;;  %v12542_v7 = vpop.permute.xlu1 %5037 }
 0x515   :  { %vm7552_vm8 = vmpackc.low %vm4576_vm1, %vm4573_vm11  ;;  %7397 = vmatprep.subr.msk.bf16.mxu0 %vm7396_vm0, %v13912_v19  ;;  %vm4565_vm1 = vcmp.eq.s32.totalorder %v12065_v9, %v10020_v44  ;;  %vm4567_vm0 = vcmp.eq.s32.totalorder %v11995_v28, %v9070_v43  ;;  %v12540_v56 = vpop.permute.xlu0 %5034 }
 0x516   :  { %7553 = vmatpush1.bf16.msk.msra.mxu1 %vm7552_vm8, %v13912_v19  ;;  %vm7554_vm11 = vmpackc.low %vm4571_vm13, %vm4568_vm5  ;;  %vm4562_vm13 = vcmp.eq.s32.totalorder %v12046_v36, %v10020_v44  ;;  %vm4650_vm5 = vcmp.eq.s32.totalorder %v12109_v39, %v10458_v63 }
 0x517   :  { %7555 = vmatprep.subr.msk.bf16.mxu1 %vm7554_vm11, %v13912_v19  ;;  %vm7610_vm12 = vmpackc.low %vm4656_vm9, %vm4653_vm3  ;;  %5587 = vperm.xlu1 %8674, %v13975_v52   ;;  %vm4647_vm9 = vcmp.eq.s32.totalorder %v12125_v55, %v10458_v63  ;;  %v8190_v52 = vpop.f32.mrf.mxu0 }
 0x518   :  { %7399 = vmatpush2.bf16.msk.msra.mxu0 %vm12490_vm2, %v13912_v19  ;;  %vm7556_vm8 = vmpackc.low %vm4570_vm6, %vm4567_vm0  ;;  %vm4605_vm2 = vcmp.eq.s32.totalorder %v11599_v3, %v10458_v63  ;;  %vm4564_vm6 = vcmp.eq.s32.totalorder %v12065_v9, %v9070_v43  ;;  %vm4602_vm0 = vcmp.eq.s32.totalorder %v11669_v31, %v10458_v63  ;;  %v12579_v20 = vpop.permute.xlu1 %5085  ;;  %v2310_v9 = vmul.f32 256.0, %v12202_v26 }
 0x519   :  { %8284 = vmatprep.subr.msk.bf16.mxu0 %vm7610_vm12, %v13912_v19  ;;  %vm7558_vm3 = vmpackc.low %vm4565_vm1, %vm4562_vm13  ;;  %vm4655_vm12 = vcmp.eq.s32.totalorder %v4560_v60, %v10020_v44  ;;  %v8191_v3 = vpop.f32.mrf.mxu0  ;;  %vm4652_vm13 = vcmp.eq.s32.totalorder %v12088_v6, %v10020_v44  ;;  %v12577_v30 = vpop.permute.xlu0 %5082 }
 0x51a   :  { %7557 = vmatpush1.bf16.msk.msra.mxu1 %vm7556_vm8, %v13912_v19  ;;  %vm7594_vm11 = vmpackc.low %vm4608_vm10, %vm4605_vm2  ;;  %vm4561_vm8 = vcmp.eq.s32.totalorder %v12046_v36, %v9070_v43  ;;  %v12581_v13 = vadd.f32 %v8191_v3, %v8190_v52  ;;  %vm4651_vm2 = vcmp.eq.s32.totalorder %v12088_v6, %v9070_v43  ;;  %v2316_v6 = vrot.slane %v12202_v26, 1 }
 0x51b   :  { %4402 = vmatmul.mubr.bf16.vlgmr.msra.gmra.mxu0 %v12260_v1  ;;  %7559 = vmatprep.subr.msk.bf16.mxu1 %vm7558_vm3, %v13912_v19  ;;  %vm7612_vm1 = vmpackc.low %vm4650_vm5, %vm4647_vm9  ;;  %vm4641_vm3 = vcmp.eq.s32.totalorder %v12159_v25, %v10458_v63  ;;  %vm4599_vm5 = vcmp.eq.s32.totalorder %v11634_v16, %v10458_v63  ;;  %vm4654_vm9 = vcmp.eq.s32.totalorder %v4560_v60, %v9070_v43  ;;  %v8193_v27 = vpop.f32.mrf.mxu0 }
 0x51c   :  { %8285 = vmatpush3.bf16.msk.msra.mxu0 %vm7594_vm11, %v13912_v19  ;;  %4977 = vmatprep.mubr.bf16.mxu0 %v12303_v38  ;;  %vm7560_vm10 = vmpackc.low %vm4564_vm6, %vm4561_vm8  ;;  %vm4649_vm8 = vcmp.eq.s32.totalorder %v12109_v39, %v10020_v44  ;;  %v12613_v21 = vpop.permute.xlu1 %5031  ;;  %v7723_v3 = vcombine.high %v12807_v0, %v12807_v0 }
 0x51d   :  { %8286 = vmatprep.subr.msk.bf16.mxu0 %vm7612_vm1, %v13912_v19  ;;  %vm7562_vm6 = vmpackc.low %vm4655_vm12, %vm4652_vm13  ;;  %vm4646_vm1 = vcmp.eq.s32.totalorder %v12125_v55, %v10020_v44  ;;  %vm14140_vm12 = vcmp.eq.s32.totalorder %v12143_v4, %v10458_v63  ;;  %v8194_v16 = vpop.f32.mrf.mxu0  ;;  %vm4635_vm13 = vcmp.eq.s32.totalorder %v12198_v23, %v10458_v63  ;;  %v12611_v31 = vpop.permute.xlu0 %5028 }
 0x51e   :  { %7561 = vmatpush1.bf16.msk.msra.mxu1 %vm7560_vm10, %v13912_v19  ;;  %vm7596_vm11 = vmpackc.low %vm4602_vm0, %vm4599_vm5  ;;  %vm4638_vm10 = vcmp.eq.s32.totalorder %v12178_v42, %v10458_v63 }
 0x51f   :  { %7563 = vmatprep.subr.msk.bf16.mxu1 %vm7562_vm6, %v13912_v19  ;;  %vm7614_vm0 = vmpackc.low %vm14140_vm12, %vm4641_vm3  ;;  %vm4648_vm6 = vcmp.eq.s32.totalorder %v12109_v39, %v9070_v43  ;;  %vm4645_vm3 = vcmp.eq.s32.totalorder %v12125_v55, %v9070_v43  ;;  %v2311_v39 = vmul.f32 256.0, %v12226_v11  ;;  %v2317_v55 = vrot.slane %v12226_v11, 1 }
 0x520   :  { %8287 = vmatpush3.bf16.msk.msra.mxu0 %vm7596_vm11, %v13912_v19  ;;  %vm7564_vm5 = vmpackc.low %vm4654_vm9, %vm4651_vm2  ;;  %vm4643_vm9 = vcmp.eq.s32.totalorder %v12143_v4, %v10020_v44  ;;  %vm4640_vm11 = vcmp.eq.s32.totalorder %v12159_v25, %v10020_v44  ;;  %v12641_v28 = vpop.permute.xlu1 %5079 }
 0x521   :  { %8288 = vmatprep.subr.msk.bf16.mxu0 %vm7614_vm0, %v13912_v19  ;;  %vm7566_vm2 = vmpackc.low %vm4649_vm8, %vm4646_vm1  ;;  %vm4629_vm8 = vcmp.eq.s32.totalorder %v12241_v49, %v10458_v63  ;;  %v12639_v58 = vpop.permute.xlu0 %5076  ;;  %vm4642_vm1 = vcmp.eq.s32.totalorder %v12143_v4, %v9070_v43  ;;  %v2322_v4 = vadd.f32 %v2316_v6, %v2310_v9  ;;  %v2323_v26 = vadd.f32 %v2317_v55, %v2311_v39 }
 0x522   :  { %7565 = vmatpush2.bf16.msk.msra.mxu1 %vm7564_vm5, %v13912_v19  ;;  %vm7616_vm12 = vmpackc.low %vm4638_vm10, %vm4635_vm13  ;;  %vm4632_vm5 = vcmp.eq.s32.totalorder %v12224_v48, %v10458_v63  ;;  %vm4637_vm13 = vcmp.eq.s32.totalorder %v12178_v42, %v10020_v44 }
 0x523   :  { %7567 = vmatprep.subr.msk.bf16.mxu1 %vm7566_vm2, %v13912_v19  ;;  %vm7568_vm0 = vmpackc.low %vm4648_vm6, %vm4645_vm3  ;;  %vm4634_vm6 = vcmp.eq.s32.totalorder %v12198_v23, %v10020_v44  ;;  %v6161_v53 = vrot.slane %v2323_v26, 2 }
 0x524   :  { %8289 = vmatpush3.bf16.msk.msra.mxu0 %vm11829_vm15, %v13912_v19  ;;  %vm4639_vm15 = vcmp.eq.s32.totalorder %v12159_v25, %v9070_v43  ;;  %vm7570_vm10 = vmpackc.low %vm4643_vm9, %vm4640_vm11  ;;  %vm4623_vm9 = vcmp.eq.s32.totalorder %v12290_v14, %v10458_v63  ;;  %v12663_v36 = vpop.permute.xlu1 %5025  ;;  %vm4636_vm11 = vcmp.eq.s32.totalorder %v12178_v42, %v9070_v43 }
 0x525   :  { %8290 = vmatprep.subr.msk.bf16.mxu0 %vm7616_vm12, %v13912_v19  ;;  %vm7618_vm3 = vmpackc.low %vm4632_vm5, %vm4629_vm8  ;;  %vm4626_vm12 = vcmp.eq.s32.totalorder %v12273_v10, %v10458_v63  ;;  %v12661_v46 = vpop.permute.xlu0 %5022  ;;  %vm4631_vm5 = vcmp.eq.s32.totalorder %v12224_v48, %v10020_v44  ;;  %vm4628_vm8 = vcmp.eq.s32.totalorder %v12241_v49, %v10020_v44 }
 0x526   :  { %7569 = vmatpush2.bf16.msk.msra.mxu1 %vm7568_vm0, %v13912_v19  ;;  %vm7572_vm2 = vmpackc.low %vm4642_vm1, %vm4639_vm15 }
 0x527   :  { %7571 = vmatprep.subr.msk.bf16.mxu1 %vm7570_vm10, %v13912_v19  ;;  %vm7574_vm0 = vmpackc.low %vm4637_vm13, %vm4634_vm6  ;;  %vm4620_vm10 = vcmp.eq.s32.totalorder %v12320_v33, %v10458_v63  ;;  %vm4617_vm13 = vcmp.eq.s32.totalorder %v12340_v24, %v10458_v63  ;;  %vm4627_vm6 = vcmp.eq.s32.totalorder %v12241_v49, %v9070_v43 }
 0x528   :  { %8291 = vmatpush3.bf16.msk.msra.mxu0 %vm11889_vm14, %v13912_v19  ;;  %vm4633_vm14 = vcmp.eq.s32.totalorder %v12198_v23, %v9070_v43  ;;  %vm7620_vm1 = vmpackc.low %vm4626_vm12, %vm4623_vm9  ;;  %v12701_v22 = vpop.permute.xlu1 %5073  ;;  %vm4622_vm12 = vcmp.eq.s32.totalorder %v12290_v14, %v10020_v44  ;;  %vm4614_vm9 = vcmp.eq.s32.totalorder %v12365_v35, %v10458_v63 }
 0x529   :  { %8292 = vmatprep.subr.msk.bf16.mxu0 %vm7618_vm3, %v13912_v19  ;;  %vm7576_vm15 = vmpackc.low %vm4636_vm11, %vm4633_vm14  ;;  %v12699_v2 = vpop.permute.xlu0 %5070  ;;  %v2798_v25 = vpop.f32.mrf.mxu1  ;;  %vm14142_vm11 = vnez %v14096_v62 }
 0x52a   :  { %7573 = vmatpush2.bf16.msk.msra.mxu1 %vm7572_vm2, %v13912_v19  ;;  %vm7578_vm3 = vmpackc.low %vm4631_vm5, %vm4628_vm8  ;;  %vm4625_vm2 = vcmp.eq.s32.totalorder %v12273_v10, %v10020_v44  ;;  %v2845_v42 = vmul.f32 256.0, %v2798_v25  ;;  %v2851_v23 = vrot.slane %v2798_v25, 1  ;;  %vm4611_vm5 = vcmp.eq.s32.totalorder %v12381_v41, %v10458_v63 }
 0x52b   :  { %7575 = vmatprep.subr.msk.bf16.mxu1 %vm7574_vm0, %v13912_v19  ;;  %vm7622_vm14 = vmpackc.low %vm4620_vm10, %vm4617_vm13  ;;  %v2800_v11 = vpop.f32.mrf.mxu1  ;;  %vm4624_vm8 = vcmp.eq.s32.totalorder %v12273_v10, %v9070_v43  ;;  %vm4616_vm13 = vcmp.eq.s32.totalorder %v12340_v24, %v10020_v44 }
 0x52c   :  { %8293 = vmatpush3.bf16.msk.msra.mxu0 %vm11947_vm7, %v13912_v19  ;;  %vm4630_vm7 = vcmp.eq.s32.totalorder %v12224_v48, %v9070_v43  ;;  %v2857_v62 = vadd.f32 %v2851_v23, %v2845_v42  ;;  %v2846_v1 = vmul.f32 256.0, %v2800_v11  ;;  %v2852_v5 = vrot.slane %v2800_v11, 1  ;;  %v12741_v51 = vpop.permute.xlu1 %5019  ;;  %vm7582_vm10 = vmpackc.low %vm4625_vm2, %vm4622_vm12 }
 0x52d   :  { %8294 = vmatprep.subr.msk.bf16.mxu0 %vm7620_vm1, %v13912_v19  ;;  %vm7580_vm0 = vmpackc.low %vm4630_vm7, %vm4627_vm6  ;;  %v12739_v18 = vpop.permute.xlu0 %5094  ;;  %vm4621_vm1 = vcmp.eq.s32.totalorder %v12290_v14, %v9070_v43  ;;  %v6160_v48 = vrot.slane %v2322_v4, 2  ;;  %v2802_v49 = vpop.f32.mrf.mxu1  ;;  %vm5142_vm7 = vcmp.eq.s32.totalorder %v12414_v12, %v10020_v44  ;;  %vm5139_vm6 = vcmp.eq.s32.totalorder %v12439_v59, %v10020_v44 }
 0x52e   :  { %7577 = vmatpush2.bf16.msk.msra.mxu1 %vm7576_vm15, %v13912_v19  ;;  %vm4619_vm15 = vcmp.eq.s32.totalorder %v12320_v33, %v10020_v44  ;;  %v6073_v38 = vrot.slane %v2857_v62, 7  ;;  %v6166_v50 = vrot.slane %v2857_v62, 1  ;;  %v2858_v54 = vadd.f32 %v2852_v5, %v2846_v1  ;;  %vm7584_vm2 = vmpackc.low %vm4624_vm8, %vm4621_vm1 }
 0x52f   :  { %7579 = vmatprep.subr.msk.bf16.mxu1 %vm7578_vm3, %v13912_v19  ;;  %vm7624_vm3 = vmpackc.low %vm4614_vm9, %vm4611_vm5  ;;  %v2803_v37 = vpop.f32.mrf.mxu1  ;;  %vm14143_vm12 = vcmask 1040384   ;;  %vm4615_vm9 = vcmp.eq.s32.totalorder %v12340_v24, %v9070_v43  ;;  %v12802_v14 = vcombine.low %v12265_v29, %v12265_v29  ;;  %vm4610_vm5 = vcmp.eq.s32.totalorder %v12381_v41, %v10020_v44 }
 0x530   :  { %8295 = vmatpush3.bf16.msk.msra.mxu0 %vm14142_vm11, %v13912_v19  ;;  %v12779_v47 = vsel %vm14143_vm12, %v2322_v4, %v6073_v38  ;;  %vm14144_vm11 = vmmov %vm14143_vm12  ;;  %v6074_v34 = vrot.slane %v2858_v54, 7  ;;  %v6167_v40 = vrot.slane %v2858_v54, 1  ;;  %vm5133_vm12 = vcmp.eq.s32.totalorder %v12542_v7, %v10020_v44 }
 0x531   :  { %8296 = vmatprep.subr.msk.bf16.mxu0 %vm7622_vm14, %v13912_v19  ;;  %v12782_v61 = vsel %vm14144_vm11, %v6160_v48, %v6166_v50  ;;  %v12785_v45 = vpop.permute.xlu0 %5016  ;;  %v12792_v10 = vpop.permute.xlu1 %5067  ;;  %vm7586_vm14 = vmpackc.low %vm4619_vm15, %vm4616_vm13  ;;  %vm5141_vm15 = vcmp.eq.s32.totalorder %v12414_v12, %v9070_v43  ;;  %vm14147_vm13 = vnez %v14107_v17  ;;  %v2318_v24 = vrot.slane %v12581_v13, 1  ;;  %v13156_v48 = vld [vmem:[%s13694_s4 + $0x38] sm:$0xff] }
 0x532   :  { %7581 = vmatpush2.bf16.msk.msra.mxu1 %vm7580_vm0, %v13912_v19  ;;  %vm4613_vm0 = vcmp.eq.s32.totalorder %v12365_v35, %v10020_v44  ;;  %vm14145_vm8 = vmmov %vm14144_vm11 }
 0x533   :  { %7583 = vmatprep.subr.msk.bf16.mxu1 %vm7582_vm10, %v13912_v19  ;;  %v12814_v60 = vsel %vm14145_vm8, %v2323_v26, %v6074_v34  ;;  %vm14146_vm1 = vmmov %vm14145_vm8  ;;  %vm5138_vm10 = vcmp.eq.s32.totalorder %v12439_v59, %v9070_v43 }
 0x534   :  { %8297 = vmatpush3.bf16.msk.msra.mxu0 %vm12053_vm4, %v13912_v19  ;;  %vm4618_vm4 = vcmp.eq.s32.totalorder %v12320_v33, %v9070_v43  ;;  %v12817_v52 = vsel %vm14146_vm1, %v6161_v53, %v6167_v40  ;;  %v8212_v29 = vpop.f32.mrf.mxu0  ;;  %v2312_v33 = vmul.f32 256.0, %v12581_v13  ;;  %vm7590_vm11 = vmpackc.low %vm4613_vm0, %vm4610_vm5  ;;  %vm5132_vm0 = vcmp.eq.s32.totalorder %v12542_v7, %v9070_v43 }
 0x535   :  { %8298 = vmatprep.subr.msk.bf16.mxu0 %vm7624_vm3, %v13912_v19  ;;  %vm7724_vm3 = vmpackc.low %vm5142_vm7, %vm5139_vm6  ;;  %v12842_v17 = vpop.permute.xlu0 %5064  ;;  %vm4612_vm7 = vcmp.eq.s32.totalorder %v12365_v35, %v9070_v43  ;;  %vm4609_vm6 = vcmp.eq.s32.totalorder %v12381_v41, %v9070_v43  ;;  %v12853_v27 = vpop.permute.xlu1 %5013  ;;  %vm5143_vm1 = vcmp.eq.s32.totalorder %v12414_v12, %v10458_v63 }
 0x536   :  { %7585 = vmatpush2.bf16.msk.msra.mxu1 %vm7584_vm2, %v13912_v19  ;;  %vm7588_vm2 = vmpackc.low %vm4618_vm4, %vm4615_vm9  ;;  %vm5136_vm9 = vcmp.eq.s32.totalorder %v12480_v32, %v10020_v44  ;;  %v8213_v13 = vpop.f32.mrf.mxu0  ;;  %v2324_v35 = vadd.f32 %v2318_v24, %v2312_v33 }
 0x537   :  { %7587 = vmatprep.subr.msk.bf16.mxu1 %vm7586_vm14, %v13912_v19  ;;  %vm7726_vm4 = vmpackc.low %vm5141_vm15, %vm5138_vm10  ;;  %vm5191_vm14 = vcmp.eq.s32.totalorder %v12739_v18, %v10458_v63  ;;  %v8214_v16 = vadd.f32 %v8213_v13, %v8212_v29  ;;  %vm5140_vm15 = vcmp.eq.s32.totalorder %v12439_v59, %v10458_v63  ;;  %vm5188_vm10 = vcmp.eq.s32.totalorder %v12456_v57, %v10458_v63 }
 0x538   :  { %8299 = vmatpush3.bf16.msk.msra.mxu0 %vm14147_vm13, %v13912_v19  ;;  %vm7728_vm5 = vmpackc.low %vm5136_vm9, %vm5133_vm12  ;;  %vm5127_vm13 = vcmp.eq.s32.totalorder %v12613_v21, %v10020_v44  ;;  %v8215_v41 = vpop.f32.mrf.mxu0  ;;  %vm5130_vm12 = vcmp.eq.s32.totalorder %v12540_v56, %v10020_v44  ;;  %v6162_v12 = vrot.slane %v2324_v35, 2 }
 0x539   :  { %7725 = vmatprep.subr.msk.bf16.mxu0 %vm7724_vm3, %v13912_v19  ;;  %vm7592_vm8 = vmpackc.low %vm4612_vm7, %vm4609_vm6  ;;  %v12894_v15 = vpop.permute.xlu0 %5010  ;;  %vm5135_vm3 = vcmp.eq.s32.totalorder %v12480_v32, %v9070_v43  ;;  %v2847_v9 = vmul.f32 256.0, %v8214_v16  ;;  %v2853_v6 = vrot.slane %v8214_v16, 1  ;;  %v12899_v39 = vpop.permute.xlu1 %5061  ;;  %vm5182_vm6 = vcmp.eq.s32.totalorder %v12579_v20, %v10458_v63 }
 0x53a   :  { %7589 = vmatpush2.bf16.msk.msra.mxu1 %vm7588_vm2, %v13912_v19  ;;  %vm7804_vm2 = vmpackc.low %vm5191_vm14, %vm5188_vm10  ;;  %v8216_v55 = vpop.f32.mrf.mxu0  ;;  %vm5185_vm14 = vcmp.eq.s32.totalorder %v12512_v8, %v10458_v63 }
 0x53b   :  { %7591 = vmatprep.subr.msk.bf16.mxu1 %vm7590_vm11, %v13912_v19  ;;  %4978 = vmatmul.mubr.bf16.vlgmr.msra.gmra.mxu0 %v12802_v14  ;;  %vm7730_vm7 = vmpackc.low %vm5135_vm3, %vm5132_vm0  ;;  %vm5126_vm11 = vcmp.eq.s32.totalorder %v12613_v21, %v9070_v43  ;;  %v2859_v4 = vadd.f32 %v2853_v6, %v2847_v9  ;;  %vm5129_vm0 = vcmp.eq.s32.totalorder %v12540_v56, %v9070_v43 }
 0x53c   :  { %7727 = vmatpush1.bf16.msk.msra.mxu0 %vm7726_vm4, %v13912_v19  ;;  %5471 = vmatprep.mubr.bf16.mxu0 %v7723_v3  ;;  %vm7732_vm4 = vmpackc.low %vm5130_vm12, %vm5127_vm13  ;;  %vm5176_vm13 = vcmp.eq.s32.totalorder %v12641_v28, %v10458_v63  ;;  %vm5137_vm3 = vcmp.eq.s32.totalorder %v12480_v32, %v10458_v63  ;;  %vm14148_vm12 = vcmask 1040384  }
 0x53d   :  { %7729 = vmatprep.subr.msk.bf16.mxu0 %vm7728_vm5, %v13912_v19  ;;  %vm7788_vm9 = vmpackc.low %vm5143_vm1, %vm5140_vm15  ;;  %vm5121_vm5 = vcmp.eq.s32.totalorder %v12663_v36, %v10020_v44  ;;  %v12932_v25 = vpop.permute.xlu0 %5058  ;;  %v6075_v59 = vrot.slane %v2859_v4, 7  ;;  %v6168_v42 = vrot.slane %v2859_v4, 1  ;;  %v12937_v23 = vpop.permute.xlu1 %5007  ;;  %vm5124_vm15 = vcmp.eq.s32.totalorder %v12611_v31, %v10020_v44 }
 0x53e   :  { %7593 = vmatpush2.bf16.msk.msra.mxu1 %vm7592_vm8, %v13912_v19  ;;  %vm5134_vm8 = vcmp.eq.s32.totalorder %v12542_v7, %v10458_v63  ;;  %vm7806_vm1 = vmpackc.low %vm5185_vm14, %vm5182_vm6  ;;  %vm5123_vm14 = vcmp.eq.s32.totalorder %v12611_v31, %v9070_v43 }
 0x53f   :  { %8306 = vmatprep.subr.msk.bf16.mxu1 %vm7804_vm2, %v13912_v19  ;;  %vm7734_vm10 = vmpackc.low %vm5129_vm0, %vm5126_vm11  ;;  %vm5120_vm2 = vcmp.eq.s32.totalorder %v12663_v36, %v9070_v43  ;;  %v12955_v26 = vsel %vm14148_vm12, %v2324_v35, %v6075_v59  ;;  %vm5128_vm0 = vcmp.eq.s32.totalorder %v12613_v21, %v10458_v63 }
 0x540   :  { %7731 = vmatpush1.bf16.msk.msra.mxu0 %vm7730_vm7, %v13912_v19  ;;  %vm14149_vm7 = vmmov %vm14148_vm12 }
 0x541   :  { %4937 = vmatmul.mubr.bf16.vlgmr.msra.gmra.mxu1 %v12802_v14  ;;  %7733 = vmatprep.subr.msk.bf16.mxu0 %vm7732_vm4, %v13912_v19  ;;  %v12958_v11 = vsel %vm14149_vm7, %v6162_v12, %v6168_v42  ;;  %vm7736_vm6 = vmpackc.low %vm5124_vm15, %vm5121_vm5  ;;  %vm5179_vm4 = vcmp.eq.s32.totalorder %v12577_v30, %v10458_v63  ;;  %v12972_v32 = vpop.permute.xlu0 %5004  ;;  %v12979_v7 = vpop.permute.xlu1 %5055  ;;  %vm5170_vm15 = vcmp.eq.s32.totalorder %v12701_v22, %v10458_v63 }
 0x542   :  { %8307 = vmatpush3.bf16.msk.msra.mxu1 %vm7788_vm9, %v13912_v19  ;;  %5512 = vmatprep.mubr.bf16.mxu1 %v7723_v3  ;;  %vm7790_vm11 = vmpackc.low %vm5137_vm3, %vm5134_vm8  ;;  %vm5115_vm9 = vcmp.eq.s32.totalorder %v12741_v51, %v10020_v44  ;;  %vm5118_vm8 = vcmp.eq.s32.totalorder %v12661_v46, %v10020_v44  ;;  %vm5114_vm3 = vcmp.eq.s32.totalorder %v12741_v51, %v9070_v43 }
 0x543   :  { %8308 = vmatprep.subr.msk.bf16.mxu1 %vm7806_vm1, %v13912_v19  ;;  %vm7808_vm5 = vmpackc.low %vm5179_vm4, %vm5176_vm13  ;;  %vm5109_vm7 = vcmp.eq.s32.totalorder %v12853_v27, %v10020_v44 }
 0x544   :  { %7735 = vmatpush1.bf16.msk.msra.mxu0 %vm7734_vm10, %v13912_v19  ;;  %vm7738_vm1 = vmpackc.low %vm5123_vm14, %vm5120_vm2  ;;  %vm5131_vm10 = vcmp.eq.s32.totalorder %v12540_v56, %v10458_v63  ;;  %vm5173_vm2 = vcmp.eq.s32.totalorder %v12639_v58, %v10458_v63  ;;  %vm5112_vm14 = vcmp.eq.s32.totalorder %v12785_v45, %v10020_v44 }
 0x545   :  { %7737 = vmatprep.subr.msk.bf16.mxu0 %vm7736_vm6, %v13912_v19  ;;  %vm7740_vm13 = vmpackc.low %vm5118_vm8, %vm5115_vm9  ;;  %v13005_v21 = vpop.permute.xlu0 %5052  ;;  %vm5117_vm6 = vcmp.eq.s32.totalorder %v12661_v46, %v9070_v43  ;;  %v13012_v56 = vpop.permute.xlu1 %5001  ;;  %vm5108_vm8 = vcmp.eq.s32.totalorder %v12853_v27, %v9070_v43 }
 0x546   :  { %8309 = vmatpush3.bf16.msk.msra.mxu1 %vm7790_vm11, %v13912_v19  ;;  %vm7792_vm12 = vmpackc.low %vm5131_vm10, %vm5128_vm0  ;;  %vm5122_vm11 = vcmp.eq.s32.totalorder %v12663_v36, %v10458_v63  ;;  %vm5164_vm0 = vcmp.eq.s32.totalorder %v12792_v10, %v10458_v63  ;;  %vm5167_vm10 = vcmp.eq.s32.totalorder %v12699_v2, %v10458_v63 }
 0x547   :  { %8310 = vmatprep.subr.msk.bf16.mxu1 %vm7808_vm5, %v13912_v19  ;;  %vm7810_vm4 = vmpackc.low %vm5173_vm2, %vm5170_vm15  ;;  %vm5125_vm5 = vcmp.eq.s32.totalorder %v12611_v31, %v10458_v63 }
 0x548   :  { %7739 = vmatpush1.bf16.msk.msra.mxu0 %vm7738_vm1, %v13912_v19  ;;  %vm7742_vm9 = vmpackc.low %vm5117_vm6, %vm5114_vm3  ;;  %vm5103_vm3 = vcmp.eq.s32.totalorder %v12937_v23, %v10020_v44  ;;  %vm5106_vm6 = vcmp.eq.s32.totalorder %v12894_v15, %v10020_v44 }
 0x549   :  { %7741 = vmatprep.subr.msk.bf16.mxu0 %vm7740_vm13, %v13912_v19  ;;  %vm7744_vm1 = vmpackc.low %vm5112_vm14, %vm5109_vm7  ;;  %vm5116_vm13 = vcmp.eq.s32.totalorder %v12741_v51, %v10458_v63  ;;  %v13040_v31 = vpop.permute.xlu1 %5049  ;;  %v13042_v36 = vpop.permute.xlu0 %5581 }
 0x54a   :  { %8311 = vmatpush3.bf16.msk.msra.mxu1 %vm7792_vm12, %v13912_v19  ;;  %vm7794_vm15 = vmpackc.low %vm5125_vm5, %vm5122_vm11  ;;  %vm5111_vm12 = vcmp.eq.s32.totalorder %v12785_v45, %v9070_v43  ;;  %vm5158_vm11 = vcmp.eq.s32.totalorder %v12899_v39, %v10458_v63  ;;  %vm5161_vm5 = vcmp.eq.s32.totalorder %v12842_v17, %v10458_v63 }
 0x54b   :  { %8312 = vmatprep.subr.msk.bf16.mxu1 %vm7810_vm4, %v13912_v19  ;;  %vm7812_vm2 = vmpackc.low %vm5167_vm10, %vm5164_vm0  ;;  %vm5119_vm4 = vcmp.eq.s32.totalorder %v12661_v46, %v10458_v63 }
 0x54c   :  { %7743 = vmatpush1.bf16.msk.msra.mxu0 %vm7742_vm9, %v13912_v19  ;;  %vm7746_vm7 = vmpackc.low %vm5111_vm12, %vm5108_vm8  ;;  %vm5102_vm9 = vcmp.eq.s32.totalorder %v12937_v23, %v9070_v43  ;;  %vm5097_vm8 = vcmp.eq.s32.totalorder %v13012_v56, %v10020_v44  ;;  %vm5152_vm12 = vcmp.eq.s32.totalorder %v12979_v7, %v10458_v63 }
 0x54d   :  { %7745 = vmatprep.subr.msk.bf16.mxu0 %vm7744_vm1, %v13912_v19  ;;  %vm7748_vm14 = vmpackc.low %vm5106_vm6, %vm5103_vm3  ;;  %vm5110_vm1 = vcmp.eq.s32.totalorder %v12853_v27, %v10458_v63  ;;  %v13067_v46 = vpop.permute.xlu0 %5566 }
 0x54e   :  { %8313 = vmatpush3.bf16.msk.msra.mxu1 %vm7794_vm15, %v13912_v19  ;;  %vm7796_vm0 = vmpackc.low %vm5119_vm4, %vm5116_vm13  ;;  %vm5105_vm15 = vcmp.eq.s32.totalorder %v12894_v15, %v9070_v43  ;;  %vm5100_vm13 = vcmp.eq.s32.totalorder %v12972_v32, %v10020_v44  ;;  %v13074_v62 = vpop.permute.xlu1 %5578 }
 0x54f   :  { %8314 = vmatprep.subr.msk.bf16.mxu1 %vm7812_vm2, %v13912_v19  ;;  %vm7814_vm10 = vmpackc.low %vm5161_vm5, %vm5158_vm11  ;;  %vm5113_vm2 = vcmp.eq.s32.totalorder %v12785_v45, %v10458_v63  ;;  %vm5190_vm11 = vcmp.eq.s32.totalorder %v12739_v18, %v10020_v44  ;;  %v1176_v45 = vld [vmem:[%s13695_s7] sm:$0xff] }
 0x550   :  { %7747 = vmatpush1.bf16.msk.msra.mxu0 %vm7746_vm7, %v13912_v19  ;;  %vm7750_vm3 = vmpackc.low %vm5105_vm15, %vm5102_vm9  ;;  %vm5096_vm7 = vcmp.eq.s32.totalorder %v13012_v56, %v9070_v43  ;;  %vm5155_vm9 = vcmp.eq.s32.totalorder %v12932_v25, %v10458_v63  ;;  %vm5146_vm15 = vcmp.eq.s32.totalorder %v13040_v31, %v10458_v63  ;;  %6227 = vperm.xlu0 %8676, %v1176_v45  }
 0x551   :  { %7749 = vmatprep.subr.msk.bf16.mxu0 %vm7748_vm14, %v13912_v19  ;;  %vm7752_vm6 = vmpackc.low %vm5100_vm13, %vm5097_vm8  ;;  %vm5104_vm14 = vcmp.eq.s32.totalorder %v12937_v23, %v10458_v63  ;;  %v13097_v1 = vpop.permute.xlu0 %5560  ;;  %vm5187_vm8 = vcmp.eq.s32.totalorder %v12456_v57, %v10020_v44 }
 0x552   :  { %8315 = vmatpush3.bf16.msk.msra.mxu1 %vm7796_vm0, %v13912_v19  ;;  %vm7798_vm4 = vmpackc.low %vm5113_vm2, %vm5110_vm1  ;;  %vm5099_vm0 = vcmp.eq.s32.totalorder %v12972_v32, %v9070_v43  ;;  %v13104_v5 = vpop.permute.xlu1 %5572 }
 0x553   :  { %8316 = vmatprep.subr.msk.bf16.mxu1 %vm7814_vm10, %v13912_v19  ;;  %vm7816_vm5 = vmpackc.low %vm5155_vm9, %vm5152_vm12  ;;  %vm5189_vm10 = vcmp.eq.s32.totalorder %v12739_v18, %v9070_v43  ;;  %vm5181_vm12 = vcmp.eq.s32.totalorder %v12579_v20, %v10020_v44  ;;  %vm5184_vm9 = vcmp.eq.s32.totalorder %v12512_v8, %v10020_v44 }
 0x554   :  { %7751 = vmatpush1.bf16.msk.msra.mxu0 %vm7750_vm3, %v13912_v19  ;;  %vm7754_vm1 = vmpackc.low %vm5099_vm0, %vm5096_vm7  ;;  %vm5107_vm3 = vcmp.eq.s32.totalorder %v12894_v15, %v10458_v63  ;;  %vm5149_vm7 = vcmp.eq.s32.totalorder %v13005_v21, %v10458_v63  ;;  %vm5674_vm0 = vcmp.eq.s32.totalorder %v13074_v62, %v10020_v44 }
 0x555   :  { %7753 = vmatprep.subr.msk.bf16.mxu0 %vm7752_vm6, %v13912_v19  ;;  %vm7756_vm13 = vmpackc.low %vm5190_vm11, %vm5187_vm8  ;;  %vm5186_vm6 = vcmp.eq.s32.totalorder %v12456_v57, %v9070_v43  ;;  %v13127_v18 = vpop.permute.xlu0 %5554  ;;  %vm5101_vm8 = vcmp.eq.s32.totalorder %v12972_v32, %v10458_v63  ;;  %v13151_v57 = vcombine.low %v12807_v0, %v12807_v0 }
 0x556   :  { %8317 = vmatpush3.bf16.msk.msra.mxu1 %vm7798_vm4, %v13912_v19  ;;  %vm7800_vm2 = vmpackc.low %vm5107_vm3, %vm5104_vm14  ;;  %vm5098_vm4 = vcmp.eq.s32.totalorder %v13012_v56, %v10458_v63  ;;  %v13134_v51 = vpop.permute.xlu1 %5575  ;;  %vm5677_vm3 = vcmp.eq.s32.totalorder %v13042_v36, %v10020_v44 }
 0x557   :  { %8318 = vmatprep.subr.msk.bf16.mxu1 %vm7816_vm5, %v13912_v19  ;;  %vm7818_vm11 = vmpackc.low %vm5149_vm7, %vm5146_vm15  ;;  %vm5180_vm5 = vcmp.eq.s32.totalorder %v12579_v20, %v9070_v43  ;;  %vm5175_vm15 = vcmp.eq.s32.totalorder %v12641_v28, %v10020_v44  ;;  %vm5178_vm7 = vcmp.eq.s32.totalorder %v12577_v30, %v10020_v44  ;;  %v13188_v20 = vcombine.high %v13156_v48, %v13156_v48 }
 0x558   :  { %7755 = vmatpush1.bf16.msk.msra.mxu0 %vm7754_vm1, %v13912_v19  ;;  %vm7758_vm14 = vmpackc.low %vm5189_vm10, %vm5186_vm6 }
 0x559   :  { %7757 = vmatprep.subr.msk.bf16.mxu0 %vm7756_vm13, %v13912_v19  ;;  %vm7760_vm1 = vmpackc.low %vm5184_vm9, %vm5181_vm12  ;;  %vm5183_vm13 = vcmp.eq.s32.totalorder %v12512_v8, %v9070_v43  ;;  %vm5673_vm12 = vcmp.eq.s32.totalorder %v13074_v62, %v9070_v43  ;;  %vm5676_vm9 = vcmp.eq.s32.totalorder %v13042_v36, %v9070_v43 }
 0x55a   :  { %8319 = vmatpush3.bf16.msk.msra.mxu1 %vm7800_vm2, %v13912_v19  ;;  %vm7802_vm10 = vmpackc.low %vm5101_vm8, %vm5098_vm4  ;;  %v13166_v49 = vpop.permute.xlu0 %5548  ;;  %vm5671_vm4 = vcmp.eq.s32.totalorder %v13134_v51, %v10020_v44  ;;  %v13176_v8 = vpop.permute.xlu1 %5569  ;;  %vm5668_vm8 = vcmp.eq.s32.totalorder %v13104_v5, %v10020_v44 }
 0x55b   :  { %8320 = vmatprep.subr.msk.bf16.mxu1 %vm7818_vm11, %v13912_v19  ;;  %vm7918_vm2 = vmpackc.low %vm5677_vm3, %vm5674_vm0  ;;  %v8234_v38 = vpop.f32.mrf.mxu1  ;;  %vm5174_vm11 = vcmp.eq.s32.totalorder %v12641_v28, %v9070_v43  ;;  %vm5169_vm0 = vcmp.eq.s32.totalorder %v12701_v22, %v10020_v44  ;;  %vm5172_vm3 = vcmp.eq.s32.totalorder %v12639_v58, %v10020_v44 }
 0x55c   :  { %7759 = vmatpush2.bf16.msk.msra.mxu0 %vm7758_vm14, %v13912_v19  ;;  %vm7762_vm6 = vmpackc.low %vm5183_vm13, %vm5180_vm5 }
 0x55d   :  { %7761 = vmatprep.subr.msk.bf16.mxu0 %vm7760_vm1, %v13912_v19  ;;  %vm7764_vm14 = vmpackc.low %vm5178_vm7, %vm5175_vm15  ;;  %v8235_v50 = vpop.f32.mrf.mxu1  ;;  %vm5177_vm1 = vcmp.eq.s32.totalorder %v12577_v30, %v9070_v43  ;;  %vm5670_vm15 = vcmp.eq.s32.totalorder %v13134_v51, %v9070_v43  ;;  %vm5667_vm7 = vcmp.eq.s32.totalorder %v13104_v5, %v9070_v43 }
 0x55e   :  { %8321 = vmatpush3.bf16.msk.msra.mxu1 %vm7802_vm10, %v13912_v19  ;;  %vm7920_vm5 = vmpackc.low %vm5676_vm9, %vm5673_vm12  ;;  %v8236_v54 = vadd.f32 %v8235_v50, %v8234_v38  ;;  %v13207_v53 = vpop.permute.xlu0 %5542  ;;  %vm5665_vm12 = vcmp.eq.s32.totalorder %v13176_v8, %v10020_v44 }
 0x55f   :  { %7919 = vmatprep.subr.msk.bf16.mxu1 %vm7918_vm2, %v13912_v19  ;;  %vm7922_vm10 = vmpackc.low %vm5671_vm4, %vm5668_vm8  ;;  %v13218_v30 = vpop.permute.xlu1 %5563  ;;  %v8237_v37 = vpop.f32.mrf.mxu1  ;;  %vm5168_vm2 = vcmp.eq.s32.totalorder %v12701_v22, %v9070_v43  ;;  %vm5163_vm4 = vcmp.eq.s32.totalorder %v12792_v10, %v10020_v44  ;;  %vm5166_vm8 = vcmp.eq.s32.totalorder %v12699_v2, %v10020_v44 }
 0x560   :  { %7763 = vmatpush2.bf16.msk.msra.mxu0 %vm7762_vm6, %v13912_v19  ;;  %vm7766_vm13 = vmpackc.low %vm5177_vm1, %vm5174_vm11  ;;  %v3382_v34 = vmul.f32 256.0, %v8236_v54  ;;  %v3388_v40 = vrot.slane %v8236_v54, 1  ;;  %vm5662_vm11 = vcmp.eq.s32.totalorder %v13067_v46, %v10020_v44 }
 0x561   :  { %7765 = vmatprep.subr.msk.bf16.mxu0 %vm7764_vm14, %v13912_v19  ;;  %5513 = vmatmul.mubr.bf16.vlgmr.msra.gmra.mxu1 %v13151_v57  ;;  %vm7768_vm6 = vmpackc.low %vm5172_vm3, %vm5169_vm0  ;;  %v8238_v28 = vpop.f32.mrf.mxu1  ;;  %vm5171_vm14 = vcmp.eq.s32.totalorder %v12639_v58, %v9070_v43  ;;  %vm5664_vm0 = vcmp.eq.s32.totalorder %v13176_v8, %v9070_v43  ;;  %vm5661_vm3 = vcmp.eq.s32.totalorder %v13067_v46, %v9070_v43 }
 0x562   :  { %7921 = vmatpush1.bf16.msk.msra.mxu1 %vm7920_vm5, %v13912_v19  ;;  %6006 = vmatprep.mubr.bf16.mxu1 %v13188_v20  ;;  %vm7924_vm9 = vmpackc.low %vm5670_vm15, %vm5667_vm7  ;;  %v3394_v14 = vadd.f32 %v3388_v40, %v3382_v34  ;;  %v13247_v0 = vpop.permute.xlu0 %5536  ;;  %vm5659_vm15 = vcmp.eq.s32.totalorder %v13218_v30, %v10020_v44  ;;  %vm5656_vm7 = vcmp.eq.s32.totalorder %v13097_v1, %v10020_v44 }
 0x563   :  { %7923 = vmatprep.subr.msk.bf16.mxu1 %vm7922_vm10, %v13912_v19  ;;  %vm7926_vm5 = vmpackc.low %vm5665_vm12, %vm5662_vm11  ;;  %v13257_v58 = vpop.permute.xlu1 %5557  ;;  %vm5162_vm10 = vcmp.eq.s32.totalorder %v12792_v10, %v9070_v43  ;;  %vm5165_vm11 = vcmp.eq.s32.totalorder %v12699_v2, %v9070_v43 }
 0x564   :  { %7767 = vmatpush2.bf16.msk.msra.mxu0 %vm7766_vm13, %v13912_v19  ;;  %vm7770_vm1 = vmpackc.low %vm5171_vm14, %vm5168_vm2  ;;  %v6084_v29 = vrot.slane %v3394_v14, 6  ;;  %vm14150_vm13 = vcmask 1041408   ;;  %vm5157_vm2 = vcmp.eq.s32.totalorder %v12899_v39, %v10020_v44 }
 0x565   :  { %7769 = vmatprep.subr.msk.bf16.mxu0 %vm7768_vm6, %v13912_v19  ;;  %v13265_v3 = vsel %vm14150_vm13, %v12958_v11, %v3394_v14  ;;  %vm7772_vm12 = vmpackc.low %vm5166_vm8, %vm5163_vm4  ;;  %vm5658_vm4 = vcmp.eq.s32.totalorder %v13218_v30, %v9070_v43  ;;  %vm5653_vm8 = vcmp.eq.s32.totalorder %v13257_v58, %v10020_v44 }
 0x566   :  { %7925 = vmatpush1.bf16.msk.msra.mxu1 %vm7924_vm9, %v13912_v19  ;;  %vm7928_vm6 = vmpackc.low %vm5664_vm0, %vm5661_vm3  ;;  %v13291_v33 = vpop.permute.xlu0 %5626  ;;  %vm5151_vm3 = vcmp.eq.s32.totalorder %v12979_v7, %v10020_v44 }
 0x567   :  { %7927 = vmatprep.subr.msk.bf16.mxu1 %vm7926_vm5, %v13912_v19  ;;  %vm14151_vm9 = vmmov %vm14150_vm13  ;;  %vm5160_vm5 = vcmp.eq.s32.totalorder %v12842_v17, %v10020_v44  ;;  %v13301_v2 = vpop.permute.xlu1 %5551  ;;  %vm5650_vm13 = vcmp.eq.s32.totalorder %v13127_v18, %v10020_v44 }
 0x568   :  { %7771 = vmatpush2.bf16.msk.msra.mxu0 %vm7770_vm1, %v13912_v19  ;;  %v13283_v22 = vsel %vm14151_vm9, %v12955_v26, %v6084_v29  ;;  %vm7930_vm14 = vmpackc.low %vm5659_vm15, %vm5656_vm7  ;;  %vm5156_vm1 = vcmp.eq.s32.totalorder %v12899_v39, %v9070_v43  ;;  %vm5655_vm15 = vcmp.eq.s32.totalorder %v13097_v1, %v9070_v43  ;;  %vm5159_vm7 = vcmp.eq.s32.totalorder %v12842_v17, %v9070_v43 }
 0x569   :  { %7773 = vmatprep.subr.msk.bf16.mxu0 %vm7772_vm12, %v13912_v19  ;;  %vm7774_vm0 = vmpackc.low %vm5165_vm11, %vm5162_vm10  ;;  %vm5154_vm9 = vcmp.eq.s32.totalorder %v12932_v25, %v10020_v44 }
 0x56a   :  { %7929 = vmatpush1.bf16.msk.msra.mxu1 %vm7928_vm6, %v13912_v19  ;;  %vm7776_vm10 = vmpackc.low %vm5160_vm5, %vm5157_vm2  ;;  %vm5652_vm6 = vcmp.eq.s32.totalorder %v13257_v58, %v9070_v43  ;;  %v13329_v10 = vpop.permute.xlu0 %5620 }
 0x56b   :  { %7931 = vmatprep.subr.msk.bf16.mxu1 %vm7930_vm14, %v13912_v19  ;;  %vm7932_vm12 = vmpackc.low %vm5658_vm4, %vm5655_vm15  ;;  %vm5647_vm14 = vcmp.eq.s32.totalorder %v13301_v2, %v10020_v44  ;;  %v13331_v24 = vpop.permute.xlu1 %5545  ;;  %vm5150_vm4 = vcmp.eq.s32.totalorder %v12979_v7, %v9070_v43 }
 0x56c   :  { %7775 = vmatpush2.bf16.msk.msra.mxu0 %vm7774_vm0, %v13912_v19  ;;  %vm7934_vm2 = vmpackc.low %vm5653_vm8, %vm5650_vm13  ;;  %vm5649_vm0 = vcmp.eq.s32.totalorder %v13127_v18, %v9070_v43  ;;  %vm5145_vm8 = vcmp.eq.s32.totalorder %v13040_v31, %v10020_v44  ;;  %vm5646_vm13 = vcmp.eq.s32.totalorder %v13301_v2, %v9070_v43 }
 0x56d   :  { %7777 = vmatprep.subr.msk.bf16.mxu0 %vm7776_vm10, %v13912_v19  ;;  %vm7778_vm11 = vmpackc.low %vm5159_vm7, %vm5156_vm1  ;;  %vm5644_vm1 = vcmp.eq.s32.totalorder %v13166_v49, %v10020_v44  ;;  %vm5153_vm10 = vcmp.eq.s32.totalorder %v12932_v25, %v9070_v43  ;;  %vm5148_vm7 = vcmp.eq.s32.totalorder %v13005_v21, %v10020_v44 }
 0x56e   :  { %7933 = vmatpush1.bf16.msk.msra.mxu1 %vm7932_vm12, %v13912_v19  ;;  %vm7780_vm5 = vmpackc.low %vm5154_vm9, %vm5151_vm3  ;;  %v13376_v27 = vpop.permute.xlu0 %5614 }
 0x56f   :  { %7935 = vmatprep.subr.msk.bf16.mxu1 %vm7934_vm2, %v13912_v19  ;;  %vm7936_vm15 = vmpackc.low %vm5652_vm6, %vm5649_vm0  ;;  %vm5641_vm6 = vcmp.eq.s32.totalorder %v13331_v24, %v10020_v44  ;;  %v13362_v17 = vpop.permute.xlu1 %5539  ;;  %vm5144_vm2 = vcmp.eq.s32.totalorder %v13040_v31, %v9070_v43  ;;  %vm5640_vm0 = vcmp.eq.s32.totalorder %v13331_v24, %v9070_v43 }
 0x570   :  { %7779 = vmatpush2.bf16.msk.msra.mxu0 %vm7778_vm11, %v13912_v19  ;;  %vm7938_vm3 = vmpackc.low %vm5647_vm14, %vm5644_vm1  ;;  %vm5643_vm11 = vcmp.eq.s32.totalorder %v13166_v49, %v9070_v43  ;;  %vm5638_vm14 = vcmp.eq.s32.totalorder %v13207_v53, %v10020_v44  ;;  %vm5635_vm1 = vcmp.eq.s32.totalorder %v13362_v17, %v10020_v44 }
 0x571   :  { %7781 = vmatprep.subr.msk.bf16.mxu0 %vm7780_vm5, %v13912_v19  ;;  %vm7782_vm12 = vmpackc.low %vm5153_vm10, %vm5150_vm4  ;;  %vm5147_vm5 = vcmp.eq.s32.totalorder %v13005_v21, %v9070_v43  ;;  %vm5637_vm10 = vcmp.eq.s32.totalorder %v13207_v53, %v9070_v43 }
 0x572   :  { %7937 = vmatpush1.bf16.msk.msra.mxu1 %vm7936_vm15, %v13912_v19  ;;  %vm7784_vm9 = vmpackc.low %vm5148_vm7, %vm5145_vm8 }
 0x573   :  { %7939 = vmatprep.subr.msk.bf16.mxu1 %vm7938_vm3, %v13912_v19  ;;  %vm7940_vm4 = vmpackc.low %vm5646_vm13, %vm5643_vm11  ;;  %vm5675_vm13 = vcmp.eq.s32.totalorder %v13074_v62, %v10458_v63  ;;  %vm5632_vm3 = vcmp.eq.s32.totalorder %v13247_v0, %v10020_v44  ;;  %v13410_v41 = vpop.permute.xlu0 %5608 }
 0x574   :  { %7783 = vmatpush2.bf16.msk.msra.mxu0 %vm7782_vm12, %v13912_v19  ;;  %vm7942_vm8 = vmpackc.low %vm5641_vm6, %vm5638_vm14  ;;  %vm5723_vm6 = vcmp.eq.s32.totalorder %v13291_v33, %v10458_v63 }
 0x575   :  { %7785 = vmatprep.subr.msk.bf16.mxu0 %vm7784_vm9, %v13912_v19  ;;  %vm7786_vm15 = vmpackc.low %vm5147_vm5, %vm5144_vm2  ;;  %v5630_v13 = vpop.permute.xlu1 %5629  ;;  %vm5634_vm2 = vcmp.eq.s32.totalorder %v13362_v17, %v9070_v43  ;;  %vm5678_vm9 = vcmp.eq.s32.totalorder %v13042_v36, %v10458_v63  ;;  %v3333_v16 = vpop.f32.mrf.mxu0  ;;  %vm5631_vm5 = vcmp.eq.s32.totalorder %v13247_v0, %v9070_v43 }
 0x576   :  { %7941 = vmatpush1.bf16.msk.msra.mxu1 %vm7940_vm4, %v13912_v19  ;;  %vm7944_vm12 = vmpackc.low %vm5640_vm0, %vm5637_vm10  ;;  %vm5726_vm7 = vcmp.eq.s32.totalorder %v5630_v13, %v10458_v63  ;;  %vm5725_vm14 = vcmp.eq.s32.totalorder %v5630_v13, %v10020_v44  ;;  %v3380_v35 = vmul.f32 256.0, %v3333_v16  ;;  %v3386_v9 = vrot.slane %v3333_v16, 1 }
 0x577   :  { %7943 = vmatprep.subr.msk.bf16.mxu1 %vm7942_vm8, %v13912_v19  ;;  %vm7946_vm11 = vmpackc.low %vm5635_vm1, %vm5632_vm3  ;;  %vm5672_vm1 = vcmp.eq.s32.totalorder %v13134_v51, %v10458_v63  ;;  %vm5722_vm8 = vcmp.eq.s32.totalorder %v13291_v33, %v10020_v44  ;;  %v3335_v39 = vpop.f32.mrf.mxu0  ;;  %vm5724_vm3 = vcmp.eq.s32.totalorder %v5630_v13, %v9070_v43  ;;  %v13467_v7 = vpop.permute.xlu0 %5602 }
 0x578   :  { %7787 = vmatpush2.bf16.msk.msra.mxu0 %vm7786_vm15, %v13912_v19  ;;  %vm7998_vm4 = vmpackc.low %vm5726_vm7, %vm5723_vm6  ;;  %vm5717_vm15 = vcmp.eq.s32.totalorder %v13329_v10, %v10458_v63  ;;  %v3392_v55 = vadd.f32 %v3386_v9, %v3380_v35  ;;  %v3381_v4 = vmul.f32 256.0, %v3335_v39  ;;  %v3387_v25 = vrot.slane %v3335_v39, 1 }
 0x579   :  { %vm13404_vm0 = vmpackc.low %vm5678_vm9, %vm5675_vm13  ;;  %v5624_v6 = vpop.permute.xlu1 %5623  ;;  %8328 = vmatprep.subr.msk.bf16.mxu0 %vm7998_vm4, %v13912_v19  ;;  %vm5669_vm7 = vcmp.eq.s32.totalorder %v13104_v5, %v10458_v63  ;;  %v3337_v12 = vpop.f32.mrf.mxu0  ;;  %vm5721_vm9 = vcmp.eq.s32.totalorder %v13291_v33, %v9070_v43  ;;  %vm5666_vm4 = vcmp.eq.s32.totalorder %v13176_v8, %v10458_v63 }
 0x57a   :  { %7945 = vmatpush1.bf16.msk.msra.mxu1 %vm7944_vm12, %v13912_v19  ;;  %vm7948_vm10 = vmpackc.low %vm5634_vm2, %vm5631_vm5  ;;  %vm5720_vm13 = vcmp.eq.s32.totalorder %v5624_v6, %v10458_v63  ;;  %vm5719_vm6 = vcmp.eq.s32.totalorder %v5624_v6, %v10020_v44  ;;  %v6082_v42 = vrot.slane %v3392_v55, 6  ;;  %v3393_v26 = vadd.f32 %v3387_v25, %v3381_v4 }
 0x57b   :  { %5472 = vmatmul.mubr.bf16.vlgmr.msra.gmra.mxu0 %v13151_v57  ;;  %7947 = vmatprep.subr.msk.bf16.mxu1 %vm7946_vm11, %v13912_v19  ;;  %vm7950_vm12 = vmpackc.low %vm5725_vm14, %vm5722_vm8  ;;  %vm14156_vm14 = vcmask 1041408   ;;  %vm5711_vm5 = vcmp.eq.s32.totalorder %v13376_v27, %v10458_v63  ;;  %vm5718_vm8 = vcmp.eq.s32.totalorder %v5624_v6, %v9070_v43 }
 0x57c   :  { %8329 = vmatpush3.bf16.msk.msra.mxu0 %vm13404_vm0, %v13912_v19  ;;  %6047 = vmatprep.mubr.bf16.mxu0 %v13188_v20  ;;  %vm8000_vm2 = vmpackc.low %vm5720_vm13, %vm5717_vm15  ;;  %v13450_v23 = vsel %vm14156_vm14, %v12782_v61, %v3392_v55  ;;  %vm5716_vm0 = vcmp.eq.s32.totalorder %v13329_v10, %v10020_v44  ;;  %v3338_v61 = vpop.f32.mrf.mxu0  ;;  %v6083_v21 = vrot.slane %v3393_v26, 6 }
 0x57d   :  { %vm13442_vm11 = vmpackc.low %vm5672_vm1, %vm5669_vm7  ;;  %8330 = vmatprep.subr.msk.bf16.mxu0 %vm8000_vm2, %v13912_v19 }
 0x57e   :  { %7949 = vmatpush1.bf16.msk.msra.mxu1 %vm7948_vm10, %v13912_v19  ;;  %v5618_v11 = vpop.permute.xlu1 %5617  ;;  %vm7952_vm1 = vmpackc.low %vm5724_vm3, %vm5721_vm9 }
 0x57f   :  { %7951 = vmatprep.subr.msk.bf16.mxu1 %vm7950_vm12, %v13912_v19  ;;  %vm14157_vm15 = vmmov %vm14156_vm14  ;;  %vm5714_vm13 = vcmp.eq.s32.totalorder %v5618_v11, %v10458_v63  ;;  %vm5663_vm12 = vcmp.eq.s32.totalorder %v13067_v46, %v10458_v63  ;;  %vm5713_vm7 = vcmp.eq.s32.totalorder %v5618_v11, %v10020_v44 }
 0x580   :  { %v13465_v32 = vsel %vm14157_vm15, %v12779_v47, %v6082_v42  ;;  %vm14158_vm10 = vmmov %vm14156_vm14  ;;  %8331 = vmatpush3.bf16.msk.msra.mxu0 %vm13442_vm11, %v13912_v19  ;;  %vm5715_vm14 = vcmp.eq.s32.totalorder %v13329_v10, %v9070_v43  ;;  %vm5712_vm15 = vcmp.eq.s32.totalorder %v5618_v11, %v9070_v43 }
 0x581   :  { %v13471_v56 = vsel %vm14158_vm10, %v12817_v52, %v3393_v26  ;;  %vm7954_vm3 = vmpackc.low %vm5719_vm6, %vm5716_vm0  ;;  %vm5660_vm6 = vcmp.eq.s32.totalorder %v13218_v30, %v10458_v63  ;;  %vm5710_vm0 = vcmp.eq.s32.totalorder %v13376_v27, %v10020_v44 }
 0x582   :  { %7953 = vmatpush2.bf16.msk.msra.mxu1 %vm7952_vm1, %v13912_v19  ;;  %vm8002_vm2 = vmpackc.low %vm5714_vm13, %vm5711_vm5  ;;  %v5612_v52 = vpop.permute.xlu1 %5611  ;;  %vm5705_vm1 = vcmp.eq.s32.totalorder %v13410_v41, %v10458_v63  ;;  %vm5657_vm13 = vcmp.eq.s32.totalorder %v13097_v1, %v10458_v63 }
 0x583   :  { %vm7986_vm9 = vmpackc.low %vm5666_vm4, %vm5663_vm12  ;;  %7955 = vmatprep.subr.msk.bf16.mxu1 %vm7954_vm3, %v13912_v19  ;;  %8332 = vmatprep.subr.msk.bf16.mxu0 %vm8002_vm2, %v13912_v19  ;;  %vm5708_vm5 = vcmp.eq.s32.totalorder %v5612_v52, %v10458_v63  ;;  %vm5707_vm3 = vcmp.eq.s32.totalorder %v5612_v52, %v10020_v44  ;;  %vm5709_vm2 = vcmp.eq.s32.totalorder %v13376_v27, %v9070_v43 }
 0x584   :  { %vm14159_vm11 = vmmov %vm14158_vm10  ;;  %8333 = vmatpush3.bf16.msk.msra.mxu0 %vm7986_vm9, %v13912_v19  ;;  %vm5704_vm9 = vcmp.eq.s32.totalorder %v13410_v41, %v10020_v44 }
 0x585   :  { %v13490_v47 = vsel %vm14159_vm11, %v12814_v60, %v6083_v21  ;;  %vm7956_vm4 = vmpackc.low %vm5718_vm8, %vm5715_vm14  ;;  %v5597_v60 = vpop.permute.xlu0 %5596 }
 0x586   :  { %vm7958_vm10 = vmpackc.low %vm5713_vm7, %vm5710_vm0  ;;  %7957 = vmatpush2.bf16.msk.msra.mxu1 %vm7956_vm4, %v13912_v19  ;;  %v5606_v31 = vpop.permute.xlu1 %5605  ;;  %vm5654_vm7 = vcmp.eq.s32.totalorder %v13257_v58, %v10458_v63  ;;  %vm5706_vm0 = vcmp.eq.s32.totalorder %v5612_v52, %v9070_v43 }
 0x587   :  { %vm8004_vm8 = vmpackc.low %vm5708_vm5, %vm5705_vm1  ;;  %7959 = vmatprep.subr.msk.bf16.mxu1 %vm7958_vm10, %v13912_v19  ;;  %vm5702_vm11 = vcmp.eq.s32.totalorder %v5606_v31, %v10458_v63  ;;  %vm5651_vm5 = vcmp.eq.s32.totalorder %v13127_v18, %v10458_v63  ;;  %vm5701_vm1 = vcmp.eq.s32.totalorder %v5606_v31, %v10020_v44  ;;  %v7916_v18 = vcombine.low %v13156_v48, %v13156_v48 }
 0x588   :  { %vm7988_vm12 = vmpackc.low %vm5660_vm6, %vm5657_vm13  ;;  %8334 = vmatprep.subr.msk.bf16.mxu0 %vm8004_vm8, %v13912_v19  ;;  %vm5699_vm6 = vcmp.eq.s32.totalorder %v13467_v7, %v10458_v63  ;;  %vm5703_vm13 = vcmp.eq.s32.totalorder %v13410_v41, %v9070_v43  ;;  %vm5698_vm8 = vcmp.eq.s32.totalorder %v13467_v7, %v10020_v44 }
 0x589   :  { %vm7960_vm14 = vmpackc.low %vm5712_vm15, %vm5709_vm2  ;;  %8335 = vmatpush3.bf16.msk.msra.mxu0 %vm7988_vm12, %v13912_v19  ;;  %v5591_v46 = vpop.permute.xlu0 %5590 }
 0x58a   :  { %vm7962_vm4 = vmpackc.low %vm5707_vm3, %vm5704_vm9  ;;  %7961 = vmatpush2.bf16.msk.msra.mxu1 %vm7960_vm14, %v13912_v19  ;;  %v5600_v36 = vpop.permute.xlu1 %5599  ;;  %vm5648_vm3 = vcmp.eq.s32.totalorder %v13301_v2, %v10458_v63  ;;  %vm5693_vm9 = vcmp.eq.s32.totalorder %v5597_v60, %v10458_v63 }
 0x58b   :  { %vm8006_vm15 = vmpackc.low %vm5702_vm11, %vm5699_vm6  ;;  %7963 = vmatprep.subr.msk.bf16.mxu1 %vm7962_vm4, %v13912_v19  ;;  %vm5696_vm2 = vcmp.eq.s32.totalorder %v5600_v36, %v10458_v63  ;;  %vm5645_vm11 = vcmp.eq.s32.totalorder %v13166_v49, %v10458_v63  ;;  %vm5695_vm6 = vcmp.eq.s32.totalorder %v5600_v36, %v10020_v44 }
 0x58c   :  { %vm7990_vm10 = vmpackc.low %vm5654_vm7, %vm5651_vm5  ;;  %8336 = vmatprep.subr.msk.bf16.mxu0 %vm8006_vm15, %v13912_v19  ;;  %vm5700_vm7 = vcmp.eq.s32.totalorder %v5606_v31, %v9070_v43  ;;  %vm5697_vm5 = vcmp.eq.s32.totalorder %v13467_v7, %v9070_v43  ;;  %vm5692_vm15 = vcmp.eq.s32.totalorder %v5597_v60, %v10020_v44 }
 0x58d   :  { %vm7964_vm12 = vmpackc.low %vm5706_vm0, %vm5703_vm13  ;;  %8337 = vmatpush3.bf16.msk.msra.mxu0 %vm7990_vm10, %v13912_v19  ;;  %vm5642_vm13 = vcmp.eq.s32.totalorder %v13331_v24, %v10458_v63  ;;  %v5585_v1 = vpop.permute.xlu0 %5584 }
 0x58e   :  { %vm7966_vm14 = vmpackc.low %vm5701_vm1, %vm5698_vm8  ;;  %7965 = vmatpush2.bf16.msk.msra.mxu1 %vm7964_vm12, %v13912_v19  ;;  %v5594_v62 = vpop.permute.xlu1 %5593  ;;  %vm5687_vm8 = vcmp.eq.s32.totalorder %v5591_v46, %v10458_v63  ;;  %vm5694_vm12 = vcmp.eq.s32.totalorder %v5600_v36, %v9070_v43 }
 0x58f   :  { %vm8008_vm0 = vmpackc.low %vm5696_vm2, %vm5693_vm9  ;;  %7967 = vmatprep.subr.msk.bf16.mxu1 %vm7966_vm14, %v13912_v19  ;;  %vm5690_vm10 = vcmp.eq.s32.totalorder %v5594_v62, %v10458_v63  ;;  %vm5639_vm9 = vcmp.eq.s32.totalorder %v13207_v53, %v10458_v63 }
 0x590   :  { %vm7992_vm4 = vmpackc.low %vm5648_vm3, %vm5645_vm11  ;;  %8338 = vmatprep.subr.msk.bf16.mxu0 %vm8008_vm0, %v13912_v19  ;;  %vm5691_vm11 = vcmp.eq.s32.totalorder %v5597_v60, %v9070_v43  ;;  %vm5636_vm0 = vcmp.eq.s32.totalorder %v13362_v17, %v10458_v63 }
 0x591   :  { %vm7968_vm1 = vmpackc.low %vm5700_vm7, %vm5697_vm5  ;;  %8339 = vmatpush3.bf16.msk.msra.mxu0 %vm7992_vm4, %v13912_v19  ;;  %vm5689_vm7 = vcmp.eq.s32.totalorder %v5594_v62, %v10020_v44  ;;  %vm5686_vm4 = vcmp.eq.s32.totalorder %v5591_v46, %v10020_v44 }
 0x592   :  { %vm7970_vm3 = vmpackc.low %vm5695_vm6, %vm5692_vm15  ;;  %7969 = vmatpush2.bf16.msk.msra.mxu1 %vm7968_vm1, %v13912_v19  ;;  %v5588_v5 = vpop.permute.xlu1 %5587  ;;  %vm5681_vm15 = vcmp.eq.s32.totalorder %v5585_v1, %v10458_v63  ;;  %vm5688_vm1 = vcmp.eq.s32.totalorder %v5594_v62, %v9070_v43 }
 0x593   :  { %vm8010_vm2 = vmpackc.low %vm5690_vm10, %vm5687_vm8  ;;  %7971 = vmatprep.subr.msk.bf16.mxu1 %vm7970_vm3, %v13912_v19  ;;  %vm5684_vm6 = vcmp.eq.s32.totalorder %v5588_v5, %v10458_v63  ;;  %vm5683_vm8 = vcmp.eq.s32.totalorder %v5588_v5, %v10020_v44 }
 0x594   :  { %8340 = vmatprep.subr.msk.bf16.mxu0 %vm8010_vm2, %v13912_v19  ;;  %vm7994_vm14 = vmpackc.low %vm5642_vm13, %vm5639_vm9  ;;  %vm5633_vm13 = vcmp.eq.s32.totalorder %v13247_v0, %v10458_v63  ;;  %vm5680_vm9 = vcmp.eq.s32.totalorder %v5585_v1, %v10020_v44 }
 0x595   :  { %vm7972_vm5 = vmpackc.low %vm5694_vm12, %vm5691_vm11  ;;  %8341 = vmatpush3.bf16.msk.msra.mxu0 %vm7994_vm14, %v13912_v19  ;;  %vm5685_vm12 = vcmp.eq.s32.totalorder %v5591_v46, %v9070_v43 }
 0x596   :  { %7973 = vmatpush2.bf16.msk.msra.mxu1 %vm7972_vm5, %v13912_v19  ;;  %vm7974_vm10 = vmpackc.low %vm5689_vm7, %vm5686_vm4  ;;  %vm5682_vm7 = vcmp.eq.s32.totalorder %v5588_v5, %v9070_v43  ;;  %v8256_v63 = vpop.f32.mrf.mxu0  ;;  %vm14160_vm4 = vcmask 1042432  }
 0x597   :  { %vm8012_vm3 = vmpackc.low %vm5684_vm6, %vm5681_vm15  ;;  %7975 = vmatprep.subr.msk.bf16.mxu1 %vm7974_vm10, %v13912_v19  ;;  %vm5679_vm6 = vcmp.eq.s32.totalorder %v5585_v1, %v9070_v43 }
 0x598   :  { %vm7996_vm2 = vmpackc.low %vm5636_vm0, %vm5633_vm13  ;;  %8342 = vmatprep.subr.msk.bf16.mxu0 %vm8012_vm3, %v13912_v19  ;;  %v8257_v51 = vpop.f32.mrf.mxu0 }
 0x599   :  { %vm7976_vm14 = vmpackc.low %vm5688_vm1, %vm5685_vm12  ;;  %8343 = vmatpush3.bf16.msk.msra.mxu0 %vm7996_vm2, %v13912_v19  ;;  %v8258_v57 = vadd.f32 %v8257_v51, %v8256_v63 }
 0x59a   :  { %vm7978_vm11 = vmpackc.low %vm5683_vm8, %vm5680_vm9  ;;  %7977 = vmatpush2.bf16.msk.msra.mxu1 %vm7976_vm14, %v13912_v19  ;;  %v8259_v44 = vpop.f32.mrf.mxu0  ;;  %vm14166_vm8 = vcmask 1043456  }
 0x59b   :  { %7979 = vmatprep.subr.msk.bf16.mxu1 %vm7978_vm11, %v13912_v19  ;;  %vm7980_vm0 = vmpackc.low %vm5682_vm7, %vm5679_vm6  ;;  %v3917_v48 = vmul.f32 256.0, %v8258_v57  ;;  %v3923_v49 = vrot.slane %v8258_v57, 1  ;;  %v3868_v8 = vpop.f32.mrf.mxu1  ;;  %vm14172_vm7 = vcmask 1044480  }
 0x59c   :  { %6048 = vmatmul.mubr.bf16.vlgmr.msra.gmra.mxu0 %v7916_v18  ;;  %v8260_v38 = vpop.f32.mrf.mxu0  ;;  %v3915_v50 = vmul.f32 256.0, %v3868_v8  ;;  %v3921_v54 = vrot.slane %v3868_v8, 1  ;;  %vm14161_vm5 = vmmov %vm14160_vm4 }
 0x59d   :  { %v3929_v20 = vadd.f32 %v3923_v49, %v3917_v48  ;;  %v3870_v53 = vpop.f32.mrf.mxu1  ;;  %vm14162_vm15 = vmmov %vm14160_vm4 }
 0x59e   :  { %7981 = vmatpush2.bf16.msk.msra.mxu1 %vm7980_vm0, %v13912_v19  ;;  %v3927_v34 = vadd.f32 %v3921_v54, %v3915_v50  ;;  %v3916_v43 = vmul.f32 256.0, %v3870_v53  ;;  %v3922_v40 = vrot.slane %v3870_v53, 1  ;;  %vm14163_vm1 = vmmov %vm14160_vm4 }
 0x59f   :  { %v6093_v30 = vrot.slane %v3929_v20, 5  ;;  %v6174_v37 = vrot.slane %v3929_v20, 7  ;;  %v3872_v28 = vpop.f32.mrf.mxu1  ;;  %vm14164_vm10 = vmmov %vm14163_vm1 }
 0x5a0   :  { %v6091_v14 = vrot.slane %v3927_v34, 5  ;;  %v6172_v0 = vrot.slane %v3927_v34, 7  ;;  %v3928_v58 = vadd.f32 %v3922_v40, %v3916_v43  ;;  %vm14165_vm13 = vmmov %vm14163_vm1 }
 0x5a1   :  { %6007 = vmatmul.mubr.bf16.vlgmr.msra.gmra.mxu1 %v7916_v18  ;;  %v6141_v45 = vsel %vm14160_vm4, %v13283_v22, %v6093_v30  ;;  %v6210_v19 = vsel %vm14161_vm5, %v13265_v3, %v6174_v37  ;;  %v3873_v29 = vpop.f32.mrf.mxu1  ;;  %vm14167_vm3 = vmmov %vm14166_vm8 }
 0x5a2   :  { %v6139_v33 = vsel %vm14162_vm15, %v13465_v32, %v6091_v14  ;;  %v6208_v2 = vsel %vm14163_vm1, %v13450_v23, %v6172_v0  ;;  %v6092_v10 = vrot.slane %v3928_v58, 5  ;;  %v6173_v24 = vrot.slane %v3928_v58, 7  ;;  %vm14168_vm2 = vmmov %vm14167_vm3 }
 0x5a3   :  { %vm14169_vm12 = vmmov %vm14168_vm2 }
 0x5a4   :  { %v6140_v17 = vsel %vm14164_vm10, %v13490_v47, %v6092_v10  ;;  %v6209_v22 = vsel %vm14165_vm13, %v13471_v56, %v6173_v24  ;;  %vm14170_vm9 = vmmov %vm14168_vm2 }
 0x5a5   :  { %vm14171_vm14 = vmmov %vm14168_vm2 }
 0x5a6   :  { %vm14173_vm11 = vmmov %vm14172_vm7 }
 0x5a7   :  { %vm14174_vm6 = vmmov %vm14172_vm7 }
 0x5a8   :  { %vm14175_vm0 = vmmov %vm14174_vm6 }
 0x5a9   :  { %vm14176_vm4 = vmmov %vm14175_vm0 }
 0x5aa   :  { %vm14177_vm5 = vmmov %vm14175_vm0 }
 0x5c0   :  { %v8278_v27 = vpop.f32.mrf.mxu1 }
 0x5c2   :  { %v8279_v3 = vpop.f32.mrf.mxu1 }
 0x5c3   :  { %v8280_v13 = vadd.f32 %v8279_v3, %v8278_v27 }
 0x5c4   :  { %v8281_v16 = vpop.f32.mrf.mxu1 }
 0x5c5   :  { %v4452_v15 = vmul.f32 256.0, %v8280_v13  ;;  %v4458_v41 = vrot.slane %v8280_v13, 1 }
 0x5c6   :  { %v8282_v35 = vpop.f32.mrf.mxu1 }
 0x5c7   :  { %v4464_v9 = vadd.f32 %v4458_v41, %v4452_v15 }
 0x5c9   :  { %v6102_v6 = vrot.slane %v4464_v9, 4  ;;  %v6180_v39 = vrot.slane %v4464_v9, 6 }
 0x5cb   :  { %v6144_v55 = vsel %vm14166_vm8, %v6141_v45, %v6102_v6  ;;  %v6213_v4 = vsel %vm14167_vm3, %v6210_v19, %v6180_v39  ;;  %vm14182_vm3 = vcmask 1045504  }
 0x5db   :  { %v4403_v25 = vpop.f32.mrf.mxu0 }
 0x5dc   :  { %v4450_v12 = vmul.f32 256.0, %v4403_v25  ;;  %v4456_v59 = vrot.slane %v4403_v25, 1 }
 0x5dd   :  { %v4405_v42 = vpop.f32.mrf.mxu0 }
 0x5de   :  { %v4462_v23 = vadd.f32 %v4456_v59, %v4450_v12  ;;  %v4451_v26 = vmul.f32 256.0, %v4405_v42  ;;  %v4457_v11 = vrot.slane %v4405_v42, 1  ;;  %v13619_v12 = vpop.permute.xlu0 %6227 }
 0x5df   :  { %v4407_v61 = vpop.f32.mrf.mxu0 }
 0x5e0   :  { %v6100_v32 = vrot.slane %v4462_v23, 4  ;;  %v6178_v7 = vrot.slane %v4462_v23, 6  ;;  %v4463_v21 = vadd.f32 %v4457_v11, %v4451_v26  ;;  %v14178_v26 = vld [vmem:[#allocation2_spill] sm:$0xff]  ;;  %v14179_v61 = vld [vmem:[#allocation83_spill] sm:$0xff] }
 0x5e1   :  { %v4408_v56 = vpop.f32.mrf.mxu0  ;;  %vm6232_vm15 = vcmp.eq.s32.totalorder %v14178_v26, %v13619_v12  ;;  %vm6234_vm1 = vcmp.eq.s32.totalorder %v14179_v61, %v13619_v12  ;;  %vm6231_vm10 = vcmp.lt.s32.totalorder %v14179_v61, %v13619_v12  ;;  %vm6229_vm13 = vcmp.lt.s32.totalorder %v14178_v26, %v13619_v12 }
 0x5e2   :  { %v6142_v47 = vsel %vm14168_vm2, %v6139_v33, %v6100_v32  ;;  %v6211_v52 = vsel %vm14169_vm12, %v6208_v2, %v6178_v7  ;;  %v6101_v60 = vrot.slane %v4463_v21, 4  ;;  %v6179_v31 = vrot.slane %v4463_v21, 6  ;;  %vm14183_vm2 = vmmov %vm14182_vm3 }
 0x5e3   :  { %vm14184_vm12 = vmmov %vm14183_vm2 }
 0x5e4   :  { %v6143_v36 = vsel %vm14170_vm9, %v6140_v17, %v6101_v60  ;;  %v6212_v46 = vsel %vm14171_vm14, %v6209_v22, %v6179_v31  ;;  %vm14185_vm9 = vmmov %vm14183_vm2  ;;  %vm14186_vm14 = vcmask 1046528  }
 0x5fb   :  { %v8300_v62 = vpop.f32.mrf.mxu0 }
 0x5fd   :  { %v8301_v1 = vpop.f32.mrf.mxu0 }
 0x5fe   :  { %v8302_v5 = vadd.f32 %v8301_v1, %v8300_v62 }
 0x5ff   :  { %v8303_v18 = vpop.f32.mrf.mxu0 }
 0x600   :  { %v4987_v63 = vmul.f32 256.0, %v8302_v5  ;;  %v4993_v51 = vrot.slane %v8302_v5, 1 }
 0x601   :  { %v4938_v57 = vpop.f32.mrf.mxu1  ;;  %v8304_v44 = vpop.f32.mrf.mxu0 }
 0x602   :  { %v4999_v48 = vadd.f32 %v4993_v51, %v4987_v63  ;;  %v4985_v49 = vmul.f32 256.0, %v4938_v57  ;;  %v4991_v8 = vrot.slane %v4938_v57, 1 }
 0x603   :  { %v4940_v38 = vpop.f32.mrf.mxu1 }
 0x604   :  { %v6111_v20 = vrot.slane %v4999_v48, 3  ;;  %v6186_v50 = vrot.slane %v4999_v48, 5  ;;  %v4997_v54 = vadd.f32 %v4991_v8, %v4985_v49  ;;  %v4986_v53 = vmul.f32 256.0, %v4940_v38 }
 0x605   :  { %v4992_v30 = vrot.slane %v4940_v38, 1  ;;  %v4942_v37 = vpop.f32.mrf.mxu1 }
 0x606   :  { %v6147_v34 = vsel %vm14172_vm7, %v6144_v55, %v6111_v20  ;;  %v6216_v43 = vsel %vm14173_vm11, %v6213_v4, %v6186_v50  ;;  %v6109_v40 = vrot.slane %v4997_v54, 3  ;;  %v6184_v28 = vrot.slane %v4997_v54, 5  ;;  %vm14187_vm7 = vmmov %vm14186_vm14 }
 0x607   :  { %v4998_v45 = vadd.f32 %v4992_v30, %v4986_v53  ;;  %v4943_v19 = vpop.f32.mrf.mxu1  ;;  %vm14188_vm11 = vmmov %vm14187_vm7 }
 0x608   :  { %v6145_v14 = vsel %vm14174_vm6, %v6142_v47, %v6109_v40  ;;  %v6214_v0 = vsel %vm14175_vm0, %v6211_v52, %v6184_v28  ;;  %vm14189_vm6 = vmmov %vm14187_vm7 }
 0x609   :  { %v6110_v58 = vrot.slane %v4998_v45, 3  ;;  %v6185_v29 = vrot.slane %v4998_v45, 5  ;;  %vm14190_vm0 = vmmov %vm14183_vm2 }
 0x60b   :  { %v13614_v33 = vsel %vm14176_vm4, %v6143_v36, %v6110_v58  ;;  %v13617_v2 = vsel %vm14177_vm5, %v6212_v46, %v6185_v29  ;;  %v14180_v36 = vld [vmem:[#allocation50_spill] sm:$0xff]  ;;  %v14181_v46 = vmov 1024   ;;  %vm14191_vm4 = vmmov %vm14190_vm0 }
 0x60c   :  { %vm6233_vm8 = vcmp.eq.s32.totalorder %v14180_v36, %v13619_v12  ;;  %v6235_v62 = vsel %vm6232_vm15, 1025, %v14181_v46  ;;  %v6237_v57 = vsel %vm6234_vm1, 1025, %v14181_v46  ;;  %vm14192_vm5 = vmmov %vm14189_vm6  ;;  %vm6230_vm1 = vcmp.lt.s32.totalorder %v14180_v36, %v13619_v12 }
 0x60d   :  { %vm14193_vm15 = vmmov %vm14192_vm5 }
 0x621   :  { %v8322_v10 = vpop.f32.mrf.mxu1 }
 0x623   :  { %v8323_v24 = vpop.f32.mrf.mxu1 }
 0x624   :  { %v8324_v15 = vadd.f32 %v8323_v24, %v8322_v10 }
 0x625   :  { %v8325_v17 = vpop.f32.mrf.mxu1 }
 0x626   :  { %v5522_v41 = vmul.f32 256.0, %v8324_v15  ;;  %v5528_v35 = vrot.slane %v8324_v15, 1 }
 0x627   :  { %v8326_v22 = vpop.f32.mrf.mxu1 }
 0x628   :  { %v5534_v39 = vadd.f32 %v5528_v35, %v5522_v41 }
 0x62a   :  { %v6120_v11 = vrot.slane %v5534_v39, 2  ;;  %v6192_v7 = vrot.slane %v5534_v39, 4 }
 0x62c   :  { %v6150_v44 = vsel %vm14182_vm3, %v6147_v34, %v6120_v11  ;;  %v6219_v38 = vsel %vm14183_vm2, %v6216_v43, %v6192_v7 }
 0x63b   :  { %v5473_v27 = vpop.f32.mrf.mxu0 }
 0x63c   :  { %v5520_v9 = vmul.f32 256.0, %v5473_v27  ;;  %v5526_v6 = vrot.slane %v5473_v27, 1 }
 0x63d   :  { %v5475_v3 = vpop.f32.mrf.mxu0 }
 0x63e   :  { %v5521_v4 = vmul.f32 256.0, %v5475_v3  ;;  %v5527_v25 = vrot.slane %v5475_v3, 1  ;;  %v5532_v42 = vadd.f32 %v5526_v6, %v5520_v9 }
 0x63f   :  { %v5477_v13 = vpop.f32.mrf.mxu0 }
 0x640   :  { %v5533_v21 = vadd.f32 %v5527_v25, %v5521_v4  ;;  %v6118_v5 = vrot.slane %v5532_v42, 2  ;;  %v6190_v18 = vrot.slane %v5532_v42, 4 }
 0x641   :  { %v5478_v16 = vpop.f32.mrf.mxu0 }
 0x642   :  { %v6119_v20 = vrot.slane %v5533_v21, 2  ;;  %v6191_v30 = vrot.slane %v5533_v21, 4  ;;  %v6148_v45 = vsel %vm14184_vm12, %v6145_v14, %v6118_v5  ;;  %v6217_v19 = vsel %vm14185_vm9, %v6214_v0, %v6190_v18 }
 0x644   :  { %v6149_v14 = vsel %vm14190_vm0, %v13614_v33, %v6119_v20  ;;  %v6218_v0 = vsel %vm14191_vm4, %v13617_v2, %v6191_v30  ;;  %v6236_v2 = vsel %vm6233_vm8, 1025, %v14181_v46 }
 0x65c   :  { %v8344_v55 = vpop.f32.mrf.mxu0 }
 0x65e   :  { %v8345_v59 = vpop.f32.mrf.mxu0 }
 0x65f   :  { %v8346_v23 = vadd.f32 %v8345_v59, %v8344_v55 }
 0x660   :  { %v8347_v32 = vpop.f32.mrf.mxu0 }
 0x661   :  { %v6057_v56 = vmul.f32 256.0, %v8346_v23  ;;  %v6063_v47 = vrot.slane %v8346_v23, 1  ;;  %v6008_v52 = vpop.f32.mrf.mxu1 }
 0x662   :  { %v6055_v60 = vmul.f32 256.0, %v6008_v52  ;;  %v6061_v31 = vrot.slane %v6008_v52, 1  ;;  %v8348_v1 = vpop.f32.mrf.mxu0 }
 0x663   :  { %v6069_v63 = vadd.f32 %v6063_v47, %v6057_v56  ;;  %v6010_v51 = vpop.f32.mrf.mxu1 }
 0x664   :  { %v6067_v48 = vadd.f32 %v6061_v31, %v6055_v60  ;;  %v6056_v49 = vmul.f32 256.0, %v6010_v51  ;;  %v6062_v8 = vrot.slane %v6010_v51, 1 }
 0x665   :  { %v6129_v50 = vrot.slane %v6069_v63, 1  ;;  %v6198_v54 = vrot.slane %v6069_v63, 3  ;;  %v6012_v53 = vpop.f32.mrf.mxu1 }
 0x666   :  { %v6127_v37 = vrot.slane %v6067_v48, 1  ;;  %v6196_v40 = vrot.slane %v6067_v48, 3  ;;  %v6068_v28 = vadd.f32 %v6062_v8, %v6056_v49 }
 0x667   :  { %v6153_v58 = vsel %vm14186_vm14, %v6150_v44, %v6129_v50  ;;  %v6222_v34 = vsel %vm14187_vm7, %v6219_v38, %v6198_v54  ;;  %v6013_v29 = vpop.f32.mrf.mxu1 }
 0x668   :  { %v8550_v10 = vtrunc.f32 %v6153_v58  ;;  %v8556_v24 = vtrunc.f32 %v6222_v34  ;;  %v6151_v43 = vsel %vm14188_vm11, %v6148_v45, %v6127_v37  ;;  %v6220_v17 = vsel %vm14189_vm6, %v6217_v19, %v6196_v40 }
 0x669   :  { %v8546_v22 = vtrunc.f32 %v6151_v43  ;;  %v8552_v27 = vtrunc.f32 %v6220_v17  ;;  %v6128_v3 = vrot.slane %v6068_v28, 1  ;;  %v6197_v13 = vrot.slane %v6068_v28, 3 }
 0x66a   :  { %v8551_v16 = vcvt.f32.s32 %v8550_v10  ;;  %v8557_v15 = vcvt.f32.s32 %v8556_v24 }
 0x66b   :  { %v8547_v41 = vcvt.f32.s32 %v8546_v22  ;;  %v8553_v35 = vcvt.f32.s32 %v8552_v27  ;;  %v6152_v9 = vsel %vm14192_vm5, %v6149_v14, %v6128_v3  ;;  %v6221_v6 = vsel %vm14193_vm15, %v6218_v0, %v6197_v13 }
 0x66c   :  { %v8548_v39 = vtrunc.f32 %v6152_v9  ;;  %v8554_v55 = vtrunc.f32 %v6221_v6  ;;  %v6240_v4 = vsel %vm6231_vm10, %v8551_v16, %v6237_v57  ;;  %v6246_v33 = vsel %vm6231_vm10, %v8557_v15, %v6237_v57 }
 0x66d   :  { %v6238_v25 = vsel %vm6229_vm13, %v8547_v41, %v6235_v62  ;;  %6243 = vst [vmem:[%s13696_s10 + $0x10] sm:$0xff] %v6240_v4  ;;  %v6244_v59 = vsel %vm6229_vm13, %v8553_v35, %v6235_v62  ;;  %6249 = vst [vmem:[%s13697_s11 + $0x10] sm:$0xff] %v6246_v33 }
 0x66e   :  { %v8549_v42 = vcvt.f32.s32 %v8548_v39  ;;  %v8555_v23 = vcvt.f32.s32 %v8554_v55  ;;  %6241 = vst [vmem:[%s13696_s10] sm:$0xff] %v6238_v25  ;;  %6247 = vst [vmem:[%s13697_s11] sm:$0xff] %v6244_v59 }
 0x670   :  { %v6239_v11 = vsel %vm6230_vm1, %v8549_v42, %v6236_v2  ;;  %v6245_v61 = vsel %vm6230_vm1, %v8555_v23, %v6236_v2 }
 0x671   :  { %6242 = vst [vmem:[%s13696_s10 + $0x8] sm:$0xff] %v6239_v11  ;;  %6248 = vst [vmem:[%s13697_s11 + $0x8] sm:$0xff] %v6245_v61 }

</bundles_post_ra>
